<compile_context>
chip_gen: v5e
topology: v5e:2x2
jax: 0.10.0
libtpu: 0.0.40
codegen_flags: <defaults>
</compile_context>

<pallas_src>
import jax
import jax.numpy as jnp
from jax import lax
from jax.experimental import pallas as pl
from jax.experimental.pallas import tpu as pltpu


# ----------------------------------------------------------------------------
# Pallas kernels
# ----------------------------------------------------------------------------

def _conv_pool_kernel(p_ref, w_ref, b_ref, o_ref):
    """Conv3x3 (im2col matmul) + MaxPool(2) + bias + ReLU + Dropout(eval).

    p_ref: (4, tn, 9*Cin) bf16 -- 4 pool offsets x tn pooled output pixels
    w_ref: (9*Cin, Cout) bf16   b_ref: (1, Cout) f32   o_ref: (tn, Cout) bf16
    """
    n_pool, tn, k = p_ref.shape
    cout = w_ref.shape[-1]
    # One large MXU matmul over all 4 pool offsets at once (f32 accumulation).
    y = jnp.dot(p_ref[...].reshape(n_pool * tn, k), w_ref[...],
                preferred_element_type=jnp.float32)
    # MaxPool over the 4 offsets, then a single hoisted bias + ReLU.
    y = jnp.max(y.reshape(n_pool, tn, cout), axis=0)
    y = jnp.maximum(y + b_ref[...], 0.0)
    o_ref[...] = y.astype(o_ref.dtype)


def _head_mlp_kernel(p3_ref, w3_ref, b3_ref,
                     wfc_ref, bfc_ref, sc_ref, tc_ref,
                     z_ref,
                     wz1_ref, bz1_ref, sz1_ref, tz1_ref,
                     wz2_ref, bz2_ref, sz2_ref, tz2_ref,
                     wz3_ref, bz3_ref, sz3_ref, tz3_ref,
                     wf1_ref, bf1_ref, sf1_ref, tf1_ref,
                     wf2_ref, bf2_ref, sf2_ref, tf2_ref,
                     wo_ref, bo_ref, we_ref,
                     znext_ref, logits_ref):
    """Conv3+ReLU+MaxPool+AvgPool+Linear+BN head fused with the z-path MLP,
    fusion MLP, logits, softmax and z_next = p @ W_embed.

    p3_ref: (4*S*B, 9*64) bf16, rows ordered (pool offset, pooled spatial pos, batch).
    """
    bsz = z_ref.shape[0]
    n_pool = 4
    n_spatial = p3_ref.shape[0] // (n_pool * bsz)

    # --- conv head: a single (4*S*B, 576) x (576, 128) matmul ---
    y = jnp.dot(p3_ref[...], w3_ref[...], preferred_element_type=jnp.float32)
    y = y.reshape(n_pool, n_spatial, bsz, y.shape[-1])
    y = jnp.max(y, axis=0)                           # MaxPool(2) over the 4 offsets
    y = jnp.maximum(y + b3_ref[...], 0.0)            # hoisted bias + ReLU
    feat = jnp.mean(y, axis=0)                       # AdaptiveAvgPool(1,1) -> (B, 128)
    xf = jnp.dot(feat.astype(jnp.bfloat16), wfc_ref[...],
                 preferred_element_type=jnp.float32) + bfc_ref[...]
    xf = xf * sc_ref[...] + tc_ref[...]              # folded BatchNorm1d (eval)

    # --- z path ---
    def lin_bn(h, w_r, b_r, s_r, t_r):
        v = jnp.dot(h.astype(jnp.bfloat16), w_r[...],
                    preferred_element_type=jnp.float32) + b_r[...]
        return v * s_r[...] + t_r[...]

    z = z_ref[...]
    h1 = jnp.maximum(lin_bn(z, wz1_ref, bz1_ref, sz1_ref, tz1_ref), 0.0)
    h2 = jnp.maximum(lin_bn(h1, wz2_ref, bz2_ref, sz2_ref, tz2_ref), 0.0)
    h3 = lin_bn(h2, wz3_ref, bz3_ref, sz3_ref, tz3_ref)
    z_feat = h3 + h1

    # --- fusion MLP: cat([x_feat, z_feat]) @ W_f1 as one K=512 dot (merged weight) ---
    cat = jnp.concatenate([xf, z_feat], axis=-1).astype(jnp.bfloat16)
    pre = jnp.dot(cat, wf1_ref[...], preferred_element_type=jnp.float32) + bf1_ref[...]
    hf = jnp.maximum(pre * sf1_ref[...] + tf1_ref[...], 0.0)
    hf = jnp.maximum(lin_bn(hf, wf2_ref, bf2_ref, sf2_ref, tf2_ref), 0.0)

    # --- logits / softmax / embedding (kept f32: tiny matmuls, accuracy-sensitive) ---
    logits = jnp.dot(hf, wo_ref[...], preferred_element_type=jnp.float32) + bo_ref[...]
    m = jnp.max(logits, axis=1, keepdims=True)
    e = jnp.exp(logits - m)
    p = e / jnp.sum(e, axis=1, keepdims=True)
    z_next = jnp.dot(p, we_ref[...], preferred_element_type=jnp.float32)

    znext_ref[...] = z_next
    logits_ref[...] = logits


# ----------------------------------------------------------------------------
# pallas_call wrappers
# ----------------------------------------------------------------------------

def _whole(a):
    """Full-array BlockSpec for a grid=(1,) kernel."""
    nd = len(a.shape)
    return pl.BlockSpec(tuple(a.shape), lambda i, _n=nd: (0,) * _n)


_CONV_COMPILER_PARAMS = pltpu.CompilerParams(
    dimension_semantics=("parallel",),          # shard row tiles across TCs (v7x)
    vmem_limit_bytes=32 * 1024 * 1024)


def _conv_pool(patches, w, b, *, max_rows=2048):
    """patches: (4, N, 9*Cin) bf16; returns (N, Cout) bf16."""
    n_pool, n, k = patches.shape
    cout = w.shape[1]
    tn = n if n <= max_rows else max_rows
    assert n % tn == 0 and tn % 8 == 0, "pooled-pixel count must tile in multiples of 8"
    return pl.pallas_call(
        _conv_pool_kernel,
        out_shape=jax.ShapeDtypeStruct((n, cout), jnp.bfloat16),
        grid=(n // tn,),
        in_specs=[pl.BlockSpec((n_pool, tn, k), lambda i: (0, i, 0)),
                  pl.BlockSpec((k, cout), lambda i: (0, 0)),
                  pl.BlockSpec((1, cout), lambda i: (0, 0))],
        out_specs=pl.BlockSpec((tn, cout), lambda i: (i, 0)),
        compiler_params=_CONV_COMPILER_PARAMS,
    )(patches, w, b)


def _head_mlp(args, bsz, emb_dim, num_classes):
    return pl.pallas_call(
        _head_mlp_kernel,
        out_shape=(jax.ShapeDtypeStruct((bsz, emb_dim), jnp.float32),
                   jax.ShapeDtypeStruct((bsz, num_classes), jnp.float32)),
        grid=(1,),
        in_specs=[_whole(a) for a in args],
        out_specs=(pl.BlockSpec((bsz, emb_dim), lambda i: (0, 0)),
                   pl.BlockSpec((bsz, num_classes), lambda i: (0, 0))),
        compiler_params=pltpu.CompilerParams(
            dimension_semantics=("arbitrary",),
            vmem_limit_bytes=32 * 1024 * 1024),
    )(*args)


# ----------------------------------------------------------------------------
# JAX glue: im2col / pool grouping / parameter handling
# ----------------------------------------------------------------------------

def _im2col(f):
    """f: (B,H,W,C) -> (B,H,W,9C), 3x3 patches with zero padding 1 (order ky,kx,cin)."""
    b, h, w, c = f.shape
    fp = jnp.pad(f, ((0, 0), (1, 1), (1, 1), (0, 0)))
    cols = [fp[:, ky:ky + h, kx:kx + w, :] for ky in range(3) for kx in range(3)]
    p = jnp.stack(cols, axis=3)            # (B,H,W,9,C)
    return p.reshape(b, h, w, 9 * c)


def _pool_group(p):
    """(B,H,W,K) -> (4, B*(H/2)*(W/2), K); axis0 = 2x2 pool offset, rows ordered (b,ho,wo)."""
    b, h, w, k = p.shape
    g = p.reshape(b, h // 2, 2, w // 2, 2, k)
    g = jnp.transpose(g, (2, 4, 0, 1, 3, 5))
    return g.reshape(4, b * (h // 2) * (w // 2), k)


def _pool_group_head(p):
    """(B,H,W,K) -> (4*S*B, K); rows ordered (pool offset, pooled spatial position, batch)."""
    b, h, w, k = p.shape
    g = p.reshape(b, h // 2, 2, w // 2, 2, k)
    g = jnp.transpose(g, (2, 4, 1, 3, 0, 5))
    return g.reshape(4 * (h // 2) * (w // 2) * b, k)


def _bn_fold(bn, eps=1e-5):
    g, b, m, v = bn
    s = g / jnp.sqrt(v + eps)
    return s.reshape(1, -1), (b - m * s).reshape(1, -1)


def denoise_block_forward(params, x_nchw, z_prev, w_embed):
    """Pallas DenoiseBlock.forward (eval). Input spatial dims must be multiples of 8."""
    bf16 = jnp.bfloat16
    x = jnp.transpose(x_nchw, (0, 2, 3, 1)).astype(jnp.float32)   # NCHW -> NHWC
    bsz, h, w = x.shape[0], x.shape[1], x.shape[2]

    # conv stage 1: Cin -> 32, pool 2  (single (4N,9Cin)x(9Cin,32) MXU matmul)
    o1 = _conv_pool(_pool_group(_im2col(x)).astype(bf16),
                    params['conv1_w'].reshape(-1, 32).astype(bf16),
                    params['conv1_b'].reshape(1, -1))
    f = o1.reshape(bsz, h // 2, w // 2, 32)

    # conv stage 2: 32 -> 64, pool 2
    o2 = _conv_pool(_pool_group(_im2col(f)).astype(bf16),
                    params['conv2_w'].reshape(-1, 64).astype(bf16),
                    params['conv2_b'].reshape(1, -1))
    f = o2.reshape(bsz, h // 4, w // 4, 64)

    # conv stage 3 + avg pool + Linear(128,256) + BN + z-path + fusion MLP + softmax
    # + p @ W_embed, all fused in one kernel (x_feat never leaves VMEM).
    p3 = _pool_group_head(_im2col(f)).astype(bf16)       # (4*S*B, 9*64)
    sc, tc = _bn_fold(params['bn_conv'])
    sz1, tz1 = _bn_fold(params['bn_z1'])
    sz2, tz2 = _bn_fold(params['bn_z2'])
    sz3, tz3 = _bn_fold(params['bn_z3'])
    sf1, tf1 = _bn_fold(params['bn_f1'])
    sf2, tf2 = _bn_fold(params['bn_f2'])
    wf1 = jnp.concatenate([params['fc_f1_wx'], params['fc_f1_wz']], axis=0)   # (512, 256)
    args = (p3,
            params['conv3_w'].reshape(-1, 128).astype(bf16),
            params['conv3_b'].reshape(1, -1),
            params['fc_conv_w'].astype(bf16), params['fc_conv_b'].reshape(1, -1), sc, tc,
            z_prev.astype(bf16),
            params['fc_z1_w'].astype(bf16), params['fc_z1_b'].reshape(1, -1), sz1, tz1,
            params['fc_z2_w'].astype(bf16), params['fc_z2_b'].reshape(1, -1), sz2, tz2,
            params['fc_z3_w'].astype(bf16), params['fc_z3_b'].reshape(1, -1), sz3, tz3,
            wf1.astype(bf16), params['fc_f1_b'].reshape(1, -1), sf1, tf1,
            params['fc_f2_w'].astype(bf16), params['fc_f2_b'].reshape(1, -1), sf2, tf2,
            params['fc_out_w'].astype(jnp.float32), params['fc_out_b'].reshape(1, -1),
            w_embed.astype(jnp.float32))
    return _head_mlp(args, bsz, w_embed.shape[1], params['fc_out_w'].shape[1])


# ----------------------------------------------------------------------------
# Pure-JAX reference (for correctness check, f32 throughout)
# ----------------------------------------------------------------------------

def reference_forward(params, x_nchw, z_prev, w_embed):
    x = jnp.transpose(x_nchw, (0, 2, 3, 1)).astype(jnp.float32)

    def conv(f, w, b):
        y = lax.conv_general_dilated(f, w, (1, 1), 'SAME',
                                     dimension_numbers=('NHWC', 'HWIO', 'NHWC'))
        return y + b

    def pool(f):
        b, h, w, c = f.shape
        return f.reshape(b, h // 2, 2, w // 2, 2, c).max(axis=(2, 4))

    def bn(y, p, eps=1e-5):
        g, b, m, v = p
        return (y - m) / jnp.sqrt(v + eps) * g + b

    f = pool(jnp.maximum(conv(x, params['conv1_w'], params['conv1_b']), 0))
    f = pool(jnp.maximum(conv(f, params['conv2_w'], params['conv2_b']), 0))
    f = pool(jnp.maximum(conv(f, params['conv3_w'], params['conv3_b']), 0))
    feat = f.mean(axis=(1, 2))
    x_feat = bn(feat @ params['fc_conv_w'] + params['fc_conv_b'], params['bn_conv'])

    h1 = jnp.maximum(bn(z_prev @ params['fc_z1_w'] + params['fc_z1_b'], params['bn_z1']), 0)
    h2 = jnp.maximum(bn(h1 @ params['fc_z2_w'] + params['fc_z2_b'], params['bn_z2']), 0)
    h3 = bn(h2 @ params['fc_z3_w'] + params['fc_z3_b'], params['bn_z3'])
    z_feat = h3 + h1
    hf = x_feat @ params['fc_f1_wx'] + z_feat @ params['fc_f1_wz'] + params['fc_f1_b']
    hf = jnp.maximum(bn(hf, params['bn_f1']), 0)
    hf = jnp.maximum(bn(hf @ params['fc_f2_w'] + params['fc_f2_b'], params['bn_f2']), 0)
    logits = hf @ params['fc_out_w'] + params['fc_out_b']
    p = jax.nn.softmax(logits, axis=1)
    return p @ w_embed, logits


# ----------------------------------------------------------------------------
# Deterministic parameter initialization (synthetic; mirrors module shapes)
# ----------------------------------------------------------------------------

def init_params(key, cin, num_classes):
    ks = iter(jax.random.split(key, 64))

    def nrm(shape, scale):
        return scale * jax.random.normal(next(ks), shape, jnp.float32)

    def bn(n):
        g = 1.0 + 0.1 * jax.random.normal(next(ks), (n,), jnp.float32)
        b = 0.1 * jax.random.normal(next(ks), (n,), jnp.float32)
        m = 0.1 * jax.random.normal(next(ks), (n,), jnp.float32)
        v = 1.0 + 0.1 * jax.random.uniform(next(ks), (n,), jnp.float32)
        return (g, b, m, v)

    p = {}
    p['conv1_w'] = nrm((3, 3, cin, 32), 0.30)   # torch weight (32,cin,3,3) transposed to HWIO
    p['conv1_b'] = nrm((32,), 0.05)
    p['conv2_w'] = nrm((3, 3, 32, 64), 0.08)
    p['conv2_b'] = nrm((64,), 0.05)
    p['conv3_w'] = nrm((3, 3, 64, 128), 0.06)
    p['conv3_b'] = nrm((128,), 0.05)
    p['fc_conv_w'] = nrm((128, 256), 0.08)      # Linear stored as (in, out)
    p['fc_conv_b'] = nrm((256,), 0.05)
    p['bn_conv'] = bn(256)
    for name in ['z1', 'z2', 'z3', 'f2']:
        p[f'fc_{name}_w'] = nrm((256, 256), 0.06)
        p[f'fc_{name}_b'] = nrm((256,), 0.05)
        p[f'bn_{name}'] = bn(256)
    p['fc_f1_wx'] = nrm((256, 256), 0.06)       # first half of fc_f1 (acts on x_feat)
    p['fc_f1_wz'] = nrm((256, 256), 0.06)       # second half of fc_f1 (acts on z_feat)
    p['fc_f1_b'] = nrm((256,), 0.05)
    p['bn_f1'] = bn(256)
    p['fc_out_w'] = nrm((256, num_classes), 0.08)
    p['fc_out_b'] = nrm((num_classes,), 0.05)
    return p


# ----------------------------------------------------------------------------
# Main
# ----------------------------------------------------------------------------

if __name__ == "__main__":
    B, C_in, H, W = 8, 1, 16, 16
    num_classes, embedding_dim = 10, 256   # fc_z1 requires z_prev dim == 256

    root = jax.random.PRNGKey(0)
    k_p, k_x, k_z, k_e = jax.random.split(root, 4)
    params = init_params(k_p, C_in, num_classes)

    x = jax.random.normal(k_x, (B, C_in, H, W), jnp.float32)          # NCHW, as PyTorch
    z_prev = jax.random.normal(k_z, (B, 256), jnp.float32)
    W_embed = 0.5 * jax.random.normal(k_e, (num_classes, embedding_dim), jnp.float32)

    fwd = jax.jit(denoise_block_forward)
    z_next, logits = fwd(params, x, z_prev, W_embed)
    jax.block_until_ready((z_next, logits))

    z_ref, logits_ref = reference_forward(params, x, z_prev, W_embed)
    assert z_next.shape == (B, embedding_dim) and logits.shape == (B, num_classes)
    # bf16 matmul operands (f32 accumulation) -> slightly looser tolerance than pure f32.
    assert bool(jnp.allclose(logits, logits_ref, atol=3e-2, rtol=3e-2)), "logits mismatch"
    assert bool(jnp.allclose(z_next, z_ref, atol=3e-2, rtol=3e-2)), "z_next mismatch"

    print("KERNEL_OK")
</pallas_src>

<mosaic_0001>
module attributes {stable_mosaic.version = 11 : i64} {
  func.func @_conv_pool_kernel(%arg0: i32, %arg1: memref<4x512x9xbf16, #tpu.memory_space<vmem>>, %arg2: memref<9x32xbf16, #tpu.memory_space<vmem>>, %arg3: memref<1x32xf32, #tpu.memory_space<vmem>>, %arg4: memref<512x32xbf16, #tpu.memory_space<vmem>>) attributes {dimension_semantics = [#tpu.dimension_semantics<parallel>], iteration_bounds = array<i64: 1>, scalar_prefetch = 0 : i64, scratch_operands = 0 : i64, tpu.core_type = #tpu.core_type<tc>, window_params = [{transform_indices = @transform_0, window_bounds = array<i64: 4, 512, 9>}, {pipeline_mode = #tpu.pipeline_mode<synchronous>, transform_indices = @transform_1, window_bounds = array<i64: 9, 32>}, {pipeline_mode = #tpu.pipeline_mode<synchronous>, transform_indices = @transform_2, window_bounds = array<i64: 1, 32>}, {transform_indices = @transform_3, window_bounds = array<i64: 512, 32>}]} {
    %c0 = arith.constant 0 : index
    %c0_0 = arith.constant 0 : index
    %c0_1 = arith.constant 0 : index
    %0 = vector.load %arg1[%c0, %c0_0, %c0_1] : memref<4x512x9xbf16, #tpu.memory_space<vmem>>, vector<4x512x9xbf16>
    %1 = vector.shape_cast %0 : vector<4x512x9xbf16> to vector<2048x9xbf16>
    %c0_2 = arith.constant 0 : index
    %c0_3 = arith.constant 0 : index
    %2 = vector.load %arg2[%c0_2, %c0_3] : memref<9x32xbf16, #tpu.memory_space<vmem>>, vector<9x32xbf16>
    %cst = arith.constant dense<0.000000e+00> : vector<2048x32xf32>
    %3 = tpu.matmul %1, %2, %cst {dimension_numbers = #tpu.dot_dimension_numbers<[1], [0], [0], [1], [0, 0, 1, 1], [], []>} : vector<2048x9xbf16>, vector<9x32xbf16>, vector<2048x32xf32> -> vector<2048x32xf32>
    %4 = vector.shape_cast %3 : vector<2048x32xf32> to vector<4x512x32xf32>
    %cst_4 = arith.constant dense<0xFF800000> : vector<512x32xf32>
    %5 = vector.multi_reduction <maximumf>, %4, %cst_4 [0] : vector<4x512x32xf32> to vector<512x32xf32>
    %c0_5 = arith.constant 0 : index
    %c0_6 = arith.constant 0 : index
    %6 = vector.load %arg3[%c0_5, %c0_6] : memref<1x32xf32, #tpu.memory_space<vmem>>, vector<1x32xf32>
    %7 = vector.broadcast %6 : vector<1x32xf32> to vector<512x32xf32>
    %8 = arith.addf %5, %7 : vector<512x32xf32>
    %cst_7 = arith.constant 0.000000e+00 : f32
    %9 = vector.broadcast %cst_7 : f32 to vector<512x32xf32>
    %10 = arith.maximumf %8, %9 : vector<512x32xf32>
    %11 = arith.truncf %10 : vector<512x32xf32> to vector<512x32xbf16>
    %c0_8 = arith.constant 0 : index
    %c0_9 = arith.constant 0 : index
    %12 = vector.load %arg4[%c0_8, %c0_9] : memref<512x32xbf16, #tpu.memory_space<vmem>>, vector<512x32xbf16>
    tpu.vector_store %arg4[%c0_8, %c0_9], %11 {strides = array<i32>} : memref<512x32xbf16, #tpu.memory_space<vmem>>, vector<512x32xbf16>,
    return
  }
  func.func @transform_0(%arg0: i32) -> (i32, i32, i32) {
    %c0_i32 = arith.constant 0 : i32
    %c0_i32_0 = arith.constant 0 : i32
    %c0_i32_1 = arith.constant 0 : i32
    return %c0_i32, %arg0, %c0_i32_0 : i32, i32, i32
  }
  func.func @transform_1(%arg0: i32) -> (i32, i32) {
    %c0_i32 = arith.constant 0 : i32
    %c0_i32_0 = arith.constant 0 : i32
    %c0_i32_1 = arith.constant 0 : i32
    return %c0_i32, %c0_i32_0 : i32, i32
  }
  func.func @transform_2(%arg0: i32) -> (i32, i32) {
    %c0_i32 = arith.constant 0 : i32
    %c0_i32_0 = arith.constant 0 : i32
    %c0_i32_1 = arith.constant 0 : i32
    return %c0_i32, %c0_i32_0 : i32, i32
  }
  func.func @transform_3(%arg0: i32) -> (i32, i32) {
    %c0_i32 = arith.constant 0 : i32
    %c0_i32_0 = arith.constant 0 : i32
    return %arg0, %c0_i32 : i32, i32
  }
}

module attributes {stable_mosaic.version = 11 : i64} {
  func.func @_conv_pool_kernel(%arg0: i32, %arg1: memref<4x128x288xbf16, #tpu.memory_space<vmem>>, %arg2: memref<288x64xbf16, #tpu.memory_space<vmem>>, %arg3: memref<1x64xf32, #tpu.memory_space<vmem>>, %arg4: memref<128x64xbf16, #tpu.memory_space<vmem>>) attributes {dimension_semantics = [#tpu.dimension_semantics<parallel>], iteration_bounds = array<i64: 1>, scalar_prefetch = 0 : i64, scratch_operands = 0 : i64, tpu.core_type = #tpu.core_type<tc>, window_params = [{transform_indices = @transform_0, window_bounds = array<i64: 4, 128, 288>}, {pipeline_mode = #tpu.pipeline_mode<synchronous>, transform_indices = @transform_1, window_bounds = array<i64: 288, 64>}, {pipeline_mode = #tpu.pipeline_mode<synchronous>, transform_indices = @transform_2, window_bounds = array<i64: 1, 64>}, {transform_indices = @transform_3, window_bounds = array<i64: 128, 64>}]} {
    %c0 = arith.constant 0 : index
    %c0_0 = arith.constant 0 : index
    %c0_1 = arith.constant 0 : index
    %0 = vector.load %arg1[%c0, %c0_0, %c0_1] : memref<4x128x288xbf16, #tpu.memory_space<vmem>>, vector<4x128x288xbf16>
    %1 = vector.shape_cast %0 : vector<4x128x288xbf16> to vector<512x288xbf16>
    %c0_2 = arith.constant 0 : index
    %c0_3 = arith.constant 0 : index
    %2 = vector.load %arg2[%c0_2, %c0_3] : memref<288x64xbf16, #tpu.memory_space<vmem>>, vector<288x64xbf16>
    %cst = arith.constant dense<0.000000e+00> : vector<512x64xf32>
    %3 = tpu.matmul %1, %2, %cst {dimension_numbers = #tpu.dot_dimension_numbers<[1], [0], [0], [1], [0, 0, 1, 1], [], []>} : vector<512x288xbf16>, vector<288x64xbf16>, vector<512x64xf32> -> vector<512x64xf32>
    %4 = vector.shape_cast %3 : vector<512x64xf32> to vector<4x128x64xf32>
    %cst_4 = arith.constant dense<0xFF800000> : vector<128x64xf32>
    %5 = vector.multi_reduction <maximumf>, %4, %cst_4 [0] : vector<4x128x64xf32> to vector<128x64xf32>
    %c0_5 = arith.constant 0 : index
    %c0_6 = arith.constant 0 : index
    %6 = vector.load %arg3[%c0_5, %c0_6] : memref<1x64xf32, #tpu.memory_space<vmem>>, vector<1x64xf32>
    %7 = vector.broadcast %6 : vector<1x64xf32> to vector<128x64xf32>
    %8 = arith.addf %5, %7 : vector<128x64xf32>
    %cst_7 = arith.constant 0.000000e+00 : f32
    %9 = vector.broadcast %cst_7 : f32 to vector<128x64xf32>
    %10 = arith.maximumf %8, %9 : vector<128x64xf32>
    %11 = arith.truncf %10 : vector<128x64xf32> to vector<128x64xbf16>
    %c0_8 = arith.constant 0 : index
    %c0_9 = arith.constant 0 : index
    %12 = vector.load %arg4[%c0_8, %c0_9] : memref<128x64xbf16, #tpu.memory_space<vmem>>, vector<128x64xbf16>
    tpu.vector_store %arg4[%c0_8, %c0_9], %11 {strides = array<i32>} : memref<128x64xbf16, #tpu.memory_space<vmem>>, vector<128x64xbf16>,
    return
  }
  func.func @transform_0(%arg0: i32) -> (i32, i32, i32) {
    %c0_i32 = arith.constant 0 : i32
    %c0_i32_0 = arith.constant 0 : i32
    %c0_i32_1 = arith.constant 0 : i32
    return %c0_i32, %arg0, %c0_i32_0 : i32, i32, i32
  }
  func.func @transform_1(%arg0: i32) -> (i32, i32) {
    %c0_i32 = arith.constant 0 : i32
    %c0_i32_0 = arith.constant 0 : i32
    %c0_i32_1 = arith.constant 0 : i32
    return %c0_i32, %c0_i32_0 : i32, i32
  }
  func.func @transform_2(%arg0: i32) -> (i32, i32) {
    %c0_i32 = arith.constant 0 : i32
    %c0_i32_0 = arith.constant 0 : i32
    %c0_i32_1 = arith.constant 0 : i32
    return %c0_i32, %c0_i32_0 : i32, i32
  }
  func.func @transform_3(%arg0: i32) -> (i32, i32) {
    %c0_i32 = arith.constant 0 : i32
    %c0_i32_0 = arith.constant 0 : i32
    return %arg0, %c0_i32 : i32, i32
  }
}

module attributes {stable_mosaic.version = 11 : i64} {
  func.func @_head_mlp_kernel(%arg0: i32, %arg1: memref<128x576xbf16, #tpu.memory_space<vmem>>, %arg2: memref<576x128xbf16, #tpu.memory_space<vmem>>, %arg3: memref<1x128xf32, #tpu.memory_space<vmem>>, %arg4: memref<128x256xbf16, #tpu.memory_space<vmem>>, %arg5: memref<1x256xf32, #tpu.memory_space<vmem>>, %arg6: memref<1x256xf32, #tpu.memory_space<vmem>>, %arg7: memref<1x256xf32, #tpu.memory_space<vmem>>, %arg8: memref<8x256xbf16, #tpu.memory_space<vmem>>, %arg9: memref<256x256xbf16, #tpu.memory_space<vmem>>, %arg10: memref<1x256xf32, #tpu.memory_space<vmem>>, %arg11: memref<1x256xf32, #tpu.memory_space<vmem>>, %arg12: memref<1x256xf32, #tpu.memory_space<vmem>>, %arg13: memref<256x256xbf16, #tpu.memory_space<vmem>>, %arg14: memref<1x256xf32, #tpu.memory_space<vmem>>, %arg15: memref<1x256xf32, #tpu.memory_space<vmem>>, %arg16: memref<1x256xf32, #tpu.memory_space<vmem>>, %arg17: memref<256x256xbf16, #tpu.memory_space<vmem>>, %arg18: memref<1x256xf32, #tpu.memory_space<vmem>>, %arg19: memref<1x256xf32, #tpu.memory_space<vmem>>, %arg20: memref<1x256xf32, #tpu.memory_space<vmem>>, %arg21: memref<512x256xbf16, #tpu.memory_space<vmem>>, %arg22: memref<1x256xf32, #tpu.memory_space<vmem>>, %arg23: memref<1x256xf32, #tpu.memory_space<vmem>>, %arg24: memref<1x256xf32, #tpu.memory_space<vmem>>, %arg25: memref<256x256xbf16, #tpu.memory_space<vmem>>, %arg26: memref<1x256xf32, #tpu.memory_space<vmem>>, %arg27: memref<1x256xf32, #tpu.memory_space<vmem>>, %arg28: memref<1x256xf32, #tpu.memory_space<vmem>>, %arg29: memref<256x10xf32, #tpu.memory_space<vmem>>, %arg30: memref<1x10xf32, #tpu.memory_space<vmem>>, %arg31: memref<10x256xf32, #tpu.memory_space<vmem>>, %arg32: memref<8x256xf32, #tpu.memory_space<vmem>>, %arg33: memref<8x10xf32, #tpu.memory_space<vmem>>) attributes {dimension_semantics = [#tpu.dimension_semantics<arbitrary>], iteration_bounds = array<i64: 1>, scalar_prefetch = 0 : i64, scratch_operands = 0 : i64, tpu.core_type = #tpu.core_type<tc>, window_params = [{pipeline_mode = #tpu.pipeline_mode<synchronous>, transform_indices = @transform_0, window_bounds = array<i64: 128, 576>}, {pipeline_mode = #tpu.pipeline_mode<synchronous>, transform_indices = @transform_1, window_bounds = array<i64: 576, 128>}, {pipeline_mode = #tpu.pipeline_mode<synchronous>, transform_indices = @transform_2, window_bounds = array<i64: 1, 128>}, {pipeline_mode = #tpu.pipeline_mode<synchronous>, transform_indices = @transform_3, window_bounds = array<i64: 128, 256>}, {pipeline_mode = #tpu.pipeline_mode<synchronous>, transform_indices = @transform_4, window_bounds = array<i64: 1, 256>}, {pipeline_mode = #tpu.pipeline_mode<synchronous>, transform_indices = @transform_5, window_bounds = array<i64: 1, 256>}, {pipeline_mode = #tpu.pipeline_mode<synchronous>, transform_indices = @transform_6, window_bounds = array<i64: 1, 256>}, {pipeline_mode = #tpu.pipeline_mode<synchronous>, transform_indices = @transform_7, window_bounds = array<i64: 8, 256>}, {pipeline_mode = #tpu.pipeline_mode<synchronous>, transform_indices = @transform_8, window_bounds = array<i64: 256, 256>}, {pipeline_mode = #tpu.pipeline_mode<synchronous>, transform_indices = @transform_9, window_bounds = array<i64: 1, 256>}, {pipeline_mode = #tpu.pipeline_mode<synchronous>, transform_indices = @transform_10, window_bounds = array<i64: 1, 256>}, {pipeline_mode = #tpu.pipeline_mode<synchronous>, transform_indices = @transform_11, window_bounds = array<i64: 1, 256>}, {pipeline_mode = #tpu.pipeline_mode<synchronous>, transform_indices = @transform_12, window_bounds = array<i64: 256, 256>}, {pipeline_mode = #tpu.pipeline_mode<synchronous>, transform_indices = @transform_13, window_bounds = array<i64: 1, 256>}, {pipeline_mode = #tpu.pipeline_mode<synchronous>, transform_indices = @transform_14, window_bounds = array<i64: 1, 256>}, {pipeline_mode = #tpu.pipeline_mode<synchronous>, transform_indices = @transform_15, window_bounds = array<i64: 1, 256>}, {pipeline_mode = #tpu.pipeline_mode<synchronous>, transform_indices = @transform_16, window_bounds = array<i64: 256, 256>}, {pipeline_mode = #tpu.pipeline_mode<synchronous>, transform_indices = @transform_17, window_bounds = array<i64: 1, 256>}, {pipeline_mode = #tpu.pipeline_mode<synchronous>, transform_indices = @transform_18, window_bounds = array<i64: 1, 256>}, {pipeline_mode = #tpu.pipeline_mode<synchronous>, transform_indices = @transform_19, window_bounds = array<i64: 1, 256>}, {pipeline_mode = #tpu.pipeline_mode<synchronous>, transform_indices = @transform_20, window_bounds = array<i64: 512, 256>}, {pipeline_mode = #tpu.pipeline_mode<synchronous>, transform_indices = @transform_21, window_bounds = array<i64: 1, 256>}, {pipeline_mode = #tpu.pipeline_mode<synchronous>, transform_indices = @transform_22, window_bounds = array<i64: 1, 256>}, {pipeline_mode = #tpu.pipeline_mode<synchronous>, transform_indices = @transform_23, window_bounds = array<i64: 1, 256>}, {pipeline_mode = #tpu.pipeline_mode<synchronous>, transform_indices = @transform_24, window_bounds = array<i64: 256, 256>}, {pipeline_mode = #tpu.pipeline_mode<synchronous>, transform_indices = @transform_25, window_bounds = array<i64: 1, 256>}, {pipeline_mode = #tpu.pipeline_mode<synchronous>, transform_indices = @transform_26, window_bounds = array<i64: 1, 256>}, {pipeline_mode = #tpu.pipeline_mode<synchronous>, transform_indices = @transform_27, window_bounds = array<i64: 1, 256>}, {pipeline_mode = #tpu.pipeline_mode<synchronous>, transform_indices = @transform_28, window_bounds = array<i64: 256, 10>}, {pipeline_mode = #tpu.pipeline_mode<synchronous>, transform_indices = @transform_29, window_bounds = array<i64: 1, 10>}, {pipeline_mode = #tpu.pipeline_mode<synchronous>, transform_indices = @transform_30, window_bounds = array<i64: 10, 256>}, {pipeline_mode = #tpu.pipeline_mode<synchronous>, transform_indices = @transform_31, window_bounds = array<i64: 8, 256>}, {pipeline_mode = #tpu.pipeline_mode<synchronous>, transform_indices = @transform_32, window_bounds = array<i64: 8, 10>}]} {
    %c0 = arith.constant 0 : index
    %c0_0 = arith.constant 0 : index
    %0 = vector.load %arg1[%c0, %c0_0] : memref<128x576xbf16, #tpu.memory_space<vmem>>, vector<128x576xbf16>
    %c0_1 = arith.constant 0 : index
    %c0_2 = arith.constant 0 : index
    %1 = vector.load %arg2[%c0_1, %c0_2] : memref<576x128xbf16, #tpu.memory_space<vmem>>, vector<576x128xbf16>
    %cst = arith.constant dense<0.000000e+00> : vector<128x128xf32>
    %2 = tpu.matmul %0, %1, %cst {dimension_numbers = #tpu.dot_dimension_numbers<[1], [0], [0], [1], [0, 0, 1, 1], [], []>} : vector<128x576xbf16>, vector<576x128xbf16>, vector<128x128xf32> -> vector<128x128xf32>
    %3 = vector.shape_cast %2 : vector<128x128xf32> to vector<4x4x8x128xf32>
    %cst_3 = arith.constant dense<0xFF800000> : vector<4x8x128xf32>
    %4 = vector.multi_reduction <maximumf>, %3, %cst_3 [0] : vector<4x4x8x128xf32> to vector<4x8x128xf32>
    %c0_4 = arith.constant 0 : index
    %c0_5 = arith.constant 0 : index
    %5 = vector.load %arg3[%c0_4, %c0_5] : memref<1x128xf32, #tpu.memory_space<vmem>>, vector<1x128xf32>
    %6 = vector.shape_cast %5 : vector<1x128xf32> to vector<1x1x128xf32>
    %7 = vector.broadcast %6 : vector<1x1x128xf32> to vector<4x8x128xf32>
    %8 = arith.addf %4, %7 : vector<4x8x128xf32>
    %cst_6 = arith.constant 0.000000e+00 : f32
    %9 = vector.broadcast %cst_6 : f32 to vector<4x8x128xf32>
    %10 = arith.maximumf %8, %9 : vector<4x8x128xf32>
    %cst_7 = arith.constant dense<0.000000e+00> : vector<8x128xf32>
    %11 = vector.multi_reduction <add>, %10, %cst_7 [0] : vector<4x8x128xf32> to vector<8x128xf32>
    %cst_8 = arith.constant 4.000000e+00 : f32
    %12 = vector.broadcast %cst_8 : f32 to vector<8x128xf32>
    %13 = arith.divf %11, %12 : vector<8x128xf32>
    %14 = arith.truncf %13 : vector<8x128xf32> to vector<8x128xbf16>
    %c0_9 = arith.constant 0 : index
    %c0_10 = arith.constant 0 : index
    %15 = vector.load %arg4[%c0_9, %c0_10] : memref<128x256xbf16, #tpu.memory_space<vmem>>, vector<128x256xbf16>
    %cst_11 = arith.constant dense<0.000000e+00> : vector<8x256xf32>
    %16 = tpu.matmul %14, %15, %cst_11 {dimension_numbers = #tpu.dot_dimension_numbers<[1], [0], [0], [1], [0, 0, 1, 1], [], []>} : vector<8x128xbf16>, vector<128x256xbf16>, vector<8x256xf32> -> vector<8x256xf32>
    %c0_12 = arith.constant 0 : index
    %c0_13 = arith.constant 0 : index
    %17 = vector.load %arg5[%c0_12, %c0_13] : memref<1x256xf32, #tpu.memory_space<vmem>>, vector<1x256xf32>
    %18 = vector.broadcast %17 : vector<1x256xf32> to vector<8x256xf32>
    %19 = arith.addf %16, %18 : vector<8x256xf32>
    %c0_14 = arith.constant 0 : index
    %c0_15 = arith.constant 0 : index
    %20 = vector.load %arg6[%c0_14, %c0_15] : memref<1x256xf32, #tpu.memory_space<vmem>>, vector<1x256xf32>
    %21 = vector.broadcast %20 : vector<1x256xf32> to vector<8x256xf32>
    %22 = arith.mulf %19, %21 : vector<8x256xf32>
    %c0_16 = arith.constant 0 : index
    %c0_17 = arith.constant 0 : index
    %23 = vector.load %arg7[%c0_16, %c0_17] : memref<1x256xf32, #tpu.memory_space<vmem>>, vector<1x256xf32>
    %24 = vector.broadcast %23 : vector<1x256xf32> to vector<8x256xf32>
    %25 = arith.addf %22, %24 : vector<8x256xf32>
    %c0_18 = arith.constant 0 : index
    %c0_19 = arith.constant 0 : index
    %26 = vector.load %arg8[%c0_18, %c0_19] : memref<8x256xbf16, #tpu.memory_space<vmem>>, vector<8x256xbf16>
    %c0_20 = arith.constant 0 : index
    %c0_21 = arith.constant 0 : index
    %27 = vector.load %arg9[%c0_20, %c0_21] : memref<256x256xbf16, #tpu.memory_space<vmem>>, vector<256x256xbf16>
    %cst_22 = arith.constant dense<0.000000e+00> : vector<8x256xf32>
    %28 = tpu.matmul %26, %27, %cst_22 {dimension_numbers = #tpu.dot_dimension_numbers<[1], [0], [0], [1], [0, 0, 1, 1], [], []>} : vector<8x256xbf16>, vector<256x256xbf16>, vector<8x256xf32> -> vector<8x256xf32>
    %c0_23 = arith.constant 0 : index
    %c0_24 = arith.constant 0 : index
    %29 = vector.load %arg10[%c0_23, %c0_24] : memref<1x256xf32, #tpu.memory_space<vmem>>, vector<1x256xf32>
    %30 = vector.broadcast %29 : vector<1x256xf32> to vector<8x256xf32>
    %31 = arith.addf %28, %30 : vector<8x256xf32>
    %c0_25 = arith.constant 0 : index
    %c0_26 = arith.constant 0 : index
    %32 = vector.load %arg11[%c0_25, %c0_26] : memref<1x256xf32, #tpu.memory_space<vmem>>, vector<1x256xf32>
    %33 = vector.broadcast %32 : vector<1x256xf32> to vector<8x256xf32>
    %34 = arith.mulf %31, %33 : vector<8x256xf32>
    %c0_27 = arith.constant 0 : index
    %c0_28 = arith.constant 0 : index
    %35 = vector.load %arg12[%c0_27, %c0_28] : memref<1x256xf32, #tpu.memory_space<vmem>>, vector<1x256xf32>
    %36 = vector.broadcast %35 : vector<1x256xf32> to vector<8x256xf32>
    %37 = arith.addf %34, %36 : vector<8x256xf32>
    %cst_29 = arith.constant 0.000000e+00 : f32
    %38 = vector.broadcast %cst_29 : f32 to vector<8x256xf32>
    %39 = arith.maximumf %37, %38 : vector<8x256xf32>
    %40 = arith.truncf %39 : vector<8x256xf32> to vector<8x256xbf16>
    %c0_30 = arith.constant 0 : index
    %c0_31 = arith.constant 0 : index
    %41 = vector.load %arg13[%c0_30, %c0_31] : memref<256x256xbf16, #tpu.memory_space<vmem>>, vector<256x256xbf16>
    %cst_32 = arith.constant dense<0.000000e+00> : vector<8x256xf32>
    %42 = tpu.matmul %40, %41, %cst_32 {dimension_numbers = #tpu.dot_dimension_numbers<[1], [0], [0], [1], [0, 0, 1, 1], [], []>} : vector<8x256xbf16>, vector<256x256xbf16>, vector<8x256xf32> -> vector<8x256xf32>
    %c0_33 = arith.constant 0 : index
    %c0_34 = arith.constant 0 : index
    %43 = vector.load %arg14[%c0_33, %c0_34] : memref<1x256xf32, #tpu.memory_space<vmem>>, vector<1x256xf32>
    %44 = vector.broadcast %43 : vector<1x256xf32> to vector<8x256xf32>
    %45 = arith.addf %42, %44 : vector<8x256xf32>
    %c0_35 = arith.constant 0 : index
    %c0_36 = arith.constant 0 : index
    %46 = vector.load %arg15[%c0_35, %c0_36] : memref<1x256xf32, #tpu.memory_space<vmem>>, vector<1x256xf32>
    %47 = vector.broadcast %46 : vector<1x256xf32> to vector<8x256xf32>
    %48 = arith.mulf %45, %47 : vector<8x256xf32>
    %c0_37 = arith.constant 0 : index
    %c0_38 = arith.constant 0 : index
    %49 = vector.load %arg16[%c0_37, %c0_38] : memref<1x256xf32, #tpu.memory_space<vmem>>, vector<1x256xf32>
    %50 = vector.broadcast %49 : vector<1x256xf32> to vector<8x256xf32>
    %51 = arith.addf %48, %50 : vector<8x256xf32>
    %cst_39 = arith.constant 0.000000e+00 : f32
    %52 = vector.broadcast %cst_39 : f32 to vector<8x256xf32>
    %53 = arith.maximumf %51, %52 : vector<8x256xf32>
    %54 = arith.truncf %53 : vector<8x256xf32> to vector<8x256xbf16>
    %c0_40 = arith.constant 0 : index
    %c0_41 = arith.constant 0 : index
    %55 = vector.load %arg17[%c0_40, %c0_41] : memref<256x256xbf16, #tpu.memory_space<vmem>>, vector<256x256xbf16>
    %cst_42 = arith.constant dense<0.000000e+00> : vector<8x256xf32>
    %56 = tpu.matmul %54, %55, %cst_42 {dimension_numbers = #tpu.dot_dimension_numbers<[1], [0], [0], [1], [0, 0, 1, 1], [], []>} : vector<8x256xbf16>, vector<256x256xbf16>, vector<8x256xf32> -> vector<8x256xf32>
    %c0_43 = arith.constant 0 : index
    %c0_44 = arith.constant 0 : index
    %57 = vector.load %arg18[%c0_43, %c0_44] : memref<1x256xf32, #tpu.memory_space<vmem>>, vector<1x256xf32>
    %58 = vector.broadcast %57 : vector<1x256xf32> to vector<8x256xf32>
    %59 = arith.addf %56, %58 : vector<8x256xf32>
    %c0_45 = arith.constant 0 : index
    %c0_46 = arith.constant 0 : index
    %60 = vector.load %arg19[%c0_45, %c0_46] : memref<1x256xf32, #tpu.memory_space<vmem>>, vector<1x256xf32>
    %61 = vector.broadcast %60 : vector<1x256xf32> to vector<8x256xf32>
    %62 = arith.mulf %59, %61 : vector<8x256xf32>
    %c0_47 = arith.constant 0 : index
    %c0_48 = arith.constant 0 : index
    %63 = vector.load %arg20[%c0_47, %c0_48] : memref<1x256xf32, #tpu.memory_space<vmem>>, vector<1x256xf32>
    %64 = vector.broadcast %63 : vector<1x256xf32> to vector<8x256xf32>
    %65 = arith.addf %62, %64 : vector<8x256xf32>
    %66 = arith.addf %65, %39 : vector<8x256xf32>
    %67 = tpu.concatenate %25, %66 in 1 : vector<8x256xf32>, vector<8x256xf32> -> vector<8x512xf32>
    %68 = arith.truncf %67 : vector<8x512xf32> to vector<8x512xbf16>
    %c0_49 = arith.constant 0 : index
    %c0_50 = arith.constant 0 : index
    %69 = vector.load %arg21[%c0_49, %c0_50] : memref<512x256xbf16, #tpu.memory_space<vmem>>, vector<512x256xbf16>
    %cst_51 = arith.constant dense<0.000000e+00> : vector<8x256xf32>
    %70 = tpu.matmul %68, %69, %cst_51 {dimension_numbers = #tpu.dot_dimension_numbers<[1], [0], [0], [1], [0, 0, 1, 1], [], []>} : vector<8x512xbf16>, vector<512x256xbf16>, vector<8x256xf32> -> vector<8x256xf32>
    %c0_52 = arith.constant 0 : index
    %c0_53 = arith.constant 0 : index
    %71 = vector.load %arg22[%c0_52, %c0_53] : memref<1x256xf32, #tpu.memory_space<vmem>>, vector<1x256xf32>
    %72 = vector.broadcast %71 : vector<1x256xf32> to vector<8x256xf32>
    %73 = arith.addf %70, %72 : vector<8x256xf32>
    %c0_54 = arith.constant 0 : index
    %c0_55 = arith.constant 0 : index
    %74 = vector.load %arg23[%c0_54, %c0_55] : memref<1x256xf32, #tpu.memory_space<vmem>>, vector<1x256xf32>
    %75 = vector.broadcast %74 : vector<1x256xf32> to vector<8x256xf32>
    %76 = arith.mulf %73, %75 : vector<8x256xf32>
    %c0_56 = arith.constant 0 : index
    %c0_57 = arith.constant 0 : index
    %77 = vector.load %arg24[%c0_56, %c0_57] : memref<1x256xf32, #tpu.memory_space<vmem>>, vector<1x256xf32>
    %78 = vector.broadcast %77 : vector<1x256xf32> to vector<8x256xf32>
    %79 = arith.addf %76, %78 : vector<8x256xf32>
    %cst_58 = arith.constant 0.000000e+00 : f32
    %80 = vector.broadcast %cst_58 : f32 to vector<8x256xf32>
    %81 = arith.maximumf %79, %80 : vector<8x256xf32>
    %82 = arith.truncf %81 : vector<8x256xf32> to vector<8x256xbf16>
    %c0_59 = arith.constant 0 : index
    %c0_60 = arith.constant 0 : index
    %83 = vector.load %arg25[%c0_59, %c0_60] : memref<256x256xbf16, #tpu.memory_space<vmem>>, vector<256x256xbf16>
    %cst_61 = arith.constant dense<0.000000e+00> : vector<8x256xf32>
    %84 = tpu.matmul %82, %83, %cst_61 {dimension_numbers = #tpu.dot_dimension_numbers<[1], [0], [0], [1], [0, 0, 1, 1], [], []>} : vector<8x256xbf16>, vector<256x256xbf16>, vector<8x256xf32> -> vector<8x256xf32>
    %c0_62 = arith.constant 0 : index
    %c0_63 = arith.constant 0 : index
    %85 = vector.load %arg26[%c0_62, %c0_63] : memref<1x256xf32, #tpu.memory_space<vmem>>, vector<1x256xf32>
    %86 = vector.broadcast %85 : vector<1x256xf32> to vector<8x256xf32>
    %87 = arith.addf %84, %86 : vector<8x256xf32>
    %c0_64 = arith.constant 0 : index
    %c0_65 = arith.constant 0 : index
    %88 = vector.load %arg27[%c0_64, %c0_65] : memref<1x256xf32, #tpu.memory_space<vmem>>, vector<1x256xf32>
    %89 = vector.broadcast %88 : vector<1x256xf32> to vector<8x256xf32>
    %90 = arith.mulf %87, %89 : vector<8x256xf32>
    %c0_66 = arith.constant 0 : index
    %c0_67 = arith.constant 0 : index
    %91 = vector.load %arg28[%c0_66, %c0_67] : memref<1x256xf32, #tpu.memory_space<vmem>>, vector<1x256xf32>
    %92 = vector.broadcast %91 : vector<1x256xf32> to vector<8x256xf32>
    %93 = arith.addf %90, %92 : vector<8x256xf32>
    %cst_68 = arith.constant 0.000000e+00 : f32
    %94 = vector.broadcast %cst_68 : f32 to vector<8x256xf32>
    %95 = arith.maximumf %93, %94 : vector<8x256xf32>
    %c0_69 = arith.constant 0 : index
    %c0_70 = arith.constant 0 : index
    %96 = vector.load %arg29[%c0_69, %c0_70] : memref<256x10xf32, #tpu.memory_space<vmem>>, vector<256x10xf32>
    %cst_71 = arith.constant dense<0.000000e+00> : vector<8x10xf32>
    %97 = tpu.matmul %95, %96, %cst_71 {dimension_numbers = #tpu.dot_dimension_numbers<[1], [0], [0], [1], [0, 0, 1, 1], [], []>} : vector<8x256xf32>, vector<256x10xf32>, vector<8x10xf32> -> vector<8x10xf32>
    %c0_72 = arith.constant 0 : index
    %c0_73 = arith.constant 0 : index
    %98 = vector.load %arg30[%c0_72, %c0_73] : memref<1x10xf32, #tpu.memory_space<vmem>>, vector<1x10xf32>
    %99 = vector.broadcast %98 : vector<1x10xf32> to vector<8x10xf32>
    %100 = arith.addf %97, %99 : vector<8x10xf32>
    %cst_74 = arith.constant dense<0xFF800000> : vector<8xf32>
    %101 = vector.multi_reduction <maximumf>, %100, %cst_74 [1] : vector<8x10xf32> to vector<8xf32>
    %102 = vector.shape_cast %101 : vector<8xf32> to vector<8x1xf32>
    %103 = vector.broadcast %102 : vector<8x1xf32> to vector<8x10xf32>
    %104 = arith.subf %100, %103 : vector<8x10xf32>
    %105 = math.exp %104 : vector<8x10xf32>
    %cst_75 = arith.constant dense<0.000000e+00> : vector<8xf32>
    %106 = vector.multi_reduction <add>, %105, %cst_75 [1] : vector<8x10xf32> to vector<8xf32>
    %107 = vector.shape_cast %106 : vector<8xf32> to vector<8x1xf32>
    %108 = vector.broadcast %107 : vector<8x1xf32> to vector<8x10xf32>
    %109 = arith.divf %105, %108 : vector<8x10xf32>
    %c0_76 = arith.constant 0 : index
    %c0_77 = arith.constant 0 : index
    %110 = vector.load %arg31[%c0_76, %c0_77] : memref<10x256xf32, #tpu.memory_space<vmem>>, vector<10x256xf32>
    %cst_78 = arith.constant dense<0.000000e+00> : vector<8x256xf32>
    %111 = tpu.matmul %109, %110, %cst_78 {dimension_numbers = #tpu.dot_dimension_numbers<[1], [0], [0], [1], [0, 0, 1, 1], [], []>} : vector<8x10xf32>, vector<10x256xf32>, vector<8x256xf32> -> vector<8x256xf32>
    %c0_79 = arith.constant 0 : index
    %c0_80 = arith.constant 0 : index
    %112 = vector.load %arg32[%c0_79, %c0_80] : memref<8x256xf32, #tpu.memory_space<vmem>>, vector<8x256xf32>
    tpu.vector_store %arg32[%c0_79, %c0_80], %111 {strides = array<i32>} : memref<8x256xf32, #tpu.memory_space<vmem>>, vector<8x256xf32>,
    %c0_81 = arith.constant 0 : index
    %c0_82 = arith.constant 0 : index
    %113 = vector.load %arg33[%c0_81, %c0_82] : memref<8x10xf32, #tpu.memory_space<vmem>>, vector<8x10xf32>
    tpu.vector_store %arg33[%c0_81, %c0_82], %100 {strides = array<i32>} : memref<8x10xf32, #tpu.memory_space<vmem>>, vector<8x10xf32>,
    return
  }
  func.func @transform_0(%arg0: i32) -> (i32, i32) {
    %c0_i32 = arith.constant 0 : i32
    %c0_i32_0 = arith.constant 0 : i32
    %c0_i32_1 = arith.constant 0 : i32
    return %c0_i32, %c0_i32_0 : i32, i32
  }
  func.func @transform_1(%arg0: i32) -> (i32, i32) {
    %c0_i32 = arith.constant 0 : i32
    %c0_i32_0 = arith.constant 0 : i32
    %c0_i32_1 = arith.constant 0 : i32
    return %c0_i32, %c0_i32_0 : i32, i32
  }
  func.func @transform_2(%arg0: i32) -> (i32, i32) {
    %c0_i32 = arith.constant 0 : i32
    %c0_i32_0 = arith.constant 0 : i32
    %c0_i32_1 = arith.constant 0 : i32
    return %c0_i32, %c0_i32_0 : i32, i32
  }
  func.func @transform_3(%arg0: i32) -> (i32, i32) {
    %c0_i32 = arith.constant 0 : i32
    %c0_i32_0 = arith.constant 0 : i32
    %c0_i32_1 = arith.constant 0 : i32
    return %c0_i32, %c0_i32_0 : i32, i32
  }
  func.func @transform_4(%arg0: i32) -> (i32, i32) {
    %c0_i32 = arith.constant 0 : i32
    %c0_i32_0 = arith.constant 0 : i32
    %c0_i32_1 = arith.constant 0 : i32
    return %c0_i32, %c0_i32_0 : i32, i32
  }
  func.func @transform_5(%arg0: i32) -> (i32, i32) {
    %c0_i32 = arith.constant 0 : i32
    %c0_i32_0 = arith.constant 0 : i32
    %c0_i32_1 = arith.constant 0 : i32
    return %c0_i32, %c0_i32_0 : i32, i32
  }
  func.func @transform_6(%arg0: i32) -> (i32, i32) {
    %c0_i32 = arith.constant 0 : i32
    %c0_i32_0 = arith.constant 0 : i32
    %c0_i32_1 = arith.constant 0 : i32
    return %c0_i32, %c0_i32_0 : i32, i32
  }
  func.func @transform_7(%arg0: i32) -> (i32, i32) {
    %c0_i32 = arith.constant 0 : i32
    %c0_i32_0 = arith.constant 0 : i32
    %c0_i32_1 = arith.constant 0 : i32
    return %c0_i32, %c0_i32_0 : i32, i32
  }
  func.func @transform_8(%arg0: i32) -> (i32, i32) {
    %c0_i32 = arith.constant 0 : i32
    %c0_i32_0 = arith.constant 0 : i32
    %c0_i32_1 = arith.constant 0 : i32
    return %c0_i32, %c0_i32_0 : i32, i32
  }
  func.func @transform_9(%arg0: i32) -> (i32, i32) {
    %c0_i32 = arith.constant 0 : i32
    %c0_i32_0 = arith.constant 0 : i32
    %c0_i32_1 = arith.constant 0 : i32
    return %c0_i32, %c0_i32_0 : i32, i32
  }
  func.func @transform_10(%arg0: i32) -> (i32, i32) {
    %c0_i32 = arith.constant 0 : i32
    %c0_i32_0 = arith.constant 0 : i32
    %c0_i32_1 = arith.constant 0 : i32
    return %c0_i32, %c0_i32_0 : i32, i32
  }
  func.func @transform_11(%arg0: i32) -> (i32, i32) {
    %c0_i32 = arith.constant 0 : i32
    %c0_i32_0 = arith.constant 0 : i32
    %c0_i32_1 = arith.constant 0 : i32
    return %c0_i32, %c0_i32_0 : i32, i32
  }
  func.func @transform_12(%arg0: i32) -> (i32, i32) {
    %c0_i32 = arith.constant 0 : i32
    %c0_i32_0 = arith.constant 0 : i32
    %c0_i32_1 = arith.constant 0 : i32
    return %c0_i32, %c0_i32_0 : i32, i32
  }
  func.func @transform_13(%arg0: i32) -> (i32, i32) {
    %c0_i32 = arith.constant 0 : i32
    %c0_i32_0 = arith.constant 0 : i32
    %c0_i32_1 = arith.constant 0 : i32
    return %c0_i32, %c0_i32_0 : i32, i32
  }
  func.func @transform_14(%arg0: i32) -> (i32, i32) {
    %c0_i32 = arith.constant 0 : i32
    %c0_i32_0 = arith.constant 0 : i32
    %c0_i32_1 = arith.constant 0 : i32
    return %c0_i32, %c0_i32_0 : i32, i32
  }
  func.func @transform_15(%arg0: i32) -> (i32, i32) {
    %c0_i32 = arith.constant 0 : i32
    %c0_i32_0 = arith.constant 0 : i32
    %c0_i32_1 = arith.constant 0 : i32
    return %c0_i32, %c0_i32_0 : i32, i32
  }
  func.func @transform_16(%arg0: i32) -> (i32, i32) {
    %c0_i32 = arith.constant 0 : i32
    %c0_i32_0 = arith.constant 0 : i32
    %c0_i32_1 = arith.constant 0 : i32
    return %c0_i32, %c0_i32_0 : i32, i32
  }
  func.func @transform_17(%arg0: i32) -> (i32, i32) {
    %c0_i32 = arith.constant 0 : i32
    %c0_i32_0 = arith.constant 0 : i32
    %c0_i32_1 = arith.constant 0 : i32
    return %c0_i32, %c0_i32_0 : i32, i32
  }
  func.func @transform_18(%arg0: i32) -> (i32, i32) {
    %c0_i32 = arith.constant 0 : i32
    %c0_i32_0 = arith.constant 0 : i32
    %c0_i32_1 = arith.constant 0 : i32
    return %c0_i32, %c0_i32_0 : i32, i32
  }
  func.func @transform_19(%arg0: i32) -> (i32, i32) {
    %c0_i32 = arith.constant 0 : i32
    %c0_i32_0 = arith.constant 0 : i32
    %c0_i32_1 = arith.constant 0 : i32
    return %c0_i32, %c0_i32_0 : i32, i32
  }
  func.func @transform_20(%arg0: i32) -> (i32, i32) {
    %c0_i32 = arith.constant 0 : i32
    %c0_i32_0 = arith.constant 0 : i32
    %c0_i32_1 = arith.constant 0 : i32
    return %c0_i32, %c0_i32_0 : i32, i32
  }
  func.func @transform_21(%arg0: i32) -> (i32, i32) {
    %c0_i32 = arith.constant 0 : i32
    %c0_i32_0 = arith.constant 0 : i32
    %c0_i32_1 = arith.constant 0 : i32
    return %c0_i32, %c0_i32_0 : i32, i32
  }
  func.func @transform_22(%arg0: i32) -> (i32, i32) {
    %c0_i32 = arith.constant 0 : i32
    %c0_i32_0 = arith.constant 0 : i32
    %c0_i32_1 = arith.constant 0 : i32
    return %c0_i32, %c0_i32_0 : i32, i32
  }
  func.func @transform_23(%arg0: i32) -> (i32, i32) {
    %c0_i32 = arith.constant 0 : i32
    %c0_i32_0 = arith.constant 0 : i32
    %c0_i32_1 = arith.constant 0 : i32
    return %c0_i32, %c0_i32_0 : i32, i32
  }
  func.func @transform_24(%arg0: i32) -> (i32, i32) {
    %c0_i32 = arith.constant 0 : i32
    %c0_i32_0 = arith.constant 0 : i32
    %c0_i32_1 = arith.constant 0 : i32
    return %c0_i32, %c0_i32_0 : i32, i32
  }
  func.func @transform_25(%arg0: i32) -> (i32, i32) {
    %c0_i32 = arith.constant 0 : i32
    %c0_i32_0 = arith.constant 0 : i32
    %c0_i32_1 = arith.constant 0 : i32
    return %c0_i32, %c0_i32_0 : i32, i32
  }
  func.func @transform_26(%arg0: i32) -> (i32, i32) {
    %c0_i32 = arith.constant 0 : i32
    %c0_i32_0 = arith.constant 0 : i32
    %c0_i32_1 = arith.constant 0 : i32
    return %c0_i32, %c0_i32_0 : i32, i32
  }
  func.func @transform_27(%arg0: i32) -> (i32, i32) {
    %c0_i32 = arith.constant 0 : i32
    %c0_i32_0 = arith.constant 0 : i32
    %c0_i32_1 = arith.constant 0 : i32
    return %c0_i32, %c0_i32_0 : i32, i32
  }
  func.func @transform_28(%arg0: i32) -> (i32, i32) {
    %c0_i32 = arith.constant 0 : i32
    %c0_i32_0 = arith.constant 0 : i32
    %c0_i32_1 = arith.constant 0 : i32
    return %c0_i32, %c0_i32_0 : i32, i32
  }
  func.func @transform_29(%arg0: i32) -> (i32, i32) {
    %c0_i32 = arith.constant 0 : i32
    %c0_i32_0 = arith.constant 0 : i32
    %c0_i32_1 = arith.constant 0 : i32
    return %c0_i32, %c0_i32_0 : i32, i32
  }
  func.func @transform_30(%arg0: i32) -> (i32, i32) {
    %c0_i32 = arith.constant 0 : i32
    %c0_i32_0 = arith.constant 0 : i32
    %c0_i32_1 = arith.constant 0 : i32
    return %c0_i32, %c0_i32_0 : i32, i32
  }
  func.func @transform_31(%arg0: i32) -> (i32, i32) {
    %c0_i32 = arith.constant 0 : i32
    %c0_i32_0 = arith.constant 0 : i32
    %c0_i32_1 = arith.constant 0 : i32
    return %c0_i32, %c0_i32_0 : i32, i32
  }
  func.func @transform_32(%arg0: i32) -> (i32, i32) {
    %c0_i32 = arith.constant 0 : i32
    %c0_i32_0 = arith.constant 0 : i32
    %c0_i32_1 = arith.constant 0 : i32
    return %c0_i32, %c0_i32_0 : i32, i32
  }
}

</mosaic_0001>

<bundles_post_ra>
// kernel: denoise_block_forward.3
= control target key start
LH: loop header
LB: loop body
LE: loop exit
PB: predicated region body
PF: predicated region fallthrough
CT: control target
= control target key end

     0   :  { %vm1303_vm0 = vcmask 1043456   ;;  %vm1304_vm1 = vcmask 1044480   ;;  %v3453_v2 = vmov 65535   ;;  %vm918_vm2 = vcmask 72704   ;;  %s4583_s1 = inlined_call_operand.vmem [shape: bf16[9,32], index: 1, kind: input, shape index: {}]   ;;  %s4584_s0 = inlined_call_operand.vmem [shape: bf16[4,512,9], index: 0, kind: input, shape index: {}]   ;;  %s4585_s2 = inlined_call_operand.vmem [shape: f32[1,32], index: 2, kind: input, shape index: {}]   ;;  %s4586_s3 = inlined_call_operand.vmem [shape: bf16[512,32], index: 3, kind: output, shape index: {}]  }
   0x1   :  { %v3187_v0 = vld [vmem:[%s4583_s1] sm:$0xf]  ;;  %v3445_v1 = vld [vmem:[%s4583_s1] sm:$0x10]  ;;  %v1305_v3 = vsel %vm1303_vm0, 4294967295, %v3453_v2  ;;  %v3318_v11 = vld [vmem:[%s4584_s0 + $0x8] sm:$0xff] }
   0x2   :  { %v3188_v4 = vor.u32 %v3445_v1, %v3187_v0  ;;  %v1306_v5 = vsel %vm1304_vm1, %v1305_v3, 0  ;;  %v3317_v7 = vld [vmem:[%s4584_s0] sm:$0xff]  ;;  %v3350_v12 = vld [vmem:[%s4584_s0 + $0x108] sm:$0xff]  ;;  %v3319_v15 = vld [vmem:[%s4584_s0 + $0x10] sm:$0xff]  ;;  %vm1959_vm3 = vcmask 261120   ;;  %vm2604_vm4 = vcmask 257024  }
   0x3   :  { %v3349_v8 = vld [vmem:[%s4584_s0 + $0x100] sm:$0xff]  ;;  %v3382_v13 = vld [vmem:[%s4584_s0 + $0x208] sm:$0xff]  ;;  %v3351_v16 = vld [vmem:[%s4584_s0 + $0x110] sm:$0xff] }
   0x4   :  { %v1308_v6 = vand.u32 %v3188_v4, %v1306_v5  ;;  %v3381_v9 = vld [vmem:[%s4584_s0 + $0x200] sm:$0xff]  ;;  %v3414_v14 = vld [vmem:[%s4584_s0 + $0x308] sm:$0xff]  ;;  %v3383_v17 = vld [vmem:[%s4584_s0 + $0x210] sm:$0xff] }
   0x5   :  { %v3413_v10 = vld [vmem:[%s4584_s0 + $0x300] sm:$0xff]  ;;  %v3415_v18 = vld [vmem:[%s4584_s0 + $0x310] sm:$0xff]  ;;  %v3320_v19 = vld [vmem:[%s4584_s0 + $0x18] sm:$0xff] }
   0x6   :  { %1317 = vmatpush.bf16.msra.mxu0 %v1308_v6  ;;  %3446 = vmatpush.bf16.msra.mxu1 %v1308_v6  ;;  %v3352_v20 = vld [vmem:[%s4584_s0 + $0x118] sm:$0xff]  ;;  %v3321_v23 = vld [vmem:[%s4584_s0 + $0x20] sm:$0xff]  ;;  %v3322_v27 = vld [vmem:[%s4584_s0 + $0x28] sm:$0xff] }
   0x7   :  { %3447 = vmatpush.bf16.msra.mxu2 %v1308_v6  ;;  %3448 = vmatpush.bf16.msra.mxu3 %v1308_v6  ;;  %v3384_v21 = vld [vmem:[%s4584_s0 + $0x218] sm:$0xff]  ;;  %v3353_v24 = vld [vmem:[%s4584_s0 + $0x120] sm:$0xff]  ;;  %v3354_v28 = vld [vmem:[%s4584_s0 + $0x128] sm:$0xff] }
   0x8   :  { %v3416_v22 = vld [vmem:[%s4584_s0 + $0x318] sm:$0xff]  ;;  %v3385_v25 = vld [vmem:[%s4584_s0 + $0x220] sm:$0xff]  ;;  %v3386_v29 = vld [vmem:[%s4584_s0 + $0x228] sm:$0xff] }
   0x9   :  { %3189 = vmatmul.msk.bf16.vlgmr.msra.gmra.mxu0 %vm918_vm2, %v3317_v7  ;;  %3221 = vmatmul.msk.bf16.vlgmr.msra.gmra.mxu1 %vm918_vm2, %v3349_v8  ;;  %v3417_v26 = vld [vmem:[%s4584_s0 + $0x320] sm:$0xff]  ;;  %v3418_v30 = vld [vmem:[%s4584_s0 + $0x328] sm:$0xff]  ;;  %v3323_v31 = vld [vmem:[%s4584_s0 + $0x30] sm:$0xff] }
   0xa   :  { %3253 = vmatmul.msk.bf16.vlgmr.msra.gmra.mxu2 %vm918_vm2, %v3381_v9  ;;  %3285 = vmatmul.msk.bf16.vlgmr.msra.gmra.mxu3 %vm918_vm2, %v3413_v10  ;;  %v3355_v32 = vld [vmem:[%s4584_s0 + $0x130] sm:$0xff]  ;;  %v3324_v35 = vld [vmem:[%s4584_s0 + $0x38] sm:$0xff]  ;;  %v3325_v39 = vld [vmem:[%s4584_s0 + $0x40] sm:$0xff] }
   0xb   :  { %v3387_v33 = vld [vmem:[%s4584_s0 + $0x230] sm:$0xff]  ;;  %v3356_v36 = vld [vmem:[%s4584_s0 + $0x138] sm:$0xff]  ;;  %v3357_v40 = vld [vmem:[%s4584_s0 + $0x140] sm:$0xff] }
   0xc   :  { %v3419_v34 = vld [vmem:[%s4584_s0 + $0x330] sm:$0xff]  ;;  %v3388_v37 = vld [vmem:[%s4584_s0 + $0x238] sm:$0xff]  ;;  %v3389_v43 = vld [vmem:[%s4584_s0 + $0x240] sm:$0xff] }
   0xd   :  { %v3420_v38 = vld [vmem:[%s4584_s0 + $0x338] sm:$0xff]  ;;  %v3421_v44 = vld [vmem:[%s4584_s0 + $0x340] sm:$0xff]  ;;  %v3326_v0 = vld [vmem:[%s4584_s0 + $0x48] sm:$0xff] }
   0xe   :  { %v3631_v55 = vld [vmem:[%s4585_s2] ss:$0 sm:$0xff]  ;;  %v3358_v1 = vld [vmem:[%s4584_s0 + $0x148] sm:$0xff] }
   0xf   :  { %v3390_v5 = vld [vmem:[%s4584_s0 + $0x248] sm:$0xff] }
  0x10   :  { %v3422_v6 = vld [vmem:[%s4584_s0 + $0x348] sm:$0xff] }
  0x19   :  { %3190 = vmatmul.msk.bf16.gmra.mxu0 %vm918_vm2, %v3318_v11  ;;  %3222 = vmatmul.msk.bf16.gmra.mxu1 %vm918_vm2, %v3350_v12 }
  0x1a   :  { %3254 = vmatmul.msk.bf16.gmra.mxu2 %vm918_vm2, %v3382_v13  ;;  %3286 = vmatmul.msk.bf16.gmra.mxu3 %vm918_vm2, %v3414_v14 }
  0x29   :  { %3191 = vmatmul.msk.bf16.gmra.mxu0 %vm918_vm2, %v3319_v15  ;;  %3223 = vmatmul.msk.bf16.gmra.mxu1 %vm918_vm2, %v3351_v16 }
  0x2a   :  { %3255 = vmatmul.msk.bf16.gmra.mxu2 %vm918_vm2, %v3383_v17  ;;  %3287 = vmatmul.msk.bf16.gmra.mxu3 %vm918_vm2, %v3415_v18 }
  0x39   :  { %3192 = vmatmul.msk.bf16.gmra.mxu0 %vm918_vm2, %v3320_v19  ;;  %3224 = vmatmul.msk.bf16.gmra.mxu1 %vm918_vm2, %v3352_v20 }
  0x3a   :  { %3256 = vmatmul.msk.bf16.gmra.mxu2 %vm918_vm2, %v3384_v21  ;;  %3288 = vmatmul.msk.bf16.gmra.mxu3 %vm918_vm2, %v3416_v22 }
  0x49   :  { %3193 = vmatmul.msk.bf16.gmra.mxu0 %vm918_vm2, %v3321_v23  ;;  %3225 = vmatmul.msk.bf16.gmra.mxu1 %vm918_vm2, %v3353_v24 }
  0x4a   :  { %3257 = vmatmul.msk.bf16.gmra.mxu2 %vm918_vm2, %v3385_v25  ;;  %3289 = vmatmul.msk.bf16.gmra.mxu3 %vm918_vm2, %v3417_v26 }
  0x59   :  { %3194 = vmatmul.msk.bf16.gmra.mxu0 %vm918_vm2, %v3322_v27  ;;  %3226 = vmatmul.msk.bf16.gmra.mxu1 %vm918_vm2, %v3354_v28 }
  0x5a   :  { %3258 = vmatmul.msk.bf16.gmra.mxu2 %vm918_vm2, %v3386_v29  ;;  %3290 = vmatmul.msk.bf16.gmra.mxu3 %vm918_vm2, %v3418_v30 }
  0x69   :  { %3195 = vmatmul.msk.bf16.gmra.mxu0 %vm918_vm2, %v3323_v31  ;;  %3227 = vmatmul.msk.bf16.gmra.mxu1 %vm918_vm2, %v3355_v32  ;;  %v3327_v32 = vld [vmem:[%s4584_s0 + $0x50] sm:$0xff] }
  0x6a   :  { %3259 = vmatmul.msk.bf16.gmra.mxu2 %vm918_vm2, %v3387_v33  ;;  %3291 = vmatmul.msk.bf16.gmra.mxu3 %vm918_vm2, %v3419_v34  ;;  %v3359_v33 = vld [vmem:[%s4584_s0 + $0x150] sm:$0xff] }
  0x79   :  { %3196 = vmatmul.msk.bf16.gmra.mxu0 %vm918_vm2, %v3324_v35  ;;  %3228 = vmatmul.msk.bf16.gmra.mxu1 %vm918_vm2, %v3356_v36 }
  0x7a   :  { %3260 = vmatmul.msk.bf16.gmra.mxu2 %vm918_vm2, %v3388_v37  ;;  %3292 = vmatmul.msk.bf16.gmra.mxu3 %vm918_vm2, %v3420_v38  ;;  %v3391_v37 = vld [vmem:[%s4584_s0 + $0x250] sm:$0xff] }
  0x7b   :  { %v3423_v38 = vld [vmem:[%s4584_s0 + $0x350] sm:$0xff] }
  0x86   :  { %v1319_v41 = vpop.f32.mrf.mxu0  ;;  %v1479_v42 = vpop.f32.mrf.mxu1 }
  0x87   :  { %v1960_v45 = vsel %vm1959_vm3, %v1319_v41, -inf  ;;  %v1961_v46 = vsel %vm1959_vm3, %v1479_v42, -inf }
  0x88   :  { %v1962_v47 = vmax.f32 %v1960_v45, %v1961_v46 }
  0x89   :  { %3197 = vmatmul.msk.bf16.gmra.mxu0 %vm918_vm2, %v3325_v39  ;;  %3229 = vmatmul.msk.bf16.gmra.mxu1 %vm918_vm2, %v3357_v40 }
  0x8a   :  { %3261 = vmatmul.msk.bf16.gmra.mxu2 %vm918_vm2, %v3389_v43  ;;  %3293 = vmatmul.msk.bf16.gmra.mxu3 %vm918_vm2, %v3421_v44 }
  0x8d   :  { %v1639_v48 = vpop.f32.mrf.mxu2  ;;  %v1799_v49 = vpop.f32.mrf.mxu3 }
  0x8e   :  { %v1963_v50 = vsel %vm1959_vm3, %v1639_v48, -inf  ;;  %v1965_v51 = vsel %vm1959_vm3, %v1799_v49, -inf  ;;  %v1321_v52 = vpop.f32.mrf.mxu0  ;;  %v1481_v53 = vpop.f32.mrf.mxu1 }
  0x8f   :  { %v1964_v54 = vmax.f32 %v1962_v47, %v1963_v50  ;;  %v1967_v57 = vsel %vm1959_vm3, %v1321_v52, -inf  ;;  %v1968_v58 = vsel %vm1959_vm3, %v1481_v53, -inf }
  0x90   :  { %v1969_v61 = vmax.f32 %v1967_v57, %v1968_v58 }
  0x91   :  { %v1966_v56 = vmax.f32 %v1964_v54, %v1965_v51 }
  0x93   :  { %v2412_v59 = vadd.f32 %v3631_v55, %v1966_v56 }
  0x95   :  { %v2476_v60 = vmax.f32 %v2412_v59, 0.0  ;;  %v1641_v62 = vpop.f32.mrf.mxu2  ;;  %v1801_v63 = vpop.f32.mrf.mxu3 }
  0x96   :  { %v1970_v2 = vsel %vm1959_vm3, %v1641_v62, -inf  ;;  %v1324_v3 = vpop.f32.mrf.mxu0  ;;  %v1484_v4 = vpop.f32.mrf.mxu1  ;;  %v1972_v9 = vsel %vm1959_vm3, %v1801_v63, -inf }
  0x97   :  { %v2540_v7 = vpack.c.bf16 %v2476_v60, %v2476_v60  ;;  %v1971_v8 = vmax.f32 %v1969_v61, %v1970_v2  ;;  %v1974_v10 = vsel %vm1959_vm3, %v1324_v3, -inf  ;;  %v1975_v11 = vsel %vm1959_vm3, %v1484_v4, -inf  ;;  %v3360_v2 = vld [vmem:[%s4584_s0 + $0x158] sm:$0xff] }
  0x98   :  { %v1976_v14 = vmax.f32 %v1974_v10, %v1975_v11 }
  0x99   :  { %2605 = vst.msk [vmem:[%s4586_s3] sm:$0xf] %vm2604_vm4, %v2540_v7  ;;  %v1973_v12 = vmax.f32 %v1971_v8, %v1972_v9  ;;  %3198 = vmatmul.msk.bf16.gmra.mxu0 %vm918_vm2, %v3326_v0  ;;  %3230 = vmatmul.msk.bf16.gmra.mxu1 %vm918_vm2, %v3358_v1  ;;  %v3328_v1 = vld [vmem:[%s4584_s0 + $0x58] sm:$0xff] }
  0x9a   :  { %3262 = vmatmul.msk.bf16.gmra.mxu2 %vm918_vm2, %v3390_v5  ;;  %3294 = vmatmul.msk.bf16.gmra.mxu3 %vm918_vm2, %v3422_v6  ;;  %v3392_v6 = vld [vmem:[%s4584_s0 + $0x258] sm:$0xff] }
  0x9b   :  { %v2413_v13 = vadd.f32 %v3631_v55, %v1973_v12  ;;  %v3424_v7 = vld [vmem:[%s4584_s0 + $0x358] sm:$0xff] }
  0x9d   :  { %v2477_v15 = vmax.f32 %v2413_v13, 0.0  ;;  %v1644_v16 = vpop.f32.mrf.mxu2  ;;  %v1804_v17 = vpop.f32.mrf.mxu3 }
  0x9e   :  { %v1977_v18 = vsel %vm1959_vm3, %v1644_v16, -inf  ;;  %v1979_v19 = vsel %vm1959_vm3, %v1804_v17, -inf  ;;  %v1326_v20 = vpop.f32.mrf.mxu0  ;;  %v1486_v21 = vpop.f32.mrf.mxu1 }
  0x9f   :  { %v2541_v22 = vpack.c.bf16 %v2477_v15, %v2477_v15  ;;  %v1978_v23 = vmax.f32 %v1976_v14, %v1977_v18  ;;  %v1981_v25 = vsel %vm1959_vm3, %v1326_v20, -inf  ;;  %v1982_v26 = vsel %vm1959_vm3, %v1486_v21, -inf }
  0xa0   :  { %v1983_v29 = vmax.f32 %v1981_v25, %v1982_v26 }
  0xa1   :  { %2606 = vst.msk [vmem:[%s4586_s3 + $0x4] sm:$0xf] %vm2604_vm4, %v2541_v22  ;;  %v1980_v24 = vmax.f32 %v1978_v23, %v1979_v19 }
  0xa3   :  { %v2414_v27 = vadd.f32 %v3631_v55, %v1980_v24 }
  0xa5   :  { %v2478_v28 = vmax.f32 %v2414_v27, 0.0  ;;  %v1646_v30 = vpop.f32.mrf.mxu2  ;;  %v1806_v31 = vpop.f32.mrf.mxu3 }
  0xa6   :  { %v1984_v34 = vsel %vm1959_vm3, %v1646_v30, -inf  ;;  %v1329_v35 = vpop.f32.mrf.mxu0  ;;  %v1489_v36 = vpop.f32.mrf.mxu1  ;;  %v1986_v41 = vsel %vm1959_vm3, %v1806_v31, -inf }
  0xa7   :  { %v2542_v39 = vpack.c.bf16 %v2478_v28, %v2478_v28  ;;  %v1985_v40 = vmax.f32 %v1983_v29, %v1984_v34  ;;  %v1988_v42 = vsel %vm1959_vm3, %v1329_v35, -inf  ;;  %v1989_v43 = vsel %vm1959_vm3, %v1489_v36, -inf  ;;  %v3361_v34 = vld [vmem:[%s4584_s0 + $0x160] sm:$0xff] }
  0xa8   :  { %v1990_v46 = vmax.f32 %v1988_v42, %v1989_v43 }
  0xa9   :  { %2607 = vst.msk [vmem:[%s4586_s3 + $0x8] sm:$0xf] %vm2604_vm4, %v2542_v39  ;;  %v1987_v44 = vmax.f32 %v1985_v40, %v1986_v41  ;;  %3199 = vmatmul.msk.bf16.gmra.mxu0 %vm918_vm2, %v3327_v32  ;;  %3231 = vmatmul.msk.bf16.gmra.mxu1 %vm918_vm2, %v3359_v33  ;;  %v3329_v33 = vld [vmem:[%s4584_s0 + $0x60] sm:$0xff] }
  0xaa   :  { %3263 = vmatmul.msk.bf16.gmra.mxu2 %vm918_vm2, %v3391_v37  ;;  %3295 = vmatmul.msk.bf16.gmra.mxu3 %vm918_vm2, %v3423_v38  ;;  %v3393_v38 = vld [vmem:[%s4584_s0 + $0x260] sm:$0xff] }
  0xab   :  { %v2415_v45 = vadd.f32 %v3631_v55, %v1987_v44  ;;  %v3425_v39 = vld [vmem:[%s4584_s0 + $0x360] sm:$0xff] }
  0xad   :  { %v2479_v47 = vmax.f32 %v2415_v45, 0.0  ;;  %v1649_v48 = vpop.f32.mrf.mxu2  ;;  %v1809_v49 = vpop.f32.mrf.mxu3 }
  0xae   :  { %v1991_v50 = vsel %vm1959_vm3, %v1649_v48, -inf  ;;  %v1993_v51 = vsel %vm1959_vm3, %v1809_v49, -inf  ;;  %v1331_v52 = vpop.f32.mrf.mxu0  ;;  %v1491_v53 = vpop.f32.mrf.mxu1 }
  0xaf   :  { %v2543_v54 = vpack.c.bf16 %v2479_v47, %v2479_v47  ;;  %v1992_v56 = vmax.f32 %v1990_v46, %v1991_v50  ;;  %v1995_v58 = vsel %vm1959_vm3, %v1331_v52, -inf  ;;  %v1996_v59 = vsel %vm1959_vm3, %v1491_v53, -inf }
  0xb0   :  { %v1997_v62 = vmax.f32 %v1995_v58, %v1996_v59 }
  0xb1   :  { %2608 = vst.msk [vmem:[%s4586_s3 + $0xc] sm:$0xf] %vm2604_vm4, %v2543_v54  ;;  %v1994_v57 = vmax.f32 %v1992_v56, %v1993_v51 }
  0xb3   :  { %v2416_v60 = vadd.f32 %v3631_v55, %v1994_v57 }
  0xb5   :  { %v2480_v61 = vmax.f32 %v2416_v60, 0.0  ;;  %v1651_v63 = vpop.f32.mrf.mxu2  ;;  %v1811_v0 = vpop.f32.mrf.mxu3 }
  0xb6   :  { %v1998_v3 = vsel %vm1959_vm3, %v1651_v63, -inf  ;;  %v1334_v4 = vpop.f32.mrf.mxu0  ;;  %v1494_v5 = vpop.f32.mrf.mxu1  ;;  %v2000_v10 = vsel %vm1959_vm3, %v1811_v0, -inf }
  0xb7   :  { %v2544_v8 = vpack.c.bf16 %v2480_v61, %v2480_v61  ;;  %v1999_v9 = vmax.f32 %v1997_v62, %v1998_v3  ;;  %v2002_v11 = vsel %vm1959_vm3, %v1334_v4, -inf  ;;  %v2003_v12 = vsel %vm1959_vm3, %v1494_v5, -inf  ;;  %v3362_v3 = vld [vmem:[%s4584_s0 + $0x168] sm:$0xff] }
  0xb8   :  { %v2004_v15 = vmax.f32 %v2002_v11, %v2003_v12 }
  0xb9   :  { %2609 = vst.msk [vmem:[%s4586_s3 + $0x10] sm:$0xf] %vm2604_vm4, %v2544_v8  ;;  %v2001_v13 = vmax.f32 %v1999_v9, %v2000_v10  ;;  %3200 = vmatmul.msk.bf16.gmra.mxu0 %vm918_vm2, %v3328_v1  ;;  %3232 = vmatmul.msk.bf16.gmra.mxu1 %vm918_vm2, %v3360_v2  ;;  %v3330_v2 = vld [vmem:[%s4584_s0 + $0x68] sm:$0xff] }
  0xba   :  { %3264 = vmatmul.msk.bf16.gmra.mxu2 %vm918_vm2, %v3392_v6  ;;  %3296 = vmatmul.msk.bf16.gmra.mxu3 %vm918_vm2, %v3424_v7  ;;  %v3394_v7 = vld [vmem:[%s4584_s0 + $0x268] sm:$0xff] }
  0xbb   :  { %v2417_v14 = vadd.f32 %v3631_v55, %v2001_v13  ;;  %v3426_v8 = vld [vmem:[%s4584_s0 + $0x368] sm:$0xff] }
  0xbd   :  { %v2481_v16 = vmax.f32 %v2417_v14, 0.0  ;;  %v1654_v17 = vpop.f32.mrf.mxu2  ;;  %v1814_v18 = vpop.f32.mrf.mxu3 }
  0xbe   :  { %v2005_v19 = vsel %vm1959_vm3, %v1654_v17, -inf  ;;  %v2007_v20 = vsel %vm1959_vm3, %v1814_v18, -inf  ;;  %v1336_v21 = vpop.f32.mrf.mxu0  ;;  %v1496_v22 = vpop.f32.mrf.mxu1 }
  0xbf   :  { %v2545_v23 = vpack.c.bf16 %v2481_v16, %v2481_v16  ;;  %v2006_v24 = vmax.f32 %v2004_v15, %v2005_v19  ;;  %v2009_v26 = vsel %vm1959_vm3, %v1336_v21, -inf  ;;  %v2010_v27 = vsel %vm1959_vm3, %v1496_v22, -inf }
  0xc0   :  { %v2011_v30 = vmax.f32 %v2009_v26, %v2010_v27 }
  0xc1   :  { %2610 = vst.msk [vmem:[%s4586_s3 + $0x14] sm:$0xf] %vm2604_vm4, %v2545_v23  ;;  %v2008_v25 = vmax.f32 %v2006_v24, %v2007_v20 }
  0xc3   :  { %v2418_v28 = vadd.f32 %v3631_v55, %v2008_v25 }
  0xc5   :  { %v2482_v29 = vmax.f32 %v2418_v28, 0.0  ;;  %v1656_v31 = vpop.f32.mrf.mxu2  ;;  %v1816_v32 = vpop.f32.mrf.mxu3 }
  0xc6   :  { %v2012_v35 = vsel %vm1959_vm3, %v1656_v31, -inf  ;;  %v1339_v36 = vpop.f32.mrf.mxu0  ;;  %v1499_v37 = vpop.f32.mrf.mxu1  ;;  %v2014_v42 = vsel %vm1959_vm3, %v1816_v32, -inf }
  0xc7   :  { %v2546_v40 = vpack.c.bf16 %v2482_v29, %v2482_v29  ;;  %v2013_v41 = vmax.f32 %v2011_v30, %v2012_v35  ;;  %v2016_v43 = vsel %vm1959_vm3, %v1339_v36, -inf  ;;  %v2017_v44 = vsel %vm1959_vm3, %v1499_v37, -inf  ;;  %v3363_v35 = vld [vmem:[%s4584_s0 + $0x170] sm:$0xff] }
  0xc8   :  { %v2018_v47 = vmax.f32 %v2016_v43, %v2017_v44 }
  0xc9   :  { %2611 = vst.msk [vmem:[%s4586_s3 + $0x18] sm:$0xf] %vm2604_vm4, %v2546_v40  ;;  %v2015_v45 = vmax.f32 %v2013_v41, %v2014_v42  ;;  %3201 = vmatmul.msk.bf16.gmra.mxu0 %vm918_vm2, %v3329_v33  ;;  %3233 = vmatmul.msk.bf16.gmra.mxu1 %vm918_vm2, %v3361_v34  ;;  %v3331_v34 = vld [vmem:[%s4584_s0 + $0x70] sm:$0xff] }
  0xca   :  { %3265 = vmatmul.msk.bf16.gmra.mxu2 %vm918_vm2, %v3393_v38  ;;  %3297 = vmatmul.msk.bf16.gmra.mxu3 %vm918_vm2, %v3425_v39  ;;  %v3395_v39 = vld [vmem:[%s4584_s0 + $0x270] sm:$0xff] }
  0xcb   :  { %v2419_v46 = vadd.f32 %v3631_v55, %v2015_v45  ;;  %v3427_v40 = vld [vmem:[%s4584_s0 + $0x370] sm:$0xff] }
  0xcd   :  { %v2483_v48 = vmax.f32 %v2419_v46, 0.0  ;;  %v1659_v49 = vpop.f32.mrf.mxu2  ;;  %v1819_v50 = vpop.f32.mrf.mxu3 }
  0xce   :  { %v2019_v51 = vsel %vm1959_vm3, %v1659_v49, -inf  ;;  %v2021_v52 = vsel %vm1959_vm3, %v1819_v50, -inf  ;;  %v1341_v53 = vpop.f32.mrf.mxu0  ;;  %v1501_v54 = vpop.f32.mrf.mxu1 }
  0xcf   :  { %v2547_v56 = vpack.c.bf16 %v2483_v48, %v2483_v48  ;;  %v2020_v57 = vmax.f32 %v2018_v47, %v2019_v51  ;;  %v2023_v59 = vsel %vm1959_vm3, %v1341_v53, -inf  ;;  %v2024_v60 = vsel %vm1959_vm3, %v1501_v54, -inf }
  0xd0   :  { %v2025_v63 = vmax.f32 %v2023_v59, %v2024_v60 }
  0xd1   :  { %2612 = vst.msk [vmem:[%s4586_s3 + $0x1c] sm:$0xf] %vm2604_vm4, %v2547_v56  ;;  %v2022_v58 = vmax.f32 %v2020_v57, %v2021_v52 }
  0xd3   :  { %v2420_v61 = vadd.f32 %v3631_v55, %v2022_v58 }
  0xd5   :  { %v2484_v62 = vmax.f32 %v2420_v61, 0.0  ;;  %v1661_v0 = vpop.f32.mrf.mxu2  ;;  %v1821_v1 = vpop.f32.mrf.mxu3 }
  0xd6   :  { %v2026_v4 = vsel %vm1959_vm3, %v1661_v0, -inf  ;;  %v1344_v5 = vpop.f32.mrf.mxu0  ;;  %v1504_v6 = vpop.f32.mrf.mxu1  ;;  %v2028_v11 = vsel %vm1959_vm3, %v1821_v1, -inf }
  0xd7   :  { %v2548_v9 = vpack.c.bf16 %v2484_v62, %v2484_v62  ;;  %v2027_v10 = vmax.f32 %v2025_v63, %v2026_v4  ;;  %v2030_v12 = vsel %vm1959_vm3, %v1344_v5, -inf  ;;  %v2031_v13 = vsel %vm1959_vm3, %v1504_v6, -inf  ;;  %v3364_v4 = vld [vmem:[%s4584_s0 + $0x178] sm:$0xff] }
  0xd8   :  { %v2032_v16 = vmax.f32 %v2030_v12, %v2031_v13 }
  0xd9   :  { %2613 = vst.msk [vmem:[%s4586_s3 + $0x20] sm:$0xf] %vm2604_vm4, %v2548_v9  ;;  %v2029_v14 = vmax.f32 %v2027_v10, %v2028_v11  ;;  %3202 = vmatmul.msk.bf16.gmra.mxu0 %vm918_vm2, %v3330_v2  ;;  %3234 = vmatmul.msk.bf16.gmra.mxu1 %vm918_vm2, %v3362_v3  ;;  %v3332_v3 = vld [vmem:[%s4584_s0 + $0x78] sm:$0xff] }
  0xda   :  { %3266 = vmatmul.msk.bf16.gmra.mxu2 %vm918_vm2, %v3394_v7  ;;  %3298 = vmatmul.msk.bf16.gmra.mxu3 %vm918_vm2, %v3426_v8  ;;  %v3396_v8 = vld [vmem:[%s4584_s0 + $0x278] sm:$0xff] }
  0xdb   :  { %v2421_v15 = vadd.f32 %v3631_v55, %v2029_v14  ;;  %v3428_v9 = vld [vmem:[%s4584_s0 + $0x378] sm:$0xff] }
  0xdd   :  { %v2485_v17 = vmax.f32 %v2421_v15, 0.0  ;;  %v1664_v18 = vpop.f32.mrf.mxu2  ;;  %v1824_v19 = vpop.f32.mrf.mxu3 }
  0xde   :  { %v2033_v20 = vsel %vm1959_vm3, %v1664_v18, -inf  ;;  %v2035_v21 = vsel %vm1959_vm3, %v1824_v19, -inf  ;;  %v1346_v22 = vpop.f32.mrf.mxu0  ;;  %v1506_v23 = vpop.f32.mrf.mxu1 }
  0xdf   :  { %v2549_v24 = vpack.c.bf16 %v2485_v17, %v2485_v17  ;;  %v2034_v25 = vmax.f32 %v2032_v16, %v2033_v20  ;;  %v2037_v27 = vsel %vm1959_vm3, %v1346_v22, -inf  ;;  %v2038_v28 = vsel %vm1959_vm3, %v1506_v23, -inf }
  0xe0   :  { %v2039_v31 = vmax.f32 %v2037_v27, %v2038_v28 }
  0xe1   :  { %2614 = vst.msk [vmem:[%s4586_s3 + $0x24] sm:$0xf] %vm2604_vm4, %v2549_v24  ;;  %v2036_v26 = vmax.f32 %v2034_v25, %v2035_v21 }
  0xe3   :  { %v2422_v29 = vadd.f32 %v3631_v55, %v2036_v26 }
  0xe5   :  { %v2486_v30 = vmax.f32 %v2422_v29, 0.0  ;;  %v1666_v32 = vpop.f32.mrf.mxu2  ;;  %v1826_v33 = vpop.f32.mrf.mxu3 }
  0xe6   :  { %v2040_v36 = vsel %vm1959_vm3, %v1666_v32, -inf  ;;  %v1349_v37 = vpop.f32.mrf.mxu0  ;;  %v1509_v38 = vpop.f32.mrf.mxu1  ;;  %v2042_v43 = vsel %vm1959_vm3, %v1826_v33, -inf }
  0xe7   :  { %v2550_v41 = vpack.c.bf16 %v2486_v30, %v2486_v30  ;;  %v2041_v42 = vmax.f32 %v2039_v31, %v2040_v36  ;;  %v2044_v44 = vsel %vm1959_vm3, %v1349_v37, -inf  ;;  %v2045_v45 = vsel %vm1959_vm3, %v1509_v38, -inf  ;;  %v3365_v36 = vld [vmem:[%s4584_s0 + $0x180] sm:$0xff] }
  0xe8   :  { %v2046_v48 = vmax.f32 %v2044_v44, %v2045_v45 }
  0xe9   :  { %2615 = vst.msk [vmem:[%s4586_s3 + $0x28] sm:$0xf] %vm2604_vm4, %v2550_v41  ;;  %v2043_v46 = vmax.f32 %v2041_v42, %v2042_v43  ;;  %3203 = vmatmul.msk.bf16.gmra.mxu0 %vm918_vm2, %v3331_v34  ;;  %3235 = vmatmul.msk.bf16.gmra.mxu1 %vm918_vm2, %v3363_v35  ;;  %v3333_v35 = vld [vmem:[%s4584_s0 + $0x80] sm:$0xff] }
  0xea   :  { %3267 = vmatmul.msk.bf16.gmra.mxu2 %vm918_vm2, %v3395_v39  ;;  %3299 = vmatmul.msk.bf16.gmra.mxu3 %vm918_vm2, %v3427_v40  ;;  %v3397_v40 = vld [vmem:[%s4584_s0 + $0x280] sm:$0xff] }
  0xeb   :  { %v2423_v47 = vadd.f32 %v3631_v55, %v2043_v46  ;;  %v3429_v41 = vld [vmem:[%s4584_s0 + $0x380] sm:$0xff] }
  0xed   :  { %v2487_v49 = vmax.f32 %v2423_v47, 0.0  ;;  %v1669_v50 = vpop.f32.mrf.mxu2  ;;  %v1829_v51 = vpop.f32.mrf.mxu3 }
  0xee   :  { %v2047_v52 = vsel %vm1959_vm3, %v1669_v50, -inf  ;;  %v2049_v53 = vsel %vm1959_vm3, %v1829_v51, -inf  ;;  %v1351_v54 = vpop.f32.mrf.mxu0  ;;  %v1511_v56 = vpop.f32.mrf.mxu1 }
  0xef   :  { %v2551_v57 = vpack.c.bf16 %v2487_v49, %v2487_v49  ;;  %v2048_v58 = vmax.f32 %v2046_v48, %v2047_v52  ;;  %v2051_v60 = vsel %vm1959_vm3, %v1351_v54, -inf  ;;  %v2052_v61 = vsel %vm1959_vm3, %v1511_v56, -inf }
  0xf0   :  { %v2053_v0 = vmax.f32 %v2051_v60, %v2052_v61 }
  0xf1   :  { %2616 = vst.msk [vmem:[%s4586_s3 + $0x2c] sm:$0xf] %vm2604_vm4, %v2551_v57  ;;  %v2050_v59 = vmax.f32 %v2048_v58, %v2049_v53 }
  0xf3   :  { %v2424_v62 = vadd.f32 %v3631_v55, %v2050_v59 }
  0xf5   :  { %v2488_v63 = vmax.f32 %v2424_v62, 0.0  ;;  %v1671_v1 = vpop.f32.mrf.mxu2  ;;  %v1831_v2 = vpop.f32.mrf.mxu3 }
  0xf6   :  { %v2054_v5 = vsel %vm1959_vm3, %v1671_v1, -inf  ;;  %v1354_v6 = vpop.f32.mrf.mxu0  ;;  %v1514_v7 = vpop.f32.mrf.mxu1  ;;  %v2056_v12 = vsel %vm1959_vm3, %v1831_v2, -inf }
  0xf7   :  { %v2552_v10 = vpack.c.bf16 %v2488_v63, %v2488_v63  ;;  %v2055_v11 = vmax.f32 %v2053_v0, %v2054_v5  ;;  %v2058_v13 = vsel %vm1959_vm3, %v1354_v6, -inf  ;;  %v2059_v14 = vsel %vm1959_vm3, %v1514_v7, -inf  ;;  %v3366_v5 = vld [vmem:[%s4584_s0 + $0x188] sm:$0xff] }
  0xf8   :  { %v2060_v17 = vmax.f32 %v2058_v13, %v2059_v14 }
  0xf9   :  { %2617 = vst.msk [vmem:[%s4586_s3 + $0x30] sm:$0xf] %vm2604_vm4, %v2552_v10  ;;  %v2057_v15 = vmax.f32 %v2055_v11, %v2056_v12  ;;  %3204 = vmatmul.msk.bf16.gmra.mxu0 %vm918_vm2, %v3332_v3  ;;  %3236 = vmatmul.msk.bf16.gmra.mxu1 %vm918_vm2, %v3364_v4  ;;  %v3334_v4 = vld [vmem:[%s4584_s0 + $0x88] sm:$0xff] }
  0xfa   :  { %3268 = vmatmul.msk.bf16.gmra.mxu2 %vm918_vm2, %v3396_v8  ;;  %3300 = vmatmul.msk.bf16.gmra.mxu3 %vm918_vm2, %v3428_v9  ;;  %v3398_v9 = vld [vmem:[%s4584_s0 + $0x288] sm:$0xff] }
  0xfb   :  { %v2425_v16 = vadd.f32 %v3631_v55, %v2057_v15  ;;  %v3430_v10 = vld [vmem:[%s4584_s0 + $0x388] sm:$0xff] }
  0xfd   :  { %v2489_v18 = vmax.f32 %v2425_v16, 0.0  ;;  %v1674_v19 = vpop.f32.mrf.mxu2  ;;  %v1834_v20 = vpop.f32.mrf.mxu3 }
  0xfe   :  { %v2061_v21 = vsel %vm1959_vm3, %v1674_v19, -inf  ;;  %v2063_v22 = vsel %vm1959_vm3, %v1834_v20, -inf  ;;  %v1356_v23 = vpop.f32.mrf.mxu0  ;;  %v1516_v24 = vpop.f32.mrf.mxu1 }
  0xff   :  { %v2553_v25 = vpack.c.bf16 %v2489_v18, %v2489_v18  ;;  %v2062_v26 = vmax.f32 %v2060_v17, %v2061_v21  ;;  %v2065_v28 = vsel %vm1959_vm3, %v1356_v23, -inf  ;;  %v2066_v29 = vsel %vm1959_vm3, %v1516_v24, -inf }
 0x100   :  { %v2067_v32 = vmax.f32 %v2065_v28, %v2066_v29 }
 0x101   :  { %2618 = vst.msk [vmem:[%s4586_s3 + $0x34] sm:$0xf] %vm2604_vm4, %v2553_v25  ;;  %v2064_v27 = vmax.f32 %v2062_v26, %v2063_v22 }
 0x103   :  { %v2426_v30 = vadd.f32 %v3631_v55, %v2064_v27 }
 0x105   :  { %v2490_v31 = vmax.f32 %v2426_v30, 0.0  ;;  %v1676_v33 = vpop.f32.mrf.mxu2  ;;  %v1836_v34 = vpop.f32.mrf.mxu3 }
 0x106   :  { %v2068_v37 = vsel %vm1959_vm3, %v1676_v33, -inf  ;;  %v1359_v38 = vpop.f32.mrf.mxu0  ;;  %v1519_v39 = vpop.f32.mrf.mxu1  ;;  %v2070_v44 = vsel %vm1959_vm3, %v1836_v34, -inf }
 0x107   :  { %v2554_v42 = vpack.c.bf16 %v2490_v31, %v2490_v31  ;;  %v2069_v43 = vmax.f32 %v2067_v32, %v2068_v37  ;;  %v2072_v45 = vsel %vm1959_vm3, %v1359_v38, -inf  ;;  %v2073_v46 = vsel %vm1959_vm3, %v1519_v39, -inf  ;;  %v3367_v37 = vld [vmem:[%s4584_s0 + $0x190] sm:$0xff] }
 0x108   :  { %v2074_v49 = vmax.f32 %v2072_v45, %v2073_v46 }
 0x109   :  { %2619 = vst.msk [vmem:[%s4586_s3 + $0x38] sm:$0xf] %vm2604_vm4, %v2554_v42  ;;  %v2071_v47 = vmax.f32 %v2069_v43, %v2070_v44  ;;  %3205 = vmatmul.msk.bf16.gmra.mxu0 %vm918_vm2, %v3333_v35  ;;  %3237 = vmatmul.msk.bf16.gmra.mxu1 %vm918_vm2, %v3365_v36  ;;  %v3335_v36 = vld [vmem:[%s4584_s0 + $0x90] sm:$0xff] }
 0x10a   :  { %3269 = vmatmul.msk.bf16.gmra.mxu2 %vm918_vm2, %v3397_v40  ;;  %3301 = vmatmul.msk.bf16.gmra.mxu3 %vm918_vm2, %v3429_v41  ;;  %v3399_v41 = vld [vmem:[%s4584_s0 + $0x290] sm:$0xff] }
 0x10b   :  { %v2427_v48 = vadd.f32 %v3631_v55, %v2071_v47  ;;  %v3431_v42 = vld [vmem:[%s4584_s0 + $0x390] sm:$0xff] }
 0x10d   :  { %v2491_v50 = vmax.f32 %v2427_v48, 0.0  ;;  %v1679_v51 = vpop.f32.mrf.mxu2  ;;  %v1839_v52 = vpop.f32.mrf.mxu3 }
 0x10e   :  { %v2075_v53 = vsel %vm1959_vm3, %v1679_v51, -inf  ;;  %v2077_v54 = vsel %vm1959_vm3, %v1839_v52, -inf  ;;  %v1361_v56 = vpop.f32.mrf.mxu0  ;;  %v1521_v57 = vpop.f32.mrf.mxu1 }
 0x10f   :  { %v2555_v58 = vpack.c.bf16 %v2491_v50, %v2491_v50  ;;  %v2076_v59 = vmax.f32 %v2074_v49, %v2075_v53  ;;  %v2079_v61 = vsel %vm1959_vm3, %v1361_v56, -inf  ;;  %v2080_v62 = vsel %vm1959_vm3, %v1521_v57, -inf }
 0x110   :  { %v2081_v1 = vmax.f32 %v2079_v61, %v2080_v62 }
 0x111   :  { %2620 = vst.msk [vmem:[%s4586_s3 + $0x3c] sm:$0xf] %vm2604_vm4, %v2555_v58  ;;  %v2078_v60 = vmax.f32 %v2076_v59, %v2077_v54 }
 0x113   :  { %v2428_v63 = vadd.f32 %v3631_v55, %v2078_v60 }
 0x115   :  { %v2492_v0 = vmax.f32 %v2428_v63, 0.0  ;;  %v1681_v2 = vpop.f32.mrf.mxu2  ;;  %v1841_v3 = vpop.f32.mrf.mxu3 }
 0x116   :  { %v2082_v6 = vsel %vm1959_vm3, %v1681_v2, -inf  ;;  %v1364_v7 = vpop.f32.mrf.mxu0  ;;  %v1524_v8 = vpop.f32.mrf.mxu1  ;;  %v2084_v13 = vsel %vm1959_vm3, %v1841_v3, -inf }
 0x117   :  { %v2556_v11 = vpack.c.bf16 %v2492_v0, %v2492_v0  ;;  %v2083_v12 = vmax.f32 %v2081_v1, %v2082_v6  ;;  %v2086_v14 = vsel %vm1959_vm3, %v1364_v7, -inf  ;;  %v2087_v15 = vsel %vm1959_vm3, %v1524_v8, -inf  ;;  %v3368_v6 = vld [vmem:[%s4584_s0 + $0x198] sm:$0xff] }
 0x118   :  { %v2088_v18 = vmax.f32 %v2086_v14, %v2087_v15 }
 0x119   :  { %2621 = vst.msk [vmem:[%s4586_s3 + $0x40] sm:$0xf] %vm2604_vm4, %v2556_v11  ;;  %v2085_v16 = vmax.f32 %v2083_v12, %v2084_v13  ;;  %3206 = vmatmul.msk.bf16.gmra.mxu0 %vm918_vm2, %v3334_v4  ;;  %3238 = vmatmul.msk.bf16.gmra.mxu1 %vm918_vm2, %v3366_v5  ;;  %v3336_v5 = vld [vmem:[%s4584_s0 + $0x98] sm:$0xff] }
 0x11a   :  { %3270 = vmatmul.msk.bf16.gmra.mxu2 %vm918_vm2, %v3398_v9  ;;  %3302 = vmatmul.msk.bf16.gmra.mxu3 %vm918_vm2, %v3430_v10  ;;  %v3400_v10 = vld [vmem:[%s4584_s0 + $0x298] sm:$0xff] }
 0x11b   :  { %v2429_v17 = vadd.f32 %v3631_v55, %v2085_v16  ;;  %v3432_v11 = vld [vmem:[%s4584_s0 + $0x398] sm:$0xff] }
 0x11d   :  { %v2493_v19 = vmax.f32 %v2429_v17, 0.0  ;;  %v1684_v20 = vpop.f32.mrf.mxu2  ;;  %v1844_v21 = vpop.f32.mrf.mxu3 }
 0x11e   :  { %v2089_v22 = vsel %vm1959_vm3, %v1684_v20, -inf  ;;  %v2091_v23 = vsel %vm1959_vm3, %v1844_v21, -inf  ;;  %v1366_v24 = vpop.f32.mrf.mxu0  ;;  %v1526_v25 = vpop.f32.mrf.mxu1 }
 0x11f   :  { %v2557_v26 = vpack.c.bf16 %v2493_v19, %v2493_v19  ;;  %v2090_v27 = vmax.f32 %v2088_v18, %v2089_v22  ;;  %v2093_v29 = vsel %vm1959_vm3, %v1366_v24, -inf  ;;  %v2094_v30 = vsel %vm1959_vm3, %v1526_v25, -inf }
 0x120   :  { %v2095_v33 = vmax.f32 %v2093_v29, %v2094_v30 }
 0x121   :  { %2622 = vst.msk [vmem:[%s4586_s3 + $0x44] sm:$0xf] %vm2604_vm4, %v2557_v26  ;;  %v2092_v28 = vmax.f32 %v2090_v27, %v2091_v23 }
 0x123   :  { %v2430_v31 = vadd.f32 %v3631_v55, %v2092_v28 }
 0x125   :  { %v2494_v32 = vmax.f32 %v2430_v31, 0.0  ;;  %v1686_v34 = vpop.f32.mrf.mxu2  ;;  %v1846_v35 = vpop.f32.mrf.mxu3 }
 0x126   :  { %v2096_v38 = vsel %vm1959_vm3, %v1686_v34, -inf  ;;  %v1369_v39 = vpop.f32.mrf.mxu0  ;;  %v1529_v40 = vpop.f32.mrf.mxu1  ;;  %v2098_v45 = vsel %vm1959_vm3, %v1846_v35, -inf }
 0x127   :  { %v2558_v43 = vpack.c.bf16 %v2494_v32, %v2494_v32  ;;  %v2097_v44 = vmax.f32 %v2095_v33, %v2096_v38  ;;  %v2100_v46 = vsel %vm1959_vm3, %v1369_v39, -inf  ;;  %v2101_v47 = vsel %vm1959_vm3, %v1529_v40, -inf  ;;  %v3369_v38 = vld [vmem:[%s4584_s0 + $0x1a0] sm:$0xff] }
 0x128   :  { %v2102_v50 = vmax.f32 %v2100_v46, %v2101_v47 }
 0x129   :  { %2623 = vst.msk [vmem:[%s4586_s3 + $0x48] sm:$0xf] %vm2604_vm4, %v2558_v43  ;;  %v2099_v48 = vmax.f32 %v2097_v44, %v2098_v45  ;;  %3207 = vmatmul.msk.bf16.gmra.mxu0 %vm918_vm2, %v3335_v36  ;;  %3239 = vmatmul.msk.bf16.gmra.mxu1 %vm918_vm2, %v3367_v37  ;;  %v3337_v37 = vld [vmem:[%s4584_s0 + $0xa0] sm:$0xff] }
 0x12a   :  { %3271 = vmatmul.msk.bf16.gmra.mxu2 %vm918_vm2, %v3399_v41  ;;  %3303 = vmatmul.msk.bf16.gmra.mxu3 %vm918_vm2, %v3431_v42  ;;  %v3401_v42 = vld [vmem:[%s4584_s0 + $0x2a0] sm:$0xff] }
 0x12b   :  { %v2431_v49 = vadd.f32 %v3631_v55, %v2099_v48  ;;  %v3433_v43 = vld [vmem:[%s4584_s0 + $0x3a0] sm:$0xff] }
 0x12d   :  { %v2495_v51 = vmax.f32 %v2431_v49, 0.0  ;;  %v1689_v52 = vpop.f32.mrf.mxu2  ;;  %v1849_v53 = vpop.f32.mrf.mxu3 }
 0x12e   :  { %v2103_v54 = vsel %vm1959_vm3, %v1689_v52, -inf  ;;  %v2105_v56 = vsel %vm1959_vm3, %v1849_v53, -inf  ;;  %v1371_v57 = vpop.f32.mrf.mxu0  ;;  %v1531_v58 = vpop.f32.mrf.mxu1 }
 0x12f   :  { %v2559_v59 = vpack.c.bf16 %v2495_v51, %v2495_v51  ;;  %v2104_v60 = vmax.f32 %v2102_v50, %v2103_v54  ;;  %v2107_v62 = vsel %vm1959_vm3, %v1371_v57, -inf  ;;  %v2108_v63 = vsel %vm1959_vm3, %v1531_v58, -inf }
 0x130   :  { %v2109_v2 = vmax.f32 %v2107_v62, %v2108_v63 }
 0x131   :  { %2624 = vst.msk [vmem:[%s4586_s3 + $0x4c] sm:$0xf] %vm2604_vm4, %v2559_v59  ;;  %v2106_v61 = vmax.f32 %v2104_v60, %v2105_v56 }
 0x133   :  { %v2432_v0 = vadd.f32 %v3631_v55, %v2106_v61 }
 0x135   :  { %v2496_v1 = vmax.f32 %v2432_v0, 0.0  ;;  %v1691_v3 = vpop.f32.mrf.mxu2  ;;  %v1851_v4 = vpop.f32.mrf.mxu3 }
 0x136   :  { %v2110_v7 = vsel %vm1959_vm3, %v1691_v3, -inf  ;;  %v1374_v8 = vpop.f32.mrf.mxu0  ;;  %v1534_v9 = vpop.f32.mrf.mxu1  ;;  %v2112_v14 = vsel %vm1959_vm3, %v1851_v4, -inf }
 0x137   :  { %v2560_v12 = vpack.c.bf16 %v2496_v1, %v2496_v1  ;;  %v2111_v13 = vmax.f32 %v2109_v2, %v2110_v7  ;;  %v2114_v15 = vsel %vm1959_vm3, %v1374_v8, -inf  ;;  %v2115_v16 = vsel %vm1959_vm3, %v1534_v9, -inf  ;;  %v3370_v7 = vld [vmem:[%s4584_s0 + $0x1a8] sm:$0xff] }
 0x138   :  { %v2116_v19 = vmax.f32 %v2114_v15, %v2115_v16 }
 0x139   :  { %2625 = vst.msk [vmem:[%s4586_s3 + $0x50] sm:$0xf] %vm2604_vm4, %v2560_v12  ;;  %v2113_v17 = vmax.f32 %v2111_v13, %v2112_v14  ;;  %3208 = vmatmul.msk.bf16.gmra.mxu0 %vm918_vm2, %v3336_v5  ;;  %3240 = vmatmul.msk.bf16.gmra.mxu1 %vm918_vm2, %v3368_v6  ;;  %v3338_v6 = vld [vmem:[%s4584_s0 + $0xa8] sm:$0xff] }
 0x13a   :  { %3272 = vmatmul.msk.bf16.gmra.mxu2 %vm918_vm2, %v3400_v10  ;;  %3304 = vmatmul.msk.bf16.gmra.mxu3 %vm918_vm2, %v3432_v11  ;;  %v3402_v11 = vld [vmem:[%s4584_s0 + $0x2a8] sm:$0xff] }
 0x13b   :  { %v2433_v18 = vadd.f32 %v3631_v55, %v2113_v17  ;;  %v3434_v12 = vld [vmem:[%s4584_s0 + $0x3a8] sm:$0xff] }
 0x13d   :  { %v2497_v20 = vmax.f32 %v2433_v18, 0.0  ;;  %v1694_v21 = vpop.f32.mrf.mxu2  ;;  %v1854_v22 = vpop.f32.mrf.mxu3 }
 0x13e   :  { %v2117_v23 = vsel %vm1959_vm3, %v1694_v21, -inf  ;;  %v2119_v24 = vsel %vm1959_vm3, %v1854_v22, -inf  ;;  %v1376_v25 = vpop.f32.mrf.mxu0  ;;  %v1536_v26 = vpop.f32.mrf.mxu1 }
 0x13f   :  { %v2561_v27 = vpack.c.bf16 %v2497_v20, %v2497_v20  ;;  %v2118_v28 = vmax.f32 %v2116_v19, %v2117_v23  ;;  %v2121_v30 = vsel %vm1959_vm3, %v1376_v25, -inf  ;;  %v2122_v31 = vsel %vm1959_vm3, %v1536_v26, -inf }
 0x140   :  { %v2123_v34 = vmax.f32 %v2121_v30, %v2122_v31 }
 0x141   :  { %2626 = vst.msk [vmem:[%s4586_s3 + $0x54] sm:$0xf] %vm2604_vm4, %v2561_v27  ;;  %v2120_v29 = vmax.f32 %v2118_v28, %v2119_v24 }
 0x143   :  { %v2434_v32 = vadd.f32 %v3631_v55, %v2120_v29 }
 0x145   :  { %v2498_v33 = vmax.f32 %v2434_v32, 0.0  ;;  %v1696_v35 = vpop.f32.mrf.mxu2  ;;  %v1856_v36 = vpop.f32.mrf.mxu3 }
 0x146   :  { %v2124_v39 = vsel %vm1959_vm3, %v1696_v35, -inf  ;;  %v1379_v40 = vpop.f32.mrf.mxu0  ;;  %v1539_v41 = vpop.f32.mrf.mxu1  ;;  %v2126_v46 = vsel %vm1959_vm3, %v1856_v36, -inf }
 0x147   :  { %v2562_v44 = vpack.c.bf16 %v2498_v33, %v2498_v33  ;;  %v2125_v45 = vmax.f32 %v2123_v34, %v2124_v39  ;;  %v2128_v47 = vsel %vm1959_vm3, %v1379_v40, -inf  ;;  %v2129_v48 = vsel %vm1959_vm3, %v1539_v41, -inf  ;;  %v3371_v39 = vld [vmem:[%s4584_s0 + $0x1b0] sm:$0xff] }
 0x148   :  { %v2130_v51 = vmax.f32 %v2128_v47, %v2129_v48 }
 0x149   :  { %2627 = vst.msk [vmem:[%s4586_s3 + $0x58] sm:$0xf] %vm2604_vm4, %v2562_v44  ;;  %v2127_v49 = vmax.f32 %v2125_v45, %v2126_v46  ;;  %3209 = vmatmul.msk.bf16.gmra.mxu0 %vm918_vm2, %v3337_v37  ;;  %3241 = vmatmul.msk.bf16.gmra.mxu1 %vm918_vm2, %v3369_v38  ;;  %v3339_v38 = vld [vmem:[%s4584_s0 + $0xb0] sm:$0xff] }
 0x14a   :  { %3273 = vmatmul.msk.bf16.gmra.mxu2 %vm918_vm2, %v3401_v42  ;;  %3305 = vmatmul.msk.bf16.gmra.mxu3 %vm918_vm2, %v3433_v43  ;;  %v3435_v43 = vld [vmem:[%s4584_s0 + $0x3b0] sm:$0xff] }
 0x14b   :  { %v2435_v50 = vadd.f32 %v3631_v55, %v2127_v49 }
 0x14d   :  { %v2499_v52 = vmax.f32 %v2435_v50, 0.0  ;;  %v1699_v53 = vpop.f32.mrf.mxu2  ;;  %v1859_v54 = vpop.f32.mrf.mxu3  ;;  %v4105_v50 = vld [vmem:[%s4585_s2] ss:$0 sm:$0xff] }
 0x14e   :  { %v2131_v56 = vsel %vm1959_vm3, %v1699_v53, -inf  ;;  %v2133_v57 = vsel %vm1959_vm3, %v1859_v54, -inf  ;;  %v1381_v58 = vpop.f32.mrf.mxu0  ;;  %v1541_v59 = vpop.f32.mrf.mxu1 }
 0x14f   :  { %v2563_v60 = vpack.c.bf16 %v2499_v52, %v2499_v52  ;;  %v2132_v61 = vmax.f32 %v2130_v51, %v2131_v56  ;;  %v2135_v63 = vsel %vm1959_vm3, %v1381_v58, -inf  ;;  %v2136_v0 = vsel %vm1959_vm3, %v1541_v59, -inf }
 0x150   :  { %v2137_v3 = vmax.f32 %v2135_v63, %v2136_v0 }
 0x151   :  { %2628 = vst.msk [vmem:[%s4586_s3 + $0x5c] sm:$0xf] %vm2604_vm4, %v2563_v60  ;;  %v2134_v62 = vmax.f32 %v2132_v61, %v2133_v57 }
 0x153   :  { %v2436_v1 = vadd.f32 %v3631_v55, %v2134_v62 }
 0x155   :  { %v2500_v2 = vmax.f32 %v2436_v1, 0.0  ;;  %v1701_v4 = vpop.f32.mrf.mxu2  ;;  %v1861_v5 = vpop.f32.mrf.mxu3 }
 0x156   :  { %v2138_v8 = vsel %vm1959_vm3, %v1701_v4, -inf  ;;  %v1384_v9 = vpop.f32.mrf.mxu0  ;;  %v1544_v10 = vpop.f32.mrf.mxu1  ;;  %v2140_v15 = vsel %vm1959_vm3, %v1861_v5, -inf }
 0x157   :  { %v2564_v13 = vpack.c.bf16 %v2500_v2, %v2500_v2  ;;  %v2139_v14 = vmax.f32 %v2137_v3, %v2138_v8  ;;  %v2142_v16 = vsel %vm1959_vm3, %v1384_v9, -inf  ;;  %v2143_v17 = vsel %vm1959_vm3, %v1544_v10, -inf  ;;  %v3372_v8 = vld [vmem:[%s4584_s0 + $0x1b8] sm:$0xff] }
 0x158   :  { %v2144_v20 = vmax.f32 %v2142_v16, %v2143_v17 }
 0x159   :  { %2629 = vst.msk [vmem:[%s4586_s3 + $0x60] sm:$0xf] %vm2604_vm4, %v2564_v13  ;;  %v2141_v18 = vmax.f32 %v2139_v14, %v2140_v15  ;;  %3210 = vmatmul.msk.bf16.gmra.mxu0 %vm918_vm2, %v3338_v6  ;;  %3242 = vmatmul.msk.bf16.gmra.mxu1 %vm918_vm2, %v3370_v7  ;;  %v3340_v7 = vld [vmem:[%s4584_s0 + $0xb8] sm:$0xff] }
 0x15a   :  { %3274 = vmatmul.msk.bf16.gmra.mxu2 %vm918_vm2, %v3402_v11  ;;  %3306 = vmatmul.msk.bf16.gmra.mxu3 %vm918_vm2, %v3434_v12  ;;  %v3404_v12 = vld [vmem:[%s4584_s0 + $0x2b8] sm:$0xff] }
 0x15b   :  { %v2437_v19 = vadd.f32 %v3631_v55, %v2141_v18  ;;  %v3436_v13 = vld [vmem:[%s4584_s0 + $0x3b8] sm:$0xff] }
 0x15d   :  { %v2501_v21 = vmax.f32 %v2437_v19, 0.0  ;;  %v1704_v22 = vpop.f32.mrf.mxu2  ;;  %v1864_v23 = vpop.f32.mrf.mxu3 }
 0x15e   :  { %v2145_v24 = vsel %vm1959_vm3, %v1704_v22, -inf  ;;  %v2147_v25 = vsel %vm1959_vm3, %v1864_v23, -inf  ;;  %v1386_v26 = vpop.f32.mrf.mxu0  ;;  %v1546_v27 = vpop.f32.mrf.mxu1 }
 0x15f   :  { %v2565_v28 = vpack.c.bf16 %v2501_v21, %v2501_v21  ;;  %v2146_v29 = vmax.f32 %v2144_v20, %v2145_v24  ;;  %v2149_v31 = vsel %vm1959_vm3, %v1386_v26, -inf  ;;  %v2150_v32 = vsel %vm1959_vm3, %v1546_v27, -inf }
 0x160   :  { %v2151_v35 = vmax.f32 %v2149_v31, %v2150_v32 }
 0x161   :  { %2630 = vst.msk [vmem:[%s4586_s3 + $0x64] sm:$0xf] %vm2604_vm4, %v2565_v28  ;;  %v2148_v30 = vmax.f32 %v2146_v29, %v2147_v25 }
 0x163   :  { %v2438_v33 = vadd.f32 %v3631_v55, %v2148_v30  ;;  %v3403_v55 = vld [vmem:[%s4584_s0 + $0x2b0] sm:$0xff] }
 0x165   :  { %v2502_v34 = vmax.f32 %v2438_v33, 0.0  ;;  %v1706_v36 = vpop.f32.mrf.mxu2  ;;  %v1866_v37 = vpop.f32.mrf.mxu3 }
 0x166   :  { %v2152_v40 = vsel %vm1959_vm3, %v1706_v36, -inf  ;;  %v1389_v41 = vpop.f32.mrf.mxu0  ;;  %v1549_v42 = vpop.f32.mrf.mxu1  ;;  %v2154_v46 = vsel %vm1959_vm3, %v1866_v37, -inf }
 0x167   :  { %v2566_v44 = vpack.c.bf16 %v2502_v34, %v2502_v34  ;;  %v2153_v45 = vmax.f32 %v2151_v35, %v2152_v40  ;;  %v2156_v47 = vsel %vm1959_vm3, %v1389_v41, -inf  ;;  %v2157_v48 = vsel %vm1959_vm3, %v1549_v42, -inf  ;;  %v3373_v40 = vld [vmem:[%s4584_s0 + $0x1c0] sm:$0xff] }
 0x168   :  { %v2158_v52 = vmax.f32 %v2156_v47, %v2157_v48 }
 0x169   :  { %2631 = vst.msk [vmem:[%s4586_s3 + $0x68] sm:$0xf] %vm2604_vm4, %v2566_v44  ;;  %v2155_v49 = vmax.f32 %v2153_v45, %v2154_v46  ;;  %3211 = vmatmul.msk.bf16.gmra.mxu0 %vm918_vm2, %v3339_v38  ;;  %3243 = vmatmul.msk.bf16.gmra.mxu1 %vm918_vm2, %v3371_v39  ;;  %v3341_v39 = vld [vmem:[%s4584_s0 + $0xc0] sm:$0xff] }
 0x16a   :  { %3275 = vmatmul.msk.bf16.gmra.mxu2 %vm918_vm2, %v3403_v55  ;;  %3307 = vmatmul.msk.bf16.gmra.mxu3 %vm918_vm2, %v3435_v43  ;;  %v3405_v43 = vld [vmem:[%s4584_s0 + $0x2c0] sm:$0xff] }
 0x16b   :  { %v2439_v51 = vadd.f32 %v4105_v50, %v2155_v49  ;;  %v3437_v44 = vld [vmem:[%s4584_s0 + $0x3c0] sm:$0xff] }
 0x16d   :  { %v2503_v53 = vmax.f32 %v2439_v51, 0.0  ;;  %v1709_v54 = vpop.f32.mrf.mxu2  ;;  %v1869_v56 = vpop.f32.mrf.mxu3 }
 0x16e   :  { %v2159_v57 = vsel %vm1959_vm3, %v1709_v54, -inf  ;;  %v2161_v58 = vsel %vm1959_vm3, %v1869_v56, -inf  ;;  %v1391_v59 = vpop.f32.mrf.mxu0  ;;  %v1551_v60 = vpop.f32.mrf.mxu1 }
 0x16f   :  { %v2567_v61 = vpack.c.bf16 %v2503_v53, %v2503_v53  ;;  %v2160_v62 = vmax.f32 %v2158_v52, %v2159_v57  ;;  %v2163_v0 = vsel %vm1959_vm3, %v1391_v59, -inf  ;;  %v2164_v1 = vsel %vm1959_vm3, %v1551_v60, -inf }
 0x170   :  { %v2165_v4 = vmax.f32 %v2163_v0, %v2164_v1 }
 0x171   :  { %2632 = vst.msk [vmem:[%s4586_s3 + $0x6c] sm:$0xf] %vm2604_vm4, %v2567_v61  ;;  %v2162_v63 = vmax.f32 %v2160_v62, %v2161_v58 }
 0x173   :  { %v2440_v2 = vadd.f32 %v4105_v50, %v2162_v63 }
 0x175   :  { %v2504_v3 = vmax.f32 %v2440_v2, 0.0  ;;  %v1711_v5 = vpop.f32.mrf.mxu2  ;;  %v1871_v6 = vpop.f32.mrf.mxu3 }
 0x176   :  { %v2166_v9 = vsel %vm1959_vm3, %v1711_v5, -inf  ;;  %v1394_v10 = vpop.f32.mrf.mxu0  ;;  %v1554_v11 = vpop.f32.mrf.mxu1  ;;  %v2168_v16 = vsel %vm1959_vm3, %v1871_v6, -inf }
 0x177   :  { %v2568_v14 = vpack.c.bf16 %v2504_v3, %v2504_v3  ;;  %v2167_v15 = vmax.f32 %v2165_v4, %v2166_v9  ;;  %v2170_v17 = vsel %vm1959_vm3, %v1394_v10, -inf  ;;  %v2171_v18 = vsel %vm1959_vm3, %v1554_v11, -inf  ;;  %v3374_v9 = vld [vmem:[%s4584_s0 + $0x1c8] sm:$0xff] }
 0x178   :  { %v2172_v21 = vmax.f32 %v2170_v17, %v2171_v18 }
 0x179   :  { %2633 = vst.msk [vmem:[%s4586_s3 + $0x70] sm:$0xf] %vm2604_vm4, %v2568_v14  ;;  %v2169_v19 = vmax.f32 %v2167_v15, %v2168_v16  ;;  %3212 = vmatmul.msk.bf16.gmra.mxu0 %vm918_vm2, %v3340_v7  ;;  %3244 = vmatmul.msk.bf16.gmra.mxu1 %vm918_vm2, %v3372_v8  ;;  %v3342_v8 = vld [vmem:[%s4584_s0 + $0xc8] sm:$0xff] }
 0x17a   :  { %3276 = vmatmul.msk.bf16.gmra.mxu2 %vm918_vm2, %v3404_v12  ;;  %3308 = vmatmul.msk.bf16.gmra.mxu3 %vm918_vm2, %v3436_v13  ;;  %v3406_v13 = vld [vmem:[%s4584_s0 + $0x2c8] sm:$0xff] }
 0x17b   :  { %v2441_v20 = vadd.f32 %v4105_v50, %v2169_v19  ;;  %v3438_v14 = vld [vmem:[%s4584_s0 + $0x3c8] sm:$0xff] }
 0x17d   :  { %v2505_v22 = vmax.f32 %v2441_v20, 0.0  ;;  %v1714_v23 = vpop.f32.mrf.mxu2  ;;  %v1874_v24 = vpop.f32.mrf.mxu3 }
 0x17e   :  { %v2173_v25 = vsel %vm1959_vm3, %v1714_v23, -inf  ;;  %v2175_v26 = vsel %vm1959_vm3, %v1874_v24, -inf  ;;  %v1396_v27 = vpop.f32.mrf.mxu0  ;;  %v1556_v28 = vpop.f32.mrf.mxu1 }
 0x17f   :  { %v2569_v29 = vpack.c.bf16 %v2505_v22, %v2505_v22  ;;  %v2174_v30 = vmax.f32 %v2172_v21, %v2173_v25  ;;  %v2177_v32 = vsel %vm1959_vm3, %v1396_v27, -inf  ;;  %v2178_v33 = vsel %vm1959_vm3, %v1556_v28, -inf }
 0x180   :  { %v2179_v36 = vmax.f32 %v2177_v32, %v2178_v33 }
 0x181   :  { %2634 = vst.msk [vmem:[%s4586_s3 + $0x74] sm:$0xf] %vm2604_vm4, %v2569_v29  ;;  %v2176_v31 = vmax.f32 %v2174_v30, %v2175_v26 }
 0x183   :  { %v2442_v34 = vadd.f32 %v4105_v50, %v2176_v31 }
 0x185   :  { %v2506_v35 = vmax.f32 %v2442_v34, 0.0  ;;  %v1716_v37 = vpop.f32.mrf.mxu2  ;;  %v1876_v38 = vpop.f32.mrf.mxu3 }
 0x186   :  { %v2180_v41 = vsel %vm1959_vm3, %v1716_v37, -inf  ;;  %v1399_v42 = vpop.f32.mrf.mxu0  ;;  %v1559_v55 = vpop.f32.mrf.mxu1  ;;  %v2182_v47 = vsel %vm1959_vm3, %v1876_v38, -inf }
 0x187   :  { %v2570_v45 = vpack.c.bf16 %v2506_v35, %v2506_v35  ;;  %v2181_v46 = vmax.f32 %v2179_v36, %v2180_v41  ;;  %v2184_v48 = vsel %vm1959_vm3, %v1399_v42, -inf  ;;  %v2185_v49 = vsel %vm1959_vm3, %v1559_v55, -inf  ;;  %v3375_v41 = vld [vmem:[%s4584_s0 + $0x1d0] sm:$0xff] }
 0x188   :  { %v2186_v53 = vmax.f32 %v2184_v48, %v2185_v49 }
 0x189   :  { %2635 = vst.msk [vmem:[%s4586_s3 + $0x78] sm:$0xf] %vm2604_vm4, %v2570_v45  ;;  %v2183_v51 = vmax.f32 %v2181_v46, %v2182_v47  ;;  %3213 = vmatmul.msk.bf16.gmra.mxu0 %vm918_vm2, %v3341_v39  ;;  %3245 = vmatmul.msk.bf16.gmra.mxu1 %vm918_vm2, %v3373_v40  ;;  %v3343_v40 = vld [vmem:[%s4584_s0 + $0xd0] sm:$0xff] }
 0x18a   :  { %3277 = vmatmul.msk.bf16.gmra.mxu2 %vm918_vm2, %v3405_v43  ;;  %3309 = vmatmul.msk.bf16.gmra.mxu3 %vm918_vm2, %v3437_v44  ;;  %v3407_v44 = vld [vmem:[%s4584_s0 + $0x2d0] sm:$0xff] }
 0x18b   :  { %v2443_v52 = vadd.f32 %v4105_v50, %v2183_v51  ;;  %v3439_v45 = vld [vmem:[%s4584_s0 + $0x3d0] sm:$0xff] }
 0x18d   :  { %v2507_v54 = vmax.f32 %v2443_v52, 0.0  ;;  %v1719_v56 = vpop.f32.mrf.mxu2  ;;  %v1879_v57 = vpop.f32.mrf.mxu3 }
 0x18e   :  { %v2187_v58 = vsel %vm1959_vm3, %v1719_v56, -inf  ;;  %v2189_v59 = vsel %vm1959_vm3, %v1879_v57, -inf  ;;  %v1401_v60 = vpop.f32.mrf.mxu0  ;;  %v1561_v61 = vpop.f32.mrf.mxu1 }
 0x18f   :  { %v2571_v62 = vpack.c.bf16 %v2507_v54, %v2507_v54  ;;  %v2188_v63 = vmax.f32 %v2186_v53, %v2187_v58  ;;  %v2191_v1 = vsel %vm1959_vm3, %v1401_v60, -inf  ;;  %v2192_v2 = vsel %vm1959_vm3, %v1561_v61, -inf }
 0x190   :  { %v2193_v5 = vmax.f32 %v2191_v1, %v2192_v2 }
 0x191   :  { %2636 = vst.msk [vmem:[%s4586_s3 + $0x7c] sm:$0xf] %vm2604_vm4, %v2571_v62  ;;  %v2190_v0 = vmax.f32 %v2188_v63, %v2189_v59 }
 0x193   :  { %v2444_v3 = vadd.f32 %v4105_v50, %v2190_v0 }
 0x195   :  { %v2508_v4 = vmax.f32 %v2444_v3, 0.0  ;;  %v1721_v6 = vpop.f32.mrf.mxu2  ;;  %v1881_v7 = vpop.f32.mrf.mxu3 }
 0x196   :  { %v2194_v10 = vsel %vm1959_vm3, %v1721_v6, -inf  ;;  %v1404_v11 = vpop.f32.mrf.mxu0  ;;  %v1564_v12 = vpop.f32.mrf.mxu1  ;;  %v2196_v17 = vsel %vm1959_vm3, %v1881_v7, -inf }
 0x197   :  { %v2572_v15 = vpack.c.bf16 %v2508_v4, %v2508_v4  ;;  %v2195_v16 = vmax.f32 %v2193_v5, %v2194_v10  ;;  %v2198_v18 = vsel %vm1959_vm3, %v1404_v11, -inf  ;;  %v2199_v19 = vsel %vm1959_vm3, %v1564_v12, -inf  ;;  %v3376_v10 = vld [vmem:[%s4584_s0 + $0x1d8] sm:$0xff] }
 0x198   :  { %v2200_v22 = vmax.f32 %v2198_v18, %v2199_v19 }
 0x199   :  { %2637 = vst.msk [vmem:[%s4586_s3 + $0x80] sm:$0xf] %vm2604_vm4, %v2572_v15  ;;  %v2197_v20 = vmax.f32 %v2195_v16, %v2196_v17  ;;  %3214 = vmatmul.msk.bf16.gmra.mxu0 %vm918_vm2, %v3342_v8  ;;  %3246 = vmatmul.msk.bf16.gmra.mxu1 %vm918_vm2, %v3374_v9  ;;  %v3344_v9 = vld [vmem:[%s4584_s0 + $0xd8] sm:$0xff] }
 0x19a   :  { %3278 = vmatmul.msk.bf16.gmra.mxu2 %vm918_vm2, %v3406_v13  ;;  %3310 = vmatmul.msk.bf16.gmra.mxu3 %vm918_vm2, %v3438_v14  ;;  %v3408_v14 = vld [vmem:[%s4584_s0 + $0x2d8] sm:$0xff] }
 0x19b   :  { %v2445_v21 = vadd.f32 %v4105_v50, %v2197_v20  ;;  %v3440_v15 = vld [vmem:[%s4584_s0 + $0x3d8] sm:$0xff] }
 0x19d   :  { %v2509_v23 = vmax.f32 %v2445_v21, 0.0  ;;  %v1724_v24 = vpop.f32.mrf.mxu2  ;;  %v1884_v25 = vpop.f32.mrf.mxu3 }
 0x19e   :  { %v2201_v26 = vsel %vm1959_vm3, %v1724_v24, -inf  ;;  %v2203_v27 = vsel %vm1959_vm3, %v1884_v25, -inf  ;;  %v1406_v28 = vpop.f32.mrf.mxu0  ;;  %v1566_v29 = vpop.f32.mrf.mxu1 }
 0x19f   :  { %v2573_v30 = vpack.c.bf16 %v2509_v23, %v2509_v23  ;;  %v2202_v31 = vmax.f32 %v2200_v22, %v2201_v26  ;;  %v2205_v33 = vsel %vm1959_vm3, %v1406_v28, -inf  ;;  %v2206_v34 = vsel %vm1959_vm3, %v1566_v29, -inf }
 0x1a0   :  { %v2207_v37 = vmax.f32 %v2205_v33, %v2206_v34 }
 0x1a1   :  { %2638 = vst.msk [vmem:[%s4586_s3 + $0x84] sm:$0xf] %vm2604_vm4, %v2573_v30  ;;  %v2204_v32 = vmax.f32 %v2202_v31, %v2203_v27 }
 0x1a3   :  { %v2446_v35 = vadd.f32 %v4105_v50, %v2204_v32 }
 0x1a5   :  { %v2510_v36 = vmax.f32 %v2446_v35, 0.0  ;;  %v1726_v38 = vpop.f32.mrf.mxu2  ;;  %v1886_v39 = vpop.f32.mrf.mxu3 }
 0x1a6   :  { %v2208_v42 = vsel %vm1959_vm3, %v1726_v38, -inf  ;;  %v1409_v55 = vpop.f32.mrf.mxu0  ;;  %v1569_v43 = vpop.f32.mrf.mxu1  ;;  %v2210_v48 = vsel %vm1959_vm3, %v1886_v39, -inf }
 0x1a7   :  { %v2574_v46 = vpack.c.bf16 %v2510_v36, %v2510_v36  ;;  %v2209_v47 = vmax.f32 %v2207_v37, %v2208_v42  ;;  %v2212_v49 = vsel %vm1959_vm3, %v1409_v55, -inf  ;;  %v2213_v51 = vsel %vm1959_vm3, %v1569_v43, -inf  ;;  %v3377_v42 = vld [vmem:[%s4584_s0 + $0x1e0] sm:$0xff] }
 0x1a8   :  { %v2214_v54 = vmax.f32 %v2212_v49, %v2213_v51 }
 0x1a9   :  { %2639 = vst.msk [vmem:[%s4586_s3 + $0x88] sm:$0xf] %vm2604_vm4, %v2574_v46  ;;  %v2211_v52 = vmax.f32 %v2209_v47, %v2210_v48  ;;  %3215 = vmatmul.msk.bf16.gmra.mxu0 %vm918_vm2, %v3343_v40  ;;  %3247 = vmatmul.msk.bf16.gmra.mxu1 %vm918_vm2, %v3375_v41  ;;  %v3345_v41 = vld [vmem:[%s4584_s0 + $0xe0] sm:$0xff] }
 0x1aa   :  { %3279 = vmatmul.msk.bf16.gmra.mxu2 %vm918_vm2, %v3407_v44  ;;  %3311 = vmatmul.msk.bf16.gmra.mxu3 %vm918_vm2, %v3439_v45  ;;  %v3409_v45 = vld [vmem:[%s4584_s0 + $0x2e0] sm:$0xff] }
 0x1ab   :  { %v2447_v53 = vadd.f32 %v4105_v50, %v2211_v52  ;;  %v3441_v46 = vld [vmem:[%s4584_s0 + $0x3e0] sm:$0xff] }
 0x1ad   :  { %v2511_v56 = vmax.f32 %v2447_v53, 0.0  ;;  %v1729_v57 = vpop.f32.mrf.mxu2  ;;  %v1889_v58 = vpop.f32.mrf.mxu3 }
 0x1ae   :  { %v2215_v59 = vsel %vm1959_vm3, %v1729_v57, -inf  ;;  %v2217_v60 = vsel %vm1959_vm3, %v1889_v58, -inf  ;;  %v1411_v61 = vpop.f32.mrf.mxu0  ;;  %v1571_v62 = vpop.f32.mrf.mxu1 }
 0x1af   :  { %v2575_v63 = vpack.c.bf16 %v2511_v56, %v2511_v56  ;;  %v2216_v0 = vmax.f32 %v2214_v54, %v2215_v59  ;;  %v2219_v2 = vsel %vm1959_vm3, %v1411_v61, -inf  ;;  %v2220_v3 = vsel %vm1959_vm3, %v1571_v62, -inf }
 0x1b0   :  { %v2221_v6 = vmax.f32 %v2219_v2, %v2220_v3 }
 0x1b1   :  { %2640 = vst.msk [vmem:[%s4586_s3 + $0x8c] sm:$0xf] %vm2604_vm4, %v2575_v63  ;;  %v2218_v1 = vmax.f32 %v2216_v0, %v2217_v60 }
 0x1b3   :  { %v2448_v4 = vadd.f32 %v4105_v50, %v2218_v1 }
 0x1b5   :  { %v2512_v5 = vmax.f32 %v2448_v4, 0.0  ;;  %v1731_v7 = vpop.f32.mrf.mxu2  ;;  %v1891_v8 = vpop.f32.mrf.mxu3 }
 0x1b6   :  { %v2222_v11 = vsel %vm1959_vm3, %v1731_v7, -inf  ;;  %v1414_v12 = vpop.f32.mrf.mxu0  ;;  %v1574_v13 = vpop.f32.mrf.mxu1  ;;  %v2224_v18 = vsel %vm1959_vm3, %v1891_v8, -inf }
 0x1b7   :  { %v2576_v16 = vpack.c.bf16 %v2512_v5, %v2512_v5  ;;  %v2223_v17 = vmax.f32 %v2221_v6, %v2222_v11  ;;  %v2226_v19 = vsel %vm1959_vm3, %v1414_v12, -inf  ;;  %v2227_v20 = vsel %vm1959_vm3, %v1574_v13, -inf  ;;  %v3378_v11 = vld [vmem:[%s4584_s0 + $0x1e8] sm:$0xff] }
 0x1b8   :  { %v2228_v23 = vmax.f32 %v2226_v19, %v2227_v20 }
 0x1b9   :  { %2641 = vst.msk [vmem:[%s4586_s3 + $0x90] sm:$0xf] %vm2604_vm4, %v2576_v16  ;;  %v2225_v21 = vmax.f32 %v2223_v17, %v2224_v18  ;;  %3216 = vmatmul.msk.bf16.gmra.mxu0 %vm918_vm2, %v3344_v9  ;;  %3248 = vmatmul.msk.bf16.gmra.mxu1 %vm918_vm2, %v3376_v10  ;;  %v3346_v10 = vld [vmem:[%s4584_s0 + $0xe8] sm:$0xff] }
 0x1ba   :  { %3280 = vmatmul.msk.bf16.gmra.mxu2 %vm918_vm2, %v3408_v14  ;;  %3312 = vmatmul.msk.bf16.gmra.mxu3 %vm918_vm2, %v3440_v15  ;;  %v3410_v15 = vld [vmem:[%s4584_s0 + $0x2e8] sm:$0xff] }
 0x1bb   :  { %v2449_v22 = vadd.f32 %v4105_v50, %v2225_v21  ;;  %v3442_v16 = vld [vmem:[%s4584_s0 + $0x3e8] sm:$0xff] }
 0x1bd   :  { %v2513_v24 = vmax.f32 %v2449_v22, 0.0  ;;  %v1734_v25 = vpop.f32.mrf.mxu2  ;;  %v1894_v26 = vpop.f32.mrf.mxu3 }
 0x1be   :  { %v2229_v27 = vsel %vm1959_vm3, %v1734_v25, -inf  ;;  %v2231_v28 = vsel %vm1959_vm3, %v1894_v26, -inf  ;;  %v1416_v29 = vpop.f32.mrf.mxu0  ;;  %v1576_v30 = vpop.f32.mrf.mxu1 }
 0x1bf   :  { %v2577_v31 = vpack.c.bf16 %v2513_v24, %v2513_v24  ;;  %v2230_v32 = vmax.f32 %v2228_v23, %v2229_v27  ;;  %v2233_v34 = vsel %vm1959_vm3, %v1416_v29, -inf  ;;  %v2234_v35 = vsel %vm1959_vm3, %v1576_v30, -inf }
 0x1c0   :  { %v2235_v38 = vmax.f32 %v2233_v34, %v2234_v35 }
 0x1c1   :  { %2642 = vst.msk [vmem:[%s4586_s3 + $0x94] sm:$0xf] %vm2604_vm4, %v2577_v31  ;;  %v2232_v33 = vmax.f32 %v2230_v32, %v2231_v28 }
 0x1c3   :  { %v2450_v36 = vadd.f32 %v4105_v50, %v2232_v33 }
 0x1c5   :  { %v2514_v37 = vmax.f32 %v2450_v36, 0.0  ;;  %v1736_v39 = vpop.f32.mrf.mxu2  ;;  %v1896_v40 = vpop.f32.mrf.mxu3 }
 0x1c6   :  { %v2236_v55 = vsel %vm1959_vm3, %v1736_v39, -inf  ;;  %v1419_v43 = vpop.f32.mrf.mxu0  ;;  %v1579_v44 = vpop.f32.mrf.mxu1  ;;  %v2238_v49 = vsel %vm1959_vm3, %v1896_v40, -inf }
 0x1c7   :  { %v2578_v47 = vpack.c.bf16 %v2514_v37, %v2514_v37  ;;  %v2237_v48 = vmax.f32 %v2235_v38, %v2236_v55  ;;  %v2240_v51 = vsel %vm1959_vm3, %v1419_v43, -inf  ;;  %v2241_v52 = vsel %vm1959_vm3, %v1579_v44, -inf  ;;  %v3379_v55 = vld [vmem:[%s4584_s0 + $0x1f0] sm:$0xff] }
 0x1c8   :  { %v2242_v56 = vmax.f32 %v2240_v51, %v2241_v52 }
 0x1c9   :  { %2643 = vst.msk [vmem:[%s4586_s3 + $0x98] sm:$0xf] %vm2604_vm4, %v2578_v47  ;;  %v2239_v53 = vmax.f32 %v2237_v48, %v2238_v49  ;;  %3217 = vmatmul.msk.bf16.gmra.mxu0 %vm918_vm2, %v3345_v41  ;;  %3249 = vmatmul.msk.bf16.gmra.mxu1 %vm918_vm2, %v3377_v42  ;;  %v3347_v42 = vld [vmem:[%s4584_s0 + $0xf0] sm:$0xff] }
 0x1ca   :  { %3281 = vmatmul.msk.bf16.gmra.mxu2 %vm918_vm2, %v3409_v45  ;;  %3313 = vmatmul.msk.bf16.gmra.mxu3 %vm918_vm2, %v3441_v46  ;;  %v3411_v46 = vld [vmem:[%s4584_s0 + $0x2f0] sm:$0xff] }
 0x1cb   :  { %v2451_v54 = vadd.f32 %v4105_v50, %v2239_v53  ;;  %v3443_v47 = vld [vmem:[%s4584_s0 + $0x3f0] sm:$0xff] }
 0x1cd   :  { %v2515_v57 = vmax.f32 %v2451_v54, 0.0  ;;  %v1739_v58 = vpop.f32.mrf.mxu2  ;;  %v1899_v59 = vpop.f32.mrf.mxu3 }
 0x1ce   :  { %v2243_v60 = vsel %vm1959_vm3, %v1739_v58, -inf  ;;  %v2245_v61 = vsel %vm1959_vm3, %v1899_v59, -inf  ;;  %v1421_v62 = vpop.f32.mrf.mxu0  ;;  %v1581_v63 = vpop.f32.mrf.mxu1 }
 0x1cf   :  { %v2579_v0 = vpack.c.bf16 %v2515_v57, %v2515_v57  ;;  %v2244_v1 = vmax.f32 %v2242_v56, %v2243_v60  ;;  %v2247_v3 = vsel %vm1959_vm3, %v1421_v62, -inf  ;;  %v2248_v4 = vsel %vm1959_vm3, %v1581_v63, -inf }
 0x1d0   :  { %v2249_v7 = vmax.f32 %v2247_v3, %v2248_v4 }
 0x1d1   :  { %2644 = vst.msk [vmem:[%s4586_s3 + $0x9c] sm:$0xf] %vm2604_vm4, %v2579_v0  ;;  %v2246_v2 = vmax.f32 %v2244_v1, %v2245_v61 }
 0x1d3   :  { %v2452_v5 = vadd.f32 %v4105_v50, %v2246_v2 }
 0x1d5   :  { %v2516_v6 = vmax.f32 %v2452_v5, 0.0  ;;  %v1741_v8 = vpop.f32.mrf.mxu2  ;;  %v1901_v9 = vpop.f32.mrf.mxu3 }
 0x1d6   :  { %v2250_v12 = vsel %vm1959_vm3, %v1741_v8, -inf  ;;  %v1424_v13 = vpop.f32.mrf.mxu0  ;;  %v1584_v14 = vpop.f32.mrf.mxu1  ;;  %v2252_v19 = vsel %vm1959_vm3, %v1901_v9, -inf }
 0x1d7   :  { %v2580_v17 = vpack.c.bf16 %v2516_v6, %v2516_v6  ;;  %v2251_v18 = vmax.f32 %v2249_v7, %v2250_v12  ;;  %v2254_v20 = vsel %vm1959_vm3, %v1424_v13, -inf  ;;  %v2255_v21 = vsel %vm1959_vm3, %v1584_v14, -inf  ;;  %v3380_v12 = vld [vmem:[%s4584_s0 + $0x1f8] sm:$0xff] }
 0x1d8   :  { %v2256_v24 = vmax.f32 %v2254_v20, %v2255_v21 }
 0x1d9   :  { %2645 = vst.msk [vmem:[%s4586_s3 + $0xa0] sm:$0xf] %vm2604_vm4, %v2580_v17  ;;  %v2253_v22 = vmax.f32 %v2251_v18, %v2252_v19  ;;  %3218 = vmatmul.msk.bf16.gmra.mxu0 %vm918_vm2, %v3346_v10  ;;  %3250 = vmatmul.msk.bf16.gmra.mxu1 %vm918_vm2, %v3378_v11  ;;  %v3348_v11 = vld [vmem:[%s4584_s0 + $0xf8] sm:$0xff] }
 0x1da   :  { %3282 = vmatmul.msk.bf16.gmra.mxu2 %vm918_vm2, %v3410_v15  ;;  %3314 = vmatmul.msk.bf16.gmra.mxu3 %vm918_vm2, %v3442_v16  ;;  %v3412_v16 = vld [vmem:[%s4584_s0 + $0x2f8] sm:$0xff] }
 0x1db   :  { %v2453_v23 = vadd.f32 %v4105_v50, %v2253_v22  ;;  %v3444_v17 = vld [vmem:[%s4584_s0 + $0x3f8] sm:$0xff] }
 0x1dd   :  { %v2517_v25 = vmax.f32 %v2453_v23, 0.0  ;;  %v1744_v26 = vpop.f32.mrf.mxu2  ;;  %v1904_v27 = vpop.f32.mrf.mxu3 }
 0x1de   :  { %v2257_v28 = vsel %vm1959_vm3, %v1744_v26, -inf  ;;  %v2259_v29 = vsel %vm1959_vm3, %v1904_v27, -inf  ;;  %v1426_v30 = vpop.f32.mrf.mxu0  ;;  %v1586_v31 = vpop.f32.mrf.mxu1 }
 0x1df   :  { %v2581_v32 = vpack.c.bf16 %v2517_v25, %v2517_v25  ;;  %v2258_v33 = vmax.f32 %v2256_v24, %v2257_v28  ;;  %v2261_v35 = vsel %vm1959_vm3, %v1426_v30, -inf  ;;  %v2262_v36 = vsel %vm1959_vm3, %v1586_v31, -inf }
 0x1e0   :  { %v2263_v39 = vmax.f32 %v2261_v35, %v2262_v36 }
 0x1e1   :  { %2646 = vst.msk [vmem:[%s4586_s3 + $0xa4] sm:$0xf] %vm2604_vm4, %v2581_v32  ;;  %v2260_v34 = vmax.f32 %v2258_v33, %v2259_v29 }
 0x1e3   :  { %v2454_v37 = vadd.f32 %v4105_v50, %v2260_v34 }
 0x1e5   :  { %v2518_v38 = vmax.f32 %v2454_v37, 0.0  ;;  %v1746_v40 = vpop.f32.mrf.mxu2  ;;  %v1906_v41 = vpop.f32.mrf.mxu3 }
 0x1e6   :  { %v2264_v43 = vsel %vm1959_vm3, %v1746_v40, -inf  ;;  %v1429_v44 = vpop.f32.mrf.mxu0  ;;  %v1589_v45 = vpop.f32.mrf.mxu1  ;;  %v2266_v51 = vsel %vm1959_vm3, %v1906_v41, -inf }
 0x1e7   :  { %v2582_v48 = vpack.c.bf16 %v2518_v38, %v2518_v38  ;;  %v2265_v49 = vmax.f32 %v2263_v39, %v2264_v43  ;;  %v2268_v52 = vsel %vm1959_vm3, %v1429_v44, -inf  ;;  %v2269_v53 = vsel %vm1959_vm3, %v1589_v45, -inf }
 0x1e8   :  { %v2270_v57 = vmax.f32 %v2268_v52, %v2269_v53 }
 0x1e9   :  { %2647 = vst.msk [vmem:[%s4586_s3 + $0xa8] sm:$0xf] %vm2604_vm4, %v2582_v48  ;;  %v2267_v54 = vmax.f32 %v2265_v49, %v2266_v51  ;;  %3219 = vmatmul.msk.bf16.gmra.mxu0 %vm918_vm2, %v3347_v42  ;;  %3251 = vmatmul.msk.bf16.gmra.mxu1 %vm918_vm2, %v3379_v55 }
 0x1ea   :  { %3283 = vmatmul.msk.bf16.gmra.mxu2 %vm918_vm2, %v3411_v46  ;;  %3315 = vmatmul.msk.bf16.gmra.mxu3 %vm918_vm2, %v3443_v47 }
 0x1eb   :  { %v2455_v56 = vadd.f32 %v4105_v50, %v2267_v54 }
 0x1ed   :  { %v2519_v58 = vmax.f32 %v2455_v56, 0.0  ;;  %v1749_v59 = vpop.f32.mrf.mxu2  ;;  %v1909_v60 = vpop.f32.mrf.mxu3 }
 0x1ee   :  { %v2271_v61 = vsel %vm1959_vm3, %v1749_v59, -inf  ;;  %v2273_v62 = vsel %vm1959_vm3, %v1909_v60, -inf  ;;  %v1431_v63 = vpop.f32.mrf.mxu0  ;;  %v1591_v0 = vpop.f32.mrf.mxu1 }
 0x1ef   :  { %v2583_v1 = vpack.c.bf16 %v2519_v58, %v2519_v58  ;;  %v2272_v2 = vmax.f32 %v2270_v57, %v2271_v61  ;;  %v2275_v4 = vsel %vm1959_vm3, %v1431_v63, -inf  ;;  %v2276_v5 = vsel %vm1959_vm3, %v1591_v0, -inf }
 0x1f0   :  { %v2277_v8 = vmax.f32 %v2275_v4, %v2276_v5 }
 0x1f1   :  { %2648 = vst.msk [vmem:[%s4586_s3 + $0xac] sm:$0xf] %vm2604_vm4, %v2583_v1  ;;  %v2274_v3 = vmax.f32 %v2272_v2, %v2273_v62 }
 0x1f3   :  { %v2456_v6 = vadd.f32 %v4105_v50, %v2274_v3 }
 0x1f5   :  { %v2520_v7 = vmax.f32 %v2456_v6, 0.0  ;;  %v1751_v9 = vpop.f32.mrf.mxu2  ;;  %v1911_v10 = vpop.f32.mrf.mxu3 }
 0x1f6   :  { %v2278_v13 = vsel %vm1959_vm3, %v1751_v9, -inf  ;;  %v1434_v14 = vpop.f32.mrf.mxu0  ;;  %v1594_v15 = vpop.f32.mrf.mxu1  ;;  %v2280_v20 = vsel %vm1959_vm3, %v1911_v10, -inf }
 0x1f7   :  { %v2584_v18 = vpack.c.bf16 %v2520_v7, %v2520_v7  ;;  %v2279_v19 = vmax.f32 %v2277_v8, %v2278_v13  ;;  %v2282_v21 = vsel %vm1959_vm3, %v1434_v14, -inf  ;;  %v2283_v22 = vsel %vm1959_vm3, %v1594_v15, -inf }
 0x1f8   :  { %v2284_v25 = vmax.f32 %v2282_v21, %v2283_v22 }
 0x1f9   :  { %2649 = vst.msk [vmem:[%s4586_s3 + $0xb0] sm:$0xf] %vm2604_vm4, %v2584_v18  ;;  %v2281_v23 = vmax.f32 %v2279_v19, %v2280_v20  ;;  %3220 = vmatmul.msk.bf16.gmra.mxu0 %vm918_vm2, %v3348_v11  ;;  %3252 = vmatmul.msk.bf16.gmra.mxu1 %vm918_vm2, %v3380_v12 }
 0x1fa   :  { %3284 = vmatmul.msk.bf16.gmra.mxu2 %vm918_vm2, %v3412_v16  ;;  %3316 = vmatmul.msk.bf16.gmra.mxu3 %vm918_vm2, %v3444_v17 }
 0x1fb   :  { %v2457_v24 = vadd.f32 %v4105_v50, %v2281_v23 }
 0x1fd   :  { %v2521_v26 = vmax.f32 %v2457_v24, 0.0  ;;  %v1754_v27 = vpop.f32.mrf.mxu2  ;;  %v1914_v28 = vpop.f32.mrf.mxu3 }
 0x1fe   :  { %v2285_v29 = vsel %vm1959_vm3, %v1754_v27, -inf  ;;  %v2287_v30 = vsel %vm1959_vm3, %v1914_v28, -inf  ;;  %v1436_v31 = vpop.f32.mrf.mxu0  ;;  %v1596_v32 = vpop.f32.mrf.mxu1 }
 0x1ff   :  { %v2585_v33 = vpack.c.bf16 %v2521_v26, %v2521_v26  ;;  %v2286_v34 = vmax.f32 %v2284_v25, %v2285_v29  ;;  %v2289_v36 = vsel %vm1959_vm3, %v1436_v31, -inf  ;;  %v2290_v37 = vsel %vm1959_vm3, %v1596_v32, -inf }
 0x200   :  { %v2291_v40 = vmax.f32 %v2289_v36, %v2290_v37 }
 0x201   :  { %2650 = vst.msk [vmem:[%s4586_s3 + $0xb4] sm:$0xf] %vm2604_vm4, %v2585_v33  ;;  %v2288_v35 = vmax.f32 %v2286_v34, %v2287_v30 }
 0x203   :  { %v2458_v38 = vadd.f32 %v4105_v50, %v2288_v35 }
 0x205   :  { %v2522_v39 = vmax.f32 %v2458_v38, 0.0  ;;  %v1756_v41 = vpop.f32.mrf.mxu2  ;;  %v1916_v42 = vpop.f32.mrf.mxu3 }
 0x206   :  { %v2292_v55 = vsel %vm1959_vm3, %v1756_v41, -inf  ;;  %v1439_v43 = vpop.f32.mrf.mxu0  ;;  %v1599_v44 = vpop.f32.mrf.mxu1  ;;  %v2294_v47 = vsel %vm1959_vm3, %v1916_v42, -inf }
 0x207   :  { %v2586_v45 = vpack.c.bf16 %v2522_v39, %v2522_v39  ;;  %v2293_v46 = vmax.f32 %v2291_v40, %v2292_v55  ;;  %v2296_v48 = vsel %vm1959_vm3, %v1439_v43, -inf  ;;  %v2297_v49 = vsel %vm1959_vm3, %v1599_v44, -inf }
 0x208   :  { %v2298_v53 = vmax.f32 %v2296_v48, %v2297_v49 }
 0x209   :  { %2651 = vst.msk [vmem:[%s4586_s3 + $0xb8] sm:$0xf] %vm2604_vm4, %v2586_v45  ;;  %v2295_v51 = vmax.f32 %v2293_v46, %v2294_v47 }
 0x20b   :  { %v2459_v52 = vadd.f32 %v4105_v50, %v2295_v51 }
 0x20d   :  { %v2523_v54 = vmax.f32 %v2459_v52, 0.0  ;;  %v1759_v56 = vpop.f32.mrf.mxu2  ;;  %v1919_v57 = vpop.f32.mrf.mxu3 }
 0x20e   :  { %v2299_v58 = vsel %vm1959_vm3, %v1759_v56, -inf  ;;  %v2301_v59 = vsel %vm1959_vm3, %v1919_v57, -inf  ;;  %v1441_v60 = vpop.f32.mrf.mxu0  ;;  %v1601_v61 = vpop.f32.mrf.mxu1 }
 0x20f   :  { %v2587_v62 = vpack.c.bf16 %v2523_v54, %v2523_v54  ;;  %v2300_v63 = vmax.f32 %v2298_v53, %v2299_v58  ;;  %v2303_v1 = vsel %vm1959_vm3, %v1441_v60, -inf  ;;  %v2304_v2 = vsel %vm1959_vm3, %v1601_v61, -inf }
 0x210   :  { %v2305_v5 = vmax.f32 %v2303_v1, %v2304_v2 }
 0x211   :  { %2652 = vst.msk [vmem:[%s4586_s3 + $0xbc] sm:$0xf] %vm2604_vm4, %v2587_v62  ;;  %v2302_v0 = vmax.f32 %v2300_v63, %v2301_v59 }
 0x213   :  { %v2460_v3 = vadd.f32 %v4105_v50, %v2302_v0 }
 0x215   :  { %v2524_v4 = vmax.f32 %v2460_v3, 0.0  ;;  %v1761_v6 = vpop.f32.mrf.mxu2  ;;  %v1921_v7 = vpop.f32.mrf.mxu3 }
 0x216   :  { %v2306_v8 = vsel %vm1959_vm3, %v1761_v6, -inf  ;;  %v1444_v9 = vpop.f32.mrf.mxu0  ;;  %v1604_v10 = vpop.f32.mrf.mxu1  ;;  %v2308_v13 = vsel %vm1959_vm3, %v1921_v7, -inf }
 0x217   :  { %v2588_v11 = vpack.c.bf16 %v2524_v4, %v2524_v4  ;;  %v2307_v12 = vmax.f32 %v2305_v5, %v2306_v8  ;;  %v2310_v14 = vsel %vm1959_vm3, %v1444_v9, -inf  ;;  %v2311_v15 = vsel %vm1959_vm3, %v1604_v10, -inf }
 0x218   :  { %v2312_v18 = vmax.f32 %v2310_v14, %v2311_v15 }
 0x219   :  { %2653 = vst.msk [vmem:[%s4586_s3 + $0xc0] sm:$0xf] %vm2604_vm4, %v2588_v11  ;;  %v2309_v16 = vmax.f32 %v2307_v12, %v2308_v13 }
 0x21b   :  { %v2461_v17 = vadd.f32 %v4105_v50, %v2309_v16 }
 0x21d   :  { %v2525_v19 = vmax.f32 %v2461_v17, 0.0  ;;  %v1764_v20 = vpop.f32.mrf.mxu2  ;;  %v1924_v21 = vpop.f32.mrf.mxu3 }
 0x21e   :  { %v2313_v22 = vsel %vm1959_vm3, %v1764_v20, -inf  ;;  %v2315_v23 = vsel %vm1959_vm3, %v1924_v21, -inf  ;;  %v1446_v24 = vpop.f32.mrf.mxu0  ;;  %v1606_v25 = vpop.f32.mrf.mxu1 }
 0x21f   :  { %v2589_v26 = vpack.c.bf16 %v2525_v19, %v2525_v19  ;;  %v2314_v27 = vmax.f32 %v2312_v18, %v2313_v22  ;;  %v2317_v29 = vsel %vm1959_vm3, %v1446_v24, -inf  ;;  %v2318_v30 = vsel %vm1959_vm3, %v1606_v25, -inf }
 0x220   :  { %v2319_v33 = vmax.f32 %v2317_v29, %v2318_v30 }
 0x221   :  { %2654 = vst.msk [vmem:[%s4586_s3 + $0xc4] sm:$0xf] %vm2604_vm4, %v2589_v26  ;;  %v2316_v28 = vmax.f32 %v2314_v27, %v2315_v23 }
 0x223   :  { %v2462_v31 = vadd.f32 %v4105_v50, %v2316_v28 }
 0x225   :  { %v2526_v32 = vmax.f32 %v2462_v31, 0.0  ;;  %v1766_v34 = vpop.f32.mrf.mxu2  ;;  %v1926_v35 = vpop.f32.mrf.mxu3 }
 0x226   :  { %v2320_v36 = vsel %vm1959_vm3, %v1766_v34, -inf  ;;  %v1449_v37 = vpop.f32.mrf.mxu0  ;;  %v1609_v38 = vpop.f32.mrf.mxu1  ;;  %v2322_v41 = vsel %vm1959_vm3, %v1926_v35, -inf }
 0x227   :  { %v2590_v39 = vpack.c.bf16 %v2526_v32, %v2526_v32  ;;  %v2321_v40 = vmax.f32 %v2319_v33, %v2320_v36  ;;  %v2324_v42 = vsel %vm1959_vm3, %v1449_v37, -inf  ;;  %v2325_v55 = vsel %vm1959_vm3, %v1609_v38, -inf }
 0x228   :  { %v2326_v45 = vmax.f32 %v2324_v42, %v2325_v55 }
 0x229   :  { %2655 = vst.msk [vmem:[%s4586_s3 + $0xc8] sm:$0xf] %vm2604_vm4, %v2590_v39  ;;  %v2323_v43 = vmax.f32 %v2321_v40, %v2322_v41 }
 0x22b   :  { %v2463_v44 = vadd.f32 %v4105_v50, %v2323_v43 }
 0x22d   :  { %v2527_v46 = vmax.f32 %v2463_v44, 0.0  ;;  %v1769_v47 = vpop.f32.mrf.mxu2  ;;  %v1929_v48 = vpop.f32.mrf.mxu3 }
 0x22e   :  { %v2327_v49 = vsel %vm1959_vm3, %v1769_v47, -inf  ;;  %v2329_v51 = vsel %vm1959_vm3, %v1929_v48, -inf  ;;  %v1451_v52 = vpop.f32.mrf.mxu0  ;;  %v1611_v53 = vpop.f32.mrf.mxu1 }
 0x22f   :  { %v2591_v54 = vpack.c.bf16 %v2527_v46, %v2527_v46  ;;  %v2328_v56 = vmax.f32 %v2326_v45, %v2327_v49  ;;  %v2331_v58 = vsel %vm1959_vm3, %v1451_v52, -inf  ;;  %v2332_v59 = vsel %vm1959_vm3, %v1611_v53, -inf }
 0x230   :  { %v2333_v62 = vmax.f32 %v2331_v58, %v2332_v59 }
 0x231   :  { %2656 = vst.msk [vmem:[%s4586_s3 + $0xcc] sm:$0xf] %vm2604_vm4, %v2591_v54  ;;  %v2330_v57 = vmax.f32 %v2328_v56, %v2329_v51 }
 0x233   :  { %v2464_v60 = vadd.f32 %v4105_v50, %v2330_v57 }
 0x235   :  { %v2528_v61 = vmax.f32 %v2464_v60, 0.0  ;;  %v1771_v63 = vpop.f32.mrf.mxu2  ;;  %v1931_v0 = vpop.f32.mrf.mxu3 }
 0x236   :  { %v2334_v1 = vsel %vm1959_vm3, %v1771_v63, -inf  ;;  %v1454_v2 = vpop.f32.mrf.mxu0  ;;  %v1614_v3 = vpop.f32.mrf.mxu1  ;;  %v2336_v6 = vsel %vm1959_vm3, %v1931_v0, -inf }
 0x237   :  { %v2592_v4 = vpack.c.bf16 %v2528_v61, %v2528_v61  ;;  %v2335_v5 = vmax.f32 %v2333_v62, %v2334_v1  ;;  %v2338_v7 = vsel %vm1959_vm3, %v1454_v2, -inf  ;;  %v2339_v8 = vsel %vm1959_vm3, %v1614_v3, -inf  ;;  %v4524_v2 = vld [vmem:[%s4585_s2] ss:$0 sm:$0xff] }
 0x238   :  { %v2340_v11 = vmax.f32 %v2338_v7, %v2339_v8 }
 0x239   :  { %2657 = vst.msk [vmem:[%s4586_s3 + $0xd0] sm:$0xf] %vm2604_vm4, %v2592_v4  ;;  %v2337_v9 = vmax.f32 %v2335_v5, %v2336_v6 }
 0x23b   :  { %v2465_v10 = vadd.f32 %v4105_v50, %v2337_v9 }
 0x23d   :  { %v2529_v12 = vmax.f32 %v2465_v10, 0.0  ;;  %v1774_v13 = vpop.f32.mrf.mxu2  ;;  %v1934_v14 = vpop.f32.mrf.mxu3 }
 0x23e   :  { %v2341_v15 = vsel %vm1959_vm3, %v1774_v13, -inf  ;;  %v2343_v16 = vsel %vm1959_vm3, %v1934_v14, -inf  ;;  %v1456_v17 = vpop.f32.mrf.mxu0  ;;  %v1616_v18 = vpop.f32.mrf.mxu1 }
 0x23f   :  { %v2593_v19 = vpack.c.bf16 %v2529_v12, %v2529_v12  ;;  %v2342_v20 = vmax.f32 %v2340_v11, %v2341_v15  ;;  %v2345_v22 = vsel %vm1959_vm3, %v1456_v17, -inf  ;;  %v2346_v23 = vsel %vm1959_vm3, %v1616_v18, -inf }
 0x240   :  { %v2347_v26 = vmax.f32 %v2345_v22, %v2346_v23 }
 0x241   :  { %2658 = vst.msk [vmem:[%s4586_s3 + $0xd4] sm:$0xf] %vm2604_vm4, %v2593_v19  ;;  %v2344_v21 = vmax.f32 %v2342_v20, %v2343_v16 }
 0x243   :  { %v2466_v24 = vadd.f32 %v4105_v50, %v2344_v21 }
 0x245   :  { %v2530_v25 = vmax.f32 %v2466_v24, 0.0  ;;  %v1776_v27 = vpop.f32.mrf.mxu2  ;;  %v1936_v28 = vpop.f32.mrf.mxu3 }
 0x246   :  { %v2348_v29 = vsel %vm1959_vm3, %v1776_v27, -inf  ;;  %v1459_v30 = vpop.f32.mrf.mxu0  ;;  %v1619_v31 = vpop.f32.mrf.mxu1  ;;  %v2350_v34 = vsel %vm1959_vm3, %v1936_v28, -inf }
 0x247   :  { %v2594_v32 = vpack.c.bf16 %v2530_v25, %v2530_v25  ;;  %v2349_v33 = vmax.f32 %v2347_v26, %v2348_v29  ;;  %v2352_v35 = vsel %vm1959_vm3, %v1459_v30, -inf  ;;  %v2353_v36 = vsel %vm1959_vm3, %v1619_v31, -inf }
 0x248   :  { %v2354_v39 = vmax.f32 %v2352_v35, %v2353_v36 }
 0x249   :  { %2659 = vst.msk [vmem:[%s4586_s3 + $0xd8] sm:$0xf] %vm2604_vm4, %v2594_v32  ;;  %v2351_v37 = vmax.f32 %v2349_v33, %v2350_v34 }
 0x24b   :  { %v2467_v38 = vadd.f32 %v4105_v50, %v2351_v37 }
 0x24d   :  { %v2531_v40 = vmax.f32 %v2467_v38, 0.0  ;;  %v1779_v41 = vpop.f32.mrf.mxu2  ;;  %v1939_v42 = vpop.f32.mrf.mxu3 }
 0x24e   :  { %v2355_v55 = vsel %vm1959_vm3, %v1779_v41, -inf  ;;  %v2357_v43 = vsel %vm1959_vm3, %v1939_v42, -inf  ;;  %v1461_v44 = vpop.f32.mrf.mxu0  ;;  %v1621_v45 = vpop.f32.mrf.mxu1 }
 0x24f   :  { %v2595_v46 = vpack.c.bf16 %v2531_v40, %v2531_v40  ;;  %v2356_v47 = vmax.f32 %v2354_v39, %v2355_v55  ;;  %v2359_v49 = vsel %vm1959_vm3, %v1461_v44, -inf  ;;  %v2360_v51 = vsel %vm1959_vm3, %v1621_v45, -inf }
 0x250   :  { %v2361_v54 = vmax.f32 %v2359_v49, %v2360_v51 }
 0x251   :  { %2660 = vst.msk [vmem:[%s4586_s3 + $0xdc] sm:$0xf] %vm2604_vm4, %v2595_v46  ;;  %v2358_v48 = vmax.f32 %v2356_v47, %v2357_v43 }
 0x253   :  { %v2468_v52 = vadd.f32 %v4105_v50, %v2358_v48 }
 0x255   :  { %v2532_v53 = vmax.f32 %v2468_v52, 0.0  ;;  %v1781_v56 = vpop.f32.mrf.mxu2  ;;  %v1941_v57 = vpop.f32.mrf.mxu3 }
 0x256   :  { %v2362_v58 = vsel %vm1959_vm3, %v1781_v56, -inf  ;;  %v1464_v59 = vpop.f32.mrf.mxu0  ;;  %v1624_v60 = vpop.f32.mrf.mxu1  ;;  %v2364_v63 = vsel %vm1959_vm3, %v1941_v57, -inf }
 0x257   :  { %v2596_v61 = vpack.c.bf16 %v2532_v53, %v2532_v53  ;;  %v2363_v62 = vmax.f32 %v2361_v54, %v2362_v58  ;;  %v2366_v0 = vsel %vm1959_vm3, %v1464_v59, -inf  ;;  %v2367_v1 = vsel %vm1959_vm3, %v1624_v60, -inf }
 0x258   :  { %v2368_v4 = vmax.f32 %v2366_v0, %v2367_v1 }
 0x259   :  { %2661 = vst.msk [vmem:[%s4586_s3 + $0xe0] sm:$0xf] %vm2604_vm4, %v2596_v61  ;;  %v2365_v50 = vmax.f32 %v2363_v62, %v2364_v63 }
 0x25b   :  { %v2469_v3 = vadd.f32 %v4524_v2, %v2365_v50 }
 0x25d   :  { %v2533_v5 = vmax.f32 %v2469_v3, 0.0  ;;  %v1784_v6 = vpop.f32.mrf.mxu2  ;;  %v1944_v7 = vpop.f32.mrf.mxu3 }
 0x25e   :  { %v2369_v8 = vsel %vm1959_vm3, %v1784_v6, -inf  ;;  %v2371_v9 = vsel %vm1959_vm3, %v1944_v7, -inf  ;;  %v1466_v10 = vpop.f32.mrf.mxu0  ;;  %v1626_v11 = vpop.f32.mrf.mxu1 }
 0x25f   :  { %v2597_v12 = vpack.c.bf16 %v2533_v5, %v2533_v5  ;;  %v2370_v13 = vmax.f32 %v2368_v4, %v2369_v8  ;;  %v2373_v15 = vsel %vm1959_vm3, %v1466_v10, -inf  ;;  %v2374_v16 = vsel %vm1959_vm3, %v1626_v11, -inf }
 0x260   :  { %v2375_v19 = vmax.f32 %v2373_v15, %v2374_v16 }
 0x261   :  { %2662 = vst.msk [vmem:[%s4586_s3 + $0xe4] sm:$0xf] %vm2604_vm4, %v2597_v12  ;;  %v2372_v14 = vmax.f32 %v2370_v13, %v2371_v9 }
 0x263   :  { %v2470_v17 = vadd.f32 %v4524_v2, %v2372_v14 }
 0x265   :  { %v2534_v18 = vmax.f32 %v2470_v17, 0.0  ;;  %v1786_v20 = vpop.f32.mrf.mxu2  ;;  %v1946_v21 = vpop.f32.mrf.mxu3 }
 0x266   :  { %v2376_v22 = vsel %vm1959_vm3, %v1786_v20, -inf  ;;  %v1469_v23 = vpop.f32.mrf.mxu0  ;;  %v1629_v24 = vpop.f32.mrf.mxu1  ;;  %v2378_v27 = vsel %vm1959_vm3, %v1946_v21, -inf }
 0x267   :  { %v2598_v25 = vpack.c.bf16 %v2534_v18, %v2534_v18  ;;  %v2377_v26 = vmax.f32 %v2375_v19, %v2376_v22  ;;  %v2380_v28 = vsel %vm1959_vm3, %v1469_v23, -inf  ;;  %v2381_v29 = vsel %vm1959_vm3, %v1629_v24, -inf }
 0x268   :  { %v2382_v32 = vmax.f32 %v2380_v28, %v2381_v29 }
 0x269   :  { %2663 = vst.msk [vmem:[%s4586_s3 + $0xe8] sm:$0xf] %vm2604_vm4, %v2598_v25  ;;  %v2379_v30 = vmax.f32 %v2377_v26, %v2378_v27 }
 0x26b   :  { %v2471_v31 = vadd.f32 %v4524_v2, %v2379_v30 }
 0x26d   :  { %v2535_v33 = vmax.f32 %v2471_v31, 0.0  ;;  %v1789_v34 = vpop.f32.mrf.mxu2  ;;  %v1949_v35 = vpop.f32.mrf.mxu3 }
 0x26e   :  { %v2383_v36 = vsel %vm1959_vm3, %v1789_v34, -inf  ;;  %v2385_v37 = vsel %vm1959_vm3, %v1949_v35, -inf  ;;  %v1471_v38 = vpop.f32.mrf.mxu0  ;;  %v1631_v39 = vpop.f32.mrf.mxu1 }
 0x26f   :  { %v2599_v40 = vpack.c.bf16 %v2535_v33, %v2535_v33  ;;  %v2384_v41 = vmax.f32 %v2382_v32, %v2383_v36  ;;  %v2387_v55 = vsel %vm1959_vm3, %v1471_v38, -inf  ;;  %v2388_v43 = vsel %vm1959_vm3, %v1631_v39, -inf }
 0x270   :  { %v2389_v46 = vmax.f32 %v2387_v55, %v2388_v43 }
 0x271   :  { %2664 = vst.msk [vmem:[%s4586_s3 + $0xec] sm:$0xf] %vm2604_vm4, %v2599_v40  ;;  %v2386_v42 = vmax.f32 %v2384_v41, %v2385_v37 }
 0x273   :  { %v2472_v44 = vadd.f32 %v4524_v2, %v2386_v42 }
 0x275   :  { %v2536_v45 = vmax.f32 %v2472_v44, 0.0  ;;  %v1791_v47 = vpop.f32.mrf.mxu2  ;;  %v1951_v48 = vpop.f32.mrf.mxu3 }
 0x276   :  { %v2390_v49 = vsel %vm1959_vm3, %v1791_v47, -inf  ;;  %v1474_v51 = vpop.f32.mrf.mxu0  ;;  %v1634_v52 = vpop.f32.mrf.mxu1  ;;  %v2392_v56 = vsel %vm1959_vm3, %v1951_v48, -inf }
 0x277   :  { %v2600_v53 = vpack.c.bf16 %v2536_v45, %v2536_v45  ;;  %v2391_v54 = vmax.f32 %v2389_v46, %v2390_v49  ;;  %v2394_v57 = vsel %vm1959_vm3, %v1474_v51, -inf  ;;  %v2395_v58 = vsel %vm1959_vm3, %v1634_v52, -inf }
 0x278   :  { %v2396_v61 = vmax.f32 %v2394_v57, %v2395_v58 }
 0x279   :  { %2665 = vst.msk [vmem:[%s4586_s3 + $0xf0] sm:$0xf] %vm2604_vm4, %v2600_v53  ;;  %v2393_v59 = vmax.f32 %v2391_v54, %v2392_v56 }
 0x27b   :  { %v2473_v60 = vadd.f32 %v4524_v2, %v2393_v59 }
 0x27d   :  { %v2537_v62 = vmax.f32 %v2473_v60, 0.0  ;;  %v1794_v63 = vpop.f32.mrf.mxu2  ;;  %v1954_v0 = vpop.f32.mrf.mxu3 }
 0x27e   :  { %v2397_v1 = vsel %vm1959_vm3, %v1794_v63, -inf  ;;  %v2399_v50 = vsel %vm1959_vm3, %v1954_v0, -inf  ;;  %v1476_v5 = vpop.f32.mrf.mxu0  ;;  %v1636_v6 = vpop.f32.mrf.mxu1 }
 0x27f   :  { %v2601_v3 = vpack.c.bf16 %v2537_v62, %v2537_v62  ;;  %v2398_v4 = vmax.f32 %v2396_v61, %v2397_v1  ;;  %v2401_v8 = vsel %vm1959_vm3, %v1476_v5, -inf  ;;  %v2402_v9 = vsel %vm1959_vm3, %v1636_v6, -inf }
 0x280   :  { %v2403_v12 = vmax.f32 %v2401_v8, %v2402_v9 }
 0x281   :  { %2666 = vst.msk [vmem:[%s4586_s3 + $0xf4] sm:$0xf] %vm2604_vm4, %v2601_v3  ;;  %v2400_v7 = vmax.f32 %v2398_v4, %v2399_v50 }
 0x283   :  { %v2474_v10 = vadd.f32 %v4524_v2, %v2400_v7 }
 0x285   :  { %v2538_v11 = vmax.f32 %v2474_v10, 0.0  ;;  %v1796_v13 = vpop.f32.mrf.mxu2  ;;  %v1956_v14 = vpop.f32.mrf.mxu3 }
 0x286   :  { %v2404_v15 = vsel %vm1959_vm3, %v1796_v13, -inf  ;;  %v2406_v18 = vsel %vm1959_vm3, %v1956_v14, -inf }
 0x287   :  { %v2602_v16 = vpack.c.bf16 %v2538_v11, %v2538_v11  ;;  %v2405_v17 = vmax.f32 %v2403_v12, %v2404_v15 }
 0x289   :  { %2667 = vst.msk [vmem:[%s4586_s3 + $0xf8] sm:$0xf] %vm2604_vm4, %v2602_v16  ;;  %v2407_v19 = vmax.f32 %v2405_v17, %v2406_v18 }
 0x28b   :  { %v2475_v20 = vadd.f32 %v4524_v2, %v2407_v19 }
 0x28d   :  { %v2539_v21 = vmax.f32 %v2475_v20, 0.0 }
 0x28f   :  { %v2603_v22 = vpack.c.bf16 %v2539_v21, %v2539_v21 }
 0x291   :  { %2668 = vst.msk [vmem:[%s4586_s3 + $0xfc] sm:$0xf] %vm2604_vm4, %v2603_v22 }

// kernel: denoise_block_forward.4
= control target key start
LH: loop header
LB: loop body
LE: loop exit
PB: predicated region body
PF: predicated region fallthrough
CT: control target
= control target key end

     0   :  { %vm767_vm0 = vcmask 261120   ;;  %vm1371_vm1 = vcmask 523264   ;;  %vm1536_vm2 = vcmask 519168   ;;  %s3317_s1 = inlined_call_operand.vmem [shape: bf16[288,64], index: 1, kind: input, shape index: {}]   ;;  %s3318_s0 = inlined_call_operand.vmem [shape: bf16[4,128,288], index: 0, kind: input, shape index: {}]   ;;  %s3319_s2 = inlined_call_operand.vmem [shape: f32[1,64], index: 2, kind: input, shape index: {}]   ;;  %s3320_s3 = inlined_call_operand.vmem [shape: bf16[128,64], index: 3, kind: output, shape index: {}]  }
   0x1   :  { %v2148_v0 = vld [vmem:[%s3317_s1 + $0x38] sm:$0xff]  ;;  %v2207_v2 = vld [vmem:[%s3317_s1 + $0x88] sm:$0xff]  ;;  %v2147_v3 = vld [vmem:[%s3317_s1 + $0x30] sm:$0xff] }
   0x2   :  { %v2156_v1 = vld [vmem:[%s3317_s1 + $0x78] sm:$0xff]  ;;  %864 = vmatpush.bf16.msra.mxu0 %v2148_v0  ;;  %2159 = vmatpush.bf16.msra.mxu3 %v2148_v0  ;;  %v2155_v4 = vld [vmem:[%s3317_s1 + $0x70] sm:$0xff]  ;;  %v2219_v5 = vld [vmem:[%s3317_s1 + $0x80] sm:$0xff] }
   0x3   :  { %1033 = vmatpush.bf16.msra.mxu1 %v2156_v1  ;;  %1208 = vmatpush.bf16.msra.mxu2 %v2207_v2  ;;  %v1567_v6 = vld [vmem:[%s3318_s0 + $0x8] sm:$0xf]  ;;  %v2047_v7 = vld [vmem:[%s3318_s0 + $0x10] sm:$0xf0]  ;;  %v2145_v11 = vld [vmem:[%s3317_s1 + $0x20] sm:$0xff] }
   0x4   :  { %v1568_v8 = vor.u32 %v2047_v7, %v1567_v6  ;;  %v2146_v9 = vld [vmem:[%s3317_s1 + $0x28] sm:$0xff]  ;;  %v2153_v12 = vld [vmem:[%s3317_s1 + $0x60] sm:$0xff]  ;;  %v2144_v13 = vld [vmem:[%s3317_s1 + $0x18] sm:$0xff] }
   0x5   :  { %v2154_v10 = vld [vmem:[%s3317_s1 + $0x68] sm:$0xff]  ;;  %v2152_v14 = vld [vmem:[%s3317_s1 + $0x58] sm:$0xff]  ;;  %v2143_v15 = vld [vmem:[%s3317_s1 + $0x10] sm:$0xff] }
   0x6   :  { %865 = vmatpush.bf16.msra.mxu0 %v2147_v3  ;;  %2160 = vmatpush.bf16.msra.mxu3 %v2147_v3  ;;  %v2151_v16 = vld [vmem:[%s3317_s1 + $0x50] sm:$0xff]  ;;  %v1579_v17 = vld [vmem:[%s3318_s0 + $0x20] sm:$0xf]  ;;  %v2050_v18 = vld [vmem:[%s3318_s0 + $0x28] sm:$0xf0] }
   0x7   :  { %1034 = vmatpush.bf16.msra.mxu1 %v2155_v4  ;;  %1209 = vmatpush.bf16.msra.mxu2 %v2219_v5  ;;  %v1580_v19 = vor.u32 %v2050_v18, %v1579_v17  ;;  %v2142_v20 = vld [vmem:[%s3317_s1 + $0x8] sm:$0xff]  ;;  %v2141_v22 = vld [vmem:[%s3317_s1] sm:$0xff]  ;;  %v1561_v29 = vld [vmem:[%s3318_s0 + $0xc] sm:$0xf0] }
   0x8   :  { %v2150_v21 = vld [vmem:[%s3317_s1 + $0x48] sm:$0xff]  ;;  %v2149_v23 = vld [vmem:[%s3317_s1 + $0x40] sm:$0xff]  ;;  %v1591_v33 = vld [vmem:[%s3318_s0 + $0x38] sm:$0xf] }
   0x9   :  { %v1559_v24 = vld [vmem:[%s3318_s0] sm:$0xf]  ;;  %v2046_v25 = vld [vmem:[%s3318_s0 + $0x8] sm:$0xf0]  ;;  %v2045_v28 = vld [vmem:[%s3318_s0 + $0x4] sm:$0xf] }
   0xa   :  { %2013 = vmatmul.msk.bf16.vlgmr.msra.gmra.mxu2 %vm767_vm0, %v1568_v8  ;;  %866 = vmatpush.bf16.msra.mxu0 %v2146_v9  ;;  %v1847_v26 = vld [vmem:[%s3318_s0 + $0x240] sm:$0xf]  ;;  %v2118_v27 = vld [vmem:[%s3318_s0 + $0x248] sm:$0xf0]  ;;  %v1560_v30 = vor.u32 %v2046_v25, %v1559_v24  ;;  %v1564_v32 = vor.u32 %v2045_v28, %v1561_v29  ;;  %v2053_v34 = vld [vmem:[%s3318_s0 + $0x40] sm:$0xf0] }
   0xb   :  { %2161 = vmatpush.bf16.msra.mxu3 %v2146_v9  ;;  %1035 = vmatpush.bf16.msra.mxu1 %v2154_v10  ;;  %v1848_v31 = vor.u32 %v2118_v27, %v1847_v26  ;;  %v1592_v35 = vor.u32 %v2053_v34, %v1591_v33  ;;  %v1571_v36 = vld [vmem:[%s3318_s0 + $0x18] sm:$0xf]  ;;  %v2049_v37 = vld [vmem:[%s3318_s0 + $0x20] sm:$0xf0]  ;;  %v2048_v40 = vld [vmem:[%s3318_s0 + $0x1c] sm:$0xf] }
   0xc   :  { %v1859_v38 = vld [vmem:[%s3318_s0 + $0x258] sm:$0xf]  ;;  %v2121_v39 = vld [vmem:[%s3318_s0 + $0x260] sm:$0xf0]  ;;  %v1573_v41 = vld [vmem:[%s3318_s0 + $0x24] sm:$0xf0]  ;;  %v1572_v42 = vor.u32 %v2049_v37, %v1571_v36 }
   0xd   :  { %v1860_v43 = vor.u32 %v2121_v39, %v1859_v38  ;;  %v1576_v44 = vor.u32 %v2048_v40, %v1573_v41  ;;  %v1603_v45 = vld [vmem:[%s3318_s0 + $0x50] sm:$0xf]  ;;  %v2056_v46 = vld [vmem:[%s3318_s0 + $0x58] sm:$0xf0]  ;;  %v2051_v52 = vld [vmem:[%s3318_s0 + $0x34] sm:$0xf] }
   0xe   :  { %867 = vmatpush.bf16.msra.mxu0 %v2145_v11  ;;  %v1604_v47 = vor.u32 %v2056_v46, %v1603_v45  ;;  %v1583_v48 = vld [vmem:[%s3318_s0 + $0x30] sm:$0xf]  ;;  %v2052_v49 = vld [vmem:[%s3318_s0 + $0x38] sm:$0xf0]  ;;  %v1585_v53 = vld [vmem:[%s3318_s0 + $0x3c] sm:$0xf0] }
   0xf   :  { %2162 = vmatpush.bf16.msra.mxu3 %v2145_v11  ;;  %1036 = vmatpush.bf16.msra.mxu1 %v2153_v12  ;;  %v1871_v50 = vld [vmem:[%s3318_s0 + $0x270] sm:$0xf]  ;;  %v2124_v51 = vld [vmem:[%s3318_s0 + $0x278] sm:$0xf0]  ;;  %v1584_v54 = vor.u32 %v2052_v49, %v1583_v48  ;;  %v1588_v56 = vor.u32 %v2051_v52, %v1585_v53  ;;  %v1615_v57 = vld [vmem:[%s3318_s0 + $0x68] sm:$0xf] }
  0x10   :  { %v1872_v55 = vor.u32 %v2124_v51, %v1871_v50  ;;  %v2059_v58 = vld [vmem:[%s3318_s0 + $0x70] sm:$0xf0]  ;;  %v1595_v60 = vld [vmem:[%s3318_s0 + $0x48] sm:$0xf]  ;;  %v2054_v0 = vld [vmem:[%s3318_s0 + $0x4c] sm:$0xf] }
  0x11   :  { %v1616_v59 = vor.u32 %v2059_v58, %v1615_v57  ;;  %v2055_v61 = vld [vmem:[%s3318_s0 + $0x50] sm:$0xf0]  ;;  %v1883_v62 = vld [vmem:[%s3318_s0 + $0x288] sm:$0xf]  ;;  %v2062_v6 = vld [vmem:[%s3318_s0 + $0x88] sm:$0xf0] }
  0x12   :  { %868 = vmatpush.bf16.msra.mxu0 %v2144_v13  ;;  %v2127_v63 = vld [vmem:[%s3318_s0 + $0x290] sm:$0xf0]  ;;  %v1607_v8 = vld [vmem:[%s3318_s0 + $0x60] sm:$0xf]  ;;  %v2058_v9 = vld [vmem:[%s3318_s0 + $0x68] sm:$0xf0] }
  0x13   :  { %2163 = vmatpush.bf16.msra.mxu3 %v2144_v13  ;;  %1037 = vmatpush.bf16.msra.mxu1 %v2152_v14  ;;  %v1884_v3 = vor.u32 %v2127_v63, %v1883_v62  ;;  %v2130_v11 = vld [vmem:[%s3318_s0 + $0x2a8] sm:$0xf0]  ;;  %v1609_v13 = vld [vmem:[%s3318_s0 + $0x6c] sm:$0xf0]  ;;  %v1639_v17 = vld [vmem:[%s3318_s0 + $0x98] sm:$0xf] }
  0x14   :  { %v2065_v18 = vld [vmem:[%s3318_s0 + $0xa0] sm:$0xf0]  ;;  %v2060_v24 = vld [vmem:[%s3318_s0 + $0x7c] sm:$0xf]  ;;  %v1621_v25 = vld [vmem:[%s3318_s0 + $0x84] sm:$0xf0] }
  0x15   :  { %v1624_v28 = vor.u32 %v2060_v24, %v1621_v25  ;;  %v1651_v29 = vld [vmem:[%s3318_s0 + $0xb0] sm:$0xf]  ;;  %v2064_v33 = vld [vmem:[%s3318_s0 + $0x98] sm:$0xf0]  ;;  %v2063_v36 = vld [vmem:[%s3318_s0 + $0x94] sm:$0xf] }
  0x16   :  { %869 = vmatpush.bf16.msra.mxu0 %v2143_v15  ;;  %v1919_v34 = vld [vmem:[%s3318_s0 + $0x2d0] sm:$0xf]  ;;  %v1633_v37 = vld [vmem:[%s3318_s0 + $0x9c] sm:$0xf0]  ;;  %v1663_v41 = vld [vmem:[%s3318_s0 + $0xc8] sm:$0xf] }
  0x17   :  { %2164 = vmatpush.bf16.msra.mxu3 %v2143_v15  ;;  %1038 = vmatpush.bf16.msra.mxu1 %v2151_v16  ;;  %v1636_v40 = vor.u32 %v2063_v36, %v1633_v37  ;;  %v2067_v45 = vld [vmem:[%s3318_s0 + $0xb0] sm:$0xf0]  ;;  %v1931_v46 = vld [vmem:[%s3318_s0 + $0x2e8] sm:$0xf]  ;;  %v2066_v48 = vld [vmem:[%s3318_s0 + $0xac] sm:$0xf] }
  0x18   :  { %v1645_v49 = vld [vmem:[%s3318_s0 + $0xb4] sm:$0xf0]  ;;  %v1655_v58 = vld [vmem:[%s3318_s0 + $0xc0] sm:$0xf]  ;;  %v2117_v62 = vld [vmem:[%s3318_s0 + $0x244] sm:$0xf] }
  0x19   :  { %v1648_v53 = vor.u32 %v2066_v48, %v1645_v49  ;;  %v1849_v63 = vld [vmem:[%s3318_s0 + $0x24c] sm:$0xf0] }
  0x1a   :  { %2014 = vmatmul.msk.bf16.gmra.mxu2 %vm767_vm0, %v1580_v19  ;;  %870 = vmatpush.bf16.msra.mxu0 %v2142_v20  ;;  %v1640_v19 = vor.u32 %v2065_v18, %v1639_v17  ;;  %v1667_v17 = vld [vmem:[%s3318_s0 + $0xd8] sm:$0xf]  ;;  %v2073_v18 = vld [vmem:[%s3318_s0 + $0xe0] sm:$0xf0] }
  0x1b   :  { %2165 = vmatpush.bf16.msra.mxu3 %v2142_v20  ;;  %1039 = vmatpush.bf16.msra.mxu1 %v2150_v21  ;;  %v1619_v20 = vld [vmem:[%s3318_s0 + $0x78] sm:$0xf]  ;;  %v1668_v25 = vor.u32 %v2073_v18, %v1667_v17 }
  0x1e   :  { %871 = vmatpush.bf16.msra.mxu0 %v2141_v22 }
  0x1f   :  { %2166 = vmatpush.bf16.msra.mxu3 %v2141_v22  ;;  %1040 = vmatpush.bf16.msra.mxu1 %v2149_v23  ;;  %v1907_v22 = vld [vmem:[%s3318_s0 + $0x2b8] sm:$0xf] }
  0x21   :  { %872 = vmatmul.bf16.vlgmr.msra.gmra.mxu0 %v1560_v30  ;;  %v2068_v30 = vld [vmem:[%s3318_s0 + $0xb8] sm:$0xf0] }
  0x22   :  { %992 = vmatmul.bf16.vlgmr.msra.gmra.mxu3 %v1848_v31  ;;  %1041 = vmatmul.bf16.vlgmr.msra.gmra.mxu1 %v1564_v32  ;;  %v1652_v31 = vor.u32 %v2068_v30, %v1651_v29  ;;  %v1631_v32 = vld [vmem:[%s3318_s0 + $0x90] sm:$0xf] }
  0x23   :  { %2167 = vmatpush.bf16.msrb.mxu3 %v2156_v1  ;;  %v1597_v1 = vld [vmem:[%s3318_s0 + $0x54] sm:$0xf0]  ;;  %v1632_v38 = vor.u32 %v2064_v33, %v1631_v32  ;;  %v1699_v32 = vld [vmem:[%s3318_s0 + $0x110] sm:$0xf]  ;;  %v2080_v33 = vld [vmem:[%s3318_s0 + $0x118] sm:$0xf0] }
  0x24   :  { %v1700_v37 = vor.u32 %v2080_v33, %v1699_v32  ;;  %v2081_v32 = vld [vmem:[%s3318_s0 + $0x124] sm:$0xf]  ;;  %v1705_v33 = vld [vmem:[%s3318_s0 + $0x12c] sm:$0xf0] }
  0x27   :  { %2168 = vmatpush.bf16.msrb.mxu3 %v2155_v4  ;;  %v1600_v4 = vor.u32 %v2054_v0, %v1597_v1 }
  0x2a   :  { %2015 = vmatmul.msk.bf16.gmra.mxu2 %vm767_vm0, %v1592_v35  ;;  %v2136_v35 = vld [vmem:[%s3318_s0 + $0x2d8] sm:$0xf0] }
  0x2b   :  { %2169 = vmatpush.bf16.msrb.mxu3 %v2154_v10  ;;  %v1895_v10 = vld [vmem:[%s3318_s0 + $0x2a0] sm:$0xf]  ;;  %v1920_v39 = vor.u32 %v2136_v35, %v1919_v34 }
  0x2c   :  { %v1896_v15 = vor.u32 %v2130_v11, %v1895_v10 }
  0x2f   :  { %2170 = vmatpush.bf16.msrb.mxu3 %v2153_v12  ;;  %v2057_v12 = vld [vmem:[%s3318_s0 + $0x64] sm:$0xf] }
  0x31   :  { %877 = vmatmul.bf16.gmra.mxu0 %v1572_v42  ;;  %v2071_v42 = vld [vmem:[%s3318_s0 + $0xd0] sm:$0xf0] }
  0x32   :  { %997 = vmatmul.bf16.gmra.mxu3 %v1860_v43  ;;  %1046 = vmatmul.bf16.gmra.mxu1 %v1576_v44  ;;  %v1664_v43 = vor.u32 %v2071_v42, %v1663_v41  ;;  %v1643_v44 = vld [vmem:[%s3318_s0 + $0xa8] sm:$0xf]  ;;  %v1679_v41 = vld [vmem:[%s3318_s0 + $0xf0] sm:$0xf]  ;;  %v2076_v42 = vld [vmem:[%s3318_s0 + $0xf8] sm:$0xf0] }
  0x33   :  { %2171 = vmatpush.bf16.msrb.mxu3 %v2152_v14  ;;  %v1608_v14 = vor.u32 %v2058_v9, %v1607_v8  ;;  %v1644_v51 = vor.u32 %v2067_v45, %v1643_v44  ;;  %v1687_v8 = vld [vmem:[%s3318_s0 + $0xf8] sm:$0xf]  ;;  %v2077_v9 = vld [vmem:[%s3318_s0 + $0x100] sm:$0xf0]  ;;  %v1681_v44 = vld [vmem:[%s3318_s0 + $0xfc] sm:$0xf0]  ;;  %v1680_v49 = vor.u32 %v2076_v42, %v1679_v41  ;;  %v1708_v42 = vor.u32 %v2081_v32, %v1705_v33 }
  0x34   :  { %v2123_v45 = vld [vmem:[%s3318_s0 + $0x274] sm:$0xf]  ;;  %v1729_v32 = vld [vmem:[%s3318_s0 + $0x15c] sm:$0xf0] }
  0x35   :  { %v2135_v33 = vld [vmem:[%s3318_s0 + $0x2d4] sm:$0xf] }
  0x37   :  { %2172 = vmatpush.bf16.msrb.mxu3 %v2151_v16  ;;  %v1612_v16 = vor.u32 %v2057_v12, %v1609_v13  ;;  %v1688_v13 = vor.u32 %v2077_v9, %v1687_v8 }
  0x3a   :  { %2016 = vmatmul.msk.bf16.gmra.mxu2 %vm767_vm0, %v1604_v47  ;;  %v2139_v47 = vld [vmem:[%s3318_s0 + $0x2f0] sm:$0xf0] }
  0x3b   :  { %2173 = vmatpush.bf16.msrb.mxu3 %v2150_v21  ;;  %v2061_v21 = vld [vmem:[%s3318_s0 + $0x80] sm:$0xf0]  ;;  %v1932_v52 = vor.u32 %v2139_v47, %v1931_v46  ;;  %v1873_v46 = vld [vmem:[%s3318_s0 + $0x27c] sm:$0xf0] }
  0x3c   :  { %v1620_v26 = vor.u32 %v2061_v21, %v1619_v20  ;;  %v1669_v20 = vld [vmem:[%s3318_s0 + $0xe4] sm:$0xf0]  ;;  %v2120_v21 = vld [vmem:[%s3318_s0 + $0x25c] sm:$0xf] }
  0x3f   :  { %2174 = vmatpush.bf16.msrb.mxu3 %v2149_v23  ;;  %v2133_v23 = vld [vmem:[%s3318_s0 + $0x2c0] sm:$0xf0] }
  0x40   :  { %v1908_v27 = vor.u32 %v2133_v23, %v1907_v22  ;;  %v1861_v22 = vld [vmem:[%s3318_s0 + $0x264] sm:$0xf0] }
  0x41   :  { %882 = vmatmul.bf16.gmra.mxu0 %v1584_v54  ;;  %v1675_v54 = vld [vmem:[%s3318_s0 + $0xe0] sm:$0xf] }
  0x42   :  { %1002 = vmatmul.bf16.gmra.mxu3 %v1872_v55  ;;  %1051 = vmatmul.bf16.gmra.mxu1 %v1588_v56  ;;  %v2074_v55 = vld [vmem:[%s3318_s0 + $0xe8] sm:$0xf0] }
  0x43   :  { %2175 = vmatpush.bf16.msra.mxu3 %v2207_v2  ;;  %v1596_v2 = vor.u32 %v2055_v61, %v1595_v60  ;;  %v1676_v57 = vor.u32 %v2074_v55, %v1675_v54  ;;  %v2069_v60 = vld [vmem:[%s3318_s0 + $0xc4] sm:$0xf]  ;;  %v1657_v61 = vld [vmem:[%s3318_s0 + $0xcc] sm:$0xf0] }
  0x47   :  { %2176 = vmatpush.bf16.msra.mxu3 %v2219_v5  ;;  %v1627_v5 = vld [vmem:[%s3318_s0 + $0x80] sm:$0xf] }
  0x48   :  { %v1628_v7 = vor.u32 %v2062_v6, %v1627_v5 }
  0x4a   :  { %2017 = vmatmul.msk.bf16.gmra.mxu2 %vm767_vm0, %v1616_v59  ;;  %v2070_v59 = vld [vmem:[%s3318_s0 + $0xc8] sm:$0xf0] }
  0x4b   :  { %v1656_v1 = vor.u32 %v2070_v59, %v1655_v58 }
  0x51   :  { %887 = vmatmul.bf16.gmra.mxu0 %v1596_v2 }
  0x52   :  { %1007 = vmatmul.bf16.gmra.mxu3 %v1884_v3  ;;  %1056 = vmatmul.bf16.gmra.mxu1 %v1600_v4  ;;  %v1660_v3 = vor.u32 %v2069_v60, %v1657_v61  ;;  %v1852_v4 = vor.u32 %v2117_v62, %v1849_v63 }
  0x5a   :  { %2018 = vmatmul.msk.bf16.gmra.mxu2 %vm767_vm0, %v1628_v7 }
  0x61   :  { %892 = vmatmul.bf16.gmra.mxu0 %v1608_v14 }
  0x62   :  { %1012 = vmatmul.bf16.gmra.mxu3 %v1896_v15  ;;  %1061 = vmatmul.bf16.gmra.mxu1 %v1612_v16 }
  0x6a   :  { %2019 = vmatmul.msk.bf16.gmra.mxu2 %vm767_vm0, %v1640_v19  ;;  %v2072_v19 = vld [vmem:[%s3318_s0 + $0xdc] sm:$0xf] }
  0x71   :  { %897 = vmatmul.bf16.gmra.mxu0 %v1620_v26 }
  0x72   :  { %1017 = vmatmul.bf16.gmra.mxu3 %v1908_v27  ;;  %1066 = vmatmul.bf16.gmra.mxu1 %v1624_v28  ;;  %v1672_v27 = vor.u32 %v2072_v19, %v1669_v20  ;;  %v1864_v28 = vor.u32 %v2120_v21, %v1861_v22  ;;  %v1723_v19 = vld [vmem:[%s3318_s0 + $0x140] sm:$0xf]  ;;  %v2086_v20 = vld [vmem:[%s3318_s0 + $0x148] sm:$0xf0] }
  0x7a   :  { %2020 = vmatmul.msk.bf16.gmra.mxu2 %vm767_vm0, %v1652_v31 }
  0x81   :  { %902 = vmatmul.bf16.gmra.mxu0 %v1632_v38 }
  0x82   :  { %1022 = vmatmul.bf16.gmra.mxu3 %v1920_v39  ;;  %1071 = vmatmul.bf16.gmra.mxu1 %v1636_v40 }
  0x8a   :  { %2021 = vmatmul.msk.bf16.gmra.mxu2 %vm767_vm0, %v1664_v43  ;;  %v2075_v43 = vld [vmem:[%s3318_s0 + $0xf4] sm:$0xf] }
  0x8d   :  { %v1211_v50 = vpop.f32.mrf.mxu2 }
  0x91   :  { %907 = vmatmul.bf16.gmra.mxu0 %v1644_v51  ;;  %v1684_v51 = vor.u32 %v2075_v43, %v1681_v44 }
  0x92   :  { %1027 = vmatmul.bf16.gmra.mxu3 %v1932_v52  ;;  %1076 = vmatmul.bf16.gmra.mxu1 %v1648_v53  ;;  %v1876_v52 = vor.u32 %v2123_v45, %v1873_v46 }
  0x95   :  { %v1213_v56 = vpop.f32.mrf.mxu2 }
  0x9a   :  { %2022 = vmatmul.msk.bf16.gmra.mxu2 %vm767_vm0, %v1676_v57  ;;  %v2083_v57 = vld [vmem:[%s3318_s0 + $0x130] sm:$0xf0] }
  0x9d   :  { %v1216_v0 = vpop.f32.mrf.mxu2 }
  0x9e   :  { %v873_v2 = vpop.f32.mrf.mxu0 }
  0x9f   :  { %v1042_v5 = vpop.f32.mrf.mxu1 }
  0xa0   :  { %v1043_v6 = vadd.f32 %v1042_v5, %v873_v2  ;;  %v2079_v2 = vld [vmem:[%s3318_s0 + $0x110] sm:$0xf0]  ;;  %v2126_v5 = vld [vmem:[%s3318_s0 + $0x28c] sm:$0xf] }
  0xa1   :  { %912 = vmatmul.bf16.gmra.mxu0 %v1656_v1  ;;  %v1691_v1 = vld [vmem:[%s3318_s0 + $0x108] sm:$0xf] }
  0xa2   :  { %v2492_v7 = vadd.f32 %v1211_v50, %v1043_v6  ;;  %1081 = vmatmul.bf16.gmra.mxu1 %v1660_v3  ;;  %1161 = vmatmul.bf16.vlgmr.msrb.gmra.mxu3 %v1852_v4  ;;  %v2078_v3 = vld [vmem:[%s3318_s0 + $0x10c] sm:$0xf]  ;;  %v1693_v4 = vld [vmem:[%s3318_s0 + $0x114] sm:$0xf0] }
  0xa3   :  { %v1885_v6 = vld [vmem:[%s3318_s0 + $0x294] sm:$0xf0] }
  0xa5   :  { %v2500_v10 = vpop.f32.mrf.mxu3  ;;  %v1218_v11 = vpop.f32.mrf.mxu2 }
  0xa6   :  { %3327 = vst [vmem:[#allocation2_spill] sm:$0xff] %v2500_v10  ;;  %v875_v12 = vpop.f32.mrf.mxu0 }
  0xa7   :  { %v1044_v14 = vpop.f32.mrf.mxu1 }
  0xa8   :  { %v1045_v15 = vadd.f32 %v1044_v14, %v875_v12  ;;  %v1888_v14 = vor.u32 %v2126_v5, %v1885_v6 }
  0xaa   :  { %v2502_v16 = vadd.f32 %v1213_v56, %v1045_v15  ;;  %2023 = vmatmul.msk.bf16.gmra.mxu2 %vm767_vm0, %v1688_v13  ;;  %v1711_v56 = vld [vmem:[%s3318_s0 + $0x128] sm:$0xf]  ;;  %v1696_v13 = vor.u32 %v2078_v3, %v1693_v4 }
  0xab   :  { %v1712_v61 = vor.u32 %v2083_v57, %v1711_v56 }
  0xad   :  { %v2523_v23 = vpop.f32.mrf.mxu3  ;;  %v1221_v24 = vpop.f32.mrf.mxu2 }
  0xae   :  { %3328 = vst [vmem:[#allocation3_spill] sm:$0xff] %v2523_v23  ;;  %v878_v26 = vpop.f32.mrf.mxu0 }
  0xaf   :  { %v1047_v29 = vpop.f32.mrf.mxu1 }
  0xb0   :  { %v1048_v30 = vadd.f32 %v1047_v29, %v878_v26  ;;  %v1703_v29 = vld [vmem:[%s3318_s0 + $0x120] sm:$0xf] }
  0xb1   :  { %917 = vmatmul.bf16.gmra.mxu0 %v1668_v25  ;;  %v1724_v25 = vor.u32 %v2086_v20, %v1723_v19 }
  0xb2   :  { %v2525_v31 = vadd.f32 %v1216_v0, %v1048_v30  ;;  %1086 = vmatmul.bf16.gmra.mxu1 %v1672_v27  ;;  %1166 = vmatmul.bf16.gmra.mxu3 %v1864_v28  ;;  %v2082_v30 = vld [vmem:[%s3318_s0 + $0x128] sm:$0xf0] }
  0xb5   :  { %v2533_v34 = vpop.f32.mrf.mxu3  ;;  %v1223_v35 = vpop.f32.mrf.mxu2 }
  0xb6   :  { %3329 = vst [vmem:[#allocation4_spill] sm:$0xff] %v2533_v34  ;;  %v880_v36 = vpop.f32.mrf.mxu0 }
  0xb7   :  { %v1049_v38 = vpop.f32.mrf.mxu1 }
  0xb8   :  { %v1050_v39 = vadd.f32 %v1049_v38, %v880_v36  ;;  %v1897_v36 = vld [vmem:[%s3318_s0 + $0x2ac] sm:$0xf0] }
  0xba   :  { %v2535_v40 = vadd.f32 %v1218_v11, %v1050_v39  ;;  %2024 = vmatmul.msk.bf16.gmra.mxu2 %vm767_vm0, %v1700_v37  ;;  %v1692_v11 = vor.u32 %v2079_v2, %v1691_v1  ;;  %v1704_v39 = vor.u32 %v2082_v30, %v1703_v29  ;;  %v1909_v1 = vld [vmem:[%s3318_s0 + $0x2c4] sm:$0xf0]  ;;  %v2088_v29 = vld [vmem:[%s3318_s0 + $0x158] sm:$0xf0]  ;;  %v2087_v30 = vld [vmem:[%s3318_s0 + $0x154] sm:$0xf] }
  0xbd   :  { %v2556_v47 = vpop.f32.mrf.mxu3  ;;  %v1226_v48 = vpop.f32.mrf.mxu2 }
  0xbe   :  { %3330 = vst [vmem:[#allocation5_spill] sm:$0xff] %v2556_v47  ;;  %v883_v50 = vpop.f32.mrf.mxu0 }
  0xbf   :  { %v1052_v53 = vpop.f32.mrf.mxu1 }
  0xc0   :  { %v1053_v54 = vadd.f32 %v1052_v53, %v883_v50 }
  0xc1   :  { %922 = vmatmul.bf16.gmra.mxu0 %v1680_v49  ;;  %v2089_v49 = vld [vmem:[%s3318_s0 + $0x160] sm:$0xf0] }
  0xc2   :  { %v2558_v55 = vadd.f32 %v1221_v24, %v1053_v54  ;;  %1091 = vmatmul.bf16.gmra.mxu1 %v1684_v51  ;;  %1171 = vmatmul.bf16.gmra.mxu3 %v1876_v52 }
  0xc5   :  { %v2566_v58 = vpop.f32.mrf.mxu3  ;;  %v1228_v59 = vpop.f32.mrf.mxu2 }
  0xc6   :  { %v885_v60 = vpop.f32.mrf.mxu0 }
  0xc7   :  { %v1054_v62 = vpop.f32.mrf.mxu1 }
  0xc8   :  { %v1055_v63 = vadd.f32 %v1054_v62, %v885_v60  ;;  %v2085_v60 = vld [vmem:[%s3318_s0 + $0x140] sm:$0xf0]  ;;  %v1717_v62 = vld [vmem:[%s3318_s0 + $0x144] sm:$0xf0] }
  0xca   :  { %v2568_v0 = vadd.f32 %v1223_v35, %v1055_v63  ;;  %2025 = vmatmul.msk.bf16.gmra.mxu2 %vm767_vm0, %v1712_v61  ;;  %v2129_v35 = vld [vmem:[%s3318_s0 + $0x2a4] sm:$0xf]  ;;  %v2084_v61 = vld [vmem:[%s3318_s0 + $0x13c] sm:$0xf] }
  0xcb   :  { %v1900_v43 = vor.u32 %v2129_v35, %v1897_v36  ;;  %v2132_v63 = vld [vmem:[%s3318_s0 + $0x2bc] sm:$0xf]  ;;  %v1720_v6 = vor.u32 %v2084_v61, %v1717_v62  ;;  %v1921_v35 = vld [vmem:[%s3318_s0 + $0x2dc] sm:$0xf0]  ;;  %v1739_v62 = vld [vmem:[%s3318_s0 + $0x168] sm:$0xf] }
  0xcd   :  { %v2589_v8 = vpop.f32.mrf.mxu3  ;;  %v1231_v9 = vpop.f32.mrf.mxu2 }
  0xce   :  { %v888_v12 = vpop.f32.mrf.mxu0 }
  0xcf   :  { %v1057_v15 = vpop.f32.mrf.mxu1 }
  0xd0   :  { %v1058_v17 = vadd.f32 %v1057_v15, %v888_v12  ;;  %v2092_v15 = vld [vmem:[%s3318_s0 + $0x178] sm:$0xf0] }
  0xd1   :  { %927 = vmatmul.bf16.gmra.mxu0 %v1692_v11 }
  0xd2   :  { %v2591_v18 = vadd.f32 %v1226_v48, %v1058_v17  ;;  %1096 = vmatmul.bf16.gmra.mxu1 %v1696_v13  ;;  %1176 = vmatmul.bf16.gmra.mxu3 %v1888_v14  ;;  %v1735_v48 = vld [vmem:[%s3318_s0 + $0x158] sm:$0xf]  ;;  %v1747_v14 = vld [vmem:[%s3318_s0 + $0x170] sm:$0xf] }
  0xd3   :  { %v1736_v53 = vor.u32 %v2089_v49, %v1735_v48  ;;  %v1759_v49 = vld [vmem:[%s3318_s0 + $0x188] sm:$0xf] }
  0xd5   :  { %v2599_v21 = vpop.f32.mrf.mxu3  ;;  %v1233_v22 = vpop.f32.mrf.mxu2 }
  0xd6   :  { %v890_v24 = vpop.f32.mrf.mxu0 }
  0xd7   :  { %v1059_v26 = vpop.f32.mrf.mxu1 }
  0xd8   :  { %v1060_v27 = vadd.f32 %v1059_v26, %v890_v24 }
  0xda   :  { %v2601_v28 = vadd.f32 %v1228_v59, %v1060_v27  ;;  %2026 = vmatmul.msk.bf16.gmra.mxu2 %vm767_vm0, %v1724_v25  ;;  %v1715_v59 = vld [vmem:[%s3318_s0 + $0x138] sm:$0xf]  ;;  %v1727_v27 = vld [vmem:[%s3318_s0 + $0x150] sm:$0xf] }
  0xdb   :  { %v1716_v4 = vor.u32 %v2085_v60, %v1715_v59 }
  0xdd   :  { %v2622_v37 = vpop.f32.mrf.mxu3  ;;  %v1236_v38 = vpop.f32.mrf.mxu2 }
  0xde   :  { %v893_v41 = vpop.f32.mrf.mxu0 }
  0xdf   :  { %v1062_v44 = vpop.f32.mrf.mxu1 }
  0xe0   :  { %v1063_v45 = vadd.f32 %v1062_v44, %v893_v41 }
  0xe1   :  { %932 = vmatmul.bf16.gmra.mxu0 %v1704_v39  ;;  %v1728_v39 = vor.u32 %v2088_v29, %v1727_v27 }
  0xe2   :  { %v2624_v46 = vadd.f32 %v1231_v9, %v1063_v45  ;;  %1101 = vmatmul.bf16.gmra.mxu1 %v1708_v42  ;;  %1181 = vmatmul.bf16.gmra.mxu3 %v1900_v43  ;;  %v1912_v9 = vor.u32 %v2132_v63, %v1909_v1  ;;  %v1732_v42 = vor.u32 %v2087_v30, %v1729_v32  ;;  %v2091_v63 = vld [vmem:[%s3318_s0 + $0x170] sm:$0xf0]  ;;  %v2090_v1 = vld [vmem:[%s3318_s0 + $0x16c] sm:$0xf] }
  0xe3   :  { %v1924_v43 = vor.u32 %v2135_v33, %v1921_v35 }
  0xe5   :  { %v2632_v50 = vpop.f32.mrf.mxu3  ;;  %v1238_v51 = vpop.f32.mrf.mxu2 }
  0xe6   :  { %v895_v52 = vpop.f32.mrf.mxu0 }
  0xe7   :  { %v1064_v54 = vpop.f32.mrf.mxu1 }
  0xe8   :  { %v1065_v56 = vadd.f32 %v1064_v54, %v895_v52 }
  0xea   :  { %v2634_v57 = vadd.f32 %v1233_v22, %v1065_v56  ;;  %2027 = vmatmul.msk.bf16.gmra.mxu2 %vm767_vm0, %v1736_v53  ;;  %v1748_v22 = vor.u32 %v2092_v15, %v1747_v14 }
  0xed   :  { %v2655_v2 = vpop.f32.mrf.mxu3  ;;  %v1241_v3 = vpop.f32.mrf.mxu2 }
  0xee   :  { %v898_v5 = vpop.f32.mrf.mxu0 }
  0xef   :  { %v1067_v11 = vpop.f32.mrf.mxu1 }
  0xf0   :  { %v1068_v12 = vadd.f32 %v1067_v11, %v898_v5  ;;  %v1933_v5 = vld [vmem:[%s3318_s0 + $0x2f4] sm:$0xf0]  ;;  %v1740_v11 = vor.u32 %v2091_v63, %v1739_v62 }
  0xf1   :  { %937 = vmatmul.bf16.gmra.mxu0 %v1716_v4  ;;  %v2138_v4 = vld [vmem:[%s3318_s0 + $0x2ec] sm:$0xf] }
  0xf2   :  { %v2657_v13 = vadd.f32 %v1236_v38, %v1068_v12  ;;  %1106 = vmatmul.bf16.gmra.mxu1 %v1720_v6  ;;  %1186 = vmatmul.bf16.gmra.mxu3 %v1912_v9  ;;  %v1936_v15 = vor.u32 %v2138_v4, %v1933_v5  ;;  %v2765_v4 = vsel %vm1371_vm1, %v2492_v7, -inf  ;;  %v1763_v7 = vld [vmem:[%s3318_s0 + $0x198] sm:$0xf] }
  0xf5   :  { %v2665_v17 = vpop.f32.mrf.mxu3  ;;  %v1243_v19 = vpop.f32.mrf.mxu2 }
  0xf6   :  { %v900_v20 = vpop.f32.mrf.mxu0 }
  0xf7   :  { %v1069_v24 = vpop.f32.mrf.mxu1 }
  0xf8   :  { %v1070_v25 = vadd.f32 %v1069_v24, %v900_v20  ;;  %v1771_v24 = vld [vmem:[%s3318_s0 + $0x1a0] sm:$0xf] }
  0xfa   :  { %v2667_v26 = vadd.f32 %v1238_v51, %v1070_v25  ;;  %2028 = vmatmul.msk.bf16.gmra.mxu2 %vm767_vm0, %v1748_v22  ;;  %v2095_v51 = vld [vmem:[%s3318_s0 + $0x190] sm:$0xf0]  ;;  %v2098_v25 = vld [vmem:[%s3318_s0 + $0x1a8] sm:$0xf0] }
  0xfb   :  { %v1760_v56 = vor.u32 %v2095_v51, %v1759_v49  ;;  %v1772_v32 = vor.u32 %v2098_v25, %v1771_v24  ;;  %v2097_v25 = vld [vmem:[%s3318_s0 + $0x1a0] sm:$0xf0] }
  0xfd   :  { %v2688_v36 = vpop.f32.mrf.mxu3  ;;  %v1246_v38 = vpop.f32.mrf.mxu2 }
  0xfe   :  { %v903_v41 = vpop.f32.mrf.mxu0 }
  0xff   :  { %v1072_v44 = vpop.f32.mrf.mxu1 }
 0x100   :  { %v1073_v45 = vadd.f32 %v1072_v44, %v903_v41  ;;  %v2094_v41 = vld [vmem:[%s3318_s0 + $0x188] sm:$0xf0]  ;;  %v1879_v44 = vld [vmem:[%s3318_s0 + $0x278] sm:$0xf] }
 0x101   :  { %942 = vmatmul.bf16.gmra.mxu0 %v1728_v39 }
 0x102   :  { %v2690_v48 = vadd.f32 %v1241_v3, %v1073_v45  ;;  %1111 = vmatmul.bf16.gmra.mxu1 %v1732_v42  ;;  %1191 = vmatmul.bf16.gmra.mxu3 %v1924_v43  ;;  %v1741_v3 = vld [vmem:[%s3318_s0 + $0x174] sm:$0xf0]  ;;  %v2093_v42 = vld [vmem:[%s3318_s0 + $0x184] sm:$0xf]  ;;  %v1753_v43 = vld [vmem:[%s3318_s0 + $0x18c] sm:$0xf0] }
 0x103   :  { %v1744_v14 = vor.u32 %v2090_v1, %v1741_v3  ;;  %v2125_v45 = vld [vmem:[%s3318_s0 + $0x280] sm:$0xf0]  ;;  %v1783_v1 = vld [vmem:[%s3318_s0 + $0x1b8] sm:$0xf] }
 0x104   :  { %v2101_v3 = vld [vmem:[%s3318_s0 + $0x1c0] sm:$0xf0] }
 0x105   :  { %v2698_v52 = vpop.f32.mrf.mxu3  ;;  %v1248_v53 = vpop.f32.mrf.mxu2 }
 0x106   :  { %v905_v54 = vpop.f32.mrf.mxu0 }
 0x107   :  { %v1074_v59 = vpop.f32.mrf.mxu1 }
 0x108   :  { %v1075_v60 = vadd.f32 %v1074_v59, %v905_v54  ;;  %v1880_v59 = vor.u32 %v2125_v45, %v1879_v44  ;;  %v1764_v44 = vor.u32 %v2097_v25, %v1763_v7  ;;  %v2100_v25 = vld [vmem:[%s3318_s0 + $0x1b8] sm:$0xf0] }
 0x10a   :  { %v2700_v61 = vadd.f32 %v1243_v19, %v1075_v60  ;;  %2029 = vmatmul.msk.bf16.gmra.mxu2 %vm767_vm0, %v1760_v56  ;;  %v1756_v56 = vor.u32 %v2093_v42, %v1753_v43 }
 0x10d   :  { %v2721_v6 = vpop.f32.mrf.mxu3  ;;  %v1251_v9 = vpop.f32.mrf.mxu2 }
 0x10e   :  { %3331 = vst [vmem:[#allocation6_spill] sm:$0xff] %v2721_v6  ;;  %v908_v12 = vpop.f32.mrf.mxu0 }
 0x10f   :  { %v1077_v19 = vpop.f32.mrf.mxu1 }
 0x110   :  { %v1078_v20 = vadd.f32 %v1077_v19, %v908_v12 }
 0x111   :  { %947 = vmatmul.bf16.gmra.mxu0 %v1740_v11 }
 0x112   :  { %v2723_v22 = vadd.f32 %v1246_v38, %v1078_v20  ;;  %1116 = vmatmul.bf16.gmra.mxu1 %v1744_v14  ;;  %1196 = vmatmul.bf16.gmra.mxu3 %v1936_v15  ;;  %v1751_v38 = vld [vmem:[%s3318_s0 + $0x180] sm:$0xf]  ;;  %v1784_v15 = vor.u32 %v2101_v3, %v1783_v1 }
 0x115   :  { %v2731_v27 = vpop.f32.mrf.mxu3  ;;  %v1253_v29 = vpop.f32.mrf.mxu2 }
 0x116   :  { %3332 = vst [vmem:[#allocation7_spill] sm:$0xff] %v2731_v27  ;;  %v910_v30 = vpop.f32.mrf.mxu0 }
 0x117   :  { %v1079_v33 = vpop.f32.mrf.mxu1 }
 0x118   :  { %v1080_v35 = vadd.f32 %v1079_v33, %v910_v30  ;;  %v2096_v30 = vld [vmem:[%s3318_s0 + $0x19c] sm:$0xf] }
 0x119   :  { %v2128_v33 = vld [vmem:[%s3318_s0 + $0x298] sm:$0xf0] }
 0x11a   :  { %v2733_v39 = vadd.f32 %v1248_v53, %v1080_v35  ;;  %2030 = vmatmul.msk.bf16.gmra.mxu2 %vm767_vm0, %v1772_v32  ;;  %v1752_v53 = vor.u32 %v2094_v41, %v1751_v38  ;;  %v1765_v32 = vld [vmem:[%s3318_s0 + $0x1a4] sm:$0xf0]  ;;  %v2795_v35 = vsel %vm1371_vm1, %v2502_v16, -inf  ;;  %v1795_v16 = vld [vmem:[%s3318_s0 + $0x1d0] sm:$0xf] }
 0x11d   :  { %v2754_v49 = vpop.f32.mrf.mxu3  ;;  %v1256_v51 = vpop.f32.mrf.mxu2 }
 0x11e   :  { %3333 = vst [vmem:[#allocation8_spill] sm:$0xff] %v2754_v49  ;;  %v913_v54 = vpop.f32.mrf.mxu0 }
 0x11f   :  { %v1082_v60 = vpop.f32.mrf.mxu1 }
 0x120   :  { %v1083_v62 = vadd.f32 %v1082_v60, %v913_v54 }
 0x121   :  { %952 = vmatmul.bf16.gmra.mxu0 %v1752_v53  ;;  %v1768_v53 = vor.u32 %v2096_v30, %v1765_v32  ;;  %v2099_v30 = vld [vmem:[%s3318_s0 + $0x1b4] sm:$0xf]  ;;  %v1777_v32 = vld [vmem:[%s3318_s0 + $0x1bc] sm:$0xf0] }
 0x122   :  { %v1252_v63 = vadd.f32 %v1251_v9, %v1083_v62  ;;  %1121 = vmatmul.bf16.gmra.mxu1 %v1756_v56  ;;  %2039 = vmatmul.msk.bf16.vlgmr.msra.gmra.mxu3 %vm767_vm0, %v1880_v59  ;;  %v2104_v62 = vld [vmem:[%s3318_s0 + $0x1d8] sm:$0xf0] }
 0x124   :  { %v2768_v5 = vsel %vm1371_vm1, %v1252_v63, -inf  ;;  %v2813_v63 = vsel %vm1371_vm1, %v2525_v31, -inf  ;;  %v1775_v31 = vld [vmem:[%s3318_s0 + $0x1b0] sm:$0xf] }
 0x125   :  { %v2772_v11 = vpop.f32.mrf.mxu3  ;;  %v1258_v12 = vpop.f32.mrf.mxu2 }
 0x126   :  { %3334 = vst [vmem:[#allocation9_spill] sm:$0xff] %v2772_v11  ;;  %v915_v14 = vpop.f32.mrf.mxu0 }
 0x127   :  { %v1084_v19 = vpop.f32.mrf.mxu1 }
 0x128   :  { %v1085_v20 = vadd.f32 %v1084_v19, %v915_v14  ;;  %v1796_v19 = vor.u32 %v2104_v62, %v1795_v16 }
 0x12a   :  { %v1254_v24 = vadd.f32 %v1253_v29, %v1085_v20  ;;  %2031 = vmatmul.msk.bf16.gmra.mxu2 %vm767_vm0, %v1784_v15  ;;  %v1891_v29 = vld [vmem:[%s3318_s0 + $0x290] sm:$0xf] }
 0x12b   :  { %v1892_v54 = vor.u32 %v2128_v33, %v1891_v29  ;;  %v2131_v29 = vld [vmem:[%s3318_s0 + $0x2b0] sm:$0xf0]  ;;  %v2843_v33 = vsel %vm1371_vm1, %v2535_v40, -inf  ;;  %v1807_v40 = vld [vmem:[%s3318_s0 + $0x1e8] sm:$0xf] }
 0x12c   :  { %v2798_v38 = vsel %vm1371_vm1, %v1254_v24, -inf }
 0x12d   :  { %v2802_v42 = vpop.f32.mrf.mxu3  ;;  %v1261_v43 = vpop.f32.mrf.mxu2 }
 0x12e   :  { %3335 = vst [vmem:[#allocation10_spill] sm:$0xff] %v2802_v42  ;;  %v918_v45 = vpop.f32.mrf.mxu0 }
 0x12f   :  { %v1087_v56 = vpop.f32.mrf.mxu1 }
 0x130   :  { %v1088_v59 = vadd.f32 %v1087_v56, %v918_v45  ;;  %v1776_v56 = vor.u32 %v2100_v25, %v1775_v31 }
 0x131   :  { %957 = vmatmul.bf16.gmra.mxu0 %v1764_v44 }
 0x132   :  { %v1257_v60 = vadd.f32 %v1256_v51, %v1088_v59  ;;  %1126 = vmatmul.bf16.gmra.mxu1 %v1768_v53  ;;  %2040 = vmatmul.msk.bf16.gmra.mxu3 %vm767_vm0, %v1892_v54 }
 0x134   :  { %v2816_v1 = vsel %vm1371_vm1, %v1257_v60, -inf  ;;  %v1780_v60 = vor.u32 %v2099_v30, %v1777_v32 }
 0x135   :  { %v2820_v3 = vpop.f32.mrf.mxu3  ;;  %v1263_v14 = vpop.f32.mrf.mxu2 }
 0x136   :  { %3336 = vst [vmem:[#allocation11_spill] sm:$0xff] %v2820_v3  ;;  %v920_v15 = vpop.f32.mrf.mxu0 }
 0x137   :  { %v1089_v20 = vpop.f32.mrf.mxu1 }
 0x138   :  { %v1090_v24 = vadd.f32 %v1089_v20, %v920_v15  ;;  %v2107_v20 = vld [vmem:[%s3318_s0 + $0x1f0] sm:$0xf0] }
 0x139   :  { %v1808_v32 = vor.u32 %v2107_v20, %v1807_v40 }
 0x13a   :  { %v1259_v7 = vadd.f32 %v1258_v12, %v1090_v24  ;;  %2032 = vmatmul.msk.bf16.gmra.mxu2 %vm767_vm0, %v1796_v19  ;;  %v1903_v12 = vld [vmem:[%s3318_s0 + $0x2a8] sm:$0xf]  ;;  %v2861_v24 = vsel %vm1371_vm1, %v2558_v55, -inf }
 0x13b   :  { %v1904_v16 = vor.u32 %v2131_v29, %v1903_v12  ;;  %v1787_v55 = vld [vmem:[%s3318_s0 + $0x1c8] sm:$0xf] }
 0x13c   :  { %v2846_v44 = vsel %vm1371_vm1, %v1259_v7, -inf }
 0x13d   :  { %v2850_v53 = vpop.f32.mrf.mxu3  ;;  %v1266_v54 = vpop.f32.mrf.mxu2 }
 0x13e   :  { %3337 = vst [vmem:[#allocation12_spill] sm:$0xff] %v2850_v53  ;;  %v923_v59 = vpop.f32.mrf.mxu0 }
 0x13f   :  { %v1092_v62 = vpop.f32.mrf.mxu1 }
 0x140   :  { %v1093_v15 = vadd.f32 %v1092_v62, %v923_v59  ;;  %v2103_v59 = vld [vmem:[%s3318_s0 + $0x1d0] sm:$0xf0]  ;;  %v2134_v62 = vld [vmem:[%s3318_s0 + $0x2c8] sm:$0xf0] }
 0x141   :  { %962 = vmatmul.bf16.gmra.mxu0 %v1776_v56 }
 0x142   :  { %v1262_v19 = vadd.f32 %v1261_v43, %v1093_v15  ;;  %1131 = vmatmul.bf16.gmra.mxu1 %v1780_v60  ;;  %2041 = vmatmul.msk.bf16.gmra.mxu3 %vm767_vm0, %v1904_v16  ;;  %v2102_v60 = vld [vmem:[%s3318_s0 + $0x1cc] sm:$0xf]  ;;  %v1789_v16 = vld [vmem:[%s3318_s0 + $0x1d4] sm:$0xf0]  ;;  %v2891_v15 = vsel %vm1371_vm1, %v2568_v0, -inf }
 0x143   :  { %v1819_v0 = vld [vmem:[%s3318_s0 + $0x200] sm:$0xf] }
 0x144   :  { %v2864_v7 = vsel %vm1371_vm1, %v1262_v19, -inf }
 0x145   :  { %v2868_v31 = vpop.f32.mrf.mxu3  ;;  %v1268_v25 = vpop.f32.mrf.mxu2 }
 0x146   :  { %v925_v30 = vpop.f32.mrf.mxu0 }
 0x147   :  { %v1094_v12 = vpop.f32.mrf.mxu1 }
 0x148   :  { %v1095_v29 = vadd.f32 %v1094_v12, %v925_v30 }
 0x14a   :  { %v1264_v56 = vadd.f32 %v1263_v14, %v1095_v29  ;;  %2033 = vmatmul.msk.bf16.gmra.mxu2 %vm767_vm0, %v1808_v32  ;;  %v1915_v14 = vld [vmem:[%s3318_s0 + $0x2c0] sm:$0xf]  ;;  %v1788_v32 = vor.u32 %v2103_v59, %v1787_v55  ;;  %v1792_v29 = vor.u32 %v2102_v60, %v1789_v16  ;;  %v2909_v55 = vsel %vm1371_vm1, %v2591_v18, -inf }
 0x14b   :  { %v1916_v43 = vor.u32 %v2134_v62, %v1915_v14  ;;  %v1799_v18 = vld [vmem:[%s3318_s0 + $0x1e0] sm:$0xf] }
 0x14c   :  { %v2894_v19 = vsel %vm1371_vm1, %v1264_v56, -inf  ;;  %v2110_v56 = vld [vmem:[%s3318_s0 + $0x208] sm:$0xf0] }
 0x14d   :  { %v2898_v20 = vpop.f32.mrf.mxu3  ;;  %v1271_v30 = vpop.f32.mrf.mxu2  ;;  %v1820_v60 = vor.u32 %v2110_v56, %v1819_v0  ;;  %v2939_v0 = vsel %vm1371_vm1, %v2601_v28, -inf  ;;  %v1831_v28 = vld [vmem:[%s3318_s0 + $0x218] sm:$0xf] }
 0x14e   :  { %v928_v12 = vpop.f32.mrf.mxu0 }
 0x14f   :  { %v1097_v45 = vpop.f32.mrf.mxu1 }
 0x150   :  { %v1098_v51 = vadd.f32 %v1097_v45, %v928_v12  ;;  %v1801_v12 = vld [vmem:[%s3318_s0 + $0x1ec] sm:$0xf0] }
 0x151   :  { %967 = vmatmul.bf16.gmra.mxu0 %v1788_v32  ;;  %v2105_v32 = vld [vmem:[%s3318_s0 + $0x1e4] sm:$0xf] }
 0x152   :  { %v1267_v41 = vadd.f32 %v1266_v54, %v1098_v51  ;;  %1136 = vmatmul.bf16.gmra.mxu1 %v1792_v29  ;;  %2042 = vmatmul.msk.bf16.gmra.mxu3 %vm767_vm0, %v1916_v43  ;;  %v2137_v29 = vld [vmem:[%s3318_s0 + $0x2e0] sm:$0xf0]  ;;  %v1804_v40 = vor.u32 %v2105_v32, %v1801_v12 }
 0x154   :  { %v2912_v59 = vsel %vm1371_vm1, %v1267_v41, -inf  ;;  %v2106_v41 = vld [vmem:[%s3318_s0 + $0x1e8] sm:$0xf0] }
 0x155   :  { %v2916_v45 = vpop.f32.mrf.mxu3  ;;  %v1273_v54 = vpop.f32.mrf.mxu2 }
 0x156   :  { %v930_v43 = vpop.f32.mrf.mxu0 }
 0x157   :  { %v1099_v16 = vpop.f32.mrf.mxu1 }
 0x158   :  { %v1100_v14 = vadd.f32 %v1099_v16, %v930_v43 }
 0x15a   :  { %v1269_v62 = vadd.f32 %v1268_v25, %v1100_v14  ;;  %2034 = vmatmul.msk.bf16.gmra.mxu2 %vm767_vm0, %v1820_v60  ;;  %v1927_v25 = vld [vmem:[%s3318_s0 + $0x2d8] sm:$0xf]  ;;  %v1800_v14 = vor.u32 %v2106_v41, %v1799_v18  ;;  %v2957_v18 = vsel %vm1371_vm1, %v2624_v46, -inf }
 0x15b   :  { %v1928_v9 = vor.u32 %v2137_v29, %v1927_v25  ;;  %v1811_v46 = vld [vmem:[%s3318_s0 + $0x1f8] sm:$0xf]  ;;  %v2108_v25 = vld [vmem:[%s3318_s0 + $0x1fc] sm:$0xf]  ;;  %v1813_v29 = vld [vmem:[%s3318_s0 + $0x204] sm:$0xf0] }
 0x15c   :  { %v2942_v56 = vsel %vm1371_vm1, %v1269_v62, -inf  ;;  %v2113_v62 = vld [vmem:[%s3318_s0 + $0x220] sm:$0xf0]  ;;  %v1816_v43 = vor.u32 %v2108_v25, %v1813_v29 }
 0x15d   :  { %v2946_v60 = vpop.f32.mrf.mxu3  ;;  %v1276_v16 = vpop.f32.mrf.mxu2 }
 0x15e   :  { %v933_v51 = vpop.f32.mrf.mxu0 }
 0x15f   :  { %v1102_v53 = vpop.f32.mrf.mxu1 }
 0x160   :  { %v1103_v47 = vadd.f32 %v1102_v53, %v933_v51 }
 0x161   :  { %972 = vmatmul.bf16.gmra.mxu0 %v1800_v14  ;;  %v2140_v14 = vld [vmem:[%s3318_s0 + $0x2f8] sm:$0xf0] }
 0x162   :  { %v1272_v3 = vadd.f32 %v1271_v30, %v1103_v47  ;;  %1141 = vmatmul.bf16.gmra.mxu1 %v1804_v40  ;;  %2043 = vmatmul.msk.bf16.gmra.mxu3 %vm767_vm0, %v1928_v9  ;;  %v1832_v30 = vor.u32 %v2113_v62, %v1831_v28  ;;  %v2987_v28 = vsel %vm1371_vm1, %v2634_v57, -inf  ;;  %v1843_v57 = vld [vmem:[%s3318_s0 + $0x230] sm:$0xf] }
 0x164   :  { %v2960_v41 = vsel %vm1371_vm1, %v1272_v3, -inf  ;;  %v2109_v3 = vld [vmem:[%s3318_s0 + $0x200] sm:$0xf0] }
 0x165   :  { %v2964_v53 = vpop.f32.mrf.mxu3  ;;  %v1278_v9 = vpop.f32.mrf.mxu2 }
 0x166   :  { %v935_v40 = vpop.f32.mrf.mxu0 }
 0x167   :  { %v1104_v51 = vpop.f32.mrf.mxu1 }
 0x168   :  { %v1105_v32 = vadd.f32 %v1104_v51, %v935_v40 }
 0x16a   :  { %v1274_v12 = vadd.f32 %v1273_v54, %v1105_v32  ;;  %2035 = vmatmul.msk.bf16.gmra.mxu2 %vm767_vm0, %v1832_v30  ;;  %v1939_v54 = vld [vmem:[%s3318_s0 + $0x2f0] sm:$0xf]  ;;  %v1812_v32 = vor.u32 %v2109_v3, %v1811_v46  ;;  %v3005_v46 = vsel %vm1371_vm1, %v2657_v13, -inf }
 0x16b   :  { %v1940_v34 = vor.u32 %v2140_v14, %v1939_v54  ;;  %v1823_v13 = vld [vmem:[%s3318_s0 + $0x210] sm:$0xf]  ;;  %v2111_v54 = vld [vmem:[%s3318_s0 + $0x214] sm:$0xf]  ;;  %v1825_v14 = vld [vmem:[%s3318_s0 + $0x21c] sm:$0xf0] }
 0x16c   :  { %v2990_v62 = vsel %vm1371_vm1, %v1274_v12, -inf  ;;  %v2116_v12 = vld [vmem:[%s3318_s0 + $0x238] sm:$0xf0] }
 0x16d   :  { %v2994_v30 = vpop.f32.mrf.mxu3  ;;  %v1281_v51 = vpop.f32.mrf.mxu2 }
 0x16e   :  { %v938_v47 = vpop.f32.mrf.mxu0 }
 0x16f   :  { %v1107_v49 = vpop.f32.mrf.mxu1 }
 0x170   :  { %v1108_v42 = vadd.f32 %v1107_v49, %v938_v47 }
 0x171   :  { %977 = vmatmul.bf16.gmra.mxu0 %v1812_v32 }
 0x172   :  { %v1277_v23 = vadd.f32 %v1276_v16, %v1108_v42  ;;  %1146 = vmatmul.bf16.gmra.mxu1 %v1816_v43  ;;  %2044 = vmatmul.msk.bf16.gmra.mxu3 %vm767_vm0, %v1940_v34  ;;  %v1844_v16 = vor.u32 %v2116_v12, %v1843_v57  ;;  %v3046_v57 = vsel %vm1371_vm1, %v2690_v48, -inf  ;;  %v1835_v48 = vld [vmem:[%s3318_s0 + $0x228] sm:$0xf] }
 0x174   :  { %v3008_v3 = vsel %vm1371_vm1, %v1277_v23, -inf  ;;  %v2112_v23 = vld [vmem:[%s3318_s0 + $0x218] sm:$0xf0] }
 0x175   :  { %v3012_v42 = vpop.f32.mrf.mxu3  ;;  %v1283_v34 = vpop.f32.mrf.mxu2 }
 0x176   :  { %v940_v43 = vpop.f32.mrf.mxu0 }
 0x177   :  { %v1109_v47 = vpop.f32.mrf.mxu1 }
 0x178   :  { %v1110_v25 = vadd.f32 %v1109_v47, %v940_v43 }
 0x17a   :  { %v1279_v29 = vadd.f32 %v1278_v9, %v1110_v25  ;;  %2036 = vmatmul.msk.bf16.gmra.mxu2 %vm767_vm0, %v1844_v16  ;;  %v3029_v9 = vsel %vm1371_vm1, %v2667_v26, -inf  ;;  %v1824_v16 = vor.u32 %v2112_v23, %v1823_v13  ;;  %v1828_v25 = vor.u32 %v2111_v54, %v1825_v14  ;;  %v1855_v26 = vld [vmem:[%s3318_s0 + $0x248] sm:$0xf] }
 0x17c   :  { %v3032_v32 = vsel %vm1371_vm1, %v1279_v29, -inf  ;;  %v2119_v29 = vld [vmem:[%s3318_s0 + $0x250] sm:$0xf0] }
 0x17d   :  { %v3036_v12 = vpop.f32.mrf.mxu3  ;;  %v1286_v43 = vpop.f32.mrf.mxu2  ;;  %v1856_v54 = vor.u32 %v2119_v29, %v1855_v26  ;;  %v1837_v26 = vld [vmem:[%s3318_s0 + $0x234] sm:$0xf0] }
 0x17e   :  { %v943_v47 = vpop.f32.mrf.mxu0 }
 0x17f   :  { %v1112_v49 = vpop.f32.mrf.mxu1 }
 0x180   :  { %v1113_v40 = vadd.f32 %v1112_v49, %v943_v47 }
 0x181   :  { %982 = vmatmul.bf16.gmra.mxu0 %v1824_v16 }
 0x182   :  { %v1282_v27 = vadd.f32 %v1281_v51, %v1113_v40  ;;  %1151 = vmatmul.bf16.gmra.mxu1 %v1828_v25  ;;  %v2114_v25 = vld [vmem:[%s3318_s0 + $0x22c] sm:$0xf] }
 0x183   :  { %v1840_v11 = vor.u32 %v2114_v25, %v1837_v26 }
 0x184   :  { %v3049_v13 = vsel %vm1371_vm1, %v1282_v27, -inf  ;;  %v2115_v27 = vld [vmem:[%s3318_s0 + $0x230] sm:$0xf0] }
 0x185   :  { %3338 = vst [vmem:[#allocation13_spill] sm:$0xff] %v3049_v13  ;;  %v3053_v40 = vpop.f32.mrf.mxu3  ;;  %v1288_v51 = vpop.f32.mrf.mxu2 }
 0x186   :  { %v945_v23 = vpop.f32.mrf.mxu0 }
 0x187   :  { %v1114_v14 = vpop.f32.mrf.mxu1 }
 0x188   :  { %v1115_v16 = vadd.f32 %v1114_v14, %v945_v23  ;;  %v3087_v23 = vsel %vm1371_vm1, %v2723_v22, -inf  ;;  %v3099_v22 = vsel %vm1371_vm1, %v2733_v39, -inf  ;;  %v3346_v39 = vmax.f32 %v2765_v4, %v2768_v5 }
 0x189   :  { %3340 = vst [vmem:[#allocation15_spill] sm:$0xff] %v3087_v23 }
 0x18a   :  { %v1284_v47 = vadd.f32 %v1283_v34, %v1115_v16  ;;  %2037 = vmatmul.msk.bf16.gmra.mxu2 %vm767_vm0, %v1856_v54  ;;  %v3070_v34 = vsel %vm1371_vm1, %v2700_v61, -inf  ;;  %v1836_v16 = vor.u32 %v2115_v27, %v1835_v48  ;;  %v1867_v61 = vld [vmem:[%s3318_s0 + $0x260] sm:$0xf]  ;;  %3343 = vst [vmem:[#allocation18_spill] sm:$0xff] %v3099_v22 }
 0x18c   :  { %v3073_v29 = vsel %vm1371_vm1, %v1284_v47, -inf  ;;  %v2122_v47 = vld [vmem:[%s3318_s0 + $0x268] sm:$0xf0] }
 0x18d   :  { %3339 = vst [vmem:[#allocation14_spill] sm:$0xff] %v3073_v29  ;;  %v3077_v54 = vpop.f32.mrf.mxu3  ;;  %v1291_v14 = vpop.f32.mrf.mxu2 }
 0x18e   :  { %v948_v49 = vpop.f32.mrf.mxu0 }
 0x18f   :  { %v1117_v10 = vpop.f32.mrf.mxu1 }
 0x190   :  { %v1118_v6 = vadd.f32 %v1117_v10, %v948_v49  ;;  %v1868_v49 = vor.u32 %v2122_v47, %v1867_v61 }
 0x191   :  { %987 = vmatmul.bf16.gmra.mxu0 %v1836_v16 }
 0x192   :  { %v1287_v13 = vadd.f32 %v1286_v43, %v1118_v6  ;;  %1156 = vmatmul.bf16.gmra.mxu1 %v1840_v11 }
 0x194   :  { %v3090_v48 = vsel %vm1371_vm1, %v1287_v13, -inf }
 0x195   :  { %3341 = vst [vmem:[#allocation16_spill] sm:$0xff] %v3090_v48  ;;  %v3094_v6 = vpop.f32.mrf.mxu3  ;;  %v1293_v11 = vpop.f32.mrf.mxu2 }
 0x196   :  { %3342 = vst [vmem:[#allocation17_spill] sm:$0xff] %v3094_v6  ;;  %v950_v43 = vpop.f32.mrf.mxu0 }
 0x197   :  { %v1119_v27 = vpop.f32.mrf.mxu1 }
 0x198   :  { %v1120_v25 = vadd.f32 %v1119_v27, %v950_v43 }
 0x19a   :  { %v1289_v26 = vadd.f32 %v1288_v51, %v1120_v25  ;;  %2038 = vmatmul.msk.bf16.gmra.mxu2 %vm767_vm0, %v1868_v49 }
 0x19c   :  { %v3102_v13 = vsel %vm1371_vm1, %v1289_v26, -inf }
 0x19d   :  { %3344 = vst [vmem:[#allocation19_spill] sm:$0xff] %v3102_v13  ;;  %v1296_v10 = vpop.f32.mrf.mxu2  ;;  %v3106_v23 = vpop.f32.mrf.mxu3 }
 0x19e   :  { %v953_v48 = vpop.f32.mrf.mxu0  ;;  %3345 = vst [vmem:[#allocation20_spill] sm:$0xff] %v3106_v23 }
 0x19f   :  { %v1122_v61 = vpop.f32.mrf.mxu1 }
 0x1a0   :  { %v1123_v47 = vadd.f32 %v1122_v61, %v953_v48  ;;  %v3347_v48 = vmax.f32 %v2795_v35, %v2798_v38 }
 0x1a2   :  { %v1292_v43 = vadd.f32 %v1291_v14, %v1123_v47 }
 0x1a4   :  { %v1375_v51 = vsel %vm1371_vm1, %v1292_v43, -inf }
 0x1a5   :  { %v1298_v49 = vpop.f32.mrf.mxu2  ;;  %v3112_v27 = vmax.f32 %v3346_v39, %v1375_v51  ;;  %v1341_v29 = vpop.f32.mrf.mxu3  ;;  %v3348_v39 = vmax.f32 %v2813_v63, %v2816_v1  ;;  %v1173_v63 = vadd.f32 %v2868_v31, %v2566_v58 }
 0x1a6   :  { %v955_v25 = vpop.f32.mrf.mxu0 }
 0x1a7   :  { %v1124_v26 = vpop.f32.mrf.mxu1 }
 0x1a8   :  { %v1125_v6 = vadd.f32 %v1124_v26, %v955_v25 }
 0x1aa   :  { %v1294_v16 = vadd.f32 %v1293_v11, %v1125_v6 }
 0x1ac   :  { %v1382_v13 = vsel %vm1371_vm1, %v1294_v16, -inf }
 0x1ad   :  { %v1301_v22 = vpop.f32.mrf.mxu2  ;;  %v3118_v14 = vmax.f32 %v3347_v48, %v1382_v13  ;;  %v1343_v4 = vpop.f32.mrf.mxu3 }
 0x1ae   :  { %v958_v61 = vpop.f32.mrf.mxu0 }
 0x1af   :  { %v1127_v47 = vpop.f32.mrf.mxu1 }
 0x1b0   :  { %v1128_v43 = vadd.f32 %v1127_v47, %v958_v61  ;;  %v1342_v47 = vadd.f32 %v1341_v29, %v1173_v63  ;;  %v1175_v29 = vadd.f32 %v2898_v20, %v2589_v8 }
 0x1b2   :  { %v1297_v23 = vadd.f32 %v1296_v10, %v1128_v43  ;;  %v3349_v10 = vmax.f32 %v2843_v33, %v2846_v44  ;;  %v3141_v33 = vld [vmem:[%s3319_s2] ss:$0 sm:$0xff] }
 0x1b4   :  { %v1389_v5 = vsel %vm1371_vm1, %v1297_v23, -inf }
 0x1b5   :  { %v1303_v51 = vpop.f32.mrf.mxu2  ;;  %v3124_v6 = vmax.f32 %v3348_v39, %v1389_v5  ;;  %v1346_v38 = vpop.f32.mrf.mxu3 }
 0x1b6   :  { %v960_v11 = vpop.f32.mrf.mxu0 }
 0x1b7   :  { %v1129_v16 = vpop.f32.mrf.mxu1 }
 0x1b8   :  { %v1130_v25 = vadd.f32 %v1129_v16, %v960_v11  ;;  %v1405_v11 = vsel %vm1371_vm1, %v1342_v47, -inf }
 0x1ba   :  { %v1299_v26 = vadd.f32 %v1298_v49, %v1130_v25  ;;  %v3350_v49 = vmax.f32 %v2861_v24, %v2864_v7  ;;  %v1344_v24 = vadd.f32 %v1343_v4, %v1175_v29  ;;  %v1178_v4 = vadd.f32 %v2916_v45, %v2599_v21 }
 0x1bc   :  { %v1396_v35 = vsel %vm1371_vm1, %v1299_v26, -inf  ;;  %v1412_v47 = vsel %vm1371_vm1, %v1344_v24, -inf }
 0x1bd   :  { %v1306_v13 = vpop.f32.mrf.mxu2  ;;  %v3130_v48 = vmax.f32 %v3349_v10, %v1396_v35  ;;  %v1348_v25 = vpop.f32.mrf.mxu3 }
 0x1be   :  { %v963_v23 = vpop.f32.mrf.mxu0 }
 0x1bf   :  { %v1132_v61 = vpop.f32.mrf.mxu1 }
 0x1c0   :  { %v1133_v1 = vadd.f32 %v1132_v61, %v963_v23  ;;  %v3351_v61 = vmax.f32 %v2891_v15, %v2894_v19  ;;  %v1347_v15 = vadd.f32 %v1346_v38, %v1178_v4  ;;  %v1180_v38 = vadd.f32 %v2946_v60, %v2622_v37 }
 0x1c2   :  { %v1302_v43 = vadd.f32 %v1301_v22, %v1133_v1 }
 0x1c4   :  { %v1403_v5 = vsel %vm1371_vm1, %v1302_v43, -inf }
 0x1c5   :  { %v1404_v39 = vmax.f32 %v3350_v49, %v1403_v5  ;;  %v1308_v44 = vpop.f32.mrf.mxu2  ;;  %v1351_v5 = vpop.f32.mrf.mxu3 }
 0x1c6   :  { %v965_v16 = vpop.f32.mrf.mxu0 }
 0x1c7   :  { %v1406_v58 = vmax.f32 %v1404_v39, %v1405_v11  ;;  %v1134_v31 = vpop.f32.mrf.mxu1 }
 0x1c8   :  { %v1135_v22 = vadd.f32 %v1134_v31, %v965_v16 }
 0x1c9   :  { %v1492_v26 = vadd.f32 %v3141_v33, %v1406_v58  ;;  %v3352_v58 = vmax.f32 %v2909_v55, %v2912_v59 }
 0x1ca   :  { %v1304_v7 = vadd.f32 %v1303_v51, %v1135_v22  ;;  %v1419_v22 = vsel %vm1371_vm1, %v1347_v15, -inf }
 0x1cb   :  { %v1508_v35 = vmax.f32 %v1492_v26, 0.0 }
 0x1cc   :  { %v1410_v10 = vsel %vm1371_vm1, %v1304_v7, -inf  ;;  %v1349_v7 = vadd.f32 %v1348_v25, %v1180_v38 }
 0x1cd   :  { %v1524_v23 = vpack.c.bf16 %v1508_v35, %v1508_v35  ;;  %v1411_v63 = vmax.f32 %v3351_v61, %v1410_v10  ;;  %v1311_v1 = vpop.f32.mrf.mxu2  ;;  %v1353_v59 = vpop.f32.mrf.mxu3  ;;  %v3353_v61 = vmax.f32 %v2939_v0, %v2942_v56 }
 0x1ce   :  { %v968_v43 = vpop.f32.mrf.mxu0 }
 0x1cf   :  { %1541 = vst.msk [vmem:[%s3320_s3 + $0x10] sm:$0xf] %vm1536_vm2, %v1524_v23  ;;  %v1413_v8 = vmax.f32 %v1411_v63, %v1412_v47  ;;  %v1137_v20 = vpop.f32.mrf.mxu1 }
 0x1d0   :  { %v1138_v51 = vadd.f32 %v1137_v20, %v968_v43  ;;  %v1426_v43 = vsel %vm1371_vm1, %v1349_v7, -inf }
 0x1d1   :  { %v1493_v49 = vadd.f32 %v3141_v33, %v1413_v8 }
 0x1d2   :  { %v1307_v19 = vadd.f32 %v1306_v13, %v1138_v51 }
 0x1d3   :  { %v1509_v39 = vmax.f32 %v1493_v49, 0.0 }
 0x1d4   :  { %v1417_v11 = vsel %vm1371_vm1, %v1307_v19, -inf  ;;  %v3354_v19 = vmax.f32 %v2957_v18, %v2960_v41 }
 0x1d5   :  { %v1525_v16 = vpack.c.bf16 %v1509_v39, %v1509_v39  ;;  %v1418_v31 = vmax.f32 %v3352_v58, %v1417_v11  ;;  %v1313_v29 = vpop.f32.mrf.mxu2  ;;  %v1356_v49 = vpop.f32.mrf.mxu3 }
 0x1d6   :  { %v970_v26 = vpop.f32.mrf.mxu0 }
 0x1d7   :  { %1542 = vst.msk [vmem:[%s3320_s3 + $0x14] sm:$0xf] %vm1536_vm2, %v1525_v16  ;;  %v1420_v21 = vmax.f32 %v1418_v31, %v1419_v22  ;;  %v1139_v45 = vpop.f32.mrf.mxu1 }
 0x1d8   :  { %v1140_v13 = vadd.f32 %v1139_v45, %v970_v26  ;;  %v3355_v45 = vmax.f32 %v2987_v28, %v2990_v62 }
 0x1d9   :  { %v1494_v24 = vadd.f32 %v3141_v33, %v1420_v21 }
 0x1da   :  { %v1309_v55 = vadd.f32 %v1308_v44, %v1140_v13  ;;  %v1183_v44 = vadd.f32 %v2964_v53, %v2632_v50 }
 0x1db   :  { %v1510_v35 = vmax.f32 %v1494_v24, 0.0 }
 0x1dc   :  { %v1424_v10 = vsel %vm1371_vm1, %v1309_v55, -inf  ;;  %v1352_v4 = vadd.f32 %v1351_v5, %v1183_v44 }
 0x1dd   :  { %v1526_v23 = vpack.c.bf16 %v1510_v35, %v1510_v35  ;;  %v1425_v63 = vmax.f32 %v3353_v61, %v1424_v10  ;;  %v1316_v47 = vpop.f32.mrf.mxu2  ;;  %v1358_v55 = vpop.f32.mrf.mxu3 }
 0x1de   :  { %v973_v8 = vpop.f32.mrf.mxu0  ;;  %v1433_v16 = vsel %vm1371_vm1, %v1352_v4, -inf }
 0x1df   :  { %1543 = vst.msk [vmem:[%s3320_s3 + $0x18] sm:$0xf] %vm1536_vm2, %v1526_v23  ;;  %v1427_v37 = vmax.f32 %v1425_v63, %v1426_v43  ;;  %v1142_v60 = vpop.f32.mrf.mxu1  ;;  %v3356_v63 = vmax.f32 %v3005_v46, %v3008_v3 }
 0x1e0   :  { %v1143_v25 = vadd.f32 %v1142_v60, %v973_v8 }
 0x1e1   :  { %v1495_v20 = vadd.f32 %v3141_v33, %v1427_v37 }
 0x1e2   :  { %v1312_v0 = vadd.f32 %v1311_v1, %v1143_v25  ;;  %v1185_v1 = vadd.f32 %v2994_v30, %v2655_v2 }
 0x1e3   :  { %v1511_v56 = vmax.f32 %v1495_v20, 0.0 }
 0x1e4   :  { %v1431_v51 = vsel %vm1371_vm1, %v1312_v0, -inf  ;;  %v1354_v22 = vadd.f32 %v1353_v59, %v1185_v1 }
 0x1e5   :  { %v1527_v15 = vpack.c.bf16 %v1511_v56, %v1511_v56  ;;  %v1432_v39 = vmax.f32 %v3354_v19, %v1431_v51  ;;  %v1318_v11 = vpop.f32.mrf.mxu2  ;;  %v1361_v25 = vpop.f32.mrf.mxu3  ;;  %v3357_v51 = vmax.f32 %v3029_v9, %v3032_v32 }
 0x1e6   :  { %v975_v58 = vpop.f32.mrf.mxu0  ;;  %v1440_v24 = vsel %vm1371_vm1, %v1354_v22, -inf }
 0x1e7   :  { %1544 = vst.msk [vmem:[%s3320_s3 + $0x1c] sm:$0xf] %vm1536_vm2, %v1527_v15  ;;  %v1434_v50 = vmax.f32 %v1432_v39, %v1433_v16  ;;  %v1144_v53 = vpop.f32.mrf.mxu1 }
 0x1e8   :  { %v1145_v5 = vadd.f32 %v1144_v53, %v975_v58 }
 0x1e9   :  { %v1496_v31 = vadd.f32 %v3141_v33, %v1434_v50 }
 0x1ea   :  { %v1314_v18 = vadd.f32 %v1313_v29, %v1145_v5  ;;  %v1188_v29 = vadd.f32 %v3012_v42, %v2665_v17 }
 0x1eb   :  { %v1512_v41 = vmax.f32 %v1496_v31, 0.0  ;;  %v3358_v31 = vld [vmem:[#allocation13_spill] sm:$0xff] }
 0x1ec   :  { %v1438_v26 = vsel %vm1371_vm1, %v1314_v18, -inf  ;;  %v1357_v28 = vadd.f32 %v1356_v49, %v1188_v29  ;;  %v3359_v22 = vmax.f32 %v3046_v57, %v3358_v31  ;;  %v3373_v31 = vld [vmem:[#allocation20_spill] sm:$0xff] }
 0x1ed   :  { %v1528_v21 = vpack.c.bf16 %v1512_v41, %v1512_v41  ;;  %v1439_v38 = vmax.f32 %v3355_v45, %v1438_v26  ;;  %v1321_v13 = vpop.f32.mrf.mxu2  ;;  %v1363_v32 = vpop.f32.mrf.mxu3  ;;  %v3360_v45 = vld [vmem:[#allocation6_spill] sm:$0xff] }
 0x1ee   :  { %v978_v7 = vpop.f32.mrf.mxu0  ;;  %v1447_v37 = vsel %vm1371_vm1, %v1357_v28, -inf }
 0x1ef   :  { %1545 = vst.msk [vmem:[%s3320_s3 + $0x20] sm:$0xf] %vm1536_vm2, %v1528_v21  ;;  %v1441_v2 = vmax.f32 %v1439_v38, %v1440_v24  ;;  %v1147_v30 = vpop.f32.mrf.mxu1  ;;  %v1195_v38 = vadd.f32 %v3077_v54, %v3360_v45 }
 0x1f0   :  { %v1148_v59 = vadd.f32 %v1147_v30, %v978_v7  ;;  %v3362_v30 = vld [vmem:[#allocation9_spill] sm:$0xff] }
 0x1f1   :  { %v1497_v35 = vadd.f32 %v3141_v33, %v1441_v2  ;;  %v1364_v7 = vadd.f32 %v1363_v32, %v1195_v38  ;;  %v3361_v2 = vld [vmem:[#allocation2_spill] sm:$0xff] }
 0x1f2   :  { %v1317_v62 = vadd.f32 %v1316_v47, %v1148_v59  ;;  %v1190_v47 = vadd.f32 %v3036_v12, %v2688_v36  ;;  %v1163_v29 = vadd.f32 %v3362_v30, %v3361_v2 }
 0x1f3   :  { %v1513_v10 = vmax.f32 %v1497_v35, 0.0  ;;  %v1468_v54 = vsel %vm1371_vm1, %v1364_v7, -inf  ;;  %v3375_v7 = vld [vmem:[#allocation11_spill] sm:$0xff] }
 0x1f4   :  { %v1445_v23 = vsel %vm1371_vm1, %v1317_v62, -inf  ;;  %v1359_v46 = vadd.f32 %v1358_v55, %v1190_v47  ;;  %v3363_v62 = vld [vmem:[#allocation14_spill] sm:$0xff] }
 0x1f5   :  { %v1529_v61 = vpack.c.bf16 %v1513_v10, %v1513_v10  ;;  %v1446_v43 = vmax.f32 %v3356_v63, %v1445_v23  ;;  %v1323_v8 = vpop.f32.mrf.mxu2  ;;  %v1366_v35 = vpop.f32.mrf.mxu3  ;;  %v3364_v10 = vmax.f32 %v3070_v34, %v3363_v62 }
 0x1f6   :  { %v980_v60 = vpop.f32.mrf.mxu0  ;;  %v1454_v19 = vsel %vm1371_vm1, %v1359_v46, -inf }
 0x1f7   :  { %1546 = vst.msk [vmem:[%s3320_s3 + $0x24] sm:$0xf] %vm1536_vm2, %v1529_v61  ;;  %v1448_v17 = vmax.f32 %v1446_v43, %v1447_v37  ;;  %v1149_v42 = vpop.f32.mrf.mxu1 }
 0x1f8   :  { %v1150_v44 = vadd.f32 %v1149_v42, %v980_v60  ;;  %v3365_v60 = vld [vmem:[#allocation7_spill] sm:$0xff] }
 0x1f9   :  { %v1498_v20 = vadd.f32 %v3141_v33, %v1448_v17  ;;  %v3366_v17 = vld [vmem:[#allocation17_spill] sm:$0xff] }
 0x1fa   :  { %v1319_v3 = vadd.f32 %v1318_v11, %v1150_v44  ;;  %v1193_v11 = vadd.f32 %v3053_v40, %v2698_v52  ;;  %v1198_v42 = vadd.f32 %v3366_v17, %v3365_v60  ;;  %v3380_v60 = vld [vmem:[#allocation12_spill] sm:$0xff] }
 0x1fb   :  { %v1514_v4 = vmax.f32 %v1498_v20, 0.0 }
 0x1fc   :  { %v1452_v0 = vsel %vm1371_vm1, %v1319_v3, -inf  ;;  %v1362_v50 = vadd.f32 %v1361_v25, %v1193_v11  ;;  %v1367_v20 = vadd.f32 %v1366_v35, %v1198_v42 }
 0x1fd   :  { %v1530_v56 = vpack.c.bf16 %v1514_v4, %v1514_v4  ;;  %v1453_v49 = vmax.f32 %v3357_v51, %v1452_v0  ;;  %v1326_v15 = vpop.f32.mrf.mxu2  ;;  %v3367_v0 = vld [vmem:[#allocation3_spill] sm:$0xff] }
 0x1fe   :  { %v983_v39 = vpop.f32.mrf.mxu0  ;;  %v1461_v26 = vsel %vm1371_vm1, %v1362_v50, -inf  ;;  %v1475_v50 = vsel %vm1371_vm1, %v1367_v20, -inf }
 0x1ff   :  { %1547 = vst.msk [vmem:[%s3320_s3 + $0x28] sm:$0xf] %vm1536_vm2, %v1530_v56  ;;  %v1455_v36 = vmax.f32 %v1453_v49, %v1454_v19  ;;  %v1152_v12 = vpop.f32.mrf.mxu1  ;;  %v3368_v56 = vld [vmem:[#allocation10_spill] sm:$0xff] }
 0x200   :  { %v1153_v16 = vadd.f32 %v1152_v12, %v983_v39  ;;  %v1165_v51 = vadd.f32 %v3368_v56, %v3367_v0  ;;  %v3370_v12 = vld [vmem:[#allocation16_spill] sm:$0xff] }
 0x201   :  { %v1499_v58 = vadd.f32 %v3141_v33, %v1455_v36  ;;  %v3369_v36 = vld [vmem:[#allocation15_spill] sm:$0xff] }
 0x202   :  { %v1322_v9 = vadd.f32 %v1321_v13, %v1153_v16  ;;  %v3371_v11 = vmax.f32 %v3369_v36, %v3370_v12 }
 0x203   :  { %v1515_v53 = vmax.f32 %v1499_v58, 0.0 }
 0x204   :  { %v1459_v1 = vsel %vm1371_vm1, %v1322_v9, -inf }
 0x205   :  { %v1531_v5 = vpack.c.bf16 %v1515_v53, %v1515_v53  ;;  %v1460_v18 = vmax.f32 %v3359_v22, %v1459_v1  ;;  %v1328_v41 = vpop.f32.mrf.mxu2 }
 0x206   :  { %v985_v21 = vpop.f32.mrf.mxu0 }
 0x207   :  { %1548 = vst.msk [vmem:[%s3320_s3 + $0x2c] sm:$0xf] %vm1536_vm2, %v1531_v5  ;;  %v1462_v52 = vmax.f32 %v1460_v18, %v1461_v26  ;;  %v1154_v40 = vpop.f32.mrf.mxu1  ;;  %v3372_v5 = vld [vmem:[#allocation8_spill] sm:$0xff] }
 0x208   :  { %v1155_v13 = vadd.f32 %v1154_v40, %v985_v21  ;;  %v1200_v22 = vadd.f32 %v3373_v31, %v3372_v5 }
 0x209   :  { %v1500_v24 = vadd.f32 %v3141_v33, %v1462_v52 }
 0x20a   :  { %v1324_v57 = vadd.f32 %v1323_v8, %v1155_v13 }
 0x20b   :  { %v1516_v55 = vmax.f32 %v1500_v24, 0.0  ;;  %v3374_v24 = vld [vmem:[#allocation4_spill] sm:$0xff] }
 0x20c   :  { %v1466_v59 = vsel %vm1371_vm1, %v1324_v57, -inf  ;;  %v1168_v57 = vadd.f32 %v3375_v7, %v3374_v24 }
 0x20d   :  { %v1532_v28 = vpack.c.bf16 %v1516_v55, %v1516_v55  ;;  %v1467_v23 = vmax.f32 %v3364_v10, %v1466_v59  ;;  %v1331_v61 = vpop.f32.mrf.mxu2  ;;  %v3377_v59 = vld [vmem:[#allocation19_spill] sm:$0xff] }
 0x20e   :  { %v1332_v63 = vadd.f32 %v1331_v61, %v1163_v29  ;;  %v988_v43 = vpop.f32.mrf.mxu0  ;;  %v3376_v29 = vld [vmem:[#allocation18_spill] sm:$0xff] }
 0x20f   :  { %1549 = vst.msk [vmem:[%s3320_s3 + $0x30] sm:$0xf] %vm1536_vm2, %v1532_v28  ;;  %v1469_v8 = vmax.f32 %v1467_v23, %v1468_v54  ;;  %v1157_v37 = vpop.f32.mrf.mxu1  ;;  %v3378_v35 = vmax.f32 %v3376_v29, %v3377_v59 }
 0x210   :  { %v1377_v47 = vsel %vm1371_vm1, %v1332_v63, -inf  ;;  %v1158_v44 = vadd.f32 %v1157_v37, %v988_v43  ;;  %v3379_v37 = vld [vmem:[#allocation5_spill] sm:$0xff] }
 0x211   :  { %v1501_v34 = vadd.f32 %v3141_v33, %v1469_v8  ;;  %v1378_v25 = vmax.f32 %v3112_v27, %v1377_v47  ;;  %v1170_v17 = vadd.f32 %v3380_v60, %v3379_v37 }
 0x212   :  { %v1327_v46 = vadd.f32 %v1326_v15, %v1158_v44  ;;  %v1368_v15 = vpop.f32.mrf.mxu3 }
 0x213   :  { %v1517_v3 = vmax.f32 %v1501_v34, 0.0  ;;  %v1488_v4 = vadd.f32 %v3141_v33, %v1378_v25  ;;  %v1369_v40 = vadd.f32 %v1368_v15, %v1200_v22 }
 0x214   :  { %v1473_v49 = vsel %vm1371_vm1, %v1327_v46, -inf }
 0x215   :  { %v1533_v19 = vpack.c.bf16 %v1517_v3, %v1517_v3  ;;  %v1504_v39 = vmax.f32 %v1488_v4, 0.0  ;;  %v1474_v16 = vmax.f32 %v3371_v11, %v1473_v49  ;;  %v1333_v58 = vpop.f32.mrf.mxu2  ;;  %v1482_v10 = vsel %vm1371_vm1, %v1369_v40, -inf }
 0x216   :  { %v1334_v27 = vadd.f32 %v1333_v58, %v1165_v51  ;;  %v990_v9 = vpop.f32.mrf.mxu0 }
 0x217   :  { %1550 = vst.msk [vmem:[%s3320_s3 + $0x34] sm:$0xf] %vm1536_vm2, %v1533_v19  ;;  %v1520_v32 = vpack.c.bf16 %v1504_v39, %v1504_v39  ;;  %v1476_v53 = vmax.f32 %v1474_v16, %v1475_v50  ;;  %v1159_v1 = vpop.f32.mrf.mxu1 }
 0x218   :  { %v1384_v18 = vsel %vm1371_vm1, %v1334_v27, -inf  ;;  %v1160_v26 = vadd.f32 %v1159_v1, %v990_v9 }
 0x219   :  { %1537 = vst.msk [vmem:[%s3320_s3] sm:$0xf] %vm1536_vm2, %v1520_v32  ;;  %v1502_v21 = vadd.f32 %v3141_v33, %v1476_v53  ;;  %v1385_v52 = vmax.f32 %v3118_v14, %v1384_v18 }
 0x21a   :  { %v1329_v45 = vadd.f32 %v1328_v41, %v1160_v26 }
 0x21b   :  { %v1518_v38 = vmax.f32 %v1502_v21, 0.0  ;;  %v1489_v13 = vadd.f32 %v3141_v33, %v1385_v52 }
 0x21c   :  { %v1480_v55 = vsel %vm1371_vm1, %v1329_v45, -inf }
 0x21d   :  { %v1534_v2 = vpack.c.bf16 %v1518_v38, %v1518_v38  ;;  %v1505_v30 = vmax.f32 %v1489_v13, 0.0  ;;  %v1481_v28 = vmax.f32 %v3378_v35, %v1480_v55  ;;  %v1336_v62 = vpop.f32.mrf.mxu2 }
 0x21e   :  { %v1337_v14 = vadd.f32 %v1336_v62, %v1168_v57 }
 0x21f   :  { %1551 = vst.msk [vmem:[%s3320_s3 + $0x38] sm:$0xf] %vm1536_vm2, %v1534_v2  ;;  %v1521_v41 = vpack.c.bf16 %v1505_v30, %v1505_v30  ;;  %v1483_v23 = vmax.f32 %v1481_v28, %v1482_v10 }
 0x220   :  { %v1391_v61 = vsel %vm1371_vm1, %v1337_v14, -inf }
 0x221   :  { %1538 = vst.msk [vmem:[%s3320_s3 + $0x4] sm:$0xf] %vm1536_vm2, %v1521_v41  ;;  %v1503_v54 = vadd.f32 %v3141_v33, %v1483_v23  ;;  %v1392_v63 = vmax.f32 %v3124_v6, %v1391_v61 }
 0x223   :  { %v1519_v43 = vmax.f32 %v1503_v54, 0.0  ;;  %v1490_v8 = vadd.f32 %v3141_v33, %v1392_v63 }
 0x225   :  { %v1535_v42 = vpack.c.bf16 %v1519_v43, %v1519_v43  ;;  %v1506_v47 = vmax.f32 %v1490_v8, 0.0  ;;  %v1338_v44 = vpop.f32.mrf.mxu2 }
 0x226   :  { %v1339_v34 = vadd.f32 %v1338_v44, %v1170_v17 }
 0x227   :  { %1552 = vst.msk [vmem:[%s3320_s3 + $0x3c] sm:$0xf] %vm1536_vm2, %v1535_v42  ;;  %v1522_v25 = vpack.c.bf16 %v1506_v47, %v1506_v47 }
 0x228   :  { %v1398_v20 = vsel %vm1371_vm1, %v1339_v34, -inf }
 0x229   :  { %1539 = vst.msk [vmem:[%s3320_s3 + $0x8] sm:$0xf] %vm1536_vm2, %v1522_v25  ;;  %v1399_v6 = vmax.f32 %v3130_v48, %v1398_v20 }
 0x22b   :  { %v1491_v46 = vadd.f32 %v3141_v33, %v1399_v6 }
 0x22d   :  { %v1507_v3 = vmax.f32 %v1491_v46, 0.0 }
 0x22f   :  { %v1523_v4 = vpack.c.bf16 %v1507_v3, %v1507_v3 }
 0x231   :  { %1540 = vst.msk [vmem:[%s3320_s3 + $0xc] sm:$0xf] %vm1536_vm2, %v1523_v4 }

// kernel: denoise_block_forward.5
= control target key start
LH: loop header
LB: loop body
LE: loop exit
PB: predicated region body
PF: predicated region fallthrough
CT: control target
= control target key end

     0   :  { %s4473_s6 = smov 1   ;;  %s4474_s10 = smov 2   ;;  %s5471_s0 = inlined_call_operand.smem [shape: u32[33], index: -1, kind: input, shape index: {}] }
   0x1   :  { %s4516_s5 = sld [smem:[%s5471_s0]]   ;;  %s4475_s14 = smov 3  }
   0x2   :  { %s4521_s9 = sld [smem:[%s5471_s0 + %s4473_s6]]   ;;  %s4476_s18 = smov 4  }
   0x3   :  { %s4526_s13 = sld [smem:[%s5471_s0 + %s4474_s10]]   ;;  %s4477_s22 = smov 5  }
   0x4   :  { %s4531_s17 = sld [smem:[%s5471_s0 + %s4475_s14]]   ;;  %s4478_s26 = smov 6  }
   0x5   :  { %s4536_s21 = sld [smem:[%s5471_s0 + %s4476_s18]]   ;;  %s4479_s30 = smov 7  }
   0x6   :  { %s4541_s25 = sld [smem:[%s5471_s0 + %s4477_s22]]   ;;  %s4480_s4 = smov 8  }
   0x7   :  { %s4546_s29 = sld [smem:[%s5471_s0 + %s4478_s26]]   ;;  %s4481_s10 = smov 9  }
   0x8   :  { %s4551_s3 = sld [smem:[%s5471_s0 + %s4479_s30]]   ;;  %s4482_s15 = smov 10  }
   0x9   :  { %s4556_s8 = sld [smem:[%s5471_s0 + %s4480_s4]]   ;;  %s4483_s20 = smov 11  }
   0xa   :  { %s4561_s14 = sld [smem:[%s5471_s0 + %s4481_s10]]   ;;  %s4484_s26 = smov 12  }
   0xb   :  { %5474 = sst [smem:[#allocation8_spill]] %s4536_s21  ;;  %s4485_s1 = smov 13  }
   0xc   :  { %5475 = sst [smem:[#allocation9_spill]] %s4541_s25  ;;  %s4486_s7 = smov 14  }
   0xd   :  { %5476 = sst [smem:[#allocation10_spill]] %s4546_s29  ;;  %s4488_s22 = smov 16  }
   0xe   :  { %s4566_s19 = sld [smem:[%s5471_s0 + %s4482_s15]]   ;;  %s4487_s15 = smov 15  }
   0xf   :  { %s4571_s24 = sld [smem:[%s5471_s0 + %s4483_s20]]   ;;  %s4489_s28 = smov 17  }
  0x10   :  { %s4576_s30 = sld [smem:[%s5471_s0 + %s4484_s26]]  }
  0x11   :  { %s4581_s6 = sld [smem:[%s5471_s0 + %s4485_s1]]  }
  0x12   :  { %s4586_s12 = sld [smem:[%s5471_s0 + %s4486_s7]]   ;;  %s4490_s7 = smov 18  }
  0x13   :  { %s4591_s20 = sld [smem:[%s5471_s0 + %s4487_s15]]   ;;  %s4491_s15 = smov 19  }
  0x14   :  { %s4596_s27 = sld [smem:[%s5471_s0 + %s4488_s22]]   ;;  %s4492_s22 = smov 20  }
  0x15   :  { %s4601_s4 = sld [smem:[%s5471_s0 + %s4489_s28]]   ;;  %s4493_s28 = smov 21  }
  0x16   :  { %s4606_s29 = sld [smem:[%s5471_s0 + %s4490_s7]]   ;;  %s4494_s7 = smov 22  }
  0x17   :  { %s4611_s25 = sld [smem:[%s5471_s0 + %s4491_s15]]   ;;  %s4495_s15 = smov 23  }
  0x18   :  { %s4616_s21 = sld [smem:[%s5471_s0 + %s4492_s22]]   ;;  %s4496_s22 = smov 24  }
  0x19   :  { %5477 = sst [smem:[#allocation11_spill]] %s4591_s20 }
  0x1a   :  { %s4636_s20 = sld [smem:[%s5471_s0 + %s4496_s22]]   ;;  %s4500_s22 = smov 28  }
  0x1b   :  { %5478 = sst [smem:[#allocation12_spill]] %s4601_s4 }
  0x1c   :  { %5479 = sst [smem:[#allocation13_spill]] %s4606_s29 }
  0x1d   :  { %5480 = sst [smem:[#allocation14_spill]] %s4611_s25 }
  0x1e   :  { %s4621_s4 = sld [smem:[%s5471_s0 + %s4493_s28]]   ;;  %s4497_s28 = smov 25  }
  0x1f   :  { %s4626_s29 = sld [smem:[%s5471_s0 + %s4494_s7]]   ;;  %s4498_s7 = smov 26  }
  0x20   :  { %s4631_s25 = sld [smem:[%s5471_s0 + %s4495_s15]]   ;;  %s4499_s15 = smov 27  }
  0x21   :  { %5484 = sst [smem:[#allocation18_spill]] %s4636_s20 }
  0x22   :  { %s4656_s20 = sld [smem:[%s5471_s0 + %s4500_s22]]   ;;  %s4504_s22 = smov 32  }
  0x24   :  { %5481 = sst [smem:[#allocation15_spill]] %s4621_s4 }
  0x25   :  { %5482 = sst [smem:[#allocation16_spill]] %s4626_s29 }
  0x26   :  { %5483 = sst [smem:[#allocation17_spill]] %s4631_s25 }
  0x27   :  { %s4641_s4 = sld [smem:[%s5471_s0 + %s4497_s28]]   ;;  %s4501_s28 = smov 29  }
  0x28   :  { %s4646_s29 = sld [smem:[%s5471_s0 + %s4498_s7]]   ;;  %s4502_s7 = smov 30  }
  0x29   :  { %s4651_s25 = sld [smem:[%s5471_s0 + %s4499_s15]]   ;;  %s4503_s15 = smov 31  }
  0x2a   :  { %5488 = sst [smem:[#allocation22_spill]] %s4656_s20 }
  0x2b   :  { %s4676_s20 = sld [smem:[%s5471_s0 + %s4504_s22]]  }
  0x2d   :  { %5485 = sst [smem:[#allocation19_spill]] %s4641_s4 }
  0x2e   :  { %5486 = sst [smem:[#allocation20_spill]] %s4646_s29 }
  0x2f   :  { %5487 = sst [smem:[#allocation21_spill]] %s4651_s25 }
  0x30   :  { %s4661_s4 = sld [smem:[%s5471_s0 + %s4501_s28]]  }
  0x31   :  { %s4666_s29 = sld [smem:[%s5471_s0 + %s4502_s7]]  }
  0x32   :  { %s4671_s25 = sld [smem:[%s5471_s0 + %s4503_s15]]  }
  0x33   :  { %71 = vsyncpa [#allocation3], 0  ;;  %v4141_v0 = vld [vmem:[%s4521_s9 + $0x38] sm:$0xff]  ;;  %v4140_v4 = vld [vmem:[%s4521_s9 + $0x30] sm:$0xff] }
  0x34   :  { %v4149_v1 = vld [vmem:[%s4521_s9 + $0x78] sm:$0xff]  ;;  %697 = vmatpush.bf16.msra.mxu0 %v4141_v0  ;;  %v4148_v5 = vld [vmem:[%s4521_s9 + $0x70] sm:$0xff]  ;;  %v4139_v8 = vld [vmem:[%s4521_s9 + $0x28] sm:$0xff] }
  0x35   :  { %v4157_v2 = vld [vmem:[%s4521_s9 + $0xb8] sm:$0xff]  ;;  %746 = vmatpush.bf16.msra.mxu1 %v4149_v1  ;;  %v4156_v6 = vld [vmem:[%s4521_s9 + $0xb0] sm:$0xff]  ;;  %v4147_v9 = vld [vmem:[%s4521_s9 + $0x68] sm:$0xff] }
  0x36   :  { %v4165_v3 = vld [vmem:[%s4521_s9 + $0xf8] sm:$0xff]  ;;  %795 = vmatpush.bf16.msra.mxu2 %v4157_v2  ;;  %v4164_v7 = vld [vmem:[%s4521_s9 + $0xf0] sm:$0xff]  ;;  %v4155_v10 = vld [vmem:[%s4521_s9 + $0xa8] sm:$0xff] }
  0x37   :  { %844 = vmatpush.bf16.msra.mxu3 %v4165_v3  ;;  %v4163_v11 = vld [vmem:[%s4521_s9 + $0xe8] sm:$0xff]  ;;  %v4138_v12 = vld [vmem:[%s4521_s9 + $0x20] sm:$0xff]  ;;  %v4137_v16 = vld [vmem:[%s4521_s9 + $0x18] sm:$0xff] }
  0x38   :  { %698 = vmatpush.bf16.msra.mxu0 %v4140_v4  ;;  %v4146_v13 = vld [vmem:[%s4521_s9 + $0x60] sm:$0xff]  ;;  %v4145_v17 = vld [vmem:[%s4521_s9 + $0x58] sm:$0xff] }
  0x39   :  { %747 = vmatpush.bf16.msra.mxu1 %v4148_v5  ;;  %v4154_v14 = vld [vmem:[%s4521_s9 + $0xa0] sm:$0xff]  ;;  %v4153_v18 = vld [vmem:[%s4521_s9 + $0x98] sm:$0xff] }
  0x3a   :  { %796 = vmatpush.bf16.msra.mxu2 %v4156_v6  ;;  %v4162_v15 = vld [vmem:[%s4521_s9 + $0xe0] sm:$0xff]  ;;  %v4161_v19 = vld [vmem:[%s4521_s9 + $0xd8] sm:$0xff] }
  0x3b   :  { %845 = vmatpush.bf16.msra.mxu3 %v4164_v7 }
  0x3c   :  { %699 = vmatpush.bf16.msra.mxu0 %v4139_v8 }
  0x3d   :  { %748 = vmatpush.bf16.msra.mxu1 %v4147_v9 }
  0x3e   :  { %797 = vmatpush.bf16.msra.mxu2 %v4155_v10 }
  0x3f   :  { %846 = vmatpush.bf16.msra.mxu3 %v4163_v11 }
  0x40   :  { %700 = vmatpush.bf16.msra.mxu0 %v4138_v12 }
  0x41   :  { %749 = vmatpush.bf16.msra.mxu1 %v4146_v13 }
  0x42   :  { %798 = vmatpush.bf16.msra.mxu2 %v4154_v14 }
  0x43   :  { %847 = vmatpush.bf16.msra.mxu3 %v4162_v15 }
  0x44   :  { %72 = vsyncpa [#allocation5], 0  ;;  %701 = vmatpush.bf16.msra.mxu0 %v4137_v16  ;;  %v4136_v20 = vld [vmem:[%s4521_s9 + $0x10] sm:$0xff]  ;;  %v4135_v24 = vld [vmem:[%s4521_s9 + $0x8] sm:$0xff]  ;;  %vm672_vm0 = vcmask 523264   ;;  %s5489_s0 = sld [smem:[#allocation11_spill]] }
  0x45   :  { %750 = vmatpush.bf16.msra.mxu1 %v4145_v17  ;;  %v4144_v21 = vld [vmem:[%s4521_s9 + $0x50] sm:$0xff]  ;;  %v4143_v25 = vld [vmem:[%s4521_s9 + $0x48] sm:$0xff]  ;;  %v4134_v28 = vld [vmem:[%s4521_s9] sm:$0xff]  ;;  %vm2800_vm2 = vcmask 80896   ;;  %vm2832_vm3 = vcmask 1041408   ;;  %s2900_s28 = sshll.u32 %s4676_s20, 4  ;;  %s2901_s28 = int_to_ptr.hbm [resolvable:$true] %s2900_s28 }
  0x46   :  { %799 = vmatpush.bf16.msra.mxu2 %v4153_v18  ;;  %v4152_v22 = vld [vmem:[%s4521_s9 + $0x90] sm:$0xff]  ;;  %v4151_v26 = vld [vmem:[%s4521_s9 + $0x88] sm:$0xff]  ;;  %v4142_v29 = vld [vmem:[%s4521_s9 + $0x40] sm:$0xff]  ;;  %s4433_s1 = sshra.s32 %s2901_s28, 4  ;;  %s4437_s7 = scalar_lea.hbm %s4676_s20, 8  ;;  %s4434_s1 = int_to_ptr.hbm [resolvable:$true] %s4433_s1 }
  0x47   :  { %848 = vmatpush.bf16.msra.mxu3 %v4161_v19  ;;  %v4160_v23 = vld [vmem:[%s4521_s9 + $0xd0] sm:$0xff]  ;;  %v4159_v27 = vld [vmem:[%s4521_s9 + $0xc8] sm:$0xff]  ;;  %v4150_v30 = vld [vmem:[%s4521_s9 + $0x80] sm:$0xff]  ;;  %s4435_s2 = scalar_lea.hbm %s4434_s1, 8  ;;  %p4438_p1 = scmp.lt.s32.totalorder %s4434_s1, %s4676_s20 }
  0x48   :  { %702 = vmatpush.bf16.msra.mxu0 %v4136_v20  ;;  %v4158_v31 = vld [vmem:[%s4521_s9 + $0xc0] sm:$0xff]  ;;  %v4096_v33 = vld [vmem:[%s4516_s5 + $0x10] sm:$0xf0]  ;;  %v2950_v35 = vld [vmem:[%s4516_s5 + $0x14] sm:$0xf0]  ;;  %p4436_p0 = scmp.ne.s32.totalorder %s4434_s1, %s4435_s2  ;;  %p4439_p2 = scmp.lt.s32.totalorder %s4437_s7, %s4435_s2 }
  0x49   :  { %751 = vmatpush.bf16.msra.mxu1 %v4144_v21  ;;  %v2948_v32 = vld [vmem:[%s4516_s5] sm:$0xf]  ;;  %v4094_v34 = vld [vmem:[%s4516_s5 + $0x4] sm:$0xf]  ;;  %v2956_v36 = vld [vmem:[%s4516_s5 + $0x8] sm:$0xf] }
  0x4a   :  { %800 = vmatpush.bf16.msra.mxu2 %v4152_v22  ;;  %v4097_v37 = vld [vmem:[%s4516_s5 + $0x18] sm:$0xf0]  ;;  %v4095_v38 = vld [vmem:[%s4516_s5 + $0xc] sm:$0xf]  ;;  %v2958_v39 = vld [vmem:[%s4516_s5 + $0x1c] sm:$0xf0]  ;;  %v2949_v41 = vor.u32 %v4096_v33, %v2948_v32  ;;  %v2953_v42 = vor.u32 %v4094_v34, %v2950_v35  ;;  %p4440_p3 = por %p4439_p2, %p4438_p1 }
  0x4b   :  { %849 = vmatpush.bf16.msra.mxu3 %v4160_v23  ;;  %v4169_v40 = vld [vmem:[%s4521_s9 + $0x118] sm:$0xff]  ;;  %v2957_v43 = vor.u32 %v4097_v37, %v2956_v36  ;;  %v2961_v44 = vor.u32 %v4095_v38, %v2958_v39  ;;  %v4168_v45 = vld [vmem:[%s4521_s9 + $0x110] sm:$0xff]  ;;  %v2968_v46 = vld [vmem:[%s4516_s5 + $0x28] sm:$0xf] }
  0x4c   :  { %703 = vmatpush.bf16.msra.mxu0 %v4135_v24  ;;  %v4101_v47 = vld [vmem:[%s4516_s5 + $0x38] sm:$0xf0]  ;;  %v4099_v48 = vld [vmem:[%s4516_s5 + $0x2c] sm:$0xf]  ;;  %v2970_v49 = vld [vmem:[%s4516_s5 + $0x3c] sm:$0xf0]  ;;  %p4441_p4 = pnand %p4440_p3, %p4436_p0 }
  0x4d   :  { %752 = vmatpush.bf16.msra.mxu1 %v4143_v25  ;;  %v2976_v50 = vld [vmem:[%s4516_s5 + $0x30] sm:$0xf]  ;;  %v4102_v51 = vld [vmem:[%s4516_s5 + $0x40] sm:$0xf0]  ;;  %v4100_v52 = vld [vmem:[%s4516_s5 + $0x34] sm:$0xf]  ;;  %v2969_v54 = vor.u32 %v4101_v47, %v2968_v46  ;;  %v2973_v55 = vor.u32 %v4099_v48, %v2970_v49 }
  0x4e   :  { %801 = vmatpush.bf16.msra.mxu2 %v4151_v26  ;;  %v2978_v53 = vld [vmem:[%s4516_s5 + $0x44] sm:$0xf0]  ;;  %v2977_v56 = vor.u32 %v4102_v51, %v2976_v50  ;;  %v2988_v58 = vld [vmem:[%s4516_s5 + $0x50] sm:$0xf]  ;;  %v4106_v59 = vld [vmem:[%s4516_s5 + $0x60] sm:$0xf0] }
  0x4f   :  { %850 = vmatpush.bf16.msra.mxu3 %v4159_v27  ;;  %v2981_v57 = vor.u32 %v4100_v52, %v2978_v53  ;;  %v4104_v60 = vld [vmem:[%s4516_s5 + $0x54] sm:$0xf]  ;;  %v2990_v61 = vld [vmem:[%s4516_s5 + $0x64] sm:$0xf0]  ;;  %v2996_v62 = vld [vmem:[%s4516_s5 + $0x58] sm:$0xf]  ;;  %v2989_v2 = vor.u32 %v4106_v59, %v2988_v58 }
  0x50   :  { %704 = vmatpush.bf16.msra.mxu0 %v4134_v28  ;;  %v4107_v63 = vld [vmem:[%s4516_s5 + $0x68] sm:$0xf0]  ;;  %v4105_v0 = vld [vmem:[%s4516_s5 + $0x5c] sm:$0xf]  ;;  %v2998_v1 = vld [vmem:[%s4516_s5 + $0x6c] sm:$0xf0]  ;;  %v2993_v3 = vor.u32 %v4104_v60, %v2990_v61 }
  0x51   :  { %753 = vmatpush.bf16.msra.mxu1 %v4142_v29  ;;  %v2997_v4 = vor.u32 %v4107_v63, %v2996_v62  ;;  %v3001_v5 = vor.u32 %v4105_v0, %v2998_v1  ;;  %v4167_v6 = vld [vmem:[%s4521_s9 + $0x108] sm:$0xff]  ;;  %v3008_v7 = vld [vmem:[%s4516_s5 + $0x78] sm:$0xf]  ;;  %v4109_v9 = vld [vmem:[%s4516_s5 + $0x7c] sm:$0xf] }
  0x52   :  { %802 = vmatpush.bf16.msra.mxu2 %v4150_v30  ;;  %v4111_v8 = vld [vmem:[%s4516_s5 + $0x88] sm:$0xf0]  ;;  %v3010_v10 = vld [vmem:[%s4516_s5 + $0x8c] sm:$0xf0]  ;;  %v3016_v11 = vld [vmem:[%s4516_s5 + $0x80] sm:$0xf] }
  0x53   :  { %851 = vmatpush.bf16.msra.mxu3 %v4158_v31  ;;  %705 = vmatmul.bf16.vlgmr.msra.gmra.mxu0 %v2949_v41  ;;  %v4112_v12 = vld [vmem:[%s4516_s5 + $0x90] sm:$0xf0]  ;;  %v4110_v13 = vld [vmem:[%s4516_s5 + $0x84] sm:$0xf]  ;;  %v3018_v14 = vld [vmem:[%s4516_s5 + $0x94] sm:$0xf0]  ;;  %v3009_v15 = vor.u32 %v4111_v8, %v3008_v7  ;;  %v3013_v16 = vor.u32 %v4109_v9, %v3010_v10 }
  0x54   :  { %897 = vmatpush.bf16.msrb.mxu0 %v4169_v40  ;;  %754 = vmatmul.bf16.vlgmr.msra.gmra.mxu1 %v2953_v42  ;;  %v3017_v17 = vor.u32 %v4112_v12, %v3016_v11  ;;  %v3021_v18 = vor.u32 %v4110_v13, %v3018_v14  ;;  %v3028_v19 = vld [vmem:[%s4516_s5 + $0xa0] sm:$0xf]  ;;  %v4116_v20 = vld [vmem:[%s4516_s5 + $0xb0] sm:$0xf0]  ;;  %v4114_v21 = vld [vmem:[%s4516_s5 + $0xa4] sm:$0xf] }
  0x55   :  { %803 = vmatmul.bf16.vlgmr.msra.gmra.mxu2 %v2957_v43  ;;  %v3030_v22 = vld [vmem:[%s4516_s5 + $0xb4] sm:$0xf0]  ;;  %v3036_v23 = vld [vmem:[%s4516_s5 + $0xa8] sm:$0xf]  ;;  %v4117_v24 = vld [vmem:[%s4516_s5 + $0xb8] sm:$0xf0]  ;;  %v3029_v27 = vor.u32 %v4116_v20, %v3028_v19 }
  0x56   :  { %852 = vmatmul.bf16.vlgmr.msra.gmra.mxu3 %v2961_v44  ;;  %v4115_v25 = vld [vmem:[%s4516_s5 + $0xac] sm:$0xf]  ;;  %v3038_v26 = vld [vmem:[%s4516_s5 + $0xbc] sm:$0xf0]  ;;  %v3033_v28 = vor.u32 %v4114_v21, %v3030_v22  ;;  %v3037_v29 = vor.u32 %v4117_v24, %v3036_v23  ;;  %v3048_v32 = vld [vmem:[%s4516_s5 + $0xc8] sm:$0xf] }
  0x57   :  { %v3041_v30 = vor.u32 %v4115_v25, %v3038_v26  ;;  %v4166_v31 = vld [vmem:[%s4521_s9 + $0x100] sm:$0xff]  ;;  %v4121_v33 = vld [vmem:[%s4516_s5 + $0xd8] sm:$0xf0]  ;;  %v4119_v34 = vld [vmem:[%s4516_s5 + $0xcc] sm:$0xf]  ;;  %s5491_s9 = sld [smem:[#allocation9_spill]] }
  0x58   :  { %898 = vmatpush.bf16.msrb.mxu0 %v4168_v45  ;;  %v3050_v35 = vld [vmem:[%s4516_s5 + $0xdc] sm:$0xf0]  ;;  %v3056_v36 = vld [vmem:[%s4516_s5 + $0xd0] sm:$0xf]  ;;  %v4122_v37 = vld [vmem:[%s4516_s5 + $0xe0] sm:$0xf0]  ;;  %v3049_v40 = vor.u32 %v4121_v33, %v3048_v32 }
  0x59   :  { %v4120_v38 = vld [vmem:[%s4516_s5 + $0xd4] sm:$0xf]  ;;  %v3058_v39 = vld [vmem:[%s4516_s5 + $0xe4] sm:$0xf0]  ;;  %v3053_v41 = vor.u32 %v4119_v34, %v3050_v35  ;;  %v3057_v42 = vor.u32 %v4122_v37, %v3056_v36  ;;  %v3068_v44 = vld [vmem:[%s4516_s5 + $0xf0] sm:$0xf] }
  0x5a   :  { %v3061_v43 = vor.u32 %v4120_v38, %v3058_v39  ;;  %v4126_v45 = vld [vmem:[%s4516_s5 + $0x100] sm:$0xf0]  ;;  %v4124_v46 = vld [vmem:[%s4516_s5 + $0xf4] sm:$0xf]  ;;  %v3070_v47 = vld [vmem:[%s4516_s5 + $0x104] sm:$0xf0] }
  0x5b   :  { %v3076_v48 = vld [vmem:[%s4516_s5 + $0xf8] sm:$0xf]  ;;  %v4127_v49 = vld [vmem:[%s4516_s5 + $0x108] sm:$0xf0]  ;;  %v4125_v50 = vld [vmem:[%s4516_s5 + $0xfc] sm:$0xf]  ;;  %v3069_v52 = vor.u32 %v4126_v45, %v3068_v44  ;;  %v3073_v53 = vor.u32 %v4124_v46, %v3070_v47 }
  0x5c   :  { %899 = vmatpush.bf16.msrb.mxu0 %v4167_v6  ;;  %v3078_v51 = vld [vmem:[%s4516_s5 + $0x10c] sm:$0xf0]  ;;  %v4129_v58 = vld [vmem:[%s4516_s5 + $0x11c] sm:$0xf]  ;;  %v3096_v60 = vld [vmem:[%s4516_s5 + $0x120] sm:$0xf] }
  0x5d   :  { %v3090_v59 = vld [vmem:[%s4516_s5 + $0x12c] sm:$0xf0]  ;;  %v4132_v61 = vld [vmem:[%s4516_s5 + $0x130] sm:$0xf0]  ;;  %v4130_v62 = vld [vmem:[%s4516_s5 + $0x124] sm:$0xf] }
  0x5e   :  { %v3098_v63 = vld [vmem:[%s4516_s5 + $0x134] sm:$0xf0]  ;;  %v3093_v1 = vor.u32 %v4129_v58, %v3090_v59  ;;  %v3024_v44 = vld [vmem:[%s4516_s5 + $0x88] sm:$0xf]  ;;  %v4113_v45 = vld [vmem:[%s4516_s5 + $0x98] sm:$0xf0] }
  0x5f   :  { %v3025_v46 = vor.u32 %v4113_v45, %v3024_v44  ;;  %v4180_v44 = vld [vmem:[%s4531_s17 + $0x54] sm:$0xf] }
  0x60   :  { %900 = vmatpush.bf16.msrb.mxu0 %v4166_v31  ;;  %v4108_v31 = vld [vmem:[%s4516_s5 + $0x70] sm:$0xf0] }
  0x63   :  { %710 = vmatmul.bf16.gmra.mxu0 %v2969_v54  ;;  %v3077_v54 = vor.u32 %v4127_v49, %v3076_v48 }
  0x64   :  { %759 = vmatmul.bf16.gmra.mxu1 %v2973_v55  ;;  %v3081_v55 = vor.u32 %v4125_v50, %v3078_v51  ;;  %v3044_v51 = vld [vmem:[%s4516_s5 + $0xb0] sm:$0xf] }
  0x65   :  { %808 = vmatmul.bf16.gmra.mxu2 %v2977_v56  ;;  %v3088_v56 = vld [vmem:[%s4516_s5 + $0x118] sm:$0xf] }
  0x66   :  { %857 = vmatmul.bf16.gmra.mxu3 %v2981_v57  ;;  %v4131_v57 = vld [vmem:[%s4516_s5 + $0x128] sm:$0xf0] }
  0x67   :  { %v3089_v0 = vor.u32 %v4131_v57, %v3088_v56  ;;  %v3064_v56 = vld [vmem:[%s4516_s5 + $0xd8] sm:$0xf]  ;;  %v4123_v57 = vld [vmem:[%s4516_s5 + $0xe8] sm:$0xf0] }
  0x68   :  { %v3065_v58 = vor.u32 %v4123_v57, %v3064_v56 }
  0x73   :  { %715 = vmatmul.bf16.gmra.mxu0 %v2989_v2  ;;  %v3097_v2 = vor.u32 %v4132_v61, %v3096_v60  ;;  %v3084_v61 = vld [vmem:[%s4516_s5 + $0x100] sm:$0xf] }
  0x74   :  { %764 = vmatmul.bf16.gmra.mxu1 %v2993_v3  ;;  %v3101_v3 = vor.u32 %v4130_v62, %v3098_v63  ;;  %v4128_v62 = vld [vmem:[%s4516_s5 + $0x110] sm:$0xf0] }
  0x75   :  { %813 = vmatmul.bf16.gmra.mxu2 %v2997_v4  ;;  %v2964_v4 = vld [vmem:[%s4516_s5 + $0x10] sm:$0xf]  ;;  %v3085_v63 = vor.u32 %v4128_v62, %v3084_v61  ;;  %v3292_v61 = vld [vmem:[%s4531_s17 + $0x40] sm:$0xf]  ;;  %v4179_v62 = vld [vmem:[%s4531_s17 + $0x44] sm:$0xf0] }
  0x76   :  { %862 = vmatmul.bf16.gmra.mxu3 %v3001_v5  ;;  %v4098_v5 = vld [vmem:[%s4516_s5 + $0x20] sm:$0xf0] }
  0x77   :  { %v2965_v6 = vor.u32 %v4098_v5, %v2964_v4  ;;  %v3318_v5 = vld [vmem:[%s4531_s17 + $0x78] sm:$0xf0] }
  0x83   :  { %720 = vmatmul.bf16.gmra.mxu0 %v3009_v15 }
  0x84   :  { %769 = vmatmul.bf16.gmra.mxu1 %v3013_v16  ;;  %v2984_v16 = vld [vmem:[%s4516_s5 + $0x38] sm:$0xf] }
  0x85   :  { %818 = vmatmul.bf16.gmra.mxu2 %v3017_v17  ;;  %v4103_v17 = vld [vmem:[%s4516_s5 + $0x48] sm:$0xf0] }
  0x86   :  { %867 = vmatmul.bf16.gmra.mxu3 %v3021_v18  ;;  %v2985_v20 = vor.u32 %v4103_v17, %v2984_v16 }
  0x93   :  { %725 = vmatmul.bf16.gmra.mxu0 %v3029_v27 }
  0x94   :  { %774 = vmatmul.bf16.gmra.mxu1 %v3033_v28 }
  0x95   :  { %823 = vmatmul.bf16.gmra.mxu2 %v3037_v29 }
  0x96   :  { %872 = vmatmul.bf16.gmra.mxu3 %v3041_v30  ;;  %v3004_v30 = vld [vmem:[%s4516_s5 + $0x60] sm:$0xf] }
  0x97   :  { %v3005_v34 = vor.u32 %v4108_v31, %v3004_v30  ;;  %v3372_v30 = vld [vmem:[%s4556_s8 + $0x60] sm:$0xf]  ;;  %v4199_v31 = vld [vmem:[%s4556_s8 + $0x64] sm:$0xf0] }
  0xa3   :  { %730 = vmatmul.bf16.gmra.mxu0 %v3049_v40 }
  0xa4   :  { %779 = vmatmul.bf16.gmra.mxu1 %v3053_v41 }
  0xa5   :  { %828 = vmatmul.bf16.gmra.mxu2 %v3057_v42 }
  0xa6   :  { %877 = vmatmul.bf16.gmra.mxu3 %v3061_v43 }
  0xb3   :  { %735 = vmatmul.bf16.gmra.mxu0 %v3069_v52  ;;  %v4118_v52 = vld [vmem:[%s4516_s5 + $0xc0] sm:$0xf0] }
  0xb4   :  { %784 = vmatmul.bf16.gmra.mxu1 %v3073_v53  ;;  %v3045_v53 = vor.u32 %v4118_v52, %v3044_v51 }
  0xb5   :  { %833 = vmatmul.bf16.gmra.mxu2 %v3077_v54 }
  0xb6   :  { %882 = vmatmul.bf16.gmra.mxu3 %v3081_v55 }
  0xc3   :  { %740 = vmatmul.bf16.gmra.mxu0 %v3089_v0 }
  0xc4   :  { %789 = vmatmul.bf16.gmra.mxu1 %v3093_v1  ;;  %v3316_v1 = vld [vmem:[%s4531_s17 + $0x70] sm:$0xf] }
  0xc5   :  { %838 = vmatmul.bf16.gmra.mxu2 %v3097_v2  ;;  %v4185_v2 = vld [vmem:[%s4531_s17 + $0x74] sm:$0xf0] }
  0xc6   :  { %887 = vmatmul.bf16.gmra.mxu3 %v3101_v3  ;;  %v4184_v3 = vld [vmem:[%s4531_s17 + $0x74] sm:$0xf]  ;;  %v3317_v4 = vor.u32 %v4185_v2, %v3316_v1  ;;  %v3293_v1 = vor.u32 %v4179_v62, %v3292_v61  ;;  %v3294_v2 = vld [vmem:[%s4531_s17 + $0x48] sm:$0xf0] }
  0xc8   :  { %1080 = vmatpush.bf16.msrb.mxu1 %v3317_v4 }
  0xd0   :  { %v706_v7 = vpop.f32.mrf.mxu0 }
  0xd1   :  { %v755_v8 = vpop.f32.mrf.mxu1 }
  0xd2   :  { %v756_v9 = vadd.f32 %v755_v8, %v706_v7  ;;  %v3380_v8 = vld [vmem:[%s4556_s8 + $0x70] sm:$0xf] }
  0xd3   :  { %3250 = vmatmul.msk.bf16.vlgmr.msrb.gmra.mxu0 %vm672_vm0, %v2965_v6  ;;  %v3321_v6 = vor.u32 %v4184_v3, %v3318_v5 }
  0xd5   :  { %1093 = vmatpush.bf16.msrb.mxu2 %v3321_v6  ;;  %v3356_v6 = vld [vmem:[%s4556_s8 + $0x40] sm:$0xf] }
  0xd8   :  { %v804_v10 = vpop.f32.mrf.mxu2  ;;  %v4781_v13 = vpop.f32.mrf.mxu0 }
  0xd9   :  { %v853_v11 = vpop.f32.mrf.mxu3  ;;  %v805_v12 = vadd.f32 %v804_v10, %v756_v9  ;;  %v4783_v14 = vpop.f32.mrf.mxu1  ;;  %v4201_v9 = vld [vmem:[%s4556_s8 + $0x74] sm:$0xf0] }
  0xda   :  { %v3381_v10 = vor.u32 %v4201_v9, %v3380_v8 }
  0xdb   :  { %v4785_v15 = vadd.f32 %v853_v11, %v805_v12  ;;  %v3104_v11 = vld [vmem:[%s4516_s5 + $0x128] sm:$0xf]  ;;  %v4133_v12 = vld [vmem:[%s4516_s5 + $0x138] sm:$0xf0]  ;;  %s5490_s5 = sld [smem:[#allocation8_spill]] }
  0xdc   :  { %1328 = vmatpush.bf16.msrb.mxu3 %v3381_v10  ;;  %v3105_v16 = vor.u32 %v4133_v12, %v3104_v11 }
  0xe0   :  { %v4789_v18 = vpop.f32.mrf.mxu2  ;;  %v711_v21 = vpop.f32.mrf.mxu0 }
  0xe1   :  { %v4791_v19 = vpop.f32.mrf.mxu3  ;;  %v760_v22 = vpop.f32.mrf.mxu1 }
  0xe2   :  { %v761_v23 = vadd.f32 %v760_v22, %v711_v21  ;;  %v4183_v21 = vld [vmem:[%s4531_s17 + $0x64] sm:$0xf0]  ;;  %v4182_v22 = vld [vmem:[%s4531_s17 + $0x64] sm:$0xf] }
  0xe3   :  { %3251 = vmatmul.msk.bf16.gmra.mxu0 %vm672_vm0, %v2985_v20  ;;  %v3308_v20 = vld [vmem:[%s4531_s17 + $0x60] sm:$0xf] }
  0xe8   :  { %v809_v24 = vpop.f32.mrf.mxu2  ;;  %v4794_v27 = vpop.f32.mrf.mxu0 }
  0xe9   :  { %v858_v25 = vpop.f32.mrf.mxu3  ;;  %v810_v26 = vadd.f32 %v809_v24, %v761_v23  ;;  %v4796_v28 = vpop.f32.mrf.mxu1  ;;  %v3309_v23 = vor.u32 %v4183_v21, %v3308_v20  ;;  %v3310_v24 = vld [vmem:[%s4531_s17 + $0x68] sm:$0xf0]  ;;  %v3284_v21 = vld [vmem:[%s4531_s17 + $0x30] sm:$0xf] }
  0xea   :  { %v763_v57 = vadd.f32 %v4796_v28, %v4794_v27 }
  0xeb   :  { %v4798_v29 = vadd.f32 %v858_v25, %v810_v26  ;;  %v3313_v25 = vor.u32 %v4182_v22, %v3310_v24  ;;  %1081 = vmatpush.bf16.msrb.mxu1 %v3309_v23  ;;  %v4177_v22 = vld [vmem:[%s4531_s17 + $0x34] sm:$0xf0]  ;;  %v4176_v23 = vld [vmem:[%s4531_s17 + $0x34] sm:$0xf] }
  0xed   :  { %1094 = vmatpush.bf16.msrb.mxu2 %v3313_v25  ;;  %v3285_v25 = vor.u32 %v4177_v22, %v3284_v21 }
  0xf0   :  { %v4802_v32 = vpop.f32.mrf.mxu2  ;;  %v716_v35 = vpop.f32.mrf.mxu0 }
  0xf1   :  { %v4804_v33 = vpop.f32.mrf.mxu3  ;;  %v765_v36 = vpop.f32.mrf.mxu1 }
  0xf2   :  { %v766_v37 = vadd.f32 %v765_v36, %v716_v35  ;;  %v758_v36 = vadd.f32 %v4783_v14, %v4781_v13  ;;  %v3364_v14 = vld [vmem:[%s4556_s8 + $0x50] sm:$0xf] }
  0xf3   :  { %3252 = vmatmul.msk.bf16.gmra.mxu0 %vm672_vm0, %v3005_v34  ;;  %v3373_v34 = vor.u32 %v4199_v31, %v3372_v30  ;;  %v3286_v30 = vld [vmem:[%s4531_s17 + $0x38] sm:$0xf0] }
  0xf4   :  { %v3289_v31 = vor.u32 %v4176_v23, %v3286_v30  ;;  %v3270_v23 = vld [vmem:[%s4531_s17 + $0x18] sm:$0xf0]  ;;  %v3332_v30 = vld [vmem:[%s4556_s8 + $0x10] sm:$0xf] }
  0xf5   :  { %1329 = vmatpush.bf16.msrb.mxu3 %v3373_v34 }
  0xf8   :  { %v814_v38 = vpop.f32.mrf.mxu2  ;;  %v4807_v41 = vpop.f32.mrf.mxu0 }
  0xf9   :  { %v863_v39 = vpop.f32.mrf.mxu3  ;;  %v815_v40 = vadd.f32 %v814_v38, %v766_v37  ;;  %v4809_v42 = vpop.f32.mrf.mxu1  ;;  %v807_v38 = vadd.f32 %v4789_v18, %v758_v36 }
  0xfa   :  { %v768_v12 = vadd.f32 %v4809_v42, %v4807_v41 }
  0xfb   :  { %v4811_v43 = vadd.f32 %v863_v39, %v815_v40  ;;  %v3300_v39 = vld [vmem:[%s4531_s17 + $0x50] sm:$0xf]  ;;  %v4181_v40 = vld [vmem:[%s4531_s17 + $0x54] sm:$0xf0] }
  0xfc   :  { %v3301_v45 = vor.u32 %v4181_v40, %v3300_v39  ;;  %v4193_v39 = vld [vmem:[%s4556_s8 + $0x34] sm:$0xf0] }
  0xfe   :  { %1082 = vmatpush.bf16.msrb.mxu1 %v3301_v45 }
 0x100   :  { %v721_v47 = vpop.f32.mrf.mxu0  ;;  %v816_v18 = vpop.f32.mrf.mxu2 }
 0x101   :  { %v770_v48 = vpop.f32.mrf.mxu1 }
 0x102   :  { %v4815_v49 = vadd.f32 %v770_v48, %v721_v47  ;;  %v856_v48 = vadd.f32 %v4791_v19, %v807_v38  ;;  %v812_v19 = vadd.f32 %v4802_v32, %v763_v57  ;;  %1083 = vmatpush.bf16.msrb.mxu1 %v3293_v1  ;;  %v4195_v32 = vld [vmem:[%s4556_s8 + $0x44] sm:$0xf0]  ;;  %v3348_v38 = vld [vmem:[%s4556_s8 + $0x30] sm:$0xf]  ;;  %v3278_v57 = vld [vmem:[%s4531_s17 + $0x28] sm:$0xf0] }
 0x103   :  { %3253 = vmatmul.msk.bf16.gmra.mxu0 %vm672_vm0, %v3025_v46  ;;  %v3302_v46 = vld [vmem:[%s4531_s17 + $0x58] sm:$0xf0]  ;;  %v3357_v8 = vor.u32 %v4195_v32, %v3356_v6  ;;  %v3349_v40 = vor.u32 %v4193_v39, %v3348_v38 }
 0x104   :  { %v3305_v47 = vor.u32 %v4180_v44, %v3302_v46  ;;  %v861_v5 = vadd.f32 %v4804_v33, %v812_v19 }
 0x106   :  { %1095 = vmatpush.bf16.msrb.mxu2 %v3305_v47  ;;  %1084 = vmatpush.bf16.msrb.mxu1 %v3285_v25 }
 0x108   :  { %v4818_v50 = vpop.f32.mrf.mxu0  ;;  %v819_v4 = vpop.f32.mrf.mxu2 }
 0x109   :  { %v772_v9 = vpop.f32.mrf.mxu1 }
 0x10a   :  { %v773_v47 = vadd.f32 %v772_v9, %v4818_v50 }
 0x110   :  { %v4822_v54 = vpop.f32.mrf.mxu0  ;;  %v821_v10 = vpop.f32.mrf.mxu2 }
 0x113   :  { %3254 = vmatmul.msk.bf16.gmra.mxu0 %vm672_vm0, %v3045_v53  ;;  %v865_v53 = vpop.f32.mrf.mxu3 }
 0x118   :  { %v4825_v55 = vpop.f32.mrf.mxu0  ;;  %v824_v42 = vpop.f32.mrf.mxu2 }
 0x120   :  { %v4829_v59 = vpop.f32.mrf.mxu0 }
 0x123   :  { %3255 = vmatmul.msk.bf16.gmra.mxu0 %vm672_vm0, %v3065_v58 }
 0x128   :  { %v4832_v60 = vpop.f32.mrf.mxu0 }
 0x130   :  { %v4836_v0 = vpop.f32.mrf.mxu0 }
 0x133   :  { %3256 = vmatmul.msk.bf16.gmra.mxu0 %vm672_vm0, %v3085_v63  ;;  %v4178_v63 = vld [vmem:[%s4531_s17 + $0x44] sm:$0xf] }
 0x134   :  { %v3297_v3 = vor.u32 %v4178_v63, %v3294_v2 }
 0x136   :  { %1096 = vmatpush.bf16.msrb.mxu2 %v3297_v3  ;;  %v3340_v3 = vld [vmem:[%s4556_s8 + $0x20] sm:$0xf] }
 0x138   :  { %v4843_v7 = vpop.f32.mrf.mxu0 }
 0x13a   :  { %1097 = vmatpush.bf16.msrb.mxu2 %v3289_v31  ;;  %v4189_v31 = vld [vmem:[%s4556_s8 + $0x14] sm:$0xf0] }
 0x140   :  { %v4849_v17 = vpop.f32.mrf.mxu0 }
 0x143   :  { %3257 = vmatmul.msk.bf16.gmra.mxu0 %vm672_vm0, %v3105_v16  ;;  %v817_v16 = vadd.f32 %v816_v18, %v768_v12  ;;  %v4175_v18 = vld [vmem:[%s4531_s17 + $0x24] sm:$0xf0]  ;;  %v4173_v12 = vld [vmem:[%s4531_s17 + $0x14] sm:$0xf0] }
 0x145   :  { %v866_v34 = vadd.f32 %v865_v53, %v817_v16  ;;  %v4912_v53 = vpop.f32.mrf.mxu2 }
 0x148   :  { %v4856_v26 = vpop.f32.mrf.mxu0 }
 0x150   :  { %v902_v35 = vpop.f32.mrf.mxu0 }
 0x151   :  { %v4863_v37 = vadd.f32 %v902_v35, %v4785_v15  ;;  %v4197_v15 = vld [vmem:[%s4556_s8 + $0x54] sm:$0xf0]  ;;  %v775_v35 = vpop.f32.mrf.mxu1 }
 0x152   :  { %v3365_v52 = vor.u32 %v4197_v15, %v3364_v14  ;;  %v822_v14 = vadd.f32 %v821_v10, %v773_v47  ;;  %v3276_v15 = vld [vmem:[%s4531_s17 + $0x20] sm:$0xf]  ;;  %v776_v63 = vadd.f32 %v775_v35, %v4822_v54  ;;  %v3333_v35 = vor.u32 %v4189_v31, %v3332_v30  ;;  %v3422_v31 = vld [vmem:[%s4556_s8 + $0xc8] sm:$0xf0] }
 0x154   :  { %1330 = vmatpush.bf16.msrb.mxu3 %v3365_v52  ;;  %v4174_v52 = vld [vmem:[%s4531_s17 + $0x24] sm:$0xf]  ;;  %v825_v1 = vadd.f32 %v824_v42, %v776_v63  ;;  %v3324_v42 = vld [vmem:[%s4556_s8] sm:$0xf]  ;;  %v3444_v63 = vld [vmem:[%s4556_s8 + $0xf0] sm:$0xf] }
 0x155   :  { %v3281_v19 = vor.u32 %v4174_v52, %v3278_v57  ;;  %v3260_v52 = vld [vmem:[%s4531_s17] sm:$0xf]  ;;  %v4170_v57 = vld [vmem:[%s4531_s17 + $0x4] sm:$0xf] }
 0x157   :  { %1098 = vmatpush.bf16.msrb.mxu2 %v3281_v19 }
 0x158   :  { %v904_v51 = vpop.f32.mrf.mxu0  ;;  %1331 = vmatpush.bf16.msrb.mxu3 %v3357_v8 }
 0x159   :  { %v4871_v13 = vadd.f32 %v904_v51, %v856_v48  ;;  %v4906_v51 = vpop.f32.mrf.mxu1 }
 0x15c   :  { %1332 = vmatpush.bf16.msrb.mxu3 %v3349_v40  ;;  %v4216_v40 = vld [vmem:[%s4556_s8 + $0xf4] sm:$0xf] }
 0x160   :  { %v907_v56 = vpop.f32.mrf.mxu0 }
 0x161   :  { %v4878_v58 = vadd.f32 %v907_v56, %v4798_v29  ;;  %v868_v29 = vpop.f32.mrf.mxu3  ;;  %v3277_v56 = vor.u32 %v4175_v18, %v3276_v15  ;;  %v3438_v15 = vld [vmem:[%s4556_s8 + $0xe8] sm:$0xf0] }
 0x163   :  { %1085 = vmatpush.bf16.msrb.mxu1 %v3277_v56  ;;  %v4171_v56 = vld [vmem:[%s4531_s17 + $0x4] sm:$0xf0] }
 0x168   :  { %v909_v27 = vpop.f32.mrf.mxu0 }
 0x169   :  { %v4886_v28 = vadd.f32 %v909_v27, %v861_v5  ;;  %v870_v24 = vpop.f32.mrf.mxu3  ;;  %v780_v5 = vpop.f32.mrf.mxu1 }
 0x16a   :  { %v871_v61 = vadd.f32 %v870_v24, %v822_v14  ;;  %v781_v24 = vadd.f32 %v780_v5, %v4829_v59  ;;  %v4214_v14 = vld [vmem:[%s4556_s8 + $0xe4] sm:$0xf]  ;;  %v3382_v5 = vld [vmem:[%s4556_s8 + $0x78] sm:$0xf0] }
 0x16b   :  { %v3441_v18 = vor.u32 %v4214_v14, %v3438_v15 }
 0x170   :  { %v912_v11 = vpop.f32.mrf.mxu0 }
 0x171   :  { %v913_v33 = vadd.f32 %v912_v11, %v4811_v43  ;;  %v820_v43 = vadd.f32 %v819_v4, %v4815_v49  ;;  %v873_v44 = vpop.f32.mrf.mxu3  ;;  %v4191_v4 = vld [vmem:[%s4556_s8 + $0x24] sm:$0xf0]  ;;  %v4926_v10 = vpop.f32.mrf.mxu1  ;;  %v3268_v11 = vld [vmem:[%s4531_s17 + $0x10] sm:$0xf] }
 0x172   :  { %v3341_v27 = vor.u32 %v4191_v4, %v3340_v3  ;;  %v874_v6 = vadd.f32 %v873_v44, %v825_v1  ;;  %v3269_v22 = vor.u32 %v4173_v12, %v3268_v11  ;;  %v3446_v44 = vld [vmem:[%s4556_s8 + $0xf8] sm:$0xf0]  ;;  %v4217_v1 = vld [vmem:[%s4556_s8 + $0xf4] sm:$0xf0]  ;;  %v4200_v4 = vld [vmem:[%s4556_s8 + $0x74] sm:$0xf] }
 0x173   :  { %v942_v20 = vmax.f32 %v4863_v37, %v913_v33  ;;  %v869_v45 = vadd.f32 %v868_v29, %v820_v43  ;;  %v829_v29 = vpop.f32.mrf.mxu2  ;;  %v4172_v33 = vld [vmem:[%s4531_s17 + $0x14] sm:$0xf]  ;;  %v4187_v43 = vld [vmem:[%s4556_s8 + $0x4] sm:$0xf0]  ;;  %v3445_v3 = vor.u32 %v4217_v1, %v3444_v63  ;;  %v3436_v12 = vld [vmem:[%s4556_s8 + $0xe0] sm:$0xf] }
 0x174   :  { %1333 = vmatpush.bf16.msrb.mxu3 %v3341_v27  ;;  %v3273_v25 = vor.u32 %v4172_v33, %v3270_v23  ;;  %1086 = vmatpush.bf16.msrb.mxu1 %v3269_v22  ;;  %v3325_v39 = vor.u32 %v4187_v43, %v3324_v42  ;;  %v4215_v33 = vld [vmem:[%s4556_s8 + $0xe4] sm:$0xf0]  ;;  %v4198_v22 = vld [vmem:[%s4556_s8 + $0x64] sm:$0xf]  ;;  %v3428_v43 = vld [vmem:[%s4556_s8 + $0xd0] sm:$0xf] }
 0x175   :  { %v4971_v42 = vld [vmem:[%s4551_s3] sm:$0xff]  ;;  %v3358_v63 = vld [vmem:[%s4556_s8 + $0x48] sm:$0xf0]  ;;  %s5494_s3 = sld [smem:[#allocation13_spill]] }
 0x176   :  { %1099 = vmatpush.bf16.msrb.mxu2 %v3273_v25  ;;  %v3374_v25 = vld [vmem:[%s4556_s8 + $0x68] sm:$0xf0]  ;;  %v4206_v1 = vld [vmem:[%s4556_s8 + $0xa4] sm:$0xf] }
 0x177   :  { %v3377_v30 = vor.u32 %v4198_v22, %v3374_v25 }
 0x178   :  { %v914_v36 = vpop.f32.mrf.mxu0  ;;  %1334 = vmatpush.bf16.msrb.mxu3 %v3333_v35  ;;  %v778_v35 = vadd.f32 %v4906_v51, %v4825_v55  ;;  %v3366_v55 = vld [vmem:[%s4556_s8 + $0x58] sm:$0xf0]  ;;  %v4208_v51 = vld [vmem:[%s4556_s8 + $0xb4] sm:$0xf] }
 0x179   :  { %v4898_v41 = vadd.f32 %v914_v36, %v866_v34  ;;  %v4915_v50 = vpop.f32.mrf.mxu3  ;;  %v785_v59 = vpop.f32.mrf.mxu1 }
 0x17b   :  { %v945_v37 = vmax.f32 %v4871_v13, %v4898_v41  ;;  %v4931_v16 = vpop.f32.mrf.mxu2 }
 0x17c   :  { %1335 = vmatpush.bf16.msrb.mxu3 %v3325_v39  ;;  %v1162_v39 = vunpack.c.l.b16 %v4971_v42 }
 0x180   :  { %v917_v46 = vpop.f32.mrf.mxu0 }
 0x181   :  { %v918_v48 = vadd.f32 %v917_v46, %v869_v45  ;;  %v878_v54 = vpop.f32.mrf.mxu3  ;;  %v3449_v46 = vor.u32 %v4216_v40, %v3446_v44  ;;  %v787_v11 = vpop.f32.mrf.mxu1  ;;  %v827_v40 = vadd.f32 %v4912_v53, %v778_v35 }
 0x182   :  { %v788_v53 = vadd.f32 %v787_v11, %v4843_v7  ;;  %v4209_v11 = vld [vmem:[%s4556_s8 + $0xb4] sm:$0xf0] }
 0x183   :  { %v948_v49 = vmax.f32 %v4878_v58, %v918_v48  ;;  %v834_v47 = vpop.f32.mrf.mxu2  ;;  %1367 = vmatpush.bf16.msra.mxu3 %v3449_v46  ;;  %v3414_v46 = vld [vmem:[%s4556_s8 + $0xb8] sm:$0xf0] }
 0x187   :  { %1368 = vmatpush.bf16.msra.mxu3 %v3441_v18  ;;  %v4981_v18 = vpack.c.b16 %v1162_v39, %v1162_v39  ;;  %v4202_v39 = vld [vmem:[%s4556_s8 + $0x84] sm:$0xf] }
 0x188   :  { %v919_v62 = vpop.f32.mrf.mxu0 }
 0x189   :  { %v4918_v58 = vadd.f32 %v919_v62, %v871_v61  ;;  %v4939_v34 = vpop.f32.mrf.mxu3  ;;  %v3261_v61 = vor.u32 %v4171_v56, %v3260_v52  ;;  %v3262_v62 = vld [vmem:[%s4531_s17 + $0x8] sm:$0xf0]  ;;  %v3417_v52 = vor.u32 %v4208_v51, %v3414_v46  ;;  %v3420_v56 = vld [vmem:[%s4556_s8 + $0xc0] sm:$0xf]  ;;  %1336 = vmatmul.bf16.vlgmr.msrb.gmra.mxu3 %v4981_v18  ;;  %v3396_v51 = vld [vmem:[%s4556_s8 + $0x90] sm:$0xf] }
 0x18a   :  { %v4205_v46 = vld [vmem:[%s4556_s8 + $0x94] sm:$0xf0]  ;;  %s5493_s17 = sld [smem:[#allocation12_spill]] }
 0x18b   :  { %v951_v2 = vmax.f32 %v4886_v28, %v4918_v58  ;;  %1087 = vmatpush.bf16.msrb.mxu1 %v3261_v61  ;;  %v4194_v61 = vld [vmem:[%s4556_s8 + $0x44] sm:$0xf]  ;;  %v3508_v58 = vld [vmem:[%s4576_s30 + $0x70] sm:$0xf] }
 0x18f   :  { %1341 = vmatpush.bf16.msra.mxu1 %v3445_v3  ;;  %v3361_v3 = vor.u32 %v4194_v61, %v3358_v63  ;;  %v4203_v63 = vld [vmem:[%s4556_s8 + $0x84] sm:$0xf0] }
 0x190   :  { %v922_v32 = vpop.f32.mrf.mxu0 }
 0x191   :  { %v923_v8 = vadd.f32 %v922_v32, %v874_v6  ;;  %v883_v19 = vpop.f32.mrf.mxu3  ;;  %v4212_v6 = vld [vmem:[%s4556_s8 + $0xd4] sm:$0xf]  ;;  %v3430_v32 = vld [vmem:[%s4556_s8 + $0xd8] sm:$0xf0] }
 0x193   :  { %v4924_v9 = vmax.f32 %v942_v20, %v923_v8  ;;  %v830_v20 = vadd.f32 %v829_v29, %v781_v24  ;;  %v3385_v29 = vor.u32 %v4200_v4, %v3382_v5  ;;  %v786_v8 = vadd.f32 %v785_v59, %v4836_v0  ;;  %v4210_v0 = vld [vmem:[%s4556_s8 + $0xc4] sm:$0xf]  ;;  %v4213_v59 = vld [vmem:[%s4556_s8 + $0xd4] sm:$0xf0] }
 0x194   :  { %v3437_v24 = vor.u32 %v4215_v33, %v3436_v12  ;;  %v876_v4 = vadd.f32 %v4915_v50, %v827_v40  ;;  %v4192_v12 = vld [vmem:[%s4556_s8 + $0x34] sm:$0xf]  ;;  %v4998_v33 = vld [vmem:[%s4526_s13] ss:$0 sm:$0xff]  ;;  %s5492_s13 = sld [smem:[#allocation10_spill]] }
 0x195   :  { %v879_v36 = vadd.f32 %v878_v54, %v830_v20  ;;  %v3433_v54 = vor.u32 %v4212_v6, %v3430_v32  ;;  %v835_v23 = vadd.f32 %v834_v47, %v786_v8  ;;  %v836_v20 = vpop.f32.mrf.mxu2  ;;  %v790_v6 = vpop.f32.mrf.mxu1 }
 0x196   :  { %1342 = vmatpush.bf16.msra.mxu1 %v3437_v24  ;;  %v837_v5 = vadd.f32 %v836_v20, %v788_v53  ;;  %v791_v24 = vadd.f32 %v790_v6, %v4849_v17  ;;  %v3342_v17 = vld [vmem:[%s4556_s8 + $0x28] sm:$0xf0] }
 0x197   :  { %1369 = vmatpush.bf16.msra.mxu3 %v3433_v54  ;;  %v884_v44 = vadd.f32 %v883_v19, %v835_v23  ;;  %v3412_v54 = vld [vmem:[%s4556_s8 + $0xb0] sm:$0xf]  ;;  %v4204_v23 = vld [vmem:[%s4556_s8 + $0x94] sm:$0xf] }
 0x198   :  { %v4933_v21 = vpop.f32.mrf.mxu0  ;;  %v3413_v22 = vor.u32 %v4209_v11, %v3412_v54 }
 0x199   :  { %v885_v47 = vpop.f32.mrf.mxu3  ;;  %v925_v32 = vadd.f32 %v4933_v21, %v876_v4  ;;  %v3350_v21 = vld [vmem:[%s4556_s8 + $0x38] sm:$0xf0] }
 0x19a   :  { %v886_v50 = vadd.f32 %v885_v47, %v837_v5  ;;  %v3353_v20 = vor.u32 %v4192_v12, %v3350_v21  ;;  %v4186_v5 = vld [vmem:[%s4556_s8 + $0x4] sm:$0xf] }
 0x19b   :  { %v946_v35 = vmax.f32 %v945_v37, %v925_v32 }
 0x19d   :  { %v839_v8 = vpop.f32.mrf.mxu2  ;;  %v792_v61 = vpop.f32.mrf.mxu1 }
 0x19e   :  { %v840_v47 = vadd.f32 %v839_v8, %v791_v24  ;;  %v793_v6 = vadd.f32 %v792_v61, %v4856_v26  ;;  %v3468_v61 = vld [vmem:[%s4576_s30 + $0x20] sm:$0xf] }
 0x1a0   :  { %v927_v38 = vpop.f32.mrf.mxu0 }
 0x1a1   :  { %v928_v45 = vadd.f32 %v927_v38, %v879_v36  ;;  %v3425_v36 = vor.u32 %v4210_v0, %v3422_v31  ;;  %v4196_v38 = vld [vmem:[%s4556_s8 + $0x54] sm:$0xf]  ;;  %v3404_v0 = vld [vmem:[%s4556_s8 + $0xa0] sm:$0xf]  ;;  %v4207_v31 = vld [vmem:[%s4556_s8 + $0xa4] sm:$0xf0]  ;;  %v888_v40 = vpop.f32.mrf.mxu3 }
 0x1a2   :  { %v3369_v15 = vor.u32 %v4196_v38, %v3366_v55  ;;  %v4190_v38 = vld [vmem:[%s4556_s8 + $0x24] sm:$0xf]  ;;  %v3390_v55 = vld [vmem:[%s4556_s8 + $0x88] sm:$0xf0] }
 0x1a3   :  { %v4945_v48 = vmax.f32 %v948_v49, %v928_v45  ;;  %v3265_v49 = vor.u32 %v4170_v57, %v3262_v62  ;;  %1370 = vmatpush.bf16.msra.mxu3 %v3425_v36  ;;  %v3429_v45 = vor.u32 %v4213_v59, %v3428_v43  ;;  %v4211_v57 = vld [vmem:[%s4556_s8 + $0xc4] sm:$0xf0]  ;;  %v3405_v59 = vor.u32 %v4207_v31, %v3404_v0  ;;  %v4232_v0 = vld [vmem:[%s4576_s30 + $0x74] sm:$0xf]  ;;  %v3510_v31 = vld [vmem:[%s4576_s30 + $0x78] sm:$0xf0] }
 0x1a4   :  { %v3421_v62 = vor.u32 %v4211_v57, %v3420_v56  ;;  %v3393_v37 = vor.u32 %v4202_v39, %v3390_v55  ;;  %v3397_v57 = vor.u32 %v4205_v46, %v3396_v51  ;;  %v3492_v55 = vld [vmem:[%s4576_s30 + $0x50] sm:$0xf]  ;;  %v4229_v51 = vld [vmem:[%s4576_s30 + $0x54] sm:$0xf0] }
 0x1a5   :  { %1100 = vmatpush.bf16.msrb.mxu2 %v3265_v49  ;;  %1343 = vmatpush.bf16.msra.mxu1 %v3429_v45  ;;  %v3406_v49 = vld [vmem:[%s4556_s8 + $0xa8] sm:$0xf0]  ;;  %v3345_v45 = vor.u32 %v4190_v38, %v3342_v17  ;;  %v3493_v46 = vor.u32 %v4229_v51, %v3492_v55  ;;  %v4239_v55 = vld [vmem:[%s4576_s30 + $0xa4] sm:$0xf0] }
 0x1a6   :  { %v3409_v7 = vor.u32 %v4206_v1, %v3406_v49  ;;  %v889_v49 = vadd.f32 %v888_v40, %v840_v47  ;;  %v3484_v47 = vld [vmem:[%s4576_s30 + $0x40] sm:$0xf] }
 0x1a7   :  { %1371 = vmatpush.bf16.msra.mxu3 %v3417_v52 }
 0x1a8   :  { %v4957_v27 = vpop.f32.mrf.mxu0 }
 0x1a9   :  { %1354 = vmatpush.bf16.msra.mxu2 %v3385_v29  ;;  %1344 = vmatpush.bf16.msra.mxu1 %v3421_v62  ;;  %v3388_v62 = vld [vmem:[%s4556_s8 + $0x80] sm:$0xf] }
 0x1aa   :  { %v3389_v54 = vor.u32 %v4203_v63, %v3388_v62  ;;  %v3572_v63 = vld [vmem:[%s4576_s30 + $0xf0] sm:$0xf] }
 0x1ab   :  { %1372 = vmatpush.bf16.msra.mxu3 %v3409_v7 }
 0x1ad   :  { %1355 = vmatpush.bf16.msra.mxu2 %v3377_v30  ;;  %v3398_v30 = vld [vmem:[%s4556_s8 + $0x98] sm:$0xf0]  ;;  %1345 = vmatpush.bf16.msra.mxu1 %v3413_v22 }
 0x1ae   :  { %v3401_v43 = vor.u32 %v4204_v23, %v3398_v30 }
 0x1b0   :  { %v932_v14 = vpop.f32.mrf.mxu0  ;;  %1373 = vmatpush.bf16.msra.mxu3 %v3401_v43 }
 0x1b1   :  { %v933_v19 = vadd.f32 %v932_v14, %v884_v44  ;;  %1356 = vmatpush.bf16.msra.mxu2 %v3369_v15  ;;  %v1163_v44 = vunpack.c.h.b16 %v4971_v42  ;;  %v4188_v14 = vld [vmem:[%s4556_s8 + $0x14] sm:$0xf]  ;;  %v3334_v15 = vld [vmem:[%s4556_s8 + $0x18] sm:$0xf0]  ;;  %v783_v42 = vadd.f32 %v4926_v10, %v4832_v60  ;;  %1346 = vmatpush.bf16.msra.mxu1 %v3405_v59  ;;  %v3326_v60 = vld [vmem:[%s4556_s8 + $0x8] sm:$0xf0]  ;;  %v841_v10 = vpop.f32.mrf.mxu2 }
 0x1b2   :  { %v3329_v11 = vor.u32 %v4186_v5, %v3326_v60  ;;  %v842_v12 = vadd.f32 %v841_v10, %v793_v6  ;;  %v4221_v5 = vld [vmem:[%s4576_s30 + $0x14] sm:$0xf0]  ;;  %v3564_v10 = vld [vmem:[%s4576_s30 + $0xe0] sm:$0xf]  ;;  %v4226_v6 = vld [vmem:[%s4576_s30 + $0x44] sm:$0xf] }
 0x1b3   :  { %v944_v29 = vmax.f32 %v4924_v9, %v933_v19  ;;  %v4505_v9 = vmov 4.0   ;;  %v5022_v53 = vpack.c.b16 %v1163_v44, %v1163_v44  ;;  %v3337_v19 = vor.u32 %v4188_v14, %v3334_v15  ;;  %v3500_v44 = vld [vmem:[%s4576_s30 + $0x60] sm:$0xf]  ;;  %v4225_v14 = vld [vmem:[%s4576_s30 + $0x34] sm:$0xf0]  ;;  %s5495_s8 = sld [smem:[#allocation14_spill]] }
 0x1b4   :  { %4415 = vrcp.f32 %v4505_v9  ;;  %v832_v1 = vadd.f32 %v4931_v16, %v783_v42  ;;  %1374 = vmatpush.bf16.msra.mxu3 %v3393_v37  ;;  %v890_v9 = vpop.f32.mrf.mxu3  ;;  %v3476_v37 = vld [vmem:[%s4576_s30 + $0x30] sm:$0xf]  ;;  %v3502_v42 = vld [vmem:[%s4576_s30 + $0x68] sm:$0xf0] }
 0x1b5   :  { %1357 = vmatpush.bf16.msra.mxu2 %v3361_v3  ;;  %v958_v13 = vadd.f32 %v4998_v33, %v944_v29  ;;  %1347 = vmatpush.bf16.msra.mxu1 %v3397_v57  ;;  %v891_v23 = vadd.f32 %v890_v9, %v842_v12  ;;  %v3477_v15 = vor.u32 %v4225_v14, %v3476_v37  ;;  %v4245_v9 = vld [vmem:[%s4576_s30 + $0xd4] sm:$0xf0]  ;;  %v3550_v37 = vld [vmem:[%s4576_s30 + $0xc8] sm:$0xf0] }
 0x1b6   :  { %v881_v16 = vadd.f32 %v4939_v34, %v832_v1  ;;  %v4249_v1 = vld [vmem:[%s4576_s30 + $0xf4] sm:$0xf0] }
 0x1b7   :  { %v962_v3 = vmax.f32 %v958_v13, 0.0  ;;  %1375 = vmatmul.bf16.vlgmr.msra.gmra.mxu3 %v5022_v53  ;;  %v4227_v13 = vld [vmem:[%s4576_s30 + $0x44] sm:$0xf0] }
 0x1b8   :  { %v934_v25 = vpop.f32.mrf.mxu0  ;;  %v930_v21 = vadd.f32 %v4957_v27, %v881_v16  ;;  %v4219_v16 = vld [vmem:[%s4576_s30 + $0x4] sm:$0xf0] }
 0x1b9   :  { %v935_v36 = vadd.f32 %v934_v25, %v886_v50  ;;  %1358 = vmatpush.bf16.msra.mxu2 %v3353_v20  ;;  %1348 = vmatpush.bf16.msra.mxu1 %v3389_v54 }
 0x1ba   :  { %v4416_v52 = vpop.eup %4415  ;;  %v952_v34 = vmax.f32 %v951_v2, %v930_v21  ;;  %v4233_v2 = vld [vmem:[%s4576_s30 + $0x74] sm:$0xf0] }
 0x1bb   :  { %v947_v41 = vmax.f32 %v946_v35, %v935_v36  ;;  %v970_v7 = vmul.f32 4.0, %v4416_v52  ;;  %v3513_v35 = vor.u32 %v4232_v0, %v3510_v31  ;;  %vm974_vm1 = vweird.f32 %v4416_v52  ;;  %v3470_v31 = vld [vmem:[%s4576_s30 + $0x28] sm:$0xf0] }
 0x1bc   :  { %v3509_v39 = vor.u32 %v4233_v2, %v3508_v58  ;;  %v4220_v2 = vld [vmem:[%s4576_s30 + $0x14] sm:$0xf] }
 0x1bd   :  { %v959_v56 = vadd.f32 %v4998_v33, %v947_v41  ;;  %1359 = vmatpush.bf16.msra.mxu2 %v3345_v45  ;;  %v971_v22 = vsub.f32 1.0, %v970_v7  ;;  %1624 = vmatpush.bf16.msrb.mxu3 %v3513_v35  ;;  %v4231_v45 = vld [vmem:[%s4576_s30 + $0x64] sm:$0xf0]  ;;  %v3485_v41 = vor.u32 %v4227_v13, %v3484_v47  ;;  %v3566_v35 = vld [vmem:[%s4576_s30 + $0xe8] sm:$0xf0] }
 0x1be   :  { %v3454_v47 = vld [vmem:[%s4576_s30 + $0x8] sm:$0xf0]  ;;  %v4242_v13 = vld [vmem:[%s4576_s30 + $0xc4] sm:$0xf] }
 0x1bf   :  { %v963_v4 = vmax.f32 %v959_v56, 0.0  ;;  %v972_v20 = vmul.f32 %v4416_v52, %v971_v22  ;;  %v4224_v22 = vld [vmem:[%s4576_s30 + $0x34] sm:$0xf] }
 0x1c0   :  { %v937_v29 = vpop.f32.mrf.mxu0 }
 0x1c1   :  { %v966_v32 = vadd.f32 %v963_v4, %v962_v3  ;;  %v938_v8 = vadd.f32 %v937_v29, %v889_v49  ;;  %1360 = vmatpush.bf16.msra.mxu2 %v3337_v19  ;;  %v973_v36 = vadd.f32 %v4416_v52, %v972_v20  ;;  %v4223_v19 = vld [vmem:[%s4576_s30 + $0x24] sm:$0xf0]  ;;  %v3494_v49 = vld [vmem:[%s4576_s30 + $0x58] sm:$0xf0]  ;;  %v3460_v4 = vld [vmem:[%s4576_s30 + $0x10] sm:$0xf] }
 0x1c2   :  { %v3469_v62 = vor.u32 %v4223_v19, %v3468_v61  ;;  %v3461_v60 = vor.u32 %v4221_v5, %v3460_v4  ;;  %v4247_v29 = vld [vmem:[%s4576_s30 + $0xe4] sm:$0xf0]  ;;  %v3542_v19 = vld [vmem:[%s4576_s30 + $0xb8] sm:$0xf0]  ;;  %v4236_v5 = vld [vmem:[%s4576_s30 + $0x94] sm:$0xf] }
 0x1c3   :  { %v950_v50 = vmax.f32 %v4945_v48, %v938_v8  ;;  %v975_v38 = vsel %vm974_vm1, %v4416_v52, %v973_v36  ;;  %v4230_v52 = vld [vmem:[%s4576_s30 + $0x64] sm:$0xf]  ;;  %v3565_v7 = vor.u32 %v4247_v29, %v3564_v10 }
 0x1c4   :  { %v3505_v56 = vor.u32 %v4230_v52, %v3502_v42  ;;  %v3524_v52 = vld [vmem:[%s4576_s30 + $0x90] sm:$0xf]  ;;  %v4237_v42 = vld [vmem:[%s4576_s30 + $0x94] sm:$0xf0]  ;;  %v4234_v29 = vld [vmem:[%s4576_s30 + $0x84] sm:$0xf] }
 0x1c5   :  { %v960_v26 = vadd.f32 %v4998_v33, %v950_v50  ;;  %1361 = vmatpush.bf16.msra.mxu2 %v3329_v11  ;;  %v3452_v11 = vld [vmem:[%s4576_s30] sm:$0xf]  ;;  %v3556_v50 = vld [vmem:[%s4576_s30 + $0xd0] sm:$0xf]  ;;  %v3525_v61 = vor.u32 %v4237_v42, %v3524_v52 }
 0x1c6   :  { %1625 = vmatpush.bf16.msrb.mxu3 %v3505_v56  ;;  %v3453_v12 = vor.u32 %v4219_v16, %v3452_v11  ;;  %v3557_v21 = vor.u32 %v4245_v9, %v3556_v50  ;;  %v4240_v56 = vld [vmem:[%s4576_s30 + $0xb4] sm:$0xf]  ;;  %v5115_v16 = vld [vmem:[%s4566_s19] sm:$0x3]  ;;  %v3638_v50 = vld [vmem:[%s4596_s27 + $0x78] sm:$0xf0] }
 0x1c7   :  { %v964_v24 = vmax.f32 %v960_v26, 0.0  ;;  %v3478_v26 = vld [vmem:[%s4576_s30 + $0x38] sm:$0xf0]  ;;  %v4262_v9 = vld [vmem:[%s4596_s27 + $0x64] sm:$0xf]  ;;  %s5497_s19 = sld [smem:[#allocation18_spill]] }
 0x1c8   :  { %v939_v25 = vpop.f32.mrf.mxu0 }
 0x1c9   :  { %v967_v30 = vadd.f32 %v966_v32, %v964_v24  ;;  %v940_v48 = vadd.f32 %v939_v25, %v891_v23  ;;  %v3486_v32 = vld [vmem:[%s4576_s30 + $0x48] sm:$0xf0]  ;;  %v4248_v23 = vld [vmem:[%s4576_s30 + $0xf4] sm:$0xf]  ;;  %v3574_v24 = vld [vmem:[%s4576_s30 + $0xf8] sm:$0xf0]  ;;  %v3481_v25 = vor.u32 %v4224_v22, %v3478_v26 }
 0x1ca   :  { %v3489_v54 = vor.u32 %v4226_v6, %v3486_v32  ;;  %v3577_v20 = vor.u32 %v4248_v23, %v3574_v24  ;;  %v1155_v32 = vld [vmem:[%s4561_s14] sm:$0x3]  ;;  %v1382_v26 = vperm.slane %v5115_v16, 0  ;;  %v3636_v24 = vld [vmem:[%s4596_s27 + $0x70] sm:$0xf]  ;;  %s5496_s14 = sld [smem:[#allocation15_spill]] }
 0x1cb   :  { %v953_v27 = vmax.f32 %v952_v34, %v940_v48  ;;  %v3548_v34 = vld [vmem:[%s4576_s30 + $0xc0] sm:$0xf]  ;;  %v4222_v48 = vld [vmem:[%s4576_s30 + $0x24] sm:$0xf]  ;;  %v1157_v11 = vperm.slane %v1155_v32, 0 }
 0x1cc   :  { %v3473_v36 = vor.u32 %v4222_v48, %v3470_v31  ;;  %v5123_v23 = vld [vmem:[%s4571_s24] sm:$0x3]  ;;  %v4265_v48 = vld [vmem:[%s4596_s27 + $0x74] sm:$0xf0]  ;;  %s5499_s24 = sld [smem:[#allocation16_spill]] }
 0x1cd   :  { %v961_v43 = vadd.f32 %v4998_v33, %v953_v27  ;;  %v3501_v33 = vor.u32 %v4231_v45, %v3500_v44  ;;  %v4246_v27 = vld [vmem:[%s4576_s30 + $0xe4] sm:$0xf]  ;;  %v3558_v44 = vld [vmem:[%s4576_s30 + $0xd8] sm:$0xf0]  ;;  %v3637_v31 = vor.u32 %v4265_v48, %v3636_v24 }
 0x1cf   :  { %v965_v59 = vmax.f32 %v961_v43, 0.0  ;;  %v3569_v43 = vor.u32 %v4246_v27, %v3566_v35  ;;  %v3700_v27 = vld [vmem:[%s4596_s27 + $0xf0] sm:$0xf]  ;;  %v4281_v35 = vld [vmem:[%s4596_s27 + $0xf4] sm:$0xf0] }
 0x1d1   :  { %v968_v28 = vadd.f32 %v967_v30, %v965_v59  ;;  %v4243_v30 = vld [vmem:[%s4576_s30 + $0xc4] sm:$0xf0] }
 0x1d2   :  { %v3549_v0 = vor.u32 %v4243_v30, %v3548_v34  ;;  %v4260_v34 = vld [vmem:[%s4596_s27 + $0x54] sm:$0xf]  ;;  %v3622_v30 = vld [vmem:[%s4596_s27 + $0x58] sm:$0xf0] }
 0x1d3   :  { %v976_v17 = vmul.f32 %v975_v38, %v968_v28  ;;  %v3540_v38 = vld [vmem:[%s4576_s30 + $0xb0] sm:$0xf]  ;;  %v4241_v28 = vld [vmem:[%s4576_s30 + $0xb4] sm:$0xf0] }
 0x1d4   :  { %v3541_v58 = vor.u32 %v4241_v28, %v3540_v38  ;;  %v3701_v38 = vor.u32 %v4281_v35, %v3700_v27  ;;  %v4263_v28 = vld [vmem:[%s4596_s27 + $0x64] sm:$0xf0] }
 0x1d5   :  { %v977_v40 = vpack.c.bf16 %v976_v17, %v976_v17  ;;  %v3462_v17 = vld [vmem:[%s4576_s30 + $0x18] sm:$0xf0] }
 0x1d7   :  { %1088 = vmatmul.bf16.vlgmr.msrb.gmra.mxu1 %v977_v40  ;;  %1101 = vmatmul.bf16.vlgmr.msrb.gmra.mxu2 %v977_v40  ;;  %v4244_v40 = vld [vmem:[%s4576_s30 + $0xd4] sm:$0xf] }
 0x1d8   :  { %1598 = vmatpush.bf16.msrb.mxu1 %v3509_v39  ;;  %v3465_v39 = vor.u32 %v4220_v2, %v3462_v17  ;;  %v3561_v45 = vor.u32 %v4244_v40, %v3558_v44  ;;  %v4279_v2 = vld [vmem:[%s4596_s27 + $0xe4] sm:$0xf0]  ;;  %v3625_v44 = vor.u32 %v4260_v34, %v3622_v30  ;;  %v3596_v34 = vld [vmem:[%s4596_s27 + $0x20] sm:$0xf] }
 0x1d9   :  { %v4255_v30 = vld [vmem:[%s4596_s27 + $0x24] sm:$0xf0] }
 0x1da   :  { %v3597_v35 = vor.u32 %v4255_v30, %v3596_v34  ;;  %v3796_v30 = vld [vmem:[%s4616_s21 + $0xb0] sm:$0xf] }
 0x1dc   :  { %1599 = vmatpush.bf16.msrb.mxu1 %v3501_v33  ;;  %v3532_v33 = vld [vmem:[%s4576_s30 + $0xa0] sm:$0xf] }
 0x1dd   :  { %v3533_v51 = vor.u32 %v4239_v55, %v3532_v33  ;;  %v3620_v55 = vld [vmem:[%s4596_s27 + $0x50] sm:$0xf] }
 0x1e0   :  { %1600 = vmatpush.bf16.msrb.mxu1 %v3493_v46  ;;  %v4218_v46 = vld [vmem:[%s4576_s30 + $0x4] sm:$0xf] }
 0x1e4   :  { %1601 = vmatpush.bf16.msrb.mxu1 %v3485_v41  ;;  %v3457_v41 = vor.u32 %v4218_v46, %v3454_v47  ;;  %v3614_v47 = vld [vmem:[%s4596_s27 + $0x48] sm:$0xf0] }
 0x1e7   :  { %1349 = vmatmul.bf16.vlgmr.msra.gmra.mxu1 %v5022_v53  ;;  %1362 = vmatmul.bf16.vlgmr.msra.gmra.mxu2 %v4981_v18  ;;  %v3573_v53 = vor.u32 %v4249_v1, %v3572_v63  ;;  %v4228_v18 = vld [vmem:[%s4576_s30 + $0x54] sm:$0xf]  ;;  %v3516_v63 = vld [vmem:[%s4576_s30 + $0x80] sm:$0xf]  ;;  %v4235_v1 = vld [vmem:[%s4576_s30 + $0x84] sm:$0xf0] }
 0x1e8   :  { %1602 = vmatpush.bf16.msrb.mxu1 %v3477_v15  ;;  %v3497_v3 = vor.u32 %v4228_v18, %v3494_v49  ;;  %v3553_v15 = vor.u32 %v4242_v13, %v3550_v37  ;;  %v3517_v18 = vor.u32 %v4235_v1, %v3516_v63  ;;  %v3534_v49 = vld [vmem:[%s4576_s30 + $0xa8] sm:$0xf0]  ;;  %v3684_v13 = vld [vmem:[%s4596_s27 + $0xd0] sm:$0xf] }
 0x1e9   :  { %1611 = vmatpush.bf16.msrb.mxu2 %v3573_v53  ;;  %v4238_v53 = vld [vmem:[%s4576_s30 + $0xa4] sm:$0xf] }
 0x1ea   :  { %1626 = vmatpush.bf16.msrb.mxu3 %v3497_v3  ;;  %v3537_v4 = vor.u32 %v4238_v53, %v3534_v49  ;;  %v1383_v53 = vperm.slane %v5115_v16, 1  ;;  %v4275_v49 = vld [vmem:[%s4596_s27 + $0xc4] sm:$0xf0]  ;;  %v4257_v16 = vld [vmem:[%s4596_s27 + $0x34] sm:$0xf0] }
 0x1ec   :  { %1603 = vmatpush.bf16.msrb.mxu1 %v3469_v62  ;;  %v3545_v62 = vor.u32 %v4240_v56, %v3542_v19  ;;  %v3606_v56 = vld [vmem:[%s4596_s27 + $0x38] sm:$0xf0]  ;;  %v3612_v19 = vld [vmem:[%s4596_s27 + $0x40] sm:$0xf] }
 0x1ed   :  { %1612 = vmatpush.bf16.msrb.mxu2 %v3565_v7  ;;  %v3518_v7 = vld [vmem:[%s4576_s30 + $0x88] sm:$0xf0] }
 0x1ee   :  { %1627 = vmatpush.bf16.msrb.mxu3 %v3489_v54 }
 0x1f0   :  { %1604 = vmatpush.bf16.msrb.mxu1 %v3461_v60  ;;  %v3526_v60 = vld [vmem:[%s4576_s30 + $0x98] sm:$0xf0]  ;;  %s5500_s30 = sld [smem:[#allocation17_spill]] }
 0x1f1   :  { %1613 = vmatpush.bf16.msrb.mxu2 %v3557_v21  ;;  %v3529_v10 = vor.u32 %v4236_v5, %v3526_v60  ;;  %v3630_v21 = vld [vmem:[%s4596_s27 + $0x68] sm:$0xf0] }
 0x1f2   :  { %1628 = vmatpush.bf16.msrb.mxu3 %v3481_v25 }
 0x1f4   :  { %1605 = vmatpush.bf16.msrb.mxu1 %v3453_v12  ;;  %v4264_v12 = vld [vmem:[%s4596_s27 + $0x74] sm:$0xf] }
 0x1f5   :  { %1614 = vmatpush.bf16.msrb.mxu2 %v3549_v0  ;;  %v3641_v22 = vor.u32 %v4264_v12, %v3638_v50  ;;  %v4254_v12 = vld [vmem:[%s4596_s27 + $0x24] sm:$0xf] }
 0x1f6   :  { %1629 = vmatpush.bf16.msrb.mxu3 %v3473_v36  ;;  %v3628_v36 = vld [vmem:[%s4596_s27 + $0x60] sm:$0xf] }
 0x1f7   :  { %1894 = vmatpush.bf16.msra.mxu0 %v3641_v22  ;;  %v3629_v40 = vor.u32 %v4263_v28, %v3628_v36  ;;  %v3668_v22 = vld [vmem:[%s4596_s27 + $0xb0] sm:$0xf] }
 0x1f8   :  { %1637 = vmatpush.bf16.msra.mxu1 %v3577_v20  ;;  %v3633_v20 = vor.u32 %v4262_v9, %v3630_v21  ;;  %v4273_v21 = vld [vmem:[%s4596_s27 + $0xb4] sm:$0xf0]  ;;  %v3652_v28 = vld [vmem:[%s4596_s27 + $0x90] sm:$0xf] }
 0x1f9   :  { %1615 = vmatpush.bf16.msrb.mxu2 %v3541_v58  ;;  %v3692_v58 = vld [vmem:[%s4596_s27 + $0xe0] sm:$0xf] }
 0x1fa   :  { %1630 = vmatpush.bf16.msrb.mxu3 %v3465_v39  ;;  %v1390_v39 = vperm.slane %v5123_v23, 0  ;;  %v3693_v33 = vor.u32 %v4279_v2, %v3692_v58  ;;  %v4269_v58 = vld [vmem:[%s4596_s27 + $0x94] sm:$0xf0] }
 0x1fb   :  { %1895 = vmatpush.bf16.msra.mxu0 %v3633_v20  ;;  %v3669_v20 = vor.u32 %v4273_v21, %v3668_v22  ;;  %v4307_v22 = vld [vmem:[%s4616_s21 + $0xc4] sm:$0xf0]  ;;  %v4272_v21 = vld [vmem:[%s4596_s27 + $0xb4] sm:$0xf] }
 0x1fc   :  { %1638 = vmatpush.bf16.msra.mxu1 %v3569_v43 }
 0x1fd   :  { %1616 = vmatpush.bf16.msrb.mxu2 %v3533_v51  ;;  %v4261_v51 = vld [vmem:[%s4596_s27 + $0x54] sm:$0xf0] }
 0x1fe   :  { %1631 = vmatpush.bf16.msrb.mxu3 %v3457_v41  ;;  %v4277_v41 = vld [vmem:[%s4596_s27 + $0xd4] sm:$0xf0] }
 0x1ff   :  { %1896 = vmatpush.bf16.msra.mxu0 %v3625_v44  ;;  %v4297_v44 = vld [vmem:[%s4616_s21 + $0x74] sm:$0xf0] }
 0x200   :  { %1639 = vmatpush.bf16.msra.mxu1 %v3561_v45  ;;  %v4258_v45 = vld [vmem:[%s4596_s27 + $0x44] sm:$0xf] }
 0x201   :  { %1617 = vmatpush.bf16.msrb.mxu2 %v3525_v61  ;;  %v3617_v42 = vor.u32 %v4258_v45, %v3614_v47  ;;  %v3685_v61 = vor.u32 %v4277_v41, %v3684_v13  ;;  %v3644_v45 = vld [vmem:[%s4596_s27 + $0x80] sm:$0xf] }
 0x202   :  { %1881 = vmatpush.bf16.msra.mxu3 %v3701_v38  ;;  %v4253_v38 = vld [vmem:[%s4596_s27 + $0x14] sm:$0xf0] }
 0x203   :  { %1897 = vmatpush.bf16.msra.mxu0 %v3617_v42  ;;  %v4295_v42 = vld [vmem:[%s4616_s21 + $0x64] sm:$0xf0] }
 0x204   :  { %1640 = vmatpush.bf16.msra.mxu1 %v3553_v15  ;;  %v3621_v15 = vor.u32 %v4261_v51, %v3620_v55  ;;  %v3828_v55 = vld [vmem:[%s4616_s21 + $0xf0] sm:$0xf]  ;;  %v4313_v51 = vld [vmem:[%s4616_s21 + $0xf4] sm:$0xf0] }
 0x205   :  { %1618 = vmatpush.bf16.msrb.mxu2 %v3517_v18  ;;  %v3676_v18 = vld [vmem:[%s4596_s27 + $0xc0] sm:$0xf]  ;;  %v3829_v41 = vor.u32 %v4313_v51, %v3828_v55  ;;  %v3582_v55 = vld [vmem:[%s4596_s27 + $0x8] sm:$0xf0] }
 0x206   :  { %1882 = vmatpush.bf16.msra.mxu3 %v3693_v33  ;;  %v4267_v33 = vld [vmem:[%s4596_s27 + $0x84] sm:$0xf0] }
 0x207   :  { %v3645_v13 = vor.u32 %v4267_v33, %v3644_v45  ;;  %v4285_v45 = vld [vmem:[%s4616_s21 + $0x14] sm:$0xf0]  ;;  %v4250_v33 = vld [vmem:[%s4596_s27 + $0x4] sm:$0xf] }
 0x208   :  { %1641 = vmatpush.bf16.msra.mxu1 %v3545_v62  ;;  %v4259_v62 = vld [vmem:[%s4596_s27 + $0x44] sm:$0xf0] }
 0x209   :  { %1868 = vmatpush.bf16.msra.mxu2 %v3637_v31  ;;  %v4271_v31 = vld [vmem:[%s4596_s27 + $0xa4] sm:$0xf0] }
 0x20a   :  { %1883 = vmatpush.bf16.msra.mxu3 %v3685_v61  ;;  %v4252_v61 = vld [vmem:[%s4596_s27 + $0x14] sm:$0xf] }
 0x20c   :  { %v5055_v57 = vpop.f32.mrf.mxu3  ;;  %1642 = vmatpush.bf16.msra.mxu1 %v3537_v4 }
 0x20d   :  { %v1338_v0 = vadd.f32 %v5055_v57, %v1157_v11  ;;  %v1158_v57 = vperm.slane %v1155_v32, 1  ;;  %1869 = vmatpush.bf16.msra.mxu2 %v3629_v40  ;;  %v3702_v32 = vld [vmem:[%s4596_s27 + $0xf8] sm:$0xf0]  ;;  %v3604_v11 = vld [vmem:[%s4596_s27 + $0x30] sm:$0xf] }
 0x20e   :  { %v3764_v40 = vld [vmem:[%s4616_s21 + $0x70] sm:$0xf] }
 0x20f   :  { %v3765_v47 = vor.u32 %v4297_v44, %v3764_v40  ;;  %v3716_v44 = vld [vmem:[%s4616_s21 + $0x10] sm:$0xf] }
 0x210   :  { %1643 = vmatpush.bf16.msra.mxu1 %v3529_v10  ;;  %v1391_v10 = vperm.slane %v5123_v23, 1  ;;  %v3605_v23 = vor.u32 %v4257_v16, %v3604_v11  ;;  %v3678_v11 = vld [vmem:[%s4596_s27 + $0xc8] sm:$0xf0]  ;;  %v3717_v51 = vor.u32 %v4285_v45, %v3716_v44  ;;  %v4310_v44 = vld [vmem:[%s4616_s21 + $0xe4] sm:$0xf] }
 0x211   :  { %1870 = vmatpush.bf16.msra.mxu2 %v3621_v15  ;;  %v3822_v45 = vld [vmem:[%s4616_s21 + $0xe8] sm:$0xf0] }
 0x214   :  { %v1339_v8 = vpop.f32.mrf.mxu3 }
 0x215   :  { %v3521_v8 = vor.u32 %v4234_v29, %v3518_v7  ;;  %v3613_v29 = vor.u32 %v4259_v62, %v3612_v19  ;;  %v4280_v7 = vld [vmem:[%s4596_s27 + $0xf4] sm:$0xf]  ;;  %v3590_v19 = vld [vmem:[%s4596_s27 + $0x18] sm:$0xf0]  ;;  %v3820_v62 = vld [vmem:[%s4616_s21 + $0xe0] sm:$0xf] }
 0x216   :  { %v3705_v50 = vor.u32 %v4280_v7, %v3702_v32  ;;  %v3812_v7 = vld [vmem:[%s4616_s21 + $0xd0] sm:$0xf]  ;;  %v4309_v32 = vld [vmem:[%s4616_s21 + $0xd4] sm:$0xf0] }
 0x217   :  { %1644 = vmatpush.bf16.msra.mxu1 %v3521_v8  ;;  %1871 = vmatpush.bf16.msra.mxu2 %v3613_v29 }
 0x21b   :  { %1872 = vmatpush.bf16.msra.mxu2 %v3605_v23  ;;  %v3670_v23 = vld [vmem:[%s4596_s27 + $0xb8] sm:$0xf0] }
 0x21f   :  { %1873 = vmatpush.bf16.msra.mxu2 %v3597_v35  ;;  %v3662_v35 = vld [vmem:[%s4596_s27 + $0xa8] sm:$0xf0] }
 0x23a   :  { %v5083_v59 = vpop.f32.mrf.mxu3 }
 0x242   :  { %v1378_v14 = vpop.f32.mrf.mxu3 }
 0x243   :  { %v4256_v14 = vld [vmem:[%s4596_s27 + $0x34] sm:$0xf] }
 0x244   :  { %v3609_v8 = vor.u32 %v4256_v14, %v3606_v56  ;;  %v3694_v14 = vld [vmem:[%s4596_s27 + $0xe8] sm:$0xf0] }
 0x246   :  { %1898 = vmatpush.bf16.msra.mxu0 %v3609_v8  ;;  %v3813_v8 = vor.u32 %v4309_v32, %v3812_v7 }
 0x254   :  { %v5105_v3 = vpop.f32.mrf.mxu1 }
 0x25a   :  { %v5111_v6 = vpop.f32.mrf.mxu2 }
 0x25c   :  { %v1091_v54 = vpop.f32.mrf.mxu1 }
 0x25d   :  { %v3677_v54 = vor.u32 %v4275_v49, %v3676_v18  ;;  %v4276_v18 = vld [vmem:[%s4596_s27 + $0xd4] sm:$0xf]  ;;  %v3686_v49 = vld [vmem:[%s4596_s27 + $0xd8] sm:$0xf0] }
 0x25f   :  { %1884 = vmatpush.bf16.msra.mxu3 %v3677_v54  ;;  %v4274_v54 = vld [vmem:[%s4596_s27 + $0xc4] sm:$0xf] }
 0x260   :  { %v3681_v16 = vor.u32 %v4274_v54, %v3678_v11 }
 0x262   :  { %v1104_v25 = vpop.f32.mrf.mxu2 }
 0x263   :  { %1885 = vmatpush.bf16.msra.mxu3 %v3669_v20  ;;  %v3673_v20 = vor.u32 %v4272_v21, %v3670_v23  ;;  %v4296_v23 = vld [vmem:[%s4616_s21 + $0x74] sm:$0xf] }
 0x264   :  { %v1350_v43 = vpop.f32.mrf.mxu1 }
 0x265   :  { %v1351_v17 = vadd.f32 %v1350_v43, %v1338_v0  ;;  %v3660_v0 = vld [vmem:[%s4596_s27 + $0xa0] sm:$0xf]  ;;  %v3588_v43 = vld [vmem:[%s4596_s27 + $0x10] sm:$0xf] }
 0x266   :  { %v3661_v36 = vor.u32 %v4271_v31, %v3660_v0  ;;  %v3589_v2 = vor.u32 %v4253_v38, %v3588_v43  ;;  %v4305_v0 = vld [vmem:[%s4616_s21 + $0xb4] sm:$0xf0]  ;;  %v3724_v43 = vld [vmem:[%s4616_s21 + $0x20] sm:$0xf]  ;;  %v4287_v38 = vld [vmem:[%s4616_s21 + $0x24] sm:$0xf0] }
 0x267   :  { %v1386_v46 = vmul.f32 %v1382_v26, %v1351_v17  ;;  %v3653_v17 = vor.u32 %v4269_v58, %v3652_v28  ;;  %v3797_v31 = vor.u32 %v4305_v0, %v3796_v30  ;;  %v3725_v28 = vor.u32 %v4287_v38, %v3724_v43  ;;  %v3788_v58 = vld [vmem:[%s4616_s21 + $0xa0] sm:$0xf]  ;;  %v4312_v30 = vld [vmem:[%s4616_s21 + $0xf4] sm:$0xf]  ;;  %v3830_v0 = vld [vmem:[%s4616_s21 + $0xf8] sm:$0xf0] }
 0x268   :  { %1886 = vmatpush.bf16.msra.mxu3 %v3661_v36  ;;  %1874 = vmatpush.bf16.msra.mxu2 %v3589_v2  ;;  %v4303_v2 = vld [vmem:[%s4616_s21 + $0xa4] sm:$0xf0] }
 0x269   :  { %v1394_v37 = vadd.f32 %v1390_v39, %v1386_v46  ;;  %v3580_v39 = vld [vmem:[%s4596_s27] sm:$0xf] }
 0x26a   :  { %v1363_v52 = vpop.f32.mrf.mxu2 }
 0x26b   :  { %v5147_v63 = vmax.f32 %v1394_v37, 0.0  ;;  %v1364_v1 = vadd.f32 %v1363_v52, %v1158_v57  ;;  %v4251_v57 = vld [vmem:[%s4596_s27 + $0x4] sm:$0xf0]  ;;  %v4278_v37 = vld [vmem:[%s4596_s27 + $0xe4] sm:$0xf] }
 0x26c   :  { %v1352_v4 = vpop.f32.mrf.mxu1  ;;  %v3581_v46 = vor.u32 %v4251_v57, %v3580_v39  ;;  %1887 = vmatpush.bf16.msra.mxu3 %v3653_v17  ;;  %v3697_v15 = vor.u32 %v4278_v37, %v3694_v14  ;;  %v3756_v52 = vld [vmem:[%s4616_s21 + $0x60] sm:$0xf]  ;;  %v3789_v17 = vor.u32 %v4303_v2, %v3788_v58  ;;  %v4268_v39 = vld [vmem:[%s4596_s27 + $0x94] sm:$0xf]  ;;  %v3654_v57 = vld [vmem:[%s4596_s27 + $0x98] sm:$0xf0] }
 0x26d   :  { %v1398_v5 = vpack.c.bf16 %v5147_v63, %v5147_v63  ;;  %v1377_v60 = vadd.f32 %v5083_v59, %v1364_v1  ;;  %v3598_v59 = vld [vmem:[%s4596_s27 + $0x28] sm:$0xf0]  ;;  %v3757_v56 = vor.u32 %v4295_v42, %v3756_v52  ;;  %v3593_v1 = vor.u32 %v4252_v61, %v3590_v19  ;;  %v4266_v37 = vld [vmem:[%s4596_s27 + $0x84] sm:$0xf]  ;;  %v3708_v52 = vld [vmem:[%s4616_s21] sm:$0xf] }
 0x26e   :  { %v3601_v25 = vor.u32 %v4254_v12, %v3598_v59  ;;  %1875 = vmatpush.bf16.msra.mxu2 %v3581_v46  ;;  %v3740_v12 = vld [vmem:[%s4616_s21 + $0x40] sm:$0xf]  ;;  %v3657_v40 = vor.u32 %v4268_v39, %v3654_v57  ;;  %v3585_v46 = vor.u32 %v4250_v33, %v3582_v55  ;;  %v3646_v14 = vld [vmem:[%s4596_s27 + $0x88] sm:$0xf0]  ;;  %v4283_v42 = vld [vmem:[%s4616_s21 + $0x4] sm:$0xf0] }
 0x26f   :  { %v1387_v9 = vmul.f32 %v1383_v53, %v1377_v60  ;;  %1606 = vmatmul.bf16.vlgmr.msrb.gmra.mxu1 %v1398_v5  ;;  %1632 = vmatmul.bf16.vlgmr.msrb.gmra.mxu3 %v1398_v5  ;;  %v4311_v53 = vld [vmem:[%s4616_s21 + $0xe4] sm:$0xf0]  ;;  %v3689_v5 = vor.u32 %v4276_v18, %v3686_v49  ;;  %v3748_v60 = vld [vmem:[%s4616_s21 + $0x50] sm:$0xf]  ;;  %v3804_v59 = vld [vmem:[%s4616_s21 + $0xc0] sm:$0xf] }
 0x270   :  { %1907 = vmatpush.bf16.msrb.mxu1 %v3705_v50  ;;  %1899 = vmatpush.bf16.msra.mxu0 %v3601_v25  ;;  %v3821_v4 = vor.u32 %v4311_v53, %v3820_v62  ;;  %v4291_v50 = vld [vmem:[%s4616_s21 + $0x44] sm:$0xf0]  ;;  %v4289_v25 = vld [vmem:[%s4616_s21 + $0x34] sm:$0xf0]  ;;  %v3772_v61 = vld [vmem:[%s4616_s21 + $0x80] sm:$0xf] }
 0x271   :  { %v1395_v26 = vadd.f32 %v1391_v10, %v1387_v9  ;;  %1888 = vmatpush.bf16.msra.mxu3 %v3645_v13  ;;  %v4293_v10 = vld [vmem:[%s4616_s21 + $0x54] sm:$0xf0]  ;;  %v3741_v9 = vor.u32 %v4291_v50, %v3740_v12  ;;  %v4299_v19 = vld [vmem:[%s4616_s21 + $0x84] sm:$0xf0]  ;;  %v1432_v53 = vld [vmem:[%s4581_s6] sm:$0x3] }
 0x272   :  { %v1365_v24 = vpop.f32.mrf.mxu2  ;;  %v3749_v29 = vor.u32 %v4293_v10, %v3748_v60  ;;  %v4301_v13 = vld [vmem:[%s4616_s21 + $0x94] sm:$0xf0]  ;;  %v3773_v62 = vor.u32 %v4299_v19, %v3772_v61  ;;  %v1435_v60 = vperm.slane %v1432_v53, 1  ;;  %v1658_v10 = vld [vmem:[%s5489_s0] sm:$0x3]  ;;  %s5501_s6 = sld [smem:[#allocation19_spill]] }
 0x273   :  { %v5166_v48 = vmax.f32 %v1395_v26, 0.0  ;;  %v3805_v26 = vor.u32 %v4307_v22, %v3804_v59  ;;  %v3732_v24 = vld [vmem:[%s4616_s21 + $0x30] sm:$0xf]  ;;  %v1661_v22 = vperm.slane %v1658_v10, 1  ;;  %v3758_v58 = vld [vmem:[%s4616_s21 + $0x68] sm:$0xf0] }
 0x274   :  { %1908 = vmatpush.bf16.msrb.mxu1 %v3697_v15  ;;  %1900 = vmatpush.bf16.msra.mxu0 %v3593_v1  ;;  %v3733_v34 = vor.u32 %v4289_v25, %v3732_v24  ;;  %v3649_v15 = vor.u32 %v4266_v37, %v3646_v14  ;;  %v3766_v24 = vld [vmem:[%s4616_s21 + $0x78] sm:$0xf0]  ;;  %v994_v25 = vld [vmem:[%s5490_s5] sm:$0x3]  ;;  %v4345_v37 = vld [vmem:[%s4616_s21 + $0x1f4] sm:$0xf0] }
 0x275   :  { %v1399_v27 = vpack.c.bf16 %v5166_v48, %v5166_v48  ;;  %2345 = vmatpush.bf16.msrb.mxu3 %v3829_v41  ;;  %v5242_v39 = vld [vmem:[%s5492_s13] sm:$0x3]  ;;  %v997_v57 = vperm.slane %v994_v25, 1  ;;  %v4329_v61 = vld [vmem:[%s4616_s21 + $0x174] sm:$0xf0] }
 0x276   :  { %v3948_v14 = vld [vmem:[%s4616_s21 + $0x1e0] sm:$0xf] }
 0x277   :  { %1619 = vmatmul.bf16.vlgmr.msrb.gmra.mxu2 %v1399_v27  ;;  %v1103_v19 = vadd.f32 %v5111_v6, %v997_v57  ;;  %v3742_v6 = vld [vmem:[%s4616_s21 + $0x48] sm:$0xf0] }
 0x278   :  { %2332 = vmatpush.bf16.msrb.mxu2 %v3765_v47  ;;  %1909 = vmatpush.bf16.msrb.mxu1 %v3689_v5  ;;  %v3780_v47 = vld [vmem:[%s4616_s21 + $0x90] sm:$0xf]  ;;  %v1650_v5 = vld [vmem:[%s4586_s12] sm:$0x3]  ;;  %s5502_s12 = sld [smem:[#allocation20_spill]] }
 0x279   :  { %2346 = vmatpush.bf16.msrb.mxu3 %v3821_v4  ;;  %v3781_v41 = vor.u32 %v4301_v13, %v3780_v47  ;;  %1901 = vmatpush.bf16.msra.mxu0 %v3585_v46  ;;  %v1434_v4 = vperm.slane %v1432_v53, 0  ;;  %v1652_v7 = vperm.slane %v1650_v5, 0  ;;  %v1653_v12 = vperm.slane %v1650_v5, 1  ;;  %v4292_v46 = vld [vmem:[%s4616_s21 + $0x54] sm:$0xf] }
 0x27a   :  { %v3750_v47 = vld [vmem:[%s4616_s21 + $0x58] sm:$0xf0]  ;;  %v3884_v53 = vld [vmem:[%s4616_s21 + $0x160] sm:$0xf] }
 0x27c   :  { %2333 = vmatpush.bf16.msrb.mxu2 %v3757_v56  ;;  %1910 = vmatpush.bf16.msrb.mxu1 %v3681_v16  ;;  %v3709_v56 = vor.u32 %v4283_v42, %v3708_v52  ;;  %v1660_v16 = vperm.slane %v1658_v10, 0  ;;  %v4343_v42 = vld [vmem:[%s4616_s21 + $0x1e4] sm:$0xf0] }
 0x27d   :  { %2347 = vmatpush.bf16.msrb.mxu3 %v3813_v8  ;;  %v3949_v5 = vor.u32 %v4343_v42, %v3948_v14  ;;  %v4319_v42 = vld [vmem:[%s4616_s21 + $0x124] sm:$0xf0] }
 0x27f   :  { %1645 = vmatmul.bf16.vlgmr.msra.gmra.mxu1 %v1399_v27  ;;  %v4270_v27 = vld [vmem:[%s4596_s27 + $0xa4] sm:$0xf]  ;;  %s5503_s27 = sld [smem:[#allocation21_spill]] }
 0x280   :  { %2334 = vmatpush.bf16.msrb.mxu2 %v3749_v29  ;;  %1911 = vmatpush.bf16.msrb.mxu1 %v3673_v20  ;;  %v3665_v36 = vor.u32 %v4270_v27, %v3662_v35  ;;  %v3769_v35 = vor.u32 %v4296_v23, %v3766_v24  ;;  %v3734_v23 = vld [vmem:[%s4616_s21 + $0x38] sm:$0xf0]  ;;  %v3932_v24 = vld [vmem:[%s4616_s21 + $0x1c0] sm:$0xf] }
 0x281   :  { %2348 = vmatpush.bf16.msrb.mxu3 %v3805_v26 }
 0x284   :  { %2335 = vmatpush.bf16.msrb.mxu2 %v3741_v9  ;;  %1912 = vmatpush.bf16.msrb.mxu1 %v3665_v36  ;;  %v996_v36 = vperm.slane %v994_v25, 0  ;;  %v4339_v25 = vld [vmem:[%s4616_s21 + $0x1c4] sm:$0xf0] }
 0x285   :  { %2349 = vmatpush.bf16.msrb.mxu3 %v3797_v31  ;;  %v1106_v31 = vld [vmem:[%s5491_s9] sm:$0x3] }
 0x286   :  { %v1108_v33 = vperm.slane %v1106_v31, 0  ;;  %v1109_v55 = vperm.slane %v1106_v31, 1  ;;  %v1090_v13 = vadd.f32 %v5105_v3, %v996_v36  ;;  %v4308_v3 = vld [vmem:[%s4616_s21 + $0xd4] sm:$0xf] }
 0x288   :  { %2336 = vmatpush.bf16.msrb.mxu2 %v3733_v34  ;;  %1913 = vmatpush.bf16.msrb.mxu1 %v3657_v40  ;;  %v1112_v10 = vmul.f32 %v1108_v33, %v1090_v13  ;;  %v4302_v33 = vld [vmem:[%s4616_s21 + $0xa4] sm:$0xf]  ;;  %v3718_v13 = vld [vmem:[%s4616_s21 + $0x18] sm:$0xf0] }
 0x289   :  { %2350 = vmatpush.bf16.msrb.mxu3 %v3789_v17  ;;  %v3833_v17 = vor.u32 %v4312_v30, %v3830_v0  ;;  %v3868_v30 = vld [vmem:[%s4616_s21 + $0x140] sm:$0xf]  ;;  %v4323_v0 = vld [vmem:[%s4616_s21 + $0x144] sm:$0xf0] }
 0x28c   :  { %2337 = vmatpush.bf16.msrb.mxu2 %v3725_v28  ;;  %1914 = vmatpush.bf16.msrb.mxu1 %v3649_v15  ;;  %v4294_v28 = vld [vmem:[%s4616_s21 + $0x64] sm:$0xf]  ;;  %v3825_v15 = vor.u32 %v4310_v44, %v3822_v45  ;;  %v4321_v44 = vld [vmem:[%s4616_s21 + $0x134] sm:$0xf0] }
 0x28d   :  { %2351 = vmatpush.bf16.msrb.mxu3 %v3781_v41  ;;  %v3956_v41 = vld [vmem:[%s4616_s21 + $0x1f0] sm:$0xf] }
 0x28e   :  { %v3957_v52 = vor.u32 %v4345_v37, %v3956_v41  ;;  %v3916_v41 = vld [vmem:[%s4616_s21 + $0x1a0] sm:$0xf]  ;;  %v4335_v37 = vld [vmem:[%s4616_s21 + $0x1a4] sm:$0xf0] }
 0x290   :  { %2338 = vmatpush.bf16.msrb.mxu2 %v3717_v51  ;;  %v3761_v51 = vor.u32 %v4294_v28, %v3758_v58  ;;  %2371 = vmatpush.bf16.msra.mxu1 %v3957_v52  ;;  %v3726_v58 = vld [vmem:[%s4616_s21 + $0x28] sm:$0xf0]  ;;  %v3852_v52 = vld [vmem:[%s4616_s21 + $0x120] sm:$0xf] }
 0x291   :  { %2352 = vmatpush.bf16.msrb.mxu3 %v3773_v62  ;;  %v3814_v62 = vld [vmem:[%s4616_s21 + $0xd8] sm:$0xf0] }
 0x294   :  { %2339 = vmatpush.bf16.msrb.mxu2 %v3709_v56  ;;  %v3892_v56 = vld [vmem:[%s4616_s21 + $0x170] sm:$0xf]  ;;  %2372 = vmatpush.bf16.msra.mxu1 %v3949_v5 }
 0x295   :  { %v3844_v5 = vld [vmem:[%s4616_s21 + $0x110] sm:$0xf] }
 0x2ec   :  { %v1607_v1 = vpop.f32.mrf.mxu1 }
 0x2ed   :  { %v1608_v29 = vadd.f32 %v1607_v1, %v1434_v4  ;;  %v3893_v1 = vor.u32 %v4329_v61, %v3892_v56  ;;  %v4290_v4 = vld [vmem:[%s4616_s21 + $0x44] sm:$0xf]  ;;  %v4300_v56 = vld [vmem:[%s4616_s21 + $0x94] sm:$0xf]  ;;  %v3782_v61 = vld [vmem:[%s4616_s21 + $0x98] sm:$0xf0] }
 0x2ef   :  { %2358 = vmatpush.bf16.msrb.mxu0 %v3893_v1  ;;  %v3710_v1 = vld [vmem:[%s4616_s21 + $0x8] sm:$0xf0] }
 0x2f2   :  { %v1633_v18 = vpop.f32.mrf.mxu3 }
 0x2f3   :  { %v1634_v54 = vadd.f32 %v1633_v18, %v1435_v60  ;;  %v1116_v18 = vperm.slane %v5242_v39, 0  ;;  %v4327_v60 = vld [vmem:[%s4616_s21 + $0x164] sm:$0xf0] }
 0x2f4   :  { %v1609_v49 = vpop.f32.mrf.mxu1 }
 0x2f5   :  { %v3753_v49 = vor.u32 %v4292_v46, %v3750_v47  ;;  %v4284_v46 = vld [vmem:[%s4616_s21 + $0x14] sm:$0xf] }
 0x2fa   :  { %v1620_v32 = vpop.f32.mrf.mxu2  ;;  %v1635_v8 = vpop.f32.mrf.mxu3 }
 0x2fb   :  { %v1621_v11 = vadd.f32 %v1620_v32, %v1608_v29  ;;  %v3940_v29 = vld [vmem:[%s4616_s21 + $0x1d0] sm:$0xf]  ;;  %v3885_v32 = vor.u32 %v4327_v60, %v3884_v53  ;;  %v3817_v8 = vor.u32 %v4308_v3, %v3814_v62  ;;  %v4282_v3 = vld [vmem:[%s4616_s21 + $0x4] sm:$0xf]  ;;  %v3917_v62 = vor.u32 %v4335_v37, %v3916_v41  ;;  %v4317_v60 = vld [vmem:[%s4616_s21 + $0x114] sm:$0xf0] }
 0x2fc   :  { %v1646_v50 = vpop.f32.mrf.mxu1  ;;  %v3908_v53 = vld [vmem:[%s4616_s21 + $0x190] sm:$0xf]  ;;  %v4332_v37 = vld [vmem:[%s4616_s21 + $0x194] sm:$0xf] }
 0x2fd   :  { %v1656_v9 = vmul.f32 %v1652_v7, %v1621_v11  ;;  %v1647_v59 = vadd.f32 %v1646_v50, %v1634_v54  ;;  %v4341_v7 = vld [vmem:[%s4616_s21 + $0x1d4] sm:$0xf0]  ;;  %v3876_v54 = vld [vmem:[%s4616_s21 + $0x150] sm:$0xf]  ;;  %v4306_v50 = vld [vmem:[%s4616_s21 + $0xc4] sm:$0xf]  ;;  %2359 = vmatpush.bf16.msrb.mxu0 %v3885_v32 }
 0x2fe   :  { %v4325_v11 = vld [vmem:[%s4616_s21 + $0x154] sm:$0xf0]  ;;  %v3900_v32 = vld [vmem:[%s4616_s21 + $0x180] sm:$0xf] }
 0x2ff   :  { %v1664_v21 = vadd.f32 %v1660_v16, %v1656_v9  ;;  %v1657_v26 = vmul.f32 %v1653_v12, %v1647_v59  ;;  %v1113_v16 = vmul.f32 %v1109_v55, %v1103_v19  ;;  %v1117_v12 = vperm.slane %v5242_v39, 1  ;;  %v3806_v9 = vld [vmem:[%s4616_s21 + $0xc8] sm:$0xf0] }
 0x300   :  { %v3745_v59 = vor.u32 %v4290_v4, %v3742_v6  ;;  %v3869_v39 = vor.u32 %v4323_v0, %v3868_v30  ;;  %v3790_v55 = vld [vmem:[%s4616_s21 + $0xa8] sm:$0xf0]  ;;  %v3721_v19 = vor.u32 %v4284_v46, %v3718_v13  ;;  %v3785_v4 = vor.u32 %v4300_v56, %v3782_v61  ;;  %v4340_v30 = vld [vmem:[%s4616_s21 + $0x1d4] sm:$0xf]  ;;  %v3942_v0 = vld [vmem:[%s4616_s21 + $0x1d8] sm:$0xf0] }
 0x301   :  { %v1666_v20 = vmax.f32 %v1664_v21, 0.0  ;;  %v1665_v34 = vadd.f32 %v1661_v22, %v1657_v26  ;;  %v4288_v22 = vld [vmem:[%s4616_s21 + $0x34] sm:$0xf]  ;;  %v3941_v21 = vor.u32 %v4341_v7, %v3940_v29  ;;  %v1120_v26 = vadd.f32 %v1116_v18, %v1112_v10  ;;  %v4333_v18 = vld [vmem:[%s4616_s21 + $0x194] sm:$0xf0] }
 0x302   :  { %v1622_v27 = vpop.f32.mrf.mxu2  ;;  %v1121_v31 = vadd.f32 %v1117_v12, %v1113_v16  ;;  %v3737_v36 = vor.u32 %v4288_v22, %v3734_v23  ;;  %v4298_v10 = vld [vmem:[%s4616_s21 + $0x84] sm:$0xf]  ;;  %v3774_v6 = vld [vmem:[%s4616_s21 + $0x88] sm:$0xf0]  ;;  %v3713_v29 = vor.u32 %v4282_v3, %v3710_v1  ;;  %v3909_v7 = vor.u32 %v4333_v18, %v3908_v53  ;;  %v4344_v16 = vld [vmem:[%s4616_s21 + $0x1f4] sm:$0xf] }
 0x303   :  { %v1668_v43 = vpack.c.bf16 %v1666_v20, %v1666_v20  ;;  %v1667_v38 = vmax.f32 %v1665_v34, 0.0  ;;  %v3877_v20 = vor.u32 %v4325_v11, %v3876_v54  ;;  %v3809_v34 = vor.u32 %v4306_v50, %v3806_v9  ;;  %v4304_v27 = vld [vmem:[%s4616_s21 + $0xb4] sm:$0xf]  ;;  %2373 = vmatpush.bf16.msra.mxu1 %v3941_v21  ;;  %v3958_v12 = vld [vmem:[%s4616_s21 + $0x1f8] sm:$0xf0] }
 0x304   :  { %v1648_v2 = vpop.f32.mrf.mxu1  ;;  %v5279_v28 = vpack.c.bf16 %v1120_v26, %v1120_v26  ;;  %v1939_v45 = vpack.c.bf16 %v1121_v31, %v1121_v31  ;;  %v3845_v54 = vor.u32 %v4317_v60, %v3844_v5  ;;  %v3777_v11 = vor.u32 %v4298_v10, %v3774_v6  ;;  %v3950_v22 = vld [vmem:[%s4616_s21 + $0x1e8] sm:$0xf0]  ;;  %v3836_v26 = vld [vmem:[%s4616_s21 + $0x100] sm:$0xf]  ;;  %v4315_v23 = vld [vmem:[%s4616_s21 + $0x104] sm:$0xf0] }
 0x305   :  { %v1669_v40 = vpack.c.bf16 %v1667_v38, %v1667_v38  ;;  %1876 = vmatmul.bf16.vlgmr.msra.gmra.mxu2 %v1668_v43  ;;  %1902 = vmatmul.bf16.vlgmr.msra.gmra.mxu0 %v1668_v43  ;;  %v4286_v43 = vld [vmem:[%s4616_s21 + $0x24] sm:$0xf]  ;;  %v3933_v38 = vor.u32 %v4339_v25, %v3932_v24  ;;  %v3924_v2 = vld [vmem:[%s4616_s21 + $0x1b0] sm:$0xf]  ;;  %v3961_v9 = vor.u32 %v4344_v16, %v3958_v12  ;;  %v4328_v25 = vld [vmem:[%s4616_s21 + $0x174] sm:$0xf] }
 0x306   :  { %2384 = vmatpush.bf16.msra.mxu2 %v3769_v35  ;;  %v3798_v35 = vld [vmem:[%s4616_s21 + $0xb8] sm:$0xf0]  ;;  %2360 = vmatpush.bf16.msrb.mxu0 %v3877_v20  ;;  %v3837_v24 = vor.u32 %v4315_v23, %v3836_v26  ;;  %v3945_v31 = vor.u32 %v4340_v30, %v3942_v0  ;;  %v4330_v61 = vld [vmem:[%s4616_s21 + $0x184] sm:$0xf]  ;;  %v1702_v53 = vld [vmem:[%s5493_s17] sm:$0x3] }
 0x307   :  { %1889 = vmatmul.bf16.vlgmr.msra.gmra.mxu3 %v1669_v40  ;;  %1915 = vmatmul.bf16.vlgmr.msrb.gmra.mxu1 %v1669_v40  ;;  %v3801_v57 = vor.u32 %v4304_v27, %v3798_v35  ;;  %v3860_v40 = vld [vmem:[%s4616_s21 + $0x130] sm:$0xf]  ;;  %v3894_v20 = vld [vmem:[%s4616_s21 + $0x178] sm:$0xf0]  ;;  %v4326_v27 = vld [vmem:[%s4616_s21 + $0x164] sm:$0xf] }
 0x308   :  { %2397 = vmatpush.bf16.msra.mxu3 %v3833_v17  ;;  %v4337_v17 = vld [vmem:[%s4616_s21 + $0x1b4] sm:$0xf0]  ;;  %2374 = vmatpush.bf16.msra.mxu1 %v3933_v38  ;;  %v3861_v14 = vor.u32 %v4321_v44, %v3860_v40  ;;  %v3886_v35 = vld [vmem:[%s4616_s21 + $0x168] sm:$0xf0]  ;;  %v4322_v44 = vld [vmem:[%s4616_s21 + $0x144] sm:$0xf] }
 0x309   :  { %v3925_v47 = vor.u32 %v4337_v17, %v3924_v2  ;;  %v3934_v38 = vld [vmem:[%s4616_s21 + $0x1c8] sm:$0xf0]  ;;  %v3878_v2 = vld [vmem:[%s4616_s21 + $0x158] sm:$0xf0]  ;;  %v4314_v5 = vld [vmem:[%s4616_s21 + $0x104] sm:$0xf] }
 0x30a   :  { %2385 = vmatpush.bf16.msra.mxu2 %v3761_v51  ;;  %v3729_v51 = vor.u32 %v4286_v43, %v3726_v58  ;;  %2361 = vmatpush.bf16.msrb.mxu0 %v3869_v39  ;;  %v4338_v43 = vld [vmem:[%s4616_s21 + $0x1c4] sm:$0xf]  ;;  %v4324_v58 = vld [vmem:[%s4616_s21 + $0x154] sm:$0xf]  ;;  %v3862_v13 = vld [vmem:[%s4616_s21 + $0x138] sm:$0xf0] }
 0x30b   :  { %v3881_v17 = vor.u32 %v4324_v58, %v3878_v2  ;;  %v4336_v39 = vld [vmem:[%s4616_s21 + $0x1b4] sm:$0xf]  ;;  %v3846_v1 = vld [vmem:[%s4616_s21 + $0x118] sm:$0xf0]  ;;  %v3838_v60 = vld [vmem:[%s4616_s21 + $0x108] sm:$0xf0] }
 0x30c   :  { %2398 = vmatpush.bf16.msra.mxu3 %v3825_v15  ;;  %v3793_v15 = vor.u32 %v4302_v33, %v3790_v55  ;;  %2375 = vmatpush.bf16.msra.mxu1 %v3925_v47  ;;  %v4334_v55 = vld [vmem:[%s4616_s21 + $0x1a4] sm:$0xf]  ;;  %v4320_v47 = vld [vmem:[%s4616_s21 + $0x134] sm:$0xf]  ;;  %v3841_v10 = vor.u32 %v4314_v5, %v3838_v60  ;;  %v1704_v16 = vperm.slane %v1702_v53, 0 }
 0x30d   :  { %v3865_v41 = vor.u32 %v4320_v47, %v3862_v13  ;;  %v4022_v2 = vld [vmem:[%s5497_s19 + $0x78] sm:$0xf0]  ;;  %v4354_v5 = vld [vmem:[%s5497_s19 + $0x44] sm:$0xf] }
 0x30e   :  { %2386 = vmatpush.bf16.msra.mxu2 %v3753_v49  ;;  %2362 = vmatpush.bf16.msrb.mxu0 %v3861_v14  ;;  %v3853_v49 = vor.u32 %v4319_v42, %v3852_v52  ;;  %v3910_v14 = vld [vmem:[%s4616_s21 + $0x198] sm:$0xf0]  ;;  %v4318_v52 = vld [vmem:[%s4616_s21 + $0x124] sm:$0xf]  ;;  %v3854_v42 = vld [vmem:[%s4616_s21 + $0x128] sm:$0xf0] }
 0x30f   :  { %v3857_v56 = vor.u32 %v4318_v52, %v3854_v42  ;;  %v4006_v47 = vld [vmem:[%s5497_s19 + $0x58] sm:$0xf0] }
 0x310   :  { %2399 = vmatpush.bf16.msra.mxu3 %v3817_v8  ;;  %2376 = vmatpush.bf16.msra.mxu1 %v3917_v62  ;;  %v4331_v8 = vld [vmem:[%s4616_s21 + $0x184] sm:$0xf0]  ;;  %v4316_v62 = vld [vmem:[%s4616_s21 + $0x114] sm:$0xf] }
 0x311   :  { %v3901_v50 = vor.u32 %v4331_v8, %v3900_v32  ;;  %v3849_v18 = vor.u32 %v4316_v62, %v3846_v1 }
 0x312   :  { %2387 = vmatpush.bf16.msra.mxu2 %v3745_v59  ;;  %2363 = vmatpush.bf16.msrb.mxu0 %v3853_v49  ;;  %v4342_v59 = vld [vmem:[%s4616_s21 + $0x1e4] sm:$0xf]  ;;  %v1705_v49 = vperm.slane %v1702_v53, 1 }
 0x313   :  { %v3953_v21 = vor.u32 %v4342_v59, %v3950_v22 }
 0x314   :  { %2400 = vmatpush.bf16.msra.mxu3 %v3809_v34  ;;  %2377 = vmatpush.bf16.msra.mxu1 %v3909_v7  ;;  %v3897_v34 = vor.u32 %v4328_v25, %v3894_v20 }
 0x315   :  { %2340 = vmatmul.bf16.vlgmr.msrb.gmra.mxu2 %v5279_v28 }
 0x316   :  { %2388 = vmatpush.bf16.msra.mxu2 %v3737_v36  ;;  %2364 = vmatpush.bf16.msrb.mxu0 %v3845_v54  ;;  %v3889_v36 = vor.u32 %v4326_v27, %v3886_v35  ;;  %v2006_v35 = vld [vmem:[%s5496_s14] sm:$0x3] }
 0x317   :  { %2353 = vmatmul.bf16.vlgmr.msrb.gmra.mxu3 %v1939_v45 }
 0x318   :  { %2401 = vmatpush.bf16.msra.mxu3 %v3801_v57  ;;  %2378 = vmatpush.bf16.msra.mxu1 %v3901_v50  ;;  %v3926_v57 = vld [vmem:[%s4616_s21 + $0x1b8] sm:$0xf0] }
 0x319   :  { %v3929_v40 = vor.u32 %v4336_v39, %v3926_v57  ;;  %v4359_v39 = vld [vmem:[%s5497_s19 + $0x64] sm:$0xf0] }
 0x31a   :  { %2389 = vmatpush.bf16.msra.mxu2 %v3729_v51  ;;  %2365 = vmatpush.bf16.msrb.mxu0 %v3837_v24  ;;  %v3918_v51 = vld [vmem:[%s4616_s21 + $0x1a8] sm:$0xf0] }
 0x31b   :  { %v3921_v46 = vor.u32 %v4334_v55, %v3918_v51  ;;  %v4004_v55 = vld [vmem:[%s5497_s19 + $0x50] sm:$0xf]  ;;  %v4357_v51 = vld [vmem:[%s5497_s19 + $0x54] sm:$0xf0] }
 0x31c   :  { %2402 = vmatpush.bf16.msra.mxu3 %v3793_v15  ;;  %2423 = vmatpush.bf16.msrb.mxu1 %v3961_v9  ;;  %v3913_v15 = vor.u32 %v4332_v37, %v3910_v14  ;;  %v4005_v37 = vor.u32 %v4357_v51, %v4004_v55  ;;  %v4371_v51 = vld [vmem:[%s5497_s19 + $0xc4] sm:$0xf0] }
 0x31e   :  { %2390 = vmatpush.bf16.msra.mxu2 %v3721_v19  ;;  %2410 = vmatpush.bf16.msra.mxu0 %v3897_v34  ;;  %v3902_v19 = vld [vmem:[%s4616_s21 + $0x188] sm:$0xf0] }
 0x31f   :  { %v3905_v3 = vor.u32 %v4330_v61, %v3902_v19  ;;  %v2009_v61 = vperm.slane %v2006_v35, 1 }
 0x320   :  { %2403 = vmatpush.bf16.msra.mxu3 %v3785_v4  ;;  %2424 = vmatpush.bf16.msrb.mxu1 %v3953_v21  ;;  %v1920_v4 = vld [vmem:[%s5494_s3] sm:$0x3] }
 0x321   :  { %v1923_v32 = vperm.slane %v1920_v4, 1  ;;  %v1922_v22 = vperm.slane %v1920_v4, 0  ;;  %v4355_v4 = vld [vmem:[%s5497_s19 + $0x44] sm:$0xf0] }
 0x322   :  { %2391 = vmatpush.bf16.msra.mxu2 %v3713_v29  ;;  %2411 = vmatpush.bf16.msra.mxu0 %v3889_v36  ;;  %v1928_v29 = vld [vmem:[%s5495_s8] sm:$0x3] }
 0x323   :  { %v1930_v25 = vperm.slane %v1928_v29, 0 }
 0x324   :  { %2404 = vmatpush.bf16.msra.mxu3 %v3777_v11  ;;  %2425 = vmatpush.bf16.msrb.mxu1 %v3945_v31  ;;  %v1931_v11 = vperm.slane %v1928_v29, 1  ;;  %v3988_v29 = vld [vmem:[%s5497_s19 + $0x30] sm:$0xf] }
 0x325   :  { %2392 = vmatmul.bf16.vlgmr.msra.gmra.mxu2 %v5279_v28  ;;  %v3937_v28 = vor.u32 %v4338_v43, %v3934_v38  ;;  %v4020_v43 = vld [vmem:[%s5497_s19 + $0x70] sm:$0xf]  ;;  %v4361_v38 = vld [vmem:[%s5497_s19 + $0x74] sm:$0xf0] }
 0x326   :  { %2412 = vmatpush.bf16.msra.mxu0 %v3881_v17  ;;  %v4021_v58 = vor.u32 %v4361_v38, %v4020_v43  ;;  %v4012_v17 = vld [vmem:[%s5497_s19 + $0x60] sm:$0xf]  ;;  %v4349_v43 = vld [vmem:[%s5497_s19 + $0x14] sm:$0xf0] }
 0x327   :  { %2405 = vmatmul.bf16.vlgmr.msra.gmra.mxu3 %v1939_v45  ;;  %v3870_v45 = vld [vmem:[%s4616_s21 + $0x148] sm:$0xf0]  ;;  %s5498_s21 = sld [smem:[#allocation22_spill]] }
 0x328   :  { %2426 = vmatpush.bf16.msrb.mxu1 %v3937_v28  ;;  %v3873_v33 = vor.u32 %v4322_v44, %v3870_v45  ;;  %v4014_v44 = vld [vmem:[%s5497_s19 + $0x68] sm:$0xf0]  ;;  %v2008_v45 = vperm.slane %v2006_v35, 0  ;;  %2654 = vmatpush.bf16.msrb.mxu2 %v4021_v58 }
 0x32a   :  { %2413 = vmatpush.bf16.msra.mxu0 %v3873_v33 }
 0x32c   :  { %2427 = vmatpush.bf16.msrb.mxu1 %v3929_v40  ;;  %v4358_v40 = vld [vmem:[%s5497_s19 + $0x64] sm:$0xf] }
 0x32d   :  { %v4017_v33 = vor.u32 %v4358_v40, %v4014_v44  ;;  %v4070_v40 = vld [vmem:[%s5497_s19 + $0xd8] sm:$0xf0] }
 0x32e   :  { %2414 = vmatpush.bf16.msra.mxu0 %v3865_v41 }
 0x330   :  { %2428 = vmatpush.bf16.msrb.mxu1 %v3921_v46  ;;  %v4356_v46 = vld [vmem:[%s5497_s19 + $0x54] sm:$0xf] }
 0x332   :  { %2415 = vmatpush.bf16.msra.mxu0 %v3857_v56 }
 0x334   :  { %2429 = vmatpush.bf16.msrb.mxu1 %v3913_v15  ;;  %v4009_v15 = vor.u32 %v4356_v46, %v4006_v47  ;;  %v4346_v46 = vld [vmem:[%s5497_s19 + $0x4] sm:$0xf]  ;;  %v3966_v47 = vld [vmem:[%s5497_s19 + $0x8] sm:$0xf0] }
 0x336   :  { %2416 = vmatpush.bf16.msra.mxu0 %v3849_v18 }
 0x338   :  { %2430 = vmatpush.bf16.msrb.mxu1 %v3905_v3 }
 0x33a   :  { %2417 = vmatpush.bf16.msra.mxu0 %v3841_v10  ;;  %v3998_v10 = vld [vmem:[%s5497_s19 + $0x48] sm:$0xf0] }
 0x382   :  { %v1903_v6 = vpop.f32.mrf.mxu0 }
 0x383   :  { %v1904_v7 = vadd.f32 %v1903_v6, %v1705_v49  ;;  %v3996_v49 = vld [vmem:[%s5497_s19 + $0x40] sm:$0xf]  ;;  %v4001_v6 = vor.u32 %v4354_v5, %v3998_v10  ;;  %v4046_v5 = vld [vmem:[%s5497_s19 + $0xa8] sm:$0xf0]  ;;  %v4036_v10 = vld [vmem:[%s5497_s19 + $0x90] sm:$0xf] }
 0x384   :  { %v1916_v8 = vpop.f32.mrf.mxu1  ;;  %v3997_v60 = vor.u32 %v4355_v4, %v3996_v49  ;;  %v4366_v49 = vld [vmem:[%s5497_s19 + $0xa4] sm:$0xf] }
 0x385   :  { %v1917_v54 = vadd.f32 %v1916_v8, %v1904_v7  ;;  %v4353_v7 = vld [vmem:[%s5497_s19 + $0x34] sm:$0xf0] }
 0x386   :  { %v3989_v8 = vor.u32 %v4353_v7, %v3988_v29  ;;  %v4364_v29 = vld [vmem:[%s5497_s19 + $0x94] sm:$0xf] }
 0x387   :  { %v1927_v12 = vmul.f32 %v1923_v32, %v1917_v54  ;;  %v4084_v32 = vld [vmem:[%s5497_s19 + $0xf0] sm:$0xf]  ;;  %v4377_v54 = vld [vmem:[%s5497_s19 + $0xf4] sm:$0xf0] }
 0x388   :  { %v1877_v50 = vpop.f32.mrf.mxu2 }
 0x389   :  { %v1935_v9 = vadd.f32 %v1931_v11, %v1927_v12  ;;  %v1878_v59 = vadd.f32 %v1877_v50, %v1704_v16  ;;  %v4352_v11 = vld [vmem:[%s5497_s19 + $0x34] sm:$0xf]  ;;  %v3990_v16 = vld [vmem:[%s5497_s19 + $0x38] sm:$0xf0]  ;;  %v4085_v12 = vor.u32 %v4377_v54, %v4084_v32  ;;  %v4028_v54 = vld [vmem:[%s5497_s19 + $0x80] sm:$0xf] }
 0x38a   :  { %v1890_v21 = vpop.f32.mrf.mxu3  ;;  %v1905_v26 = vpop.f32.mrf.mxu0  ;;  %v3993_v50 = vor.u32 %v4352_v11, %v3990_v16  ;;  %v4038_v32 = vld [vmem:[%s5497_s19 + $0x98] sm:$0xf0]  ;;  %v4363_v11 = vld [vmem:[%s5497_s19 + $0x84] sm:$0xf0]  ;;  %v4362_v16 = vld [vmem:[%s5497_s19 + $0x84] sm:$0xf] }
 0x38b   :  { %v1937_v23 = vadd.f32 %v1935_v9, %v5166_v48  ;;  %v1891_v24 = vadd.f32 %v1890_v21, %v1878_v59  ;;  %v4360_v48 = vld [vmem:[%s5497_s19 + $0x74] sm:$0xf]  ;;  %v4086_v59 = vld [vmem:[%s5497_s19 + $0xf8] sm:$0xf0]  ;;  %2667 = vmatpush.bf16.msrb.mxu3 %v4085_v12  ;;  %v3980_v21 = vld [vmem:[%s5497_s19 + $0x20] sm:$0xf]  ;;  %v4029_v12 = vor.u32 %v4363_v11, %v4028_v54 }
 0x38c   :  { %v1918_v20 = vpop.f32.mrf.mxu1  ;;  %v4025_v57 = vor.u32 %v4360_v48, %v4022_v2  ;;  %v4376_v9 = vld [vmem:[%s5497_s19 + $0xf4] sm:$0xf]  ;;  %v4351_v26 = vld [vmem:[%s5497_s19 + $0x24] sm:$0xf0]  ;;  %v4068_v48 = vld [vmem:[%s5497_s19 + $0xd0] sm:$0xf] }
 0x38d   :  { %v1941_v34 = vpack.c.bf16 %v1937_v23, %v1937_v23  ;;  %v1926_v30 = vmul.f32 %v1922_v22, %v1891_v24  ;;  %v4089_v22 = vor.u32 %v4376_v9, %v4086_v59  ;;  %v4076_v23 = vld [vmem:[%s5497_s19 + $0xe0] sm:$0xf]  ;;  %v3981_v24 = vor.u32 %v4351_v26, %v3980_v21  ;;  %v4350_v20 = vld [vmem:[%s5497_s19 + $0x24] sm:$0xf]  ;;  %v4348_v2 = vld [vmem:[%s5497_s19 + $0x14] sm:$0xf] }
 0x38e   :  { %v2754_v21 = vld [vmem:[%s5498_s21 + $0xf0] sm:$0xff]  ;;  %v2436_v26 = vld [vmem:[%s5499_s24] sm:$0x3] }
 0x38f   :  { %v1934_v0 = vadd.f32 %v1930_v25, %v1926_v30  ;;  %2379 = vmatmul.bf16.vlgmr.msra.gmra.mxu1 %v1941_v34  ;;  %v4375_v25 = vld [vmem:[%s5497_s19 + $0xe4] sm:$0xf0] }
 0x390   :  { %v1879_v31 = vpop.f32.mrf.mxu2  ;;  %2693 = vmatpush.bf16.msra.mxu1 %v4089_v22  ;;  %v4077_v30 = vor.u32 %v4375_v25, %v4076_v23  ;;  %v2755_v22 = vld [vmem:[%s5498_s21 + $0xf8] sm:$0xff]  ;;  %v2753_v23 = vld [vmem:[%s5498_s21 + $0xe8] sm:$0xff]  ;;  %v2444_v25 = vld [vmem:[%s5500_s30] sm:$0x3] }
 0x391   :  { %v1936_v27 = vadd.f32 %v1934_v0, %v5147_v63  ;;  %v4013_v63 = vor.u32 %v4359_v39, %v4012_v17  ;;  %v4374_v31 = vld [vmem:[%s5497_s19 + $0xe4] sm:$0xf]  ;;  %v3974_v17 = vld [vmem:[%s5497_s19 + $0x18] sm:$0xf0] }
 0x392   :  { %v1892_v36 = vpop.f32.mrf.mxu3  ;;  %2668 = vmatpush.bf16.msrb.mxu3 %v4077_v30  ;;  %v3977_v39 = vor.u32 %v4348_v2, %v3974_v17 }
 0x393   :  { %v1940_v28 = vpack.c.bf16 %v1936_v27, %v1936_v27  ;;  %2655 = vmatpush.bf16.msrb.mxu2 %v4013_v63  ;;  %v4078_v27 = vld [vmem:[%s5497_s19 + $0xe8] sm:$0xf0]  ;;  %v3972_v36 = vld [vmem:[%s5497_s19 + $0x10] sm:$0xf]  ;;  %v4347_v63 = vld [vmem:[%s5497_s19 + $0x4] sm:$0xf0] }
 0x394   :  { %v4081_v35 = vor.u32 %v4374_v31, %v4078_v27  ;;  %v3973_v38 = vor.u32 %v4349_v43, %v3972_v36  ;;  %v2446_v31 = vperm.slane %v2444_v25, 0 }
 0x395   :  { %2366 = vmatmul.bf16.vlgmr.msrb.gmra.mxu0 %v1940_v28 }
 0x396   :  { %2680 = vmatpush.bf16.msrb.mxu0 %v4025_v57  ;;  %2694 = vmatpush.bf16.msra.mxu1 %v4081_v35  ;;  %v4372_v57 = vld [vmem:[%s5497_s19 + $0xd4] sm:$0xf] }
 0x397   :  { %2656 = vmatpush.bf16.msrb.mxu2 %v4005_v37  ;;  %v4073_v44 = vor.u32 %v4372_v57, %v4070_v40  ;;  %v4370_v37 = vld [vmem:[%s5497_s19 + $0xc4] sm:$0xf] }
 0x398   :  { %v2341_v13 = vpop.f32.mrf.mxu2 }
 0x399   :  { %v2342_v41 = vadd.f32 %v2341_v13, %v2008_v45  ;;  %v3964_v45 = vld [vmem:[%s5497_s19] sm:$0xf] }
 0x39a   :  { %v2354_v14 = vpop.f32.mrf.mxu3  ;;  %2681 = vmatpush.bf16.msrb.mxu0 %v4017_v33  ;;  %v4060_v33 = vld [vmem:[%s5497_s19 + $0xc0] sm:$0xf]  ;;  %v3965_v55 = vor.u32 %v4347_v63, %v3964_v45  ;;  %2695 = vmatpush.bf16.msra.mxu1 %v4073_v44 }
 0x39b   :  { %v5360_v52 = vadd.f32 %v2354_v14, %v2342_v41  ;;  %2657 = vmatpush.bf16.msrb.mxu2 %v3997_v60  ;;  %v4061_v13 = vor.u32 %v4371_v51, %v4060_v33  ;;  %v3969_v41 = vor.u32 %v4346_v46, %v3966_v47  ;;  %v4062_v14 = vld [vmem:[%s5497_s19 + $0xc8] sm:$0xf0]  ;;  %v4049_v60 = vor.u32 %v4366_v49, %v4046_v5  ;;  %v2739_v33 = vld [vmem:[%s5498_s21 + $0x78] sm:$0xff]  ;;  %v2750_v47 = vld [vmem:[%s5498_s21 + $0xd0] sm:$0xff] }
 0x39c   :  { %v2751_v51 = vld [vmem:[%s5498_s21 + $0xd8] sm:$0xff]  ;;  %v2737_v46 = vld [vmem:[%s5498_s21 + $0x68] sm:$0xff]  ;;  %v2742_v5 = vld [vmem:[%s5498_s21 + $0x90] sm:$0xff] }
 0x39d   :  { %v2743_v49 = vld [vmem:[%s5498_s21 + $0x98] sm:$0xff] }
 0x39e   :  { %2682 = vmatpush.bf16.msrb.mxu0 %v4009_v15  ;;  %v4065_v15 = vor.u32 %v4370_v37, %v4062_v14  ;;  %v2735_v37 = vld [vmem:[%s5498_s21 + $0x58] sm:$0xff]  ;;  %v2748_v14 = vld [vmem:[%s5498_s21 + $0xc0] sm:$0xff] }
 0x39f   :  { %2431 = vmatmul.bf16.vlgmr.msrb.gmra.mxu1 %v1941_v34  ;;  %2658 = vmatpush.bf16.msrb.mxu2 %v3989_v8  ;;  %v3982_v34 = vld [vmem:[%s5497_s19 + $0x28] sm:$0xf0]  ;;  %v4041_v8 = vor.u32 %v4364_v29, %v4038_v32  ;;  %v2740_v29 = vld [vmem:[%s5498_s21 + $0x80] sm:$0xff] }
 0x3a0   :  { %v2343_v42 = vpop.f32.mrf.mxu2  ;;  %v3985_v0 = vor.u32 %v4350_v20, %v3982_v34  ;;  %2696 = vmatpush.bf16.msra.mxu1 %v4065_v15  ;;  %v2438_v34 = vperm.slane %v2436_v26, 0  ;;  %v2734_v15 = vld [vmem:[%s5498_s21 + $0x50] sm:$0xff]  ;;  %v2725_v32 = vld [vmem:[%s5498_s21 + $0x8] sm:$0xff] }
 0x3a1   :  { %v4052_v42 = vld [vmem:[%s5497_s19 + $0xb0] sm:$0xf] }
 0x3a2   :  { %v2356_v56 = vpop.f32.mrf.mxu3  ;;  %2683 = vmatpush.bf16.msrb.mxu0 %v4001_v6  ;;  %v4365_v6 = vld [vmem:[%s5497_s19 + $0x94] sm:$0xf0] }
 0x3a3   :  { %2659 = vmatpush.bf16.msrb.mxu2 %v3981_v24  ;;  %v4369_v56 = vld [vmem:[%s5497_s19 + $0xb4] sm:$0xf0]  ;;  %v4037_v7 = vor.u32 %v4365_v6, %v4036_v10  ;;  %v2741_v10 = vld [vmem:[%s5498_s21 + $0x88] sm:$0xff] }
 0x3a4   :  { %v2727_v6 = vld [vmem:[%s5498_s21 + $0x18] sm:$0xff] }
 0x3a5   :  { %2418 = vmatmul.bf16.vlgmr.msra.gmra.mxu0 %v1940_v28  ;;  %v4373_v28 = vld [vmem:[%s5497_s19 + $0xd4] sm:$0xf0] }
 0x3a6   :  { %2684 = vmatpush.bf16.msrb.mxu0 %v3993_v50  ;;  %v4069_v58 = vor.u32 %v4373_v28, %v4068_v48  ;;  %v4030_v50 = vld [vmem:[%s5497_s19 + $0x88] sm:$0xf0] }
 0x3a7   :  { %2660 = vmatpush.bf16.msrb.mxu2 %v3973_v38  ;;  %v4033_v59 = vor.u32 %v4362_v16, %v4030_v50  ;;  %v2488_v16 = vld [vmem:[%s5501_s6] sm:$0x3] }
 0x3a8   :  { %v2393_v19 = vpop.f32.mrf.mxu2  ;;  %2669 = vmatpush.bf16.msrb.mxu3 %v4069_v58  ;;  %v2491_v50 = vperm.slane %v2488_v16, 1 }
 0x3a9   :  { %v2394_v3 = vadd.f32 %v2393_v19, %v2009_v61  ;;  %v4368_v61 = vld [vmem:[%s5497_s19 + $0xb4] sm:$0xf]  ;;  %v4053_v19 = vor.u32 %v4369_v56, %v4052_v42  ;;  %v2747_v42 = vld [vmem:[%s5498_s21 + $0xb8] sm:$0xff]  ;;  %v2733_v56 = vld [vmem:[%s5498_s21 + $0x48] sm:$0xff] }
 0x3aa   :  { %v2406_v62 = vpop.f32.mrf.mxu3  ;;  %2685 = vmatpush.bf16.msrb.mxu0 %v3985_v0 }
 0x3ab   :  { %v5362_v1 = vadd.f32 %v2406_v62, %v2394_v3  ;;  %2661 = vmatpush.bf16.msrb.mxu2 %v3965_v55  ;;  %v4054_v3 = vld [vmem:[%s5497_s19 + $0xb8] sm:$0xf0]  ;;  %v2738_v55 = vld [vmem:[%s5498_s21 + $0x70] sm:$0xff] }
 0x3ac   :  { %2670 = vmatpush.bf16.msrb.mxu3 %v4061_v13  ;;  %v4057_v62 = vor.u32 %v4368_v61, %v4054_v3  ;;  %v2736_v13 = vld [vmem:[%s5498_s21 + $0x60] sm:$0xff]  ;;  %v2746_v61 = vld [vmem:[%s5498_s21 + $0xb0] sm:$0xff]  ;;  %v2745_v3 = vld [vmem:[%s5498_s21 + $0xa8] sm:$0xff] }
 0x3ae   :  { %2686 = vmatpush.bf16.msrb.mxu0 %v3977_v39  ;;  %2697 = vmatpush.bf16.msra.mxu1 %v4057_v62  ;;  %v2447_v39 = vperm.slane %v2444_v25, 1  ;;  %v2731_v62 = vld [vmem:[%s5498_s21 + $0x38] sm:$0xff] }
 0x3af   :  { %2760 = vmatpush.msra.mxu2 %v2739_v33 }
 0x3b0   :  { %v2395_v53 = vpop.f32.mrf.mxu2  ;;  %2671 = vmatpush.bf16.msrb.mxu3 %v4053_v19  ;;  %v2732_v19 = vld [vmem:[%s5498_s21 + $0x40] sm:$0xff] }
 0x3b1   :  { %v4044_v53 = vld [vmem:[%s5497_s19 + $0xa0] sm:$0xf]  ;;  %2761 = vmatpush.msra.mxu2 %v2738_v55 }
 0x3b2   :  { %v2408_v18 = vpop.f32.mrf.mxu3  ;;  %2687 = vmatpush.bf16.msrb.mxu0 %v3969_v41  ;;  %2698 = vmatpush.bf16.msra.mxu1 %v4049_v60  ;;  %v2749_v41 = vld [vmem:[%s5498_s21 + $0xc8] sm:$0xff]  ;;  %v2728_v60 = vld [vmem:[%s5498_s21 + $0x20] sm:$0xff] }
 0x3b3   :  { %v4367_v18 = vld [vmem:[%s5497_s19 + $0xa4] sm:$0xf0]  ;;  %2762 = vmatpush.msra.mxu2 %v2737_v46  ;;  %v2828_v46 = vld [vmem:[%s4666_s29 + $0x18] sm:$0x3] }
 0x3b4   :  { %v4045_v4 = vor.u32 %v4367_v18, %v4044_v53  ;;  %v2744_v53 = vld [vmem:[%s5498_s21 + $0xa0] sm:$0xff]  ;;  %v2730_v18 = vld [vmem:[%s5498_s21 + $0x30] sm:$0xff] }
 0x3b5   :  { %2763 = vmatpush.msra.mxu2 %v2736_v13  ;;  %v2826_v13 = vld [vmem:[%s4666_s29 + $0x8] sm:$0xff] }
 0x3b6   :  { %2672 = vmatpush.bf16.msrb.mxu3 %v4045_v4  ;;  %2699 = vmatpush.bf16.msra.mxu1 %v4041_v8  ;;  %v2729_v4 = vld [vmem:[%s5498_s21 + $0x28] sm:$0xff]  ;;  %v2724_v8 = vld [vmem:[%s5498_s21] sm:$0xff] }
 0x3b7   :  { %2764 = vmatpush.msra.mxu2 %v2735_v37 }
 0x3b9   :  { %2765 = vmatpush.msra.mxu2 %v2734_v15 }
 0x3ba   :  { %2673 = vmatpush.bf16.msrb.mxu3 %v4037_v7  ;;  %2700 = vmatpush.bf16.msra.mxu1 %v4033_v59  ;;  %v2726_v7 = vld [vmem:[%s5498_s21 + $0x10] sm:$0xff] }
 0x3bb   :  { %2766 = vmatpush.msra.mxu2 %v2733_v56 }
 0x3bd   :  { %2767 = vmatpush.msra.mxu2 %v2732_v19 }
 0x3be   :  { %2674 = vmatpush.bf16.msrb.mxu3 %v4029_v12 }
 0x3bf   :  { %2768 = vmatpush.msra.mxu2 %v2731_v62 }
 0x3c1   :  { %2769 = vmatpush.msra.mxu2 %v2730_v18 }
 0x3c2   :  { %2780 = vmatpush.msra.mxu3 %v2755_v22  ;;  %v2714_v22 = vld [vmem:[%s5503_s27] sm:$0x3] }
 0x3c3   :  { %2770 = vmatpush.msra.mxu2 %v2729_v4 }
 0x3c4   :  { %2781 = vmatpush.msra.mxu3 %v2754_v21 }
 0x3c5   :  { %2771 = vmatpush.msra.mxu2 %v2728_v60 }
 0x3c6   :  { %2782 = vmatpush.msra.mxu3 %v2753_v23 }
 0x3c7   :  { %2772 = vmatpush.msra.mxu2 %v2727_v6 }
 0x3c9   :  { %2773 = vmatpush.msra.mxu2 %v2726_v7 }
 0x3cb   :  { %2774 = vmatpush.msra.mxu2 %v2725_v32 }
 0x3cd   :  { %2775 = vmatpush.msra.mxu2 %v2724_v8 }
 0x40c   :  { %v2380_v9 = vpop.f32.mrf.mxu1 }
 0x412   :  { %v2367_v24 = vpop.f32.mrf.mxu0 }
 0x413   :  { %v2368_v20 = vadd.f32 %v2367_v24, %v5360_v52  ;;  %v2439_v52 = vperm.slane %v2436_v26, 1  ;;  %v2490_v24 = vperm.slane %v2488_v16, 0 }
 0x414   :  { %v2382_v30 = vpop.f32.mrf.mxu1 }
 0x415   :  { %v2381_v0 = vadd.f32 %v2380_v9, %v2368_v20  ;;  %v2706_v9 = vld [vmem:[%s5502_s12] sm:$0x3]  ;;  %v2717_v20 = vperm.slane %v2714_v22, 1 }
 0x416   :  { %v2709_v26 = vperm.slane %v2706_v9, 1 }
 0x417   :  { %v2442_v27 = vmul.f32 %v2438_v34, %v2381_v0 }
 0x419   :  { %v2450_v35 = vadd.f32 %v2446_v31, %v2442_v27  ;;  %v2708_v31 = vperm.slane %v2706_v9, 0 }
 0x41a   :  { %v2369_v36 = vpop.f32.mrf.mxu0 }
 0x41b   :  { %v2452_v43 = vmax.f32 %v2450_v35, 0.0 }
 0x41c   :  { %v2432_v38 = vpop.f32.mrf.mxu1 }
 0x41d   :  { %v2454_v48 = vpack.c.bf16 %v2452_v43, %v2452_v43  ;;  %v2716_v43 = vperm.slane %v2714_v22, 0 }
 0x41f   :  { %2662 = vmatmul.bf16.vlgmr.msrb.gmra.mxu2 %v2454_v48  ;;  %2688 = vmatmul.bf16.vlgmr.msrb.gmra.mxu0 %v2454_v48 }
 0x422   :  { %v2419_v28 = vpop.f32.mrf.mxu0 }
 0x423   :  { %v2420_v58 = vadd.f32 %v2419_v28, %v5362_v1  ;;  %v2752_v1 = vld [vmem:[%s5498_s21 + $0xe0] sm:$0xff] }
 0x424   :  { %v2434_v2 = vpop.f32.mrf.mxu1  ;;  %2783 = vmatpush.msra.mxu3 %v2752_v1 }
 0x425   :  { %v2433_v17 = vadd.f32 %v2432_v38, %v2420_v58  ;;  %v4414_v2 = vld [vmem:[%s4661_s4] ss:$0 sm:$0xff] }
 0x426   :  { %2784 = vmatpush.msra.mxu3 %v2751_v51  ;;  %v2827_v51 = vld [vmem:[%s4666_s29 + $0x10] sm:$0x3] }
 0x427   :  { %v2443_v57 = vmul.f32 %v2439_v52, %v2433_v17  ;;  %4090 = vmatpush.msk.msrb.mxu2 %vm2832_vm3, %v2827_v51 }
 0x428   :  { %2785 = vmatpush.msra.mxu3 %v2750_v47  ;;  %v2825_v47 = vld [vmem:[%s4666_s29] sm:$0xff]  ;;  %s4506_s29 = smov [#allocation4]  }
 0x429   :  { %v2451_v40 = vadd.f32 %v2447_v39, %v2443_v57  ;;  %2854 = vmatpush.msrb.mxu2 %v2825_v47  ;;  %s2898_s4 = sshll.u32 %s4506_s29, 4  ;;  %s2899_s4 = int_to_ptr.vmem [resolvable:$true] %s2898_s4 }
 0x42a   :  { %v2421_v44 = vpop.f32.mrf.mxu0  ;;  %2786 = vmatpush.msra.mxu3 %v2749_v41 }
 0x42b   :  { %v2453_v45 = vmax.f32 %v2451_v40, 0.0 }
 0x42c   :  { %2787 = vmatpush.msra.mxu3 %v2748_v14 }
 0x42d   :  { %v2455_v63 = vpack.c.bf16 %v2453_v45, %v2453_v45 }
 0x42e   :  { %2788 = vmatpush.msra.mxu3 %v2747_v42 }
 0x42f   :  { %2675 = vmatmul.bf16.vlgmr.msrb.gmra.mxu3 %v2455_v63  ;;  %2701 = vmatmul.bf16.vlgmr.msra.gmra.mxu1 %v2455_v63 }
 0x430   :  { %2789 = vmatpush.msra.mxu3 %v2746_v61 }
 0x432   :  { %2790 = vmatpush.msra.mxu3 %v2745_v3 }
 0x434   :  { %2791 = vmatpush.msra.mxu3 %v2744_v53 }
 0x436   :  { %2792 = vmatpush.msra.mxu3 %v2743_v49 }
 0x438   :  { %2793 = vmatpush.msra.mxu3 %v2742_v5 }
 0x43a   :  { %2794 = vmatpush.msra.mxu3 %v2741_v10 }
 0x43c   :  { %2795 = vmatpush.msra.mxu3 %v2740_v29 }
 0x43e   :  { %4092 = vmatpush.msk.msrb.mxu3 %vm2832_vm3, %v2828_v46 }
 0x440   :  { %2874 = vmatpush.msrb.mxu3 %v2826_v13 }
 0x49c   :  { %v2689_v54 = vpop.f32.mrf.mxu0 }
 0x49d   :  { %v2690_v21 = vadd.f32 %v2689_v54, %v2491_v50 }
 0x4a2   :  { %v2663_v11 = vpop.f32.mrf.mxu2 }
 0x4a3   :  { %v2664_v30 = vadd.f32 %v2663_v11, %v2490_v24 }
 0x4a4   :  { %v2691_v12 = vpop.f32.mrf.mxu0 }
 0x4aa   :  { %v2665_v59 = vpop.f32.mrf.mxu2 }
 0x4ac   :  { %v2702_v23 = vpop.f32.mrf.mxu1 }
 0x4ad   :  { %v2703_v25 = vadd.f32 %v2702_v23, %v2690_v21 }
 0x4af   :  { %v2713_v34 = vmul.f32 %v2709_v26, %v2703_v25 }
 0x4b1   :  { %v2721_v0 = vadd.f32 %v2717_v20, %v2713_v34 }
 0x4b2   :  { %v2676_v27 = vpop.f32.mrf.mxu3 }
 0x4b3   :  { %v2723_v35 = vmax.f32 %v2721_v0, 0.0  ;;  %v2677_v36 = vadd.f32 %v2676_v27, %v2664_v30 }
 0x4b4   :  { %v2704_v38 = vpop.f32.mrf.mxu1 }
 0x4b5   :  { %v2712_v48 = vmul.f32 %v2708_v31, %v2677_v36  ;;  %2796 = vmatmul.f32.vlgmr.msra.gmra.mxu3 %v2723_v35 }
 0x4b7   :  { %v2720_v28 = vadd.f32 %v2716_v43, %v2712_v48 }
 0x4b9   :  { %v2722_v58 = vmax.f32 %v2720_v28, 0.0 }
 0x4ba   :  { %v2678_v52 = vpop.f32.mrf.mxu3 }
 0x4bb   :  { %2776 = vmatmul.f32.vlgmr.msra.gmra.mxu2 %v2722_v58 }
 0x538   :  { %v2797_v57 = vpop.f32.mrf.mxu3 }
 0x53e   :  { %v2777_v17 = vpop.f32.mrf.mxu2 }
 0x53f   :  { %v2778_v39 = vadd.f32 %v4414_v2, %v2777_v17 }
 0x541   :  { %v2798_v40 = vadd.f32 %v2797_v57, %v2778_v39 }
 0x543   :  { %v2801_v44 = vsel %vm2800_vm2, %v2798_v40, -inf  ;;  %2881 = vst.msk [vmem:[#allocation4] sm:$0xff] %vm2800_vm2, %v2798_v40 }
 0x544   :  { %2802 = vmax.xlane.f32.xlu0 %v2801_v44 }
 0x5b7   :  { %v2803_v45 = vpop.xlane.xlu0 %2802 }
 0x5b8   :  { %v2804_v63 = vsub.f32 %v2798_v40, %v2803_v45 }
 0x5ba   :  { %v2805_v33 = vmul.f32 1.442695, %v2804_v63 }
 0x5bc   :  { %4417 = vpow2.f32 %v2805_v33 }
 0x5c2   :  { %v4418_v1 = vpop.eup %4417 }
 0x5c3   :  { %v2807_v55 = vsel %vm2800_vm2, %v4418_v1, 0.0 }
 0x5c4   :  { %2808 = vadd.xlane.f32.xlu0 %v2807_v55 }
 0x637   :  { %v2809_v41 = vpop.xlane.xlu0 %2808 }
 0x638   :  { %4419 = vrcp.f32 %v2809_v41  ;;  %v2821_v42 = vand.u32 2147483648, %v2809_v41  ;;  %v2819_v61 = vand.u32 2147483647, %v2809_v41  ;;  %vm2815_vm5 = vweird.f32 %v2809_v41 }
 0x63a   :  { %v2822_v3 = vor.u32 1.1754944e-38, %v2821_v42  ;;  %vm2820_vm7 = vcmp.eq.f32.partialorder %v2819_v61, 8.507059e+37 }
 0x63e   :  { %v4420_v37 = vpop.eup %4419 }
 0x63f   :  { %v2811_v14 = vmul.f32 %v4420_v37, %v2809_v41  ;;  %vm2816_vm4 = vweird.f32 %v4420_v37 }
 0x640   :  { %vm2817_vm6 = vmor %vm2815_vm5, %vm2816_vm4 }
 0x641   :  { %v2812_v15 = vsub.f32 1.0, %v2811_v14 }
 0x643   :  { %v2813_v56 = vmul.f32 %v4420_v37, %v2812_v15 }
 0x645   :  { %v2814_v19 = vadd.f32 %v4420_v37, %v2813_v56 }
 0x647   :  { %v2818_v62 = vsel %vm2817_vm6, %v4420_v37, %v2814_v19 }
 0x648   :  { %v2823_v53 = vsel %vm2820_vm7, %v2822_v3, %v2818_v62 }
 0x649   :  { %v2824_v18 = vmul.f32 %v4418_v1, %v2823_v53 }
 0x64b   :  { %4091 = vmatmul.msk.f32.vlgmr.msrb.gmra.mxu2 %vm2800_vm2, %v2824_v18  ;;  %4093 = vmatmul.msk.f32.vlgmr.msrb.gmra.mxu3 %vm2800_vm2, %v2824_v18 }
 0x64c   :  { %4444 = shalt.err (!%p4441_p4)
}
 0x64d   :  { %2903 = dma.vmem_to_hbm [thread:$0]  %s2899_s4, 128, %s2901_s28, [#allocation5]  }
 0x64e   :  { %s4507_s10 = smov [#allocation2]   ;;  %s2889_s15 = sshll.u32 %s4671_s25, 4  ;;  %s2890_s15 = int_to_ptr.hbm [resolvable:$true] %s2889_s15 }
 0x64f   :  { %s2887_s11 = sshll.u32 %s4507_s10, 4  ;;  %s4457_s16 = sshra.s32 %s2890_s15, 4  ;;  %s2888_s11 = int_to_ptr.vmem [resolvable:$true] %s2887_s11  ;;  %s4458_s16 = int_to_ptr.hbm [resolvable:$true] %s4457_s16 }
 0x650   :  { %s4459_s20 = scalar_lea.hbm %s4458_s16, 16  ;;  %s4461_s18 = scalar_lea.hbm %s4671_s25, 16 }
 0x651   :  { %p4460_p5 = scmp.ne.s32.totalorder %s4458_s16, %s4459_s20  ;;  %p4462_p6 = scmp.lt.s32.totalorder %s4458_s16, %s4671_s25 }
 0x652   :  { %p4463_p7 = scmp.lt.s32.totalorder %s4461_s18, %s4459_s20 }
 0x654   :  { %p4464_p8 = por %p4463_p7, %p4462_p6 }
 0x656   :  { %p4465_p9 = pnand %p4464_p8, %p4460_p5 }
 0x6ce   :  { %v2856_v49 = vpop.f32.mrf.mxu2  ;;  %v2876_v4 = vpop.f32.mrf.mxu3 }
 0x6cf   :  { %2879 = vst [vmem:[#allocation2] sm:$0xff] %v2856_v49 }
 0x6d0   :  { %2880 = vst [vmem:[#allocation2 + $0x8] sm:$0xff] %v2876_v4 }
 0x6d1   :  { %4468 = shalt.err (!%p4465_p9)
}
 0x6d2   :  { %2892 = dma.vmem_to_hbm [thread:$0]  %s2888_s11, 256, %s2890_s15, [#allocation3]  }
 0x6d3   :  { %4469 = dma.done.wait [#allocation3], 256  }
 0x6d4   :  { %4470 = vsyncadd [#allocation3], 4294967040 }
 0x6d5   :  { %4471 = dma.done.wait [#allocation5], 128  }
 0x6d6   :  { %4472 = vsyncadd [#allocation5], 4294967168 }
 0x6d7   :  { %2912 = vsyncpa [#allocation3], 1 }
 0x6d8   :  { %2913 = vsyncpa [#allocation5], 1 }

</bundles_post_ra>
